<compile_context>
chip_gen: v6e
topology: v6e:2x2x1
jax: 0.10.0
libtpu: 0.0.40
codegen_flags: <defaults>
</compile_context>

<pallas_src>
import functools

import jax
import jax.numpy as jnp
import numpy as np
from jax.experimental import pallas as pl
from jax.experimental.pallas import tpu as pltpu

EPS = 1e-5                      # torch.nn.BatchNorm3d default eps
MATMUL_DTYPE = jnp.float32      # set to jnp.bfloat16 for max MXU throughput


def _round_up(v, m):
    return (v + m - 1) // m * m


def _pick_d_tile(d, p, hw):
    """Largest depth tile <= max(8, 2p) that divides D, is a multiple of 2p,
    and keeps the stage-2 output block lane count a multiple of 128."""
    hi = min(d, max(8, 2 * p))
    for c in range(hi, 0, -1):
        if d % c == 0 and c % (2 * p) == 0 and (c * hw) % 128 == 0:
            return c
    return None


def _fold_bn(w_oidhw, bias, gamma, beta, mean, var):
    """Fold eval-mode BN + conv bias into a (c_out, k^3*c_in) weight matrix
    (columns ordered (kd, kh, kw, c_in)) and a (c_out, 1) bias."""
    co, ci, kd, kh, kw = w_oidhw.shape
    s = gamma * jax.lax.rsqrt(var + EPS)                      # (c_out,)
    w = w_oidhw * s[:, None, None, None, None]
    w2d = jnp.transpose(w, (0, 2, 3, 4, 1)).reshape(co, kd * kh * kw * ci)
    b = ((bias - mean) * s + beta).reshape(co, 1)
    return w2d, b


# ---------------------------------------------------------------------------
# Stage 1 kernel: conv1 + folded BN1 + ReLU, emitted in stage-2's padded-plane
# input layout (L-wide rows: [flat halo | padded (PH,PW) plane | tail], with
# spatial halo and out-of-range depth planes exactly zero).
# ---------------------------------------------------------------------------
def _make_stage1_kernel(*, k, H, W, PW, PAD, L, d_tile, c_out, d_real):
    p = k // 2
    HPW = H * PW                      # interior rows x padded cols
    off0 = PAD + p * PW               # start of interior-row region in the L row

    def kernel(xa_ref, xb_ref, w_ref, b_ref, o_ref):
        di = pl.program_id(1)

        # interior-column mask over the (H, PW) grid (one per grid step)
        pos = jax.lax.broadcasted_iota(jnp.int32, (1, HPW), 1)
        col = pos % PW
        colmask = ((col >= p) & (col < p + W)).astype(jnp.float32)

        w = w_ref[...].astype(MATMUL_DTYPE)
        b = b_ref[...].astype(jnp.float32)

        # im2col patch for the whole depth tile: (k^3*c_in, d_tile*HPW)
        patches = []
        for j in range(d_tile):
            parts = []
            for kd in range(k):
                t = j + kd
                src, ti = (xa_ref, t) if t < d_tile else (xb_ref, t - d_tile)
                for kh in range(k):
                    for kw in range(k):
                        s0 = PAD + kh * PW + (kw - p)
                        parts.append(src[0, ti, :, s0:s0 + HPW])
                patch_cols = None  # (keeps lints quiet; parts built above)
            patches.append(jnp.concatenate(parts, axis=0))
        big = jnp.concatenate(patches, axis=1).astype(MATMUL_DTYPE)

        acc = jnp.dot(w, big, preferred_element_type=jnp.float32) + b

        zl = jnp.zeros((c_out, off0), jnp.float32)
        zr = jnp.zeros((c_out, L - off0 - HPW), jnp.float32)
        for j in range(d_tile):
            s = di * d_tile + j
            # planes outside the real conv1 output become stage-2's zero depth pad
            validf = jnp.logical_and(s >= p, s < p + d_real).astype(jnp.float32)
            row = acc[:, j * HPW:(j + 1) * HPW]
            row = jnp.maximum(row * (colmask * validf), 0.0)      # ReLU
            o_ref[0, j, :, :] = jnp.concatenate([zl, row, zr],
                                                axis=1).astype(o_ref.dtype)

    return kernel


# ---------------------------------------------------------------------------
# Stage 2 kernel: conv2 + folded BN2, * res_scale, + residual x.  Output is the
# final lane-dense channels-major (c_out, d_tile*H*W) block.
# ---------------------------------------------------------------------------
def _make_stage2_kernel(*, k, H, W, PW, PAD, L, d_tile, c_out, res_scale):
    p = k // 2
    HPW = H * PW
    HW = H * W

    def kernel(ya_ref, yb_ref, xres_ref, w_ref, b_ref, o_ref):
        w = w_ref[...].astype(MATMUL_DTYPE)
        b = b_ref[...].astype(jnp.float32)

        patches = []
        for j in range(d_tile):
            parts = []
            for kd in range(k):
                t = j + kd
                src, ti = (ya_ref, t) if t < d_tile else (yb_ref, t - d_tile)
                for kh in range(k):
                    for kw in range(k):
                        s0 = PAD + kh * PW + (kw - p)
                        parts.append(src[0, ti, :, s0:s0 + HPW])
            patches.append(jnp.concatenate(parts, axis=0))
        big = jnp.concatenate(patches, axis=1).astype(MATMUL_DTYPE)

        acc = jnp.dot(w, big, preferred_element_type=jnp.float32) + b

        cols = []
        for j in range(d_tile):
            a = acc[:, j * HPW:(j + 1) * HPW]
            # crop the padded-column halo: (c_out, H*PW) -> (c_out, H*W)
            pieces = [a[:, i * PW + p:i * PW + p + W] for i in range(H)]
            y = jnp.concatenate(pieces, axis=1)
            xr = xres_ref[0, :, j * HW:(j + 1) * HW].astype(jnp.float32)
            cols.append(y * res_scale + xr)
        o_ref[0, :, :] = jnp.concatenate(cols, axis=1).astype(o_ref.dtype)

    return kernel


# ---------------------------------------------------------------------------
# pallas_call plumbing
# ---------------------------------------------------------------------------
def _common_vmem_limit(d_tile, p, c, c_out, L, k3c, hpw):
    per_step = 4 * (2 * (d_tile + 2 * p) * c * L      # double-buffered input window
                    + 2 * d_tile * c_out * L          # double-buffered output
                    + int(k3c) * d_tile * hpw * 2     # patch + acc intermediates
                    + int(k3c) * c_out)
    return int(min(max(2 * per_step, 32 * 2 ** 20), 64 * 2 ** 20))


def _conv_stage1(xp, w2d, bvec, *, k, H, W, PW, PAD, L, d_tile, d_real):
    n, t1, c, _ = xp.shape
    p = k // 2
    c_out, k3c = w2d.shape
    hpw = H * PW
    n_db = d_real // d_tile + 1            # extra block produces the depth pad
    ratio = d_tile // (2 * p)

    kernel = _make_stage1_kernel(k=k, H=H, W=W, PW=PW, PAD=PAD, L=L,
                                 d_tile=d_tile, c_out=c_out, d_real=d_real)

    in_specs = [
        pl.BlockSpec((1, d_tile, c, L), lambda ni, di: (ni, di, 0, 0)),
        pl.BlockSpec((1, 2 * p, c, L),
                     lambda ni, di: (ni, (di + 1) * ratio, 0, 0)),
        pl.BlockSpec((c_out, k3c), lambda ni, di: (0, 0)),
        pl.BlockSpec((c_out, 1), lambda ni, di: (0, 0)),
    ]
    out_specs = pl.BlockSpec((1, d_tile, c_out, L), lambda ni, di: (ni, di, 0, 0))
    out_shape = jax.ShapeDtypeStruct((n, n_db * d_tile, c_out, L), xp.dtype)

    flops = int(2 * n * n_db * d_tile * c_out * k3c * hpw)
    bytes_accessed = int(4 * (n * n_db * (d_tile + 2 * p) * c * L
                              + int(w2d.size) + int(bvec.size)
                              + n * n_db * d_tile * c_out * L))

    return pl.pallas_call(
        kernel,
        out_shape=out_shape,
        grid=(n, n_db),
        in_specs=in_specs,
        out_specs=out_specs,
        compiler_params=pltpu.CompilerParams(
            dimension_semantics=("parallel", "parallel"),
            vmem_limit_bytes=_common_vmem_limit(d_tile, p, c, c_out, L, k3c, hpw)),
        cost_estimate=pl.CostEstimate(flops=flops, transcendentals=0,
                                      bytes_accessed=bytes_accessed),
    )(xp, xp, w2d, bvec)


def _conv_stage2(y1, xres, w2d, bvec, *, k, H, W, PW, PAD, L, d_tile, d_real,
                 res_scale):
    n, _, c, _ = y1.shape
    p = k // 2
    c_out, k3c = w2d.shape
    hpw = H * PW
    hw = H * W
    n_db = d_real // d_tile
    ratio = d_tile // (2 * p)

    kernel = _make_stage2_kernel(k=k, H=H, W=W, PW=PW, PAD=PAD, L=L,
                                 d_tile=d_tile, c_out=c_out, res_scale=res_scale)

    in_specs = [
        pl.BlockSpec((1, d_tile, c, L), lambda ni, di: (ni, di, 0, 0)),
        pl.BlockSpec((1, 2 * p, c, L),
                     lambda ni, di: (ni, (di + 1) * ratio, 0, 0)),
        pl.BlockSpec((1, c_out, d_tile * hw), lambda ni, di: (ni, 0, di)),
        pl.BlockSpec((c_out, k3c), lambda ni, di: (0, 0)),
        pl.BlockSpec((c_out, 1), lambda ni, di: (0, 0)),
    ]
    out_specs = pl.BlockSpec((1, c_out, d_tile * hw), lambda ni, di: (ni, 0, di))
    out_shape = jax.ShapeDtypeStruct((n, c_out, d_real * hw), y1.dtype)

    flops = int(2 * n * n_db * d_tile * c_out * k3c * hpw)
    bytes_accessed = int(4 * (n * n_db * (d_tile + 2 * p) * c * L
                              + int(w2d.size) + int(bvec.size)
                              + int(xres.size) + n * c_out * d_real * hw))

    return pl.pallas_call(
        kernel,
        out_shape=out_shape,
        grid=(n, n_db),
        in_specs=in_specs,
        out_specs=out_specs,
        compiler_params=pltpu.CompilerParams(
            dimension_semantics=("parallel", "parallel"),
            vmem_limit_bytes=_common_vmem_limit(d_tile, p, c, c_out, L, k3c, hpw)),
        cost_estimate=pl.CostEstimate(flops=flops, transcendentals=0,
                                      bytes_accessed=bytes_accessed),
    )(y1, y1, xres, w2d, bvec)


# ---------------------------------------------------------------------------
# ResBlock forward
# ---------------------------------------------------------------------------
def res_block_forward(x_ncdhw, params, kernel_size=3, res_scale=1.0):
    """x: (N, C, D, H, W) float32 -> (N, C, D, H, W)."""
    k = kernel_size
    assert k % 2 == 1, "odd kernel size expected (PyTorch padding=k//2)"
    p = k // 2
    n, c, d, h, w = x_ncdhw.shape
    hw = h * w
    ph, pw = h + 2 * p, w + 2 * p
    phw = ph * pw
    pad = p * pw + p                        # max |lane shift| of any tap
    L = _round_up(phw + 2 * pad, 128)       # lane-aligned padded-plane row

    d_tile = _pick_d_tile(d, p, hw)
    if d_tile is None:
        # TODO(synk): support depth/spatial sizes that admit no valid depth tile
        #             (e.g. odd D with k=3) via a depth-padding fallback path.
        raise NotImplementedError("no valid depth tile for D=%d, k=%d, HW=%d"
                                  % (d, k, hw))

    w1, b1 = _fold_bn(params["w1"], params["b1"], params["g1"], params["be1"],
                      params["m1"], params["v1"])
    w2, b2 = _fold_bn(params["w2"], params["b2"], params["g2"], params["be2"],
                      params["m2"], params["v2"])

    # Stage-1 input layout: (N, D+d_tile+2p, C, L) depth-major, channels, then
    # the spatially padded plane flattened with a `pad` lane halo on each side.
    t1 = d + d_tile + 2 * p
    xp = jnp.pad(x_ncdhw, ((0, 0), (0, 0), (0, 0), (p, p), (p, p)))
    xp = jnp.pad(xp, ((0, 0), (0, 0), (2 * p, d_tile), (0, 0), (0, 0)))
    xp = jnp.transpose(xp, (0, 2, 1, 3, 4)).reshape(n, t1, c, phw)
    xp = jnp.pad(xp, ((0, 0), (0, 0), (0, 0), (pad, L - pad - phw)))

    # residual consumed channels-major / depth-flattened: a free reshape
    xres = x_ncdhw.reshape(n, c, d * hw)

    # stage 1: conv1 + BN1 (folded) + ReLU  -> already in stage-2 input layout
    y1 = _conv_stage1(xp, w1, b1, k=k, H=h, W=w, PW=pw, PAD=pad, L=L,
                      d_tile=d_tile, d_real=d)
    # stage 2: conv2 + BN2 (folded), * res_scale, + x  (fused in-kernel)
    out_flat = _conv_stage2(y1, xres, w2, b2, k=k, H=h, W=w, PW=pw, PAD=pad,
                            L=L, d_tile=d_tile, d_real=d, res_scale=res_scale)

    return out_flat.reshape(n, c, d, h, w)


# ---------------------------------------------------------------------------
# Pure-JAX reference (correctness check only)
# ---------------------------------------------------------------------------
def _reference(x, params, k, res_scale):
    def conv(x, wgt, b):
        y = jax.lax.conv_general_dilated(
            x, wgt, (1, 1, 1), "SAME",
            dimension_numbers=("NCDHW", "OIDHW", "NCDHW"))
        return y + b.reshape(1, -1, 1, 1, 1)

    def bn(x, g, be, m, v):
        sh = (1, -1, 1, 1, 1)
        return ((x - m.reshape(sh)) * jax.lax.rsqrt(v.reshape(sh) + EPS)
                * g.reshape(sh) + be.reshape(sh))

    y = conv(x, params["w1"], params["b1"])
    y = bn(y, params["g1"], params["be1"], params["m1"], params["v1"])
    y = jnp.maximum(y, 0.0)
    y = conv(y, params["w2"], params["b2"])
    y = bn(y, params["g2"], params["be2"], params["m2"], params["v2"])
    return y * res_scale + x


# ---------------------------------------------------------------------------
if __name__ == "__main__":
    n_feats, k = 4, 3
    N, D, H, W = 2, 8, 8, 8          # 5-D input (BatchNorm3d => 3-D conv)
    res_scale = 1.0

    key = jax.random.PRNGKey(0)
    ks = jax.random.split(key, 13)
    fan_in = n_feats * k * k * k
    std = 1.0 / np.sqrt(fan_in)

    params = {
        "w1": jax.random.normal(ks[0], (n_feats, n_feats, k, k, k), jnp.float32) * std,
        "b1": jax.random.normal(ks[1], (n_feats,), jnp.float32) * 0.1,
        "g1": jax.random.uniform(ks[2], (n_feats,), jnp.float32, 0.5, 1.5),
        "be1": jax.random.normal(ks[3], (n_feats,), jnp.float32) * 0.1,
        "m1": jax.random.normal(ks[4], (n_feats,), jnp.float32) * 0.1,
        "v1": jax.random.uniform(ks[5], (n_feats,), jnp.float32, 0.5, 1.5),
        "w2": jax.random.normal(ks[6], (n_feats, n_feats, k, k, k), jnp.float32) * std,
        "b2": jax.random.normal(ks[7], (n_feats,), jnp.float32) * 0.1,
        "g2": jax.random.uniform(ks[8], (n_feats,), jnp.float32, 0.5, 1.5),
        "be2": jax.random.normal(ks[9], (n_feats,), jnp.float32) * 0.1,
        "m2": jax.random.normal(ks[10], (n_feats,), jnp.float32) * 0.1,
        "v2": jax.random.uniform(ks[11], (n_feats,), jnp.float32, 0.5, 1.5),
    }

    x = jax.random.normal(ks[12], (N, n_feats, D, H, W), jnp.float32)

    fwd = jax.jit(functools.partial(res_block_forward,
                                    kernel_size=k, res_scale=res_scale))
    out = jax.block_until_ready(fwd(x, params))
    ref = jax.block_until_ready(_reference(x, params, k, res_scale))

    assert out.shape == (N, n_feats, D, H, W)
    assert np.allclose(np.asarray(out), np.asarray(ref), atol=1e-4, rtol=1e-4)
    print("KERNEL_OK")
</pallas_src>

<mosaic_0001>
module attributes {stable_mosaic.version = 11 : i64} {
  func.func @kernel(%arg0: i32, %arg1: i32, %arg2: memref<1x8x4x128xf32, #tpu.memory_space<vmem>>, %arg3: memref<1x2x4x128xf32, #tpu.memory_space<vmem>>, %arg4: memref<1x4x512xf32, #tpu.memory_space<vmem>>, %arg5: memref<4x108xf32, #tpu.memory_space<vmem>>, %arg6: memref<4x1xf32, #tpu.memory_space<vmem>>, %arg7: memref<1x4x512xf32, #tpu.memory_space<vmem>>) attributes {dimension_semantics = [#tpu.dimension_semantics<parallel>, #tpu.dimension_semantics<parallel>], iteration_bounds = array<i64: 2, 1>, scalar_prefetch = 0 : i64, scratch_operands = 0 : i64, tpu.core_type = #tpu.core_type<tc>, window_params = [{transform_indices = @transform_0, window_bounds = array<i64: 1, 8, 4, 128>}, {transform_indices = @transform_1, window_bounds = array<i64: 1, 2, 4, 128>}, {transform_indices = @transform_2, window_bounds = array<i64: 1, 4, 512>}, {pipeline_mode = #tpu.pipeline_mode<synchronous>, transform_indices = @transform_3, window_bounds = array<i64: 4, 108>}, {pipeline_mode = #tpu.pipeline_mode<synchronous>, transform_indices = @transform_4, window_bounds = array<i64: 4, 1>}, {transform_indices = @transform_5, window_bounds = array<i64: 1, 4, 512>}]} {
    %c0 = arith.constant 0 : index
    %c0_0 = arith.constant 0 : index
    %0 = vector.load %arg5[%c0, %c0_0] : memref<4x108xf32, #tpu.memory_space<vmem>>, vector<4x108xf32>
    %c0_1 = arith.constant 0 : index
    %c0_2 = arith.constant 0 : index
    %1 = vector.load %arg6[%c0_1, %c0_2] : memref<4x1xf32, #tpu.memory_space<vmem>>, vector<4x1xf32>
    %c0_3 = arith.constant 0 : index
    %c0_4 = arith.constant 0 : index
    %c0_5 = arith.constant 0 : index
    %c10 = arith.constant 10 : index
    %2 = vector.load %arg2[%c0_3, %c0_4, %c0_5, %c10] : memref<1x8x4x128xf32, #tpu.memory_space<vmem>>, vector<1x1x4x80xf32>
    %3 = vector.shape_cast %2 : vector<1x1x4x80xf32> to vector<4x80xf32>
    %c0_6 = arith.constant 0 : index
    %c0_7 = arith.constant 0 : index
    %c0_8 = arith.constant 0 : index
    %c11 = arith.constant 11 : index
    %4 = vector.load %arg2[%c0_6, %c0_7, %c0_8, %c11] : memref<1x8x4x128xf32, #tpu.memory_space<vmem>>, vector<1x1x4x80xf32>
    %5 = vector.shape_cast %4 : vector<1x1x4x80xf32> to vector<4x80xf32>
    %c0_9 = arith.constant 0 : index
    %c0_10 = arith.constant 0 : index
    %c0_11 = arith.constant 0 : index
    %c12 = arith.constant 12 : index
    %6 = vector.load %arg2[%c0_9, %c0_10, %c0_11, %c12] : memref<1x8x4x128xf32, #tpu.memory_space<vmem>>, vector<1x1x4x80xf32>
    %7 = vector.shape_cast %6 : vector<1x1x4x80xf32> to vector<4x80xf32>
    %c0_12 = arith.constant 0 : index
    %c0_13 = arith.constant 0 : index
    %c0_14 = arith.constant 0 : index
    %c20 = arith.constant 20 : index
    %8 = vector.load %arg2[%c0_12, %c0_13, %c0_14, %c20] : memref<1x8x4x128xf32, #tpu.memory_space<vmem>>, vector<1x1x4x80xf32>
    %9 = vector.shape_cast %8 : vector<1x1x4x80xf32> to vector<4x80xf32>
    %c0_15 = arith.constant 0 : index
    %c0_16 = arith.constant 0 : index
    %c0_17 = arith.constant 0 : index
    %c21 = arith.constant 21 : index
    %10 = vector.load %arg2[%c0_15, %c0_16, %c0_17, %c21] : memref<1x8x4x128xf32, #tpu.memory_space<vmem>>, vector<1x1x4x80xf32>
    %11 = vector.shape_cast %10 : vector<1x1x4x80xf32> to vector<4x80xf32>
    %c0_18 = arith.constant 0 : index
    %c0_19 = arith.constant 0 : index
    %c0_20 = arith.constant 0 : index
    %c22 = arith.constant 22 : index
    %12 = vector.load %arg2[%c0_18, %c0_19, %c0_20, %c22] : memref<1x8x4x128xf32, #tpu.memory_space<vmem>>, vector<1x1x4x80xf32>
    %13 = vector.shape_cast %12 : vector<1x1x4x80xf32> to vector<4x80xf32>
    %c0_21 = arith.constant 0 : index
    %c0_22 = arith.constant 0 : index
    %c0_23 = arith.constant 0 : index
    %c30 = arith.constant 30 : index
    %14 = vector.load %arg2[%c0_21, %c0_22, %c0_23, %c30] : memref<1x8x4x128xf32, #tpu.memory_space<vmem>>, vector<1x1x4x80xf32>
    %15 = vector.shape_cast %14 : vector<1x1x4x80xf32> to vector<4x80xf32>
    %c0_24 = arith.constant 0 : index
    %c0_25 = arith.constant 0 : index
    %c0_26 = arith.constant 0 : index
    %c31 = arith.constant 31 : index
    %16 = vector.load %arg2[%c0_24, %c0_25, %c0_26, %c31] : memref<1x8x4x128xf32, #tpu.memory_space<vmem>>, vector<1x1x4x80xf32>
    %17 = vector.shape_cast %16 : vector<1x1x4x80xf32> to vector<4x80xf32>
    %c0_27 = arith.constant 0 : index
    %c0_28 = arith.constant 0 : index
    %c0_29 = arith.constant 0 : index
    %c32 = arith.constant 32 : index
    %18 = vector.load %arg2[%c0_27, %c0_28, %c0_29, %c32] : memref<1x8x4x128xf32, #tpu.memory_space<vmem>>, vector<1x1x4x80xf32>
    %19 = vector.shape_cast %18 : vector<1x1x4x80xf32> to vector<4x80xf32>
    %c0_30 = arith.constant 0 : index
    %c1 = arith.constant 1 : index
    %c0_31 = arith.constant 0 : index
    %c10_32 = arith.constant 10 : index
    %20 = vector.load %arg2[%c0_30, %c1, %c0_31, %c10_32] : memref<1x8x4x128xf32, #tpu.memory_space<vmem>>, vector<1x1x4x80xf32>
    %21 = vector.shape_cast %20 : vector<1x1x4x80xf32> to vector<4x80xf32>
    %c0_33 = arith.constant 0 : index
    %c1_34 = arith.constant 1 : index
    %c0_35 = arith.constant 0 : index
    %c11_36 = arith.constant 11 : index
    %22 = vector.load %arg2[%c0_33, %c1_34, %c0_35, %c11_36] : memref<1x8x4x128xf32, #tpu.memory_space<vmem>>, vector<1x1x4x80xf32>
    %23 = vector.shape_cast %22 : vector<1x1x4x80xf32> to vector<4x80xf32>
    %c0_37 = arith.constant 0 : index
    %c1_38 = arith.constant 1 : index
    %c0_39 = arith.constant 0 : index
    %c12_40 = arith.constant 12 : index
    %24 = vector.load %arg2[%c0_37, %c1_38, %c0_39, %c12_40] : memref<1x8x4x128xf32, #tpu.memory_space<vmem>>, vector<1x1x4x80xf32>
    %25 = vector.shape_cast %24 : vector<1x1x4x80xf32> to vector<4x80xf32>
    %c0_41 = arith.constant 0 : index
    %c1_42 = arith.constant 1 : index
    %c0_43 = arith.constant 0 : index
    %c20_44 = arith.constant 20 : index
    %26 = vector.load %arg2[%c0_41, %c1_42, %c0_43, %c20_44] : memref<1x8x4x128xf32, #tpu.memory_space<vmem>>, vector<1x1x4x80xf32>
    %27 = vector.shape_cast %26 : vector<1x1x4x80xf32> to vector<4x80xf32>
    %c0_45 = arith.constant 0 : index
    %c1_46 = arith.constant 1 : index
    %c0_47 = arith.constant 0 : index
    %c21_48 = arith.constant 21 : index
    %28 = vector.load %arg2[%c0_45, %c1_46, %c0_47, %c21_48] : memref<1x8x4x128xf32, #tpu.memory_space<vmem>>, vector<1x1x4x80xf32>
    %29 = vector.shape_cast %28 : vector<1x1x4x80xf32> to vector<4x80xf32>
    %c0_49 = arith.constant 0 : index
    %c1_50 = arith.constant 1 : index
    %c0_51 = arith.constant 0 : index
    %c22_52 = arith.constant 22 : index
    %30 = vector.load %arg2[%c0_49, %c1_50, %c0_51, %c22_52] : memref<1x8x4x128xf32, #tpu.memory_space<vmem>>, vector<1x1x4x80xf32>
    %31 = vector.shape_cast %30 : vector<1x1x4x80xf32> to vector<4x80xf32>
    %c0_53 = arith.constant 0 : index
    %c1_54 = arith.constant 1 : index
    %c0_55 = arith.constant 0 : index
    %c30_56 = arith.constant 30 : index
    %32 = vector.load %arg2[%c0_53, %c1_54, %c0_55, %c30_56] : memref<1x8x4x128xf32, #tpu.memory_space<vmem>>, vector<1x1x4x80xf32>
    %33 = vector.shape_cast %32 : vector<1x1x4x80xf32> to vector<4x80xf32>
    %c0_57 = arith.constant 0 : index
    %c1_58 = arith.constant 1 : index
    %c0_59 = arith.constant 0 : index
    %c31_60 = arith.constant 31 : index
    %34 = vector.load %arg2[%c0_57, %c1_58, %c0_59, %c31_60] : memref<1x8x4x128xf32, #tpu.memory_space<vmem>>, vector<1x1x4x80xf32>
    %35 = vector.shape_cast %34 : vector<1x1x4x80xf32> to vector<4x80xf32>
    %c0_61 = arith.constant 0 : index
    %c1_62 = arith.constant 1 : index
    %c0_63 = arith.constant 0 : index
    %c32_64 = arith.constant 32 : index
    %36 = vector.load %arg2[%c0_61, %c1_62, %c0_63, %c32_64] : memref<1x8x4x128xf32, #tpu.memory_space<vmem>>, vector<1x1x4x80xf32>
    %37 = vector.shape_cast %36 : vector<1x1x4x80xf32> to vector<4x80xf32>
    %c0_65 = arith.constant 0 : index
    %c2 = arith.constant 2 : index
    %c0_66 = arith.constant 0 : index
    %c10_67 = arith.constant 10 : index
    %38 = vector.load %arg2[%c0_65, %c2, %c0_66, %c10_67] : memref<1x8x4x128xf32, #tpu.memory_space<vmem>>, vector<1x1x4x80xf32>
    %39 = vector.shape_cast %38 : vector<1x1x4x80xf32> to vector<4x80xf32>
    %c0_68 = arith.constant 0 : index
    %c2_69 = arith.constant 2 : index
    %c0_70 = arith.constant 0 : index
    %c11_71 = arith.constant 11 : index
    %40 = vector.load %arg2[%c0_68, %c2_69, %c0_70, %c11_71] : memref<1x8x4x128xf32, #tpu.memory_space<vmem>>, vector<1x1x4x80xf32>
    %41 = vector.shape_cast %40 : vector<1x1x4x80xf32> to vector<4x80xf32>
    %c0_72 = arith.constant 0 : index
    %c2_73 = arith.constant 2 : index
    %c0_74 = arith.constant 0 : index
    %c12_75 = arith.constant 12 : index
    %42 = vector.load %arg2[%c0_72, %c2_73, %c0_74, %c12_75] : memref<1x8x4x128xf32, #tpu.memory_space<vmem>>, vector<1x1x4x80xf32>
    %43 = vector.shape_cast %42 : vector<1x1x4x80xf32> to vector<4x80xf32>
    %c0_76 = arith.constant 0 : index
    %c2_77 = arith.constant 2 : index
    %c0_78 = arith.constant 0 : index
    %c20_79 = arith.constant 20 : index
    %44 = vector.load %arg2[%c0_76, %c2_77, %c0_78, %c20_79] : memref<1x8x4x128xf32, #tpu.memory_space<vmem>>, vector<1x1x4x80xf32>
    %45 = vector.shape_cast %44 : vector<1x1x4x80xf32> to vector<4x80xf32>
    %c0_80 = arith.constant 0 : index
    %c2_81 = arith.constant 2 : index
    %c0_82 = arith.constant 0 : index
    %c21_83 = arith.constant 21 : index
    %46 = vector.load %arg2[%c0_80, %c2_81, %c0_82, %c21_83] : memref<1x8x4x128xf32, #tpu.memory_space<vmem>>, vector<1x1x4x80xf32>
    %47 = vector.shape_cast %46 : vector<1x1x4x80xf32> to vector<4x80xf32>
    %c0_84 = arith.constant 0 : index
    %c2_85 = arith.constant 2 : index
    %c0_86 = arith.constant 0 : index
    %c22_87 = arith.constant 22 : index
    %48 = vector.load %arg2[%c0_84, %c2_85, %c0_86, %c22_87] : memref<1x8x4x128xf32, #tpu.memory_space<vmem>>, vector<1x1x4x80xf32>
    %49 = vector.shape_cast %48 : vector<1x1x4x80xf32> to vector<4x80xf32>
    %c0_88 = arith.constant 0 : index
    %c2_89 = arith.constant 2 : index
    %c0_90 = arith.constant 0 : index
    %c30_91 = arith.constant 30 : index
    %50 = vector.load %arg2[%c0_88, %c2_89, %c0_90, %c30_91] : memref<1x8x4x128xf32, #tpu.memory_space<vmem>>, vector<1x1x4x80xf32>
    %51 = vector.shape_cast %50 : vector<1x1x4x80xf32> to vector<4x80xf32>
    %c0_92 = arith.constant 0 : index
    %c2_93 = arith.constant 2 : index
    %c0_94 = arith.constant 0 : index
    %c31_95 = arith.constant 31 : index
    %52 = vector.load %arg2[%c0_92, %c2_93, %c0_94, %c31_95] : memref<1x8x4x128xf32, #tpu.memory_space<vmem>>, vector<1x1x4x80xf32>
    %53 = vector.shape_cast %52 : vector<1x1x4x80xf32> to vector<4x80xf32>
    %c0_96 = arith.constant 0 : index
    %c2_97 = arith.constant 2 : index
    %c0_98 = arith.constant 0 : index
    %c32_99 = arith.constant 32 : index
    %54 = vector.load %arg2[%c0_96, %c2_97, %c0_98, %c32_99] : memref<1x8x4x128xf32, #tpu.memory_space<vmem>>, vector<1x1x4x80xf32>
    %55 = vector.shape_cast %54 : vector<1x1x4x80xf32> to vector<4x80xf32>
    %56 = tpu.concatenate %3, %5, %7, %9, %11, %13, %15, %17, %19, %21, %23, %25, %27, %29, %31, %33 in 0 : vector<4x80xf32>, vector<4x80xf32>, vector<4x80xf32>, vector<4x80xf32>, vector<4x80xf32>, vector<4x80xf32>, vector<4x80xf32>, vector<4x80xf32>, vector<4x80xf32>, vector<4x80xf32>, vector<4x80xf32>, vector<4x80xf32>, vector<4x80xf32>, vector<4x80xf32>, vector<4x80xf32>, vector<4x80xf32> -> vector<64x80xf32>
    %57 = tpu.concatenate %35, %37, %39, %41, %43, %45, %47, %49, %51, %53, %55 in 0 : vector<4x80xf32>, vector<4x80xf32>, vector<4x80xf32>, vector<4x80xf32>, vector<4x80xf32>, vector<4x80xf32>, vector<4x80xf32>, vector<4x80xf32>, vector<4x80xf32>, vector<4x80xf32>, vector<4x80xf32> -> vector<44x80xf32>
    %58 = tpu.concatenate %56, %57 in 0 : vector<64x80xf32>, vector<44x80xf32> -> vector<108x80xf32>
    %c0_100 = arith.constant 0 : index
    %c1_101 = arith.constant 1 : index
    %c0_102 = arith.constant 0 : index
    %c10_103 = arith.constant 10 : index
    %59 = vector.load %arg2[%c0_100, %c1_101, %c0_102, %c10_103] : memref<1x8x4x128xf32, #tpu.memory_space<vmem>>, vector<1x1x4x80xf32>
    %60 = vector.shape_cast %59 : vector<1x1x4x80xf32> to vector<4x80xf32>
    %c0_104 = arith.constant 0 : index
    %c1_105 = arith.constant 1 : index
    %c0_106 = arith.constant 0 : index
    %c11_107 = arith.constant 11 : index
    %61 = vector.load %arg2[%c0_104, %c1_105, %c0_106, %c11_107] : memref<1x8x4x128xf32, #tpu.memory_space<vmem>>, vector<1x1x4x80xf32>
    %62 = vector.shape_cast %61 : vector<1x1x4x80xf32> to vector<4x80xf32>
    %c0_108 = arith.constant 0 : index
    %c1_109 = arith.constant 1 : index
    %c0_110 = arith.constant 0 : index
    %c12_111 = arith.constant 12 : index
    %63 = vector.load %arg2[%c0_108, %c1_109, %c0_110, %c12_111] : memref<1x8x4x128xf32, #tpu.memory_space<vmem>>, vector<1x1x4x80xf32>
    %64 = vector.shape_cast %63 : vector<1x1x4x80xf32> to vector<4x80xf32>
    %c0_112 = arith.constant 0 : index
    %c1_113 = arith.constant 1 : index
    %c0_114 = arith.constant 0 : index
    %c20_115 = arith.constant 20 : index
    %65 = vector.load %arg2[%c0_112, %c1_113, %c0_114, %c20_115] : memref<1x8x4x128xf32, #tpu.memory_space<vmem>>, vector<1x1x4x80xf32>
    %66 = vector.shape_cast %65 : vector<1x1x4x80xf32> to vector<4x80xf32>
    %c0_116 = arith.constant 0 : index
    %c1_117 = arith.constant 1 : index
    %c0_118 = arith.constant 0 : index
    %c21_119 = arith.constant 21 : index
    %67 = vector.load %arg2[%c0_116, %c1_117, %c0_118, %c21_119] : memref<1x8x4x128xf32, #tpu.memory_space<vmem>>, vector<1x1x4x80xf32>
    %68 = vector.shape_cast %67 : vector<1x1x4x80xf32> to vector<4x80xf32>
    %c0_120 = arith.constant 0 : index
    %c1_121 = arith.constant 1 : index
    %c0_122 = arith.constant 0 : index
    %c22_123 = arith.constant 22 : index
    %69 = vector.load %arg2[%c0_120, %c1_121, %c0_122, %c22_123] : memref<1x8x4x128xf32, #tpu.memory_space<vmem>>, vector<1x1x4x80xf32>
    %70 = vector.shape_cast %69 : vector<1x1x4x80xf32> to vector<4x80xf32>
    %c0_124 = arith.constant 0 : index
    %c1_125 = arith.constant 1 : index
    %c0_126 = arith.constant 0 : index
    %c30_127 = arith.constant 30 : index
    %71 = vector.load %arg2[%c0_124, %c1_125, %c0_126, %c30_127] : memref<1x8x4x128xf32, #tpu.memory_space<vmem>>, vector<1x1x4x80xf32>
    %72 = vector.shape_cast %71 : vector<1x1x4x80xf32> to vector<4x80xf32>
    %c0_128 = arith.constant 0 : index
    %c1_129 = arith.constant 1 : index
    %c0_130 = arith.constant 0 : index
    %c31_131 = arith.constant 31 : index
    %73 = vector.load %arg2[%c0_128, %c1_129, %c0_130, %c31_131] : memref<1x8x4x128xf32, #tpu.memory_space<vmem>>, vector<1x1x4x80xf32>
    %74 = vector.shape_cast %73 : vector<1x1x4x80xf32> to vector<4x80xf32>
    %c0_132 = arith.constant 0 : index
    %c1_133 = arith.constant 1 : index
    %c0_134 = arith.constant 0 : index
    %c32_135 = arith.constant 32 : index
    %75 = vector.load %arg2[%c0_132, %c1_133, %c0_134, %c32_135] : memref<1x8x4x128xf32, #tpu.memory_space<vmem>>, vector<1x1x4x80xf32>
    %76 = vector.shape_cast %75 : vector<1x1x4x80xf32> to vector<4x80xf32>
    %c0_136 = arith.constant 0 : index
    %c2_137 = arith.constant 2 : index
    %c0_138 = arith.constant 0 : index
    %c10_139 = arith.constant 10 : index
    %77 = vector.load %arg2[%c0_136, %c2_137, %c0_138, %c10_139] : memref<1x8x4x128xf32, #tpu.memory_space<vmem>>, vector<1x1x4x80xf32>
    %78 = vector.shape_cast %77 : vector<1x1x4x80xf32> to vector<4x80xf32>
    %c0_140 = arith.constant 0 : index
    %c2_141 = arith.constant 2 : index
    %c0_142 = arith.constant 0 : index
    %c11_143 = arith.constant 11 : index
    %79 = vector.load %arg2[%c0_140, %c2_141, %c0_142, %c11_143] : memref<1x8x4x128xf32, #tpu.memory_space<vmem>>, vector<1x1x4x80xf32>
    %80 = vector.shape_cast %79 : vector<1x1x4x80xf32> to vector<4x80xf32>
    %c0_144 = arith.constant 0 : index
    %c2_145 = arith.constant 2 : index
    %c0_146 = arith.constant 0 : index
    %c12_147 = arith.constant 12 : index
    %81 = vector.load %arg2[%c0_144, %c2_145, %c0_146, %c12_147] : memref<1x8x4x128xf32, #tpu.memory_space<vmem>>, vector<1x1x4x80xf32>
    %82 = vector.shape_cast %81 : vector<1x1x4x80xf32> to vector<4x80xf32>
    %c0_148 = arith.constant 0 : index
    %c2_149 = arith.constant 2 : index
    %c0_150 = arith.constant 0 : index
    %c20_151 = arith.constant 20 : index
    %83 = vector.load %arg2[%c0_148, %c2_149, %c0_150, %c20_151] : memref<1x8x4x128xf32, #tpu.memory_space<vmem>>, vector<1x1x4x80xf32>
    %84 = vector.shape_cast %83 : vector<1x1x4x80xf32> to vector<4x80xf32>
    %c0_152 = arith.constant 0 : index
    %c2_153 = arith.constant 2 : index
    %c0_154 = arith.constant 0 : index
    %c21_155 = arith.constant 21 : index
    %85 = vector.load %arg2[%c0_152, %c2_153, %c0_154, %c21_155] : memref<1x8x4x128xf32, #tpu.memory_space<vmem>>, vector<1x1x4x80xf32>
    %86 = vector.shape_cast %85 : vector<1x1x4x80xf32> to vector<4x80xf32>
    %c0_156 = arith.constant 0 : index
    %c2_157 = arith.constant 2 : index
    %c0_158 = arith.constant 0 : index
    %c22_159 = arith.constant 22 : index
    %87 = vector.load %arg2[%c0_156, %c2_157, %c0_158, %c22_159] : memref<1x8x4x128xf32, #tpu.memory_space<vmem>>, vector<1x1x4x80xf32>
    %88 = vector.shape_cast %87 : vector<1x1x4x80xf32> to vector<4x80xf32>
    %c0_160 = arith.constant 0 : index
    %c2_161 = arith.constant 2 : index
    %c0_162 = arith.constant 0 : index
    %c30_163 = arith.constant 30 : index
    %89 = vector.load %arg2[%c0_160, %c2_161, %c0_162, %c30_163] : memref<1x8x4x128xf32, #tpu.memory_space<vmem>>, vector<1x1x4x80xf32>
    %90 = vector.shape_cast %89 : vector<1x1x4x80xf32> to vector<4x80xf32>
    %c0_164 = arith.constant 0 : index
    %c2_165 = arith.constant 2 : index
    %c0_166 = arith.constant 0 : index
    %c31_167 = arith.constant 31 : index
    %91 = vector.load %arg2[%c0_164, %c2_165, %c0_166, %c31_167] : memref<1x8x4x128xf32, #tpu.memory_space<vmem>>, vector<1x1x4x80xf32>
    %92 = vector.shape_cast %91 : vector<1x1x4x80xf32> to vector<4x80xf32>
    %c0_168 = arith.constant 0 : index
    %c2_169 = arith.constant 2 : index
    %c0_170 = arith.constant 0 : index
    %c32_171 = arith.constant 32 : index
    %93 = vector.load %arg2[%c0_168, %c2_169, %c0_170, %c32_171] : memref<1x8x4x128xf32, #tpu.memory_space<vmem>>, vector<1x1x4x80xf32>
    %94 = vector.shape_cast %93 : vector<1x1x4x80xf32> to vector<4x80xf32>
    %c0_172 = arith.constant 0 : index
    %c3 = arith.constant 3 : index
    %c0_173 = arith.constant 0 : index
    %c10_174 = arith.constant 10 : index
    %95 = vector.load %arg2[%c0_172, %c3, %c0_173, %c10_174] : memref<1x8x4x128xf32, #tpu.memory_space<vmem>>, vector<1x1x4x80xf32>
    %96 = vector.shape_cast %95 : vector<1x1x4x80xf32> to vector<4x80xf32>
    %c0_175 = arith.constant 0 : index
    %c3_176 = arith.constant 3 : index
    %c0_177 = arith.constant 0 : index
    %c11_178 = arith.constant 11 : index
    %97 = vector.load %arg2[%c0_175, %c3_176, %c0_177, %c11_178] : memref<1x8x4x128xf32, #tpu.memory_space<vmem>>, vector<1x1x4x80xf32>
    %98 = vector.shape_cast %97 : vector<1x1x4x80xf32> to vector<4x80xf32>
    %c0_179 = arith.constant 0 : index
    %c3_180 = arith.constant 3 : index
    %c0_181 = arith.constant 0 : index
    %c12_182 = arith.constant 12 : index
    %99 = vector.load %arg2[%c0_179, %c3_180, %c0_181, %c12_182] : memref<1x8x4x128xf32, #tpu.memory_space<vmem>>, vector<1x1x4x80xf32>
    %100 = vector.shape_cast %99 : vector<1x1x4x80xf32> to vector<4x80xf32>
    %c0_183 = arith.constant 0 : index
    %c3_184 = arith.constant 3 : index
    %c0_185 = arith.constant 0 : index
    %c20_186 = arith.constant 20 : index
    %101 = vector.load %arg2[%c0_183, %c3_184, %c0_185, %c20_186] : memref<1x8x4x128xf32, #tpu.memory_space<vmem>>, vector<1x1x4x80xf32>
    %102 = vector.shape_cast %101 : vector<1x1x4x80xf32> to vector<4x80xf32>
    %c0_187 = arith.constant 0 : index
    %c3_188 = arith.constant 3 : index
    %c0_189 = arith.constant 0 : index
    %c21_190 = arith.constant 21 : index
    %103 = vector.load %arg2[%c0_187, %c3_188, %c0_189, %c21_190] : memref<1x8x4x128xf32, #tpu.memory_space<vmem>>, vector<1x1x4x80xf32>
    %104 = vector.shape_cast %103 : vector<1x1x4x80xf32> to vector<4x80xf32>
    %c0_191 = arith.constant 0 : index
    %c3_192 = arith.constant 3 : index
    %c0_193 = arith.constant 0 : index
    %c22_194 = arith.constant 22 : index
    %105 = vector.load %arg2[%c0_191, %c3_192, %c0_193, %c22_194] : memref<1x8x4x128xf32, #tpu.memory_space<vmem>>, vector<1x1x4x80xf32>
    %106 = vector.shape_cast %105 : vector<1x1x4x80xf32> to vector<4x80xf32>
    %c0_195 = arith.constant 0 : index
    %c3_196 = arith.constant 3 : index
    %c0_197 = arith.constant 0 : index
    %c30_198 = arith.constant 30 : index
    %107 = vector.load %arg2[%c0_195, %c3_196, %c0_197, %c30_198] : memref<1x8x4x128xf32, #tpu.memory_space<vmem>>, vector<1x1x4x80xf32>
    %108 = vector.shape_cast %107 : vector<1x1x4x80xf32> to vector<4x80xf32>
    %c0_199 = arith.constant 0 : index
    %c3_200 = arith.constant 3 : index
    %c0_201 = arith.constant 0 : index
    %c31_202 = arith.constant 31 : index
    %109 = vector.load %arg2[%c0_199, %c3_200, %c0_201, %c31_202] : memref<1x8x4x128xf32, #tpu.memory_space<vmem>>, vector<1x1x4x80xf32>
    %110 = vector.shape_cast %109 : vector<1x1x4x80xf32> to vector<4x80xf32>
    %c0_203 = arith.constant 0 : index
    %c3_204 = arith.constant 3 : index
    %c0_205 = arith.constant 0 : index
    %c32_206 = arith.constant 32 : index
    %111 = vector.load %arg2[%c0_203, %c3_204, %c0_205, %c32_206] : memref<1x8x4x128xf32, #tpu.memory_space<vmem>>, vector<1x1x4x80xf32>
    %112 = vector.shape_cast %111 : vector<1x1x4x80xf32> to vector<4x80xf32>
    %113 = tpu.concatenate %60, %62, %64, %66, %68, %70, %72, %74, %76, %78, %80, %82, %84, %86, %88, %90 in 0 : vector<4x80xf32>, vector<4x80xf32>, vector<4x80xf32>, vector<4x80xf32>, vector<4x80xf32>, vector<4x80xf32>, vector<4x80xf32>, vector<4x80xf32>, vector<4x80xf32>, vector<4x80xf32>, vector<4x80xf32>, vector<4x80xf32>, vector<4x80xf32>, vector<4x80xf32>, vector<4x80xf32>, vector<4x80xf32> -> vector<64x80xf32>
    %114 = tpu.concatenate %92, %94, %96, %98, %100, %102, %104, %106, %108, %110, %112 in 0 : vector<4x80xf32>, vector<4x80xf32>, vector<4x80xf32>, vector<4x80xf32>, vector<4x80xf32>, vector<4x80xf32>, vector<4x80xf32>, vector<4x80xf32>, vector<4x80xf32>, vector<4x80xf32>, vector<4x80xf32> -> vector<44x80xf32>
    %115 = tpu.concatenate %113, %114 in 0 : vector<64x80xf32>, vector<44x80xf32> -> vector<108x80xf32>
    %c0_207 = arith.constant 0 : index
    %c2_208 = arith.constant 2 : index
    %c0_209 = arith.constant 0 : index
    %c10_210 = arith.constant 10 : index
    %116 = vector.load %arg2[%c0_207, %c2_208, %c0_209, %c10_210] : memref<1x8x4x128xf32, #tpu.memory_space<vmem>>, vector<1x1x4x80xf32>
    %117 = vector.shape_cast %116 : vector<1x1x4x80xf32> to vector<4x80xf32>
    %c0_211 = arith.constant 0 : index
    %c2_212 = arith.constant 2 : index
    %c0_213 = arith.constant 0 : index
    %c11_214 = arith.constant 11 : index
    %118 = vector.load %arg2[%c0_211, %c2_212, %c0_213, %c11_214] : memref<1x8x4x128xf32, #tpu.memory_space<vmem>>, vector<1x1x4x80xf32>
    %119 = vector.shape_cast %118 : vector<1x1x4x80xf32> to vector<4x80xf32>
    %c0_215 = arith.constant 0 : index
    %c2_216 = arith.constant 2 : index
    %c0_217 = arith.constant 0 : index
    %c12_218 = arith.constant 12 : index
    %120 = vector.load %arg2[%c0_215, %c2_216, %c0_217, %c12_218] : memref<1x8x4x128xf32, #tpu.memory_space<vmem>>, vector<1x1x4x80xf32>
    %121 = vector.shape_cast %120 : vector<1x1x4x80xf32> to vector<4x80xf32>
    %c0_219 = arith.constant 0 : index
    %c2_220 = arith.constant 2 : index
    %c0_221 = arith.constant 0 : index
    %c20_222 = arith.constant 20 : index
    %122 = vector.load %arg2[%c0_219, %c2_220, %c0_221, %c20_222] : memref<1x8x4x128xf32, #tpu.memory_space<vmem>>, vector<1x1x4x80xf32>
    %123 = vector.shape_cast %122 : vector<1x1x4x80xf32> to vector<4x80xf32>
    %c0_223 = arith.constant 0 : index
    %c2_224 = arith.constant 2 : index
    %c0_225 = arith.constant 0 : index
    %c21_226 = arith.constant 21 : index
    %124 = vector.load %arg2[%c0_223, %c2_224, %c0_225, %c21_226] : memref<1x8x4x128xf32, #tpu.memory_space<vmem>>, vector<1x1x4x80xf32>
    %125 = vector.shape_cast %124 : vector<1x1x4x80xf32> to vector<4x80xf32>
    %c0_227 = arith.constant 0 : index
    %c2_228 = arith.constant 2 : index
    %c0_229 = arith.constant 0 : index
    %c22_230 = arith.constant 22 : index
    %126 = vector.load %arg2[%c0_227, %c2_228, %c0_229, %c22_230] : memref<1x8x4x128xf32, #tpu.memory_space<vmem>>, vector<1x1x4x80xf32>
    %127 = vector.shape_cast %126 : vector<1x1x4x80xf32> to vector<4x80xf32>
    %c0_231 = arith.constant 0 : index
    %c2_232 = arith.constant 2 : index
    %c0_233 = arith.constant 0 : index
    %c30_234 = arith.constant 30 : index
    %128 = vector.load %arg2[%c0_231, %c2_232, %c0_233, %c30_234] : memref<1x8x4x128xf32, #tpu.memory_space<vmem>>, vector<1x1x4x80xf32>
    %129 = vector.shape_cast %128 : vector<1x1x4x80xf32> to vector<4x80xf32>
    %c0_235 = arith.constant 0 : index
    %c2_236 = arith.constant 2 : index
    %c0_237 = arith.constant 0 : index
    %c31_238 = arith.constant 31 : index
    %130 = vector.load %arg2[%c0_235, %c2_236, %c0_237, %c31_238] : memref<1x8x4x128xf32, #tpu.memory_space<vmem>>, vector<1x1x4x80xf32>
    %131 = vector.shape_cast %130 : vector<1x1x4x80xf32> to vector<4x80xf32>
    %c0_239 = arith.constant 0 : index
    %c2_240 = arith.constant 2 : index
    %c0_241 = arith.constant 0 : index
    %c32_242 = arith.constant 32 : index
    %132 = vector.load %arg2[%c0_239, %c2_240, %c0_241, %c32_242] : memref<1x8x4x128xf32, #tpu.memory_space<vmem>>, vector<1x1x4x80xf32>
    %133 = vector.shape_cast %132 : vector<1x1x4x80xf32> to vector<4x80xf32>
    %c0_243 = arith.constant 0 : index
    %c3_244 = arith.constant 3 : index
    %c0_245 = arith.constant 0 : index
    %c10_246 = arith.constant 10 : index
    %134 = vector.load %arg2[%c0_243, %c3_244, %c0_245, %c10_246] : memref<1x8x4x128xf32, #tpu.memory_space<vmem>>, vector<1x1x4x80xf32>
    %135 = vector.shape_cast %134 : vector<1x1x4x80xf32> to vector<4x80xf32>
    %c0_247 = arith.constant 0 : index
    %c3_248 = arith.constant 3 : index
    %c0_249 = arith.constant 0 : index
    %c11_250 = arith.constant 11 : index
    %136 = vector.load %arg2[%c0_247, %c3_248, %c0_249, %c11_250] : memref<1x8x4x128xf32, #tpu.memory_space<vmem>>, vector<1x1x4x80xf32>
    %137 = vector.shape_cast %136 : vector<1x1x4x80xf32> to vector<4x80xf32>
    %c0_251 = arith.constant 0 : index
    %c3_252 = arith.constant 3 : index
    %c0_253 = arith.constant 0 : index
    %c12_254 = arith.constant 12 : index
    %138 = vector.load %arg2[%c0_251, %c3_252, %c0_253, %c12_254] : memref<1x8x4x128xf32, #tpu.memory_space<vmem>>, vector<1x1x4x80xf32>
    %139 = vector.shape_cast %138 : vector<1x1x4x80xf32> to vector<4x80xf32>
    %c0_255 = arith.constant 0 : index
    %c3_256 = arith.constant 3 : index
    %c0_257 = arith.constant 0 : index
    %c20_258 = arith.constant 20 : index
    %140 = vector.load %arg2[%c0_255, %c3_256, %c0_257, %c20_258] : memref<1x8x4x128xf32, #tpu.memory_space<vmem>>, vector<1x1x4x80xf32>
    %141 = vector.shape_cast %140 : vector<1x1x4x80xf32> to vector<4x80xf32>
    %c0_259 = arith.constant 0 : index
    %c3_260 = arith.constant 3 : index
    %c0_261 = arith.constant 0 : index
    %c21_262 = arith.constant 21 : index
    %142 = vector.load %arg2[%c0_259, %c3_260, %c0_261, %c21_262] : memref<1x8x4x128xf32, #tpu.memory_space<vmem>>, vector<1x1x4x80xf32>
    %143 = vector.shape_cast %142 : vector<1x1x4x80xf32> to vector<4x80xf32>
    %c0_263 = arith.constant 0 : index
    %c3_264 = arith.constant 3 : index
    %c0_265 = arith.constant 0 : index
    %c22_266 = arith.constant 22 : index
    %144 = vector.load %arg2[%c0_263, %c3_264, %c0_265, %c22_266] : memref<1x8x4x128xf32, #tpu.memory_space<vmem>>, vector<1x1x4x80xf32>
    %145 = vector.shape_cast %144 : vector<1x1x4x80xf32> to vector<4x80xf32>
    %c0_267 = arith.constant 0 : index
    %c3_268 = arith.constant 3 : index
    %c0_269 = arith.constant 0 : index
    %c30_270 = arith.constant 30 : index
    %146 = vector.load %arg2[%c0_267, %c3_268, %c0_269, %c30_270] : memref<1x8x4x128xf32, #tpu.memory_space<vmem>>, vector<1x1x4x80xf32>
    %147 = vector.shape_cast %146 : vector<1x1x4x80xf32> to vector<4x80xf32>
    %c0_271 = arith.constant 0 : index
    %c3_272 = arith.constant 3 : index
    %c0_273 = arith.constant 0 : index
    %c31_274 = arith.constant 31 : index
    %148 = vector.load %arg2[%c0_271, %c3_272, %c0_273, %c31_274] : memref<1x8x4x128xf32, #tpu.memory_space<vmem>>, vector<1x1x4x80xf32>
    %149 = vector.shape_cast %148 : vector<1x1x4x80xf32> to vector<4x80xf32>
    %c0_275 = arith.constant 0 : index
    %c3_276 = arith.constant 3 : index
    %c0_277 = arith.constant 0 : index
    %c32_278 = arith.constant 32 : index
    %150 = vector.load %arg2[%c0_275, %c3_276, %c0_277, %c32_278] : memref<1x8x4x128xf32, #tpu.memory_space<vmem>>, vector<1x1x4x80xf32>
    %151 = vector.shape_cast %150 : vector<1x1x4x80xf32> to vector<4x80xf32>
    %c0_279 = arith.constant 0 : index
    %c4 = arith.constant 4 : index
    %c0_280 = arith.constant 0 : index
    %c10_281 = arith.constant 10 : index
    %152 = vector.load %arg2[%c0_279, %c4, %c0_280, %c10_281] : memref<1x8x4x128xf32, #tpu.memory_space<vmem>>, vector<1x1x4x80xf32>
    %153 = vector.shape_cast %152 : vector<1x1x4x80xf32> to vector<4x80xf32>
    %c0_282 = arith.constant 0 : index
    %c4_283 = arith.constant 4 : index
    %c0_284 = arith.constant 0 : index
    %c11_285 = arith.constant 11 : index
    %154 = vector.load %arg2[%c0_282, %c4_283, %c0_284, %c11_285] : memref<1x8x4x128xf32, #tpu.memory_space<vmem>>, vector<1x1x4x80xf32>
    %155 = vector.shape_cast %154 : vector<1x1x4x80xf32> to vector<4x80xf32>
    %c0_286 = arith.constant 0 : index
    %c4_287 = arith.constant 4 : index
    %c0_288 = arith.constant 0 : index
    %c12_289 = arith.constant 12 : index
    %156 = vector.load %arg2[%c0_286, %c4_287, %c0_288, %c12_289] : memref<1x8x4x128xf32, #tpu.memory_space<vmem>>, vector<1x1x4x80xf32>
    %157 = vector.shape_cast %156 : vector<1x1x4x80xf32> to vector<4x80xf32>
    %c0_290 = arith.constant 0 : index
    %c4_291 = arith.constant 4 : index
    %c0_292 = arith.constant 0 : index
    %c20_293 = arith.constant 20 : index
    %158 = vector.load %arg2[%c0_290, %c4_291, %c0_292, %c20_293] : memref<1x8x4x128xf32, #tpu.memory_space<vmem>>, vector<1x1x4x80xf32>
    %159 = vector.shape_cast %158 : vector<1x1x4x80xf32> to vector<4x80xf32>
    %c0_294 = arith.constant 0 : index
    %c4_295 = arith.constant 4 : index
    %c0_296 = arith.constant 0 : index
    %c21_297 = arith.constant 21 : index
    %160 = vector.load %arg2[%c0_294, %c4_295, %c0_296, %c21_297] : memref<1x8x4x128xf32, #tpu.memory_space<vmem>>, vector<1x1x4x80xf32>
    %161 = vector.shape_cast %160 : vector<1x1x4x80xf32> to vector<4x80xf32>
    %c0_298 = arith.constant 0 : index
    %c4_299 = arith.constant 4 : index
    %c0_300 = arith.constant 0 : index
    %c22_301 = arith.constant 22 : index
    %162 = vector.load %arg2[%c0_298, %c4_299, %c0_300, %c22_301] : memref<1x8x4x128xf32, #tpu.memory_space<vmem>>, vector<1x1x4x80xf32>
    %163 = vector.shape_cast %162 : vector<1x1x4x80xf32> to vector<4x80xf32>
    %c0_302 = arith.constant 0 : index
    %c4_303 = arith.constant 4 : index
    %c0_304 = arith.constant 0 : index
    %c30_305 = arith.constant 30 : index
    %164 = vector.load %arg2[%c0_302, %c4_303, %c0_304, %c30_305] : memref<1x8x4x128xf32, #tpu.memory_space<vmem>>, vector<1x1x4x80xf32>
    %165 = vector.shape_cast %164 : vector<1x1x4x80xf32> to vector<4x80xf32>
    %c0_306 = arith.constant 0 : index
    %c4_307 = arith.constant 4 : index
    %c0_308 = arith.constant 0 : index
    %c31_309 = arith.constant 31 : index
    %166 = vector.load %arg2[%c0_306, %c4_307, %c0_308, %c31_309] : memref<1x8x4x128xf32, #tpu.memory_space<vmem>>, vector<1x1x4x80xf32>
    %167 = vector.shape_cast %166 : vector<1x1x4x80xf32> to vector<4x80xf32>
    %c0_310 = arith.constant 0 : index
    %c4_311 = arith.constant 4 : index
    %c0_312 = arith.constant 0 : index
    %c32_313 = arith.constant 32 : index
    %168 = vector.load %arg2[%c0_310, %c4_311, %c0_312, %c32_313] : memref<1x8x4x128xf32, #tpu.memory_space<vmem>>, vector<1x1x4x80xf32>
    %169 = vector.shape_cast %168 : vector<1x1x4x80xf32> to vector<4x80xf32>
    %170 = tpu.concatenate %117, %119, %121, %123, %125, %127, %129, %131, %133, %135, %137, %139, %141, %143, %145, %147 in 0 : vector<4x80xf32>, vector<4x80xf32>, vector<4x80xf32>, vector<4x80xf32>, vector<4x80xf32>, vector<4x80xf32>, vector<4x80xf32>, vector<4x80xf32>, vector<4x80xf32>, vector<4x80xf32>, vector<4x80xf32>, vector<4x80xf32>, vector<4x80xf32>, vector<4x80xf32>, vector<4x80xf32>, vector<4x80xf32> -> vector<64x80xf32>
    %171 = tpu.concatenate %149, %151, %153, %155, %157, %159, %161, %163, %165, %167, %169 in 0 : vector<4x80xf32>, vector<4x80xf32>, vector<4x80xf32>, vector<4x80xf32>, vector<4x80xf32>, vector<4x80xf32>, vector<4x80xf32>, vector<4x80xf32>, vector<4x80xf32>, vector<4x80xf32>, vector<4x80xf32> -> vector<44x80xf32>
    %172 = tpu.concatenate %170, %171 in 0 : vector<64x80xf32>, vector<44x80xf32> -> vector<108x80xf32>
    %c0_314 = arith.constant 0 : index
    %c3_315 = arith.constant 3 : index
    %c0_316 = arith.constant 0 : index
    %c10_317 = arith.constant 10 : index
    %173 = vector.load %arg2[%c0_314, %c3_315, %c0_316, %c10_317] : memref<1x8x4x128xf32, #tpu.memory_space<vmem>>, vector<1x1x4x80xf32>
    %174 = vector.shape_cast %173 : vector<1x1x4x80xf32> to vector<4x80xf32>
    %c0_318 = arith.constant 0 : index
    %c3_319 = arith.constant 3 : index
    %c0_320 = arith.constant 0 : index
    %c11_321 = arith.constant 11 : index
    %175 = vector.load %arg2[%c0_318, %c3_319, %c0_320, %c11_321] : memref<1x8x4x128xf32, #tpu.memory_space<vmem>>, vector<1x1x4x80xf32>
    %176 = vector.shape_cast %175 : vector<1x1x4x80xf32> to vector<4x80xf32>
    %c0_322 = arith.constant 0 : index
    %c3_323 = arith.constant 3 : index
    %c0_324 = arith.constant 0 : index
    %c12_325 = arith.constant 12 : index
    %177 = vector.load %arg2[%c0_322, %c3_323, %c0_324, %c12_325] : memref<1x8x4x128xf32, #tpu.memory_space<vmem>>, vector<1x1x4x80xf32>
    %178 = vector.shape_cast %177 : vector<1x1x4x80xf32> to vector<4x80xf32>
    %c0_326 = arith.constant 0 : index
    %c3_327 = arith.constant 3 : index
    %c0_328 = arith.constant 0 : index
    %c20_329 = arith.constant 20 : index
    %179 = vector.load %arg2[%c0_326, %c3_327, %c0_328, %c20_329] : memref<1x8x4x128xf32, #tpu.memory_space<vmem>>, vector<1x1x4x80xf32>
    %180 = vector.shape_cast %179 : vector<1x1x4x80xf32> to vector<4x80xf32>
    %c0_330 = arith.constant 0 : index
    %c3_331 = arith.constant 3 : index
    %c0_332 = arith.constant 0 : index
    %c21_333 = arith.constant 21 : index
    %181 = vector.load %arg2[%c0_330, %c3_331, %c0_332, %c21_333] : memref<1x8x4x128xf32, #tpu.memory_space<vmem>>, vector<1x1x4x80xf32>
    %182 = vector.shape_cast %181 : vector<1x1x4x80xf32> to vector<4x80xf32>
    %c0_334 = arith.constant 0 : index
    %c3_335 = arith.constant 3 : index
    %c0_336 = arith.constant 0 : index
    %c22_337 = arith.constant 22 : index
    %183 = vector.load %arg2[%c0_334, %c3_335, %c0_336, %c22_337] : memref<1x8x4x128xf32, #tpu.memory_space<vmem>>, vector<1x1x4x80xf32>
    %184 = vector.shape_cast %183 : vector<1x1x4x80xf32> to vector<4x80xf32>
    %c0_338 = arith.constant 0 : index
    %c3_339 = arith.constant 3 : index
    %c0_340 = arith.constant 0 : index
    %c30_341 = arith.constant 30 : index
    %185 = vector.load %arg2[%c0_338, %c3_339, %c0_340, %c30_341] : memref<1x8x4x128xf32, #tpu.memory_space<vmem>>, vector<1x1x4x80xf32>
    %186 = vector.shape_cast %185 : vector<1x1x4x80xf32> to vector<4x80xf32>
    %c0_342 = arith.constant 0 : index
    %c3_343 = arith.constant 3 : index
    %c0_344 = arith.constant 0 : index
    %c31_345 = arith.constant 31 : index
    %187 = vector.load %arg2[%c0_342, %c3_343, %c0_344, %c31_345] : memref<1x8x4x128xf32, #tpu.memory_space<vmem>>, vector<1x1x4x80xf32>
    %188 = vector.shape_cast %187 : vector<1x1x4x80xf32> to vector<4x80xf32>
    %c0_346 = arith.constant 0 : index
    %c3_347 = arith.constant 3 : index
    %c0_348 = arith.constant 0 : index
    %c32_349 = arith.constant 32 : index
    %189 = vector.load %arg2[%c0_346, %c3_347, %c0_348, %c32_349] : memref<1x8x4x128xf32, #tpu.memory_space<vmem>>, vector<1x1x4x80xf32>
    %190 = vector.shape_cast %189 : vector<1x1x4x80xf32> to vector<4x80xf32>
    %c0_350 = arith.constant 0 : index
    %c4_351 = arith.constant 4 : index
    %c0_352 = arith.constant 0 : index
    %c10_353 = arith.constant 10 : index
    %191 = vector.load %arg2[%c0_350, %c4_351, %c0_352, %c10_353] : memref<1x8x4x128xf32, #tpu.memory_space<vmem>>, vector<1x1x4x80xf32>
    %192 = vector.shape_cast %191 : vector<1x1x4x80xf32> to vector<4x80xf32>
    %c0_354 = arith.constant 0 : index
    %c4_355 = arith.constant 4 : index
    %c0_356 = arith.constant 0 : index
    %c11_357 = arith.constant 11 : index
    %193 = vector.load %arg2[%c0_354, %c4_355, %c0_356, %c11_357] : memref<1x8x4x128xf32, #tpu.memory_space<vmem>>, vector<1x1x4x80xf32>
    %194 = vector.shape_cast %193 : vector<1x1x4x80xf32> to vector<4x80xf32>
    %c0_358 = arith.constant 0 : index
    %c4_359 = arith.constant 4 : index
    %c0_360 = arith.constant 0 : index
    %c12_361 = arith.constant 12 : index
    %195 = vector.load %arg2[%c0_358, %c4_359, %c0_360, %c12_361] : memref<1x8x4x128xf32, #tpu.memory_space<vmem>>, vector<1x1x4x80xf32>
    %196 = vector.shape_cast %195 : vector<1x1x4x80xf32> to vector<4x80xf32>
    %c0_362 = arith.constant 0 : index
    %c4_363 = arith.constant 4 : index
    %c0_364 = arith.constant 0 : index
    %c20_365 = arith.constant 20 : index
    %197 = vector.load %arg2[%c0_362, %c4_363, %c0_364, %c20_365] : memref<1x8x4x128xf32, #tpu.memory_space<vmem>>, vector<1x1x4x80xf32>
    %198 = vector.shape_cast %197 : vector<1x1x4x80xf32> to vector<4x80xf32>
    %c0_366 = arith.constant 0 : index
    %c4_367 = arith.constant 4 : index
    %c0_368 = arith.constant 0 : index
    %c21_369 = arith.constant 21 : index
    %199 = vector.load %arg2[%c0_366, %c4_367, %c0_368, %c21_369] : memref<1x8x4x128xf32, #tpu.memory_space<vmem>>, vector<1x1x4x80xf32>
    %200 = vector.shape_cast %199 : vector<1x1x4x80xf32> to vector<4x80xf32>
    %c0_370 = arith.constant 0 : index
    %c4_371 = arith.constant 4 : index
    %c0_372 = arith.constant 0 : index
    %c22_373 = arith.constant 22 : index
    %201 = vector.load %arg2[%c0_370, %c4_371, %c0_372, %c22_373] : memref<1x8x4x128xf32, #tpu.memory_space<vmem>>, vector<1x1x4x80xf32>
    %202 = vector.shape_cast %201 : vector<1x1x4x80xf32> to vector<4x80xf32>
    %c0_374 = arith.constant 0 : index
    %c4_375 = arith.constant 4 : index
    %c0_376 = arith.constant 0 : index
    %c30_377 = arith.constant 30 : index
    %203 = vector.load %arg2[%c0_374, %c4_375, %c0_376, %c30_377] : memref<1x8x4x128xf32, #tpu.memory_space<vmem>>, vector<1x1x4x80xf32>
    %204 = vector.shape_cast %203 : vector<1x1x4x80xf32> to vector<4x80xf32>
    %c0_378 = arith.constant 0 : index
    %c4_379 = arith.constant 4 : index
    %c0_380 = arith.constant 0 : index
    %c31_381 = arith.constant 31 : index
    %205 = vector.load %arg2[%c0_378, %c4_379, %c0_380, %c31_381] : memref<1x8x4x128xf32, #tpu.memory_space<vmem>>, vector<1x1x4x80xf32>
    %206 = vector.shape_cast %205 : vector<1x1x4x80xf32> to vector<4x80xf32>
    %c0_382 = arith.constant 0 : index
    %c4_383 = arith.constant 4 : index
    %c0_384 = arith.constant 0 : index
    %c32_385 = arith.constant 32 : index
    %207 = vector.load %arg2[%c0_382, %c4_383, %c0_384, %c32_385] : memref<1x8x4x128xf32, #tpu.memory_space<vmem>>, vector<1x1x4x80xf32>
    %208 = vector.shape_cast %207 : vector<1x1x4x80xf32> to vector<4x80xf32>
    %c0_386 = arith.constant 0 : index
    %c5 = arith.constant 5 : index
    %c0_387 = arith.constant 0 : index
    %c10_388 = arith.constant 10 : index
    %209 = vector.load %arg2[%c0_386, %c5, %c0_387, %c10_388] : memref<1x8x4x128xf32, #tpu.memory_space<vmem>>, vector<1x1x4x80xf32>
    %210 = vector.shape_cast %209 : vector<1x1x4x80xf32> to vector<4x80xf32>
    %c0_389 = arith.constant 0 : index
    %c5_390 = arith.constant 5 : index
    %c0_391 = arith.constant 0 : index
    %c11_392 = arith.constant 11 : index
    %211 = vector.load %arg2[%c0_389, %c5_390, %c0_391, %c11_392] : memref<1x8x4x128xf32, #tpu.memory_space<vmem>>, vector<1x1x4x80xf32>
    %212 = vector.shape_cast %211 : vector<1x1x4x80xf32> to vector<4x80xf32>
    %c0_393 = arith.constant 0 : index
    %c5_394 = arith.constant 5 : index
    %c0_395 = arith.constant 0 : index
    %c12_396 = arith.constant 12 : index
    %213 = vector.load %arg2[%c0_393, %c5_394, %c0_395, %c12_396] : memref<1x8x4x128xf32, #tpu.memory_space<vmem>>, vector<1x1x4x80xf32>
    %214 = vector.shape_cast %213 : vector<1x1x4x80xf32> to vector<4x80xf32>
    %c0_397 = arith.constant 0 : index
    %c5_398 = arith.constant 5 : index
    %c0_399 = arith.constant 0 : index
    %c20_400 = arith.constant 20 : index
    %215 = vector.load %arg2[%c0_397, %c5_398, %c0_399, %c20_400] : memref<1x8x4x128xf32, #tpu.memory_space<vmem>>, vector<1x1x4x80xf32>
    %216 = vector.shape_cast %215 : vector<1x1x4x80xf32> to vector<4x80xf32>
    %c0_401 = arith.constant 0 : index
    %c5_402 = arith.constant 5 : index
    %c0_403 = arith.constant 0 : index
    %c21_404 = arith.constant 21 : index
    %217 = vector.load %arg2[%c0_401, %c5_402, %c0_403, %c21_404] : memref<1x8x4x128xf32, #tpu.memory_space<vmem>>, vector<1x1x4x80xf32>
    %218 = vector.shape_cast %217 : vector<1x1x4x80xf32> to vector<4x80xf32>
    %c0_405 = arith.constant 0 : index
    %c5_406 = arith.constant 5 : index
    %c0_407 = arith.constant 0 : index
    %c22_408 = arith.constant 22 : index
    %219 = vector.load %arg2[%c0_405, %c5_406, %c0_407, %c22_408] : memref<1x8x4x128xf32, #tpu.memory_space<vmem>>, vector<1x1x4x80xf32>
    %220 = vector.shape_cast %219 : vector<1x1x4x80xf32> to vector<4x80xf32>
    %c0_409 = arith.constant 0 : index
    %c5_410 = arith.constant 5 : index
    %c0_411 = arith.constant 0 : index
    %c30_412 = arith.constant 30 : index
    %221 = vector.load %arg2[%c0_409, %c5_410, %c0_411, %c30_412] : memref<1x8x4x128xf32, #tpu.memory_space<vmem>>, vector<1x1x4x80xf32>
    %222 = vector.shape_cast %221 : vector<1x1x4x80xf32> to vector<4x80xf32>
    %c0_413 = arith.constant 0 : index
    %c5_414 = arith.constant 5 : index
    %c0_415 = arith.constant 0 : index
    %c31_416 = arith.constant 31 : index
    %223 = vector.load %arg2[%c0_413, %c5_414, %c0_415, %c31_416] : memref<1x8x4x128xf32, #tpu.memory_space<vmem>>, vector<1x1x4x80xf32>
    %224 = vector.shape_cast %223 : vector<1x1x4x80xf32> to vector<4x80xf32>
    %c0_417 = arith.constant 0 : index
    %c5_418 = arith.constant 5 : index
    %c0_419 = arith.constant 0 : index
    %c32_420 = arith.constant 32 : index
    %225 = vector.load %arg2[%c0_417, %c5_418, %c0_419, %c32_420] : memref<1x8x4x128xf32, #tpu.memory_space<vmem>>, vector<1x1x4x80xf32>
    %226 = vector.shape_cast %225 : vector<1x1x4x80xf32> to vector<4x80xf32>
    %227 = tpu.concatenate %174, %176, %178, %180, %182, %184, %186, %188, %190, %192, %194, %196, %198, %200, %202, %204 in 0 : vector<4x80xf32>, vector<4x80xf32>, vector<4x80xf32>, vector<4x80xf32>, vector<4x80xf32>, vector<4x80xf32>, vector<4x80xf32>, vector<4x80xf32>, vector<4x80xf32>, vector<4x80xf32>, vector<4x80xf32>, vector<4x80xf32>, vector<4x80xf32>, vector<4x80xf32>, vector<4x80xf32>, vector<4x80xf32> -> vector<64x80xf32>
    %228 = tpu.concatenate %206, %208, %210, %212, %214, %216, %218, %220, %222, %224, %226 in 0 : vector<4x80xf32>, vector<4x80xf32>, vector<4x80xf32>, vector<4x80xf32>, vector<4x80xf32>, vector<4x80xf32>, vector<4x80xf32>, vector<4x80xf32>, vector<4x80xf32>, vector<4x80xf32>, vector<4x80xf32> -> vector<44x80xf32>
    %229 = tpu.concatenate %227, %228 in 0 : vector<64x80xf32>, vector<44x80xf32> -> vector<108x80xf32>
    %c0_421 = arith.constant 0 : index
    %c4_422 = arith.constant 4 : index
    %c0_423 = arith.constant 0 : index
    %c10_424 = arith.constant 10 : index
    %230 = vector.load %arg2[%c0_421, %c4_422, %c0_423, %c10_424] : memref<1x8x4x128xf32, #tpu.memory_space<vmem>>, vector<1x1x4x80xf32>
    %231 = vector.shape_cast %230 : vector<1x1x4x80xf32> to vector<4x80xf32>
    %c0_425 = arith.constant 0 : index
    %c4_426 = arith.constant 4 : index
    %c0_427 = arith.constant 0 : index
    %c11_428 = arith.constant 11 : index
    %232 = vector.load %arg2[%c0_425, %c4_426, %c0_427, %c11_428] : memref<1x8x4x128xf32, #tpu.memory_space<vmem>>, vector<1x1x4x80xf32>
    %233 = vector.shape_cast %232 : vector<1x1x4x80xf32> to vector<4x80xf32>
    %c0_429 = arith.constant 0 : index
    %c4_430 = arith.constant 4 : index
    %c0_431 = arith.constant 0 : index
    %c12_432 = arith.constant 12 : index
    %234 = vector.load %arg2[%c0_429, %c4_430, %c0_431, %c12_432] : memref<1x8x4x128xf32, #tpu.memory_space<vmem>>, vector<1x1x4x80xf32>
    %235 = vector.shape_cast %234 : vector<1x1x4x80xf32> to vector<4x80xf32>
    %c0_433 = arith.constant 0 : index
    %c4_434 = arith.constant 4 : index
    %c0_435 = arith.constant 0 : index
    %c20_436 = arith.constant 20 : index
    %236 = vector.load %arg2[%c0_433, %c4_434, %c0_435, %c20_436] : memref<1x8x4x128xf32, #tpu.memory_space<vmem>>, vector<1x1x4x80xf32>
    %237 = vector.shape_cast %236 : vector<1x1x4x80xf32> to vector<4x80xf32>
    %c0_437 = arith.constant 0 : index
    %c4_438 = arith.constant 4 : index
    %c0_439 = arith.constant 0 : index
    %c21_440 = arith.constant 21 : index
    %238 = vector.load %arg2[%c0_437, %c4_438, %c0_439, %c21_440] : memref<1x8x4x128xf32, #tpu.memory_space<vmem>>, vector<1x1x4x80xf32>
    %239 = vector.shape_cast %238 : vector<1x1x4x80xf32> to vector<4x80xf32>
    %c0_441 = arith.constant 0 : index
    %c4_442 = arith.constant 4 : index
    %c0_443 = arith.constant 0 : index
    %c22_444 = arith.constant 22 : index
    %240 = vector.load %arg2[%c0_441, %c4_442, %c0_443, %c22_444] : memref<1x8x4x128xf32, #tpu.memory_space<vmem>>, vector<1x1x4x80xf32>
    %241 = vector.shape_cast %240 : vector<1x1x4x80xf32> to vector<4x80xf32>
    %c0_445 = arith.constant 0 : index
    %c4_446 = arith.constant 4 : index
    %c0_447 = arith.constant 0 : index
    %c30_448 = arith.constant 30 : index
    %242 = vector.load %arg2[%c0_445, %c4_446, %c0_447, %c30_448] : memref<1x8x4x128xf32, #tpu.memory_space<vmem>>, vector<1x1x4x80xf32>
    %243 = vector.shape_cast %242 : vector<1x1x4x80xf32> to vector<4x80xf32>
    %c0_449 = arith.constant 0 : index
    %c4_450 = arith.constant 4 : index
    %c0_451 = arith.constant 0 : index
    %c31_452 = arith.constant 31 : index
    %244 = vector.load %arg2[%c0_449, %c4_450, %c0_451, %c31_452] : memref<1x8x4x128xf32, #tpu.memory_space<vmem>>, vector<1x1x4x80xf32>
    %245 = vector.shape_cast %244 : vector<1x1x4x80xf32> to vector<4x80xf32>
    %c0_453 = arith.constant 0 : index
    %c4_454 = arith.constant 4 : index
    %c0_455 = arith.constant 0 : index
    %c32_456 = arith.constant 32 : index
    %246 = vector.load %arg2[%c0_453, %c4_454, %c0_455, %c32_456] : memref<1x8x4x128xf32, #tpu.memory_space<vmem>>, vector<1x1x4x80xf32>
    %247 = vector.shape_cast %246 : vector<1x1x4x80xf32> to vector<4x80xf32>
    %c0_457 = arith.constant 0 : index
    %c5_458 = arith.constant 5 : index
    %c0_459 = arith.constant 0 : index
    %c10_460 = arith.constant 10 : index
    %248 = vector.load %arg2[%c0_457, %c5_458, %c0_459, %c10_460] : memref<1x8x4x128xf32, #tpu.memory_space<vmem>>, vector<1x1x4x80xf32>
    %249 = vector.shape_cast %248 : vector<1x1x4x80xf32> to vector<4x80xf32>
    %c0_461 = arith.constant 0 : index
    %c5_462 = arith.constant 5 : index
    %c0_463 = arith.constant 0 : index
    %c11_464 = arith.constant 11 : index
    %250 = vector.load %arg2[%c0_461, %c5_462, %c0_463, %c11_464] : memref<1x8x4x128xf32, #tpu.memory_space<vmem>>, vector<1x1x4x80xf32>
    %251 = vector.shape_cast %250 : vector<1x1x4x80xf32> to vector<4x80xf32>
    %c0_465 = arith.constant 0 : index
    %c5_466 = arith.constant 5 : index
    %c0_467 = arith.constant 0 : index
    %c12_468 = arith.constant 12 : index
    %252 = vector.load %arg2[%c0_465, %c5_466, %c0_467, %c12_468] : memref<1x8x4x128xf32, #tpu.memory_space<vmem>>, vector<1x1x4x80xf32>
    %253 = vector.shape_cast %252 : vector<1x1x4x80xf32> to vector<4x80xf32>
    %c0_469 = arith.constant 0 : index
    %c5_470 = arith.constant 5 : index
    %c0_471 = arith.constant 0 : index
    %c20_472 = arith.constant 20 : index
    %254 = vector.load %arg2[%c0_469, %c5_470, %c0_471, %c20_472] : memref<1x8x4x128xf32, #tpu.memory_space<vmem>>, vector<1x1x4x80xf32>
    %255 = vector.shape_cast %254 : vector<1x1x4x80xf32> to vector<4x80xf32>
    %c0_473 = arith.constant 0 : index
    %c5_474 = arith.constant 5 : index
    %c0_475 = arith.constant 0 : index
    %c21_476 = arith.constant 21 : index
    %256 = vector.load %arg2[%c0_473, %c5_474, %c0_475, %c21_476] : memref<1x8x4x128xf32, #tpu.memory_space<vmem>>, vector<1x1x4x80xf32>
    %257 = vector.shape_cast %256 : vector<1x1x4x80xf32> to vector<4x80xf32>
    %c0_477 = arith.constant 0 : index
    %c5_478 = arith.constant 5 : index
    %c0_479 = arith.constant 0 : index
    %c22_480 = arith.constant 22 : index
    %258 = vector.load %arg2[%c0_477, %c5_478, %c0_479, %c22_480] : memref<1x8x4x128xf32, #tpu.memory_space<vmem>>, vector<1x1x4x80xf32>
    %259 = vector.shape_cast %258 : vector<1x1x4x80xf32> to vector<4x80xf32>
    %c0_481 = arith.constant 0 : index
    %c5_482 = arith.constant 5 : index
    %c0_483 = arith.constant 0 : index
    %c30_484 = arith.constant 30 : index
    %260 = vector.load %arg2[%c0_481, %c5_482, %c0_483, %c30_484] : memref<1x8x4x128xf32, #tpu.memory_space<vmem>>, vector<1x1x4x80xf32>
    %261 = vector.shape_cast %260 : vector<1x1x4x80xf32> to vector<4x80xf32>
    %c0_485 = arith.constant 0 : index
    %c5_486 = arith.constant 5 : index
    %c0_487 = arith.constant 0 : index
    %c31_488 = arith.constant 31 : index
    %262 = vector.load %arg2[%c0_485, %c5_486, %c0_487, %c31_488] : memref<1x8x4x128xf32, #tpu.memory_space<vmem>>, vector<1x1x4x80xf32>
    %263 = vector.shape_cast %262 : vector<1x1x4x80xf32> to vector<4x80xf32>
    %c0_489 = arith.constant 0 : index
    %c5_490 = arith.constant 5 : index
    %c0_491 = arith.constant 0 : index
    %c32_492 = arith.constant 32 : index
    %264 = vector.load %arg2[%c0_489, %c5_490, %c0_491, %c32_492] : memref<1x8x4x128xf32, #tpu.memory_space<vmem>>, vector<1x1x4x80xf32>
    %265 = vector.shape_cast %264 : vector<1x1x4x80xf32> to vector<4x80xf32>
    %c0_493 = arith.constant 0 : index
    %c6 = arith.constant 6 : index
    %c0_494 = arith.constant 0 : index
    %c10_495 = arith.constant 10 : index
    %266 = vector.load %arg2[%c0_493, %c6, %c0_494, %c10_495] : memref<1x8x4x128xf32, #tpu.memory_space<vmem>>, vector<1x1x4x80xf32>
    %267 = vector.shape_cast %266 : vector<1x1x4x80xf32> to vector<4x80xf32>
    %c0_496 = arith.constant 0 : index
    %c6_497 = arith.constant 6 : index
    %c0_498 = arith.constant 0 : index
    %c11_499 = arith.constant 11 : index
    %268 = vector.load %arg2[%c0_496, %c6_497, %c0_498, %c11_499] : memref<1x8x4x128xf32, #tpu.memory_space<vmem>>, vector<1x1x4x80xf32>
    %269 = vector.shape_cast %268 : vector<1x1x4x80xf32> to vector<4x80xf32>
    %c0_500 = arith.constant 0 : index
    %c6_501 = arith.constant 6 : index
    %c0_502 = arith.constant 0 : index
    %c12_503 = arith.constant 12 : index
    %270 = vector.load %arg2[%c0_500, %c6_501, %c0_502, %c12_503] : memref<1x8x4x128xf32, #tpu.memory_space<vmem>>, vector<1x1x4x80xf32>
    %271 = vector.shape_cast %270 : vector<1x1x4x80xf32> to vector<4x80xf32>
    %c0_504 = arith.constant 0 : index
    %c6_505 = arith.constant 6 : index
    %c0_506 = arith.constant 0 : index
    %c20_507 = arith.constant 20 : index
    %272 = vector.load %arg2[%c0_504, %c6_505, %c0_506, %c20_507] : memref<1x8x4x128xf32, #tpu.memory_space<vmem>>, vector<1x1x4x80xf32>
    %273 = vector.shape_cast %272 : vector<1x1x4x80xf32> to vector<4x80xf32>
    %c0_508 = arith.constant 0 : index
    %c6_509 = arith.constant 6 : index
    %c0_510 = arith.constant 0 : index
    %c21_511 = arith.constant 21 : index
    %274 = vector.load %arg2[%c0_508, %c6_509, %c0_510, %c21_511] : memref<1x8x4x128xf32, #tpu.memory_space<vmem>>, vector<1x1x4x80xf32>
    %275 = vector.shape_cast %274 : vector<1x1x4x80xf32> to vector<4x80xf32>
    %c0_512 = arith.constant 0 : index
    %c6_513 = arith.constant 6 : index
    %c0_514 = arith.constant 0 : index
    %c22_515 = arith.constant 22 : index
    %276 = vector.load %arg2[%c0_512, %c6_513, %c0_514, %c22_515] : memref<1x8x4x128xf32, #tpu.memory_space<vmem>>, vector<1x1x4x80xf32>
    %277 = vector.shape_cast %276 : vector<1x1x4x80xf32> to vector<4x80xf32>
    %c0_516 = arith.constant 0 : index
    %c6_517 = arith.constant 6 : index
    %c0_518 = arith.constant 0 : index
    %c30_519 = arith.constant 30 : index
    %278 = vector.load %arg2[%c0_516, %c6_517, %c0_518, %c30_519] : memref<1x8x4x128xf32, #tpu.memory_space<vmem>>, vector<1x1x4x80xf32>
    %279 = vector.shape_cast %278 : vector<1x1x4x80xf32> to vector<4x80xf32>
    %c0_520 = arith.constant 0 : index
    %c6_521 = arith.constant 6 : index
    %c0_522 = arith.constant 0 : index
    %c31_523 = arith.constant 31 : index
    %280 = vector.load %arg2[%c0_520, %c6_521, %c0_522, %c31_523] : memref<1x8x4x128xf32, #tpu.memory_space<vmem>>, vector<1x1x4x80xf32>
    %281 = vector.shape_cast %280 : vector<1x1x4x80xf32> to vector<4x80xf32>
    %c0_524 = arith.constant 0 : index
    %c6_525 = arith.constant 6 : index
    %c0_526 = arith.constant 0 : index
    %c32_527 = arith.constant 32 : index
    %282 = vector.load %arg2[%c0_524, %c6_525, %c0_526, %c32_527] : memref<1x8x4x128xf32, #tpu.memory_space<vmem>>, vector<1x1x4x80xf32>
    %283 = vector.shape_cast %282 : vector<1x1x4x80xf32> to vector<4x80xf32>
    %284 = tpu.concatenate %231, %233, %235, %237, %239, %241, %243, %245, %247, %249, %251, %253, %255, %257, %259, %261 in 0 : vector<4x80xf32>, vector<4x80xf32>, vector<4x80xf32>, vector<4x80xf32>, vector<4x80xf32>, vector<4x80xf32>, vector<4x80xf32>, vector<4x80xf32>, vector<4x80xf32>, vector<4x80xf32>, vector<4x80xf32>, vector<4x80xf32>, vector<4x80xf32>, vector<4x80xf32>, vector<4x80xf32>, vector<4x80xf32> -> vector<64x80xf32>
    %285 = tpu.concatenate %263, %265, %267, %269, %271, %273, %275, %277, %279, %281, %283 in 0 : vector<4x80xf32>, vector<4x80xf32>, vector<4x80xf32>, vector<4x80xf32>, vector<4x80xf32>, vector<4x80xf32>, vector<4x80xf32>, vector<4x80xf32>, vector<4x80xf32>, vector<4x80xf32>, vector<4x80xf32> -> vector<44x80xf32>
    %286 = tpu.concatenate %284, %285 in 0 : vector<64x80xf32>, vector<44x80xf32> -> vector<108x80xf32>
    %c0_528 = arith.constant 0 : index
    %c5_529 = arith.constant 5 : index
    %c0_530 = arith.constant 0 : index
    %c10_531 = arith.constant 10 : index
    %287 = vector.load %arg2[%c0_528, %c5_529, %c0_530, %c10_531] : memref<1x8x4x128xf32, #tpu.memory_space<vmem>>, vector<1x1x4x80xf32>
    %288 = vector.shape_cast %287 : vector<1x1x4x80xf32> to vector<4x80xf32>
    %c0_532 = arith.constant 0 : index
    %c5_533 = arith.constant 5 : index
    %c0_534 = arith.constant 0 : index
    %c11_535 = arith.constant 11 : index
    %289 = vector.load %arg2[%c0_532, %c5_533, %c0_534, %c11_535] : memref<1x8x4x128xf32, #tpu.memory_space<vmem>>, vector<1x1x4x80xf32>
    %290 = vector.shape_cast %289 : vector<1x1x4x80xf32> to vector<4x80xf32>
    %c0_536 = arith.constant 0 : index
    %c5_537 = arith.constant 5 : index
    %c0_538 = arith.constant 0 : index
    %c12_539 = arith.constant 12 : index
    %291 = vector.load %arg2[%c0_536, %c5_537, %c0_538, %c12_539] : memref<1x8x4x128xf32, #tpu.memory_space<vmem>>, vector<1x1x4x80xf32>
    %292 = vector.shape_cast %291 : vector<1x1x4x80xf32> to vector<4x80xf32>
    %c0_540 = arith.constant 0 : index
    %c5_541 = arith.constant 5 : index
    %c0_542 = arith.constant 0 : index
    %c20_543 = arith.constant 20 : index
    %293 = vector.load %arg2[%c0_540, %c5_541, %c0_542, %c20_543] : memref<1x8x4x128xf32, #tpu.memory_space<vmem>>, vector<1x1x4x80xf32>
    %294 = vector.shape_cast %293 : vector<1x1x4x80xf32> to vector<4x80xf32>
    %c0_544 = arith.constant 0 : index
    %c5_545 = arith.constant 5 : index
    %c0_546 = arith.constant 0 : index
    %c21_547 = arith.constant 21 : index
    %295 = vector.load %arg2[%c0_544, %c5_545, %c0_546, %c21_547] : memref<1x8x4x128xf32, #tpu.memory_space<vmem>>, vector<1x1x4x80xf32>
    %296 = vector.shape_cast %295 : vector<1x1x4x80xf32> to vector<4x80xf32>
    %c0_548 = arith.constant 0 : index
    %c5_549 = arith.constant 5 : index
    %c0_550 = arith.constant 0 : index
    %c22_551 = arith.constant 22 : index
    %297 = vector.load %arg2[%c0_548, %c5_549, %c0_550, %c22_551] : memref<1x8x4x128xf32, #tpu.memory_space<vmem>>, vector<1x1x4x80xf32>
    %298 = vector.shape_cast %297 : vector<1x1x4x80xf32> to vector<4x80xf32>
    %c0_552 = arith.constant 0 : index
    %c5_553 = arith.constant 5 : index
    %c0_554 = arith.constant 0 : index
    %c30_555 = arith.constant 30 : index
    %299 = vector.load %arg2[%c0_552, %c5_553, %c0_554, %c30_555] : memref<1x8x4x128xf32, #tpu.memory_space<vmem>>, vector<1x1x4x80xf32>
    %300 = vector.shape_cast %299 : vector<1x1x4x80xf32> to vector<4x80xf32>
    %c0_556 = arith.constant 0 : index
    %c5_557 = arith.constant 5 : index
    %c0_558 = arith.constant 0 : index
    %c31_559 = arith.constant 31 : index
    %301 = vector.load %arg2[%c0_556, %c5_557, %c0_558, %c31_559] : memref<1x8x4x128xf32, #tpu.memory_space<vmem>>, vector<1x1x4x80xf32>
    %302 = vector.shape_cast %301 : vector<1x1x4x80xf32> to vector<4x80xf32>
    %c0_560 = arith.constant 0 : index
    %c5_561 = arith.constant 5 : index
    %c0_562 = arith.constant 0 : index
    %c32_563 = arith.constant 32 : index
    %303 = vector.load %arg2[%c0_560, %c5_561, %c0_562, %c32_563] : memref<1x8x4x128xf32, #tpu.memory_space<vmem>>, vector<1x1x4x80xf32>
    %304 = vector.shape_cast %303 : vector<1x1x4x80xf32> to vector<4x80xf32>
    %c0_564 = arith.constant 0 : index
    %c6_565 = arith.constant 6 : index
    %c0_566 = arith.constant 0 : index
    %c10_567 = arith.constant 10 : index
    %305 = vector.load %arg2[%c0_564, %c6_565, %c0_566, %c10_567] : memref<1x8x4x128xf32, #tpu.memory_space<vmem>>, vector<1x1x4x80xf32>
    %306 = vector.shape_cast %305 : vector<1x1x4x80xf32> to vector<4x80xf32>
    %c0_568 = arith.constant 0 : index
    %c6_569 = arith.constant 6 : index
    %c0_570 = arith.constant 0 : index
    %c11_571 = arith.constant 11 : index
    %307 = vector.load %arg2[%c0_568, %c6_569, %c0_570, %c11_571] : memref<1x8x4x128xf32, #tpu.memory_space<vmem>>, vector<1x1x4x80xf32>
    %308 = vector.shape_cast %307 : vector<1x1x4x80xf32> to vector<4x80xf32>
    %c0_572 = arith.constant 0 : index
    %c6_573 = arith.constant 6 : index
    %c0_574 = arith.constant 0 : index
    %c12_575 = arith.constant 12 : index
    %309 = vector.load %arg2[%c0_572, %c6_573, %c0_574, %c12_575] : memref<1x8x4x128xf32, #tpu.memory_space<vmem>>, vector<1x1x4x80xf32>
    %310 = vector.shape_cast %309 : vector<1x1x4x80xf32> to vector<4x80xf32>
    %c0_576 = arith.constant 0 : index
    %c6_577 = arith.constant 6 : index
    %c0_578 = arith.constant 0 : index
    %c20_579 = arith.constant 20 : index
    %311 = vector.load %arg2[%c0_576, %c6_577, %c0_578, %c20_579] : memref<1x8x4x128xf32, #tpu.memory_space<vmem>>, vector<1x1x4x80xf32>
    %312 = vector.shape_cast %311 : vector<1x1x4x80xf32> to vector<4x80xf32>
    %c0_580 = arith.constant 0 : index
    %c6_581 = arith.constant 6 : index
    %c0_582 = arith.constant 0 : index
    %c21_583 = arith.constant 21 : index
    %313 = vector.load %arg2[%c0_580, %c6_581, %c0_582, %c21_583] : memref<1x8x4x128xf32, #tpu.memory_space<vmem>>, vector<1x1x4x80xf32>
    %314 = vector.shape_cast %313 : vector<1x1x4x80xf32> to vector<4x80xf32>
    %c0_584 = arith.constant 0 : index
    %c6_585 = arith.constant 6 : index
    %c0_586 = arith.constant 0 : index
    %c22_587 = arith.constant 22 : index
    %315 = vector.load %arg2[%c0_584, %c6_585, %c0_586, %c22_587] : memref<1x8x4x128xf32, #tpu.memory_space<vmem>>, vector<1x1x4x80xf32>
    %316 = vector.shape_cast %315 : vector<1x1x4x80xf32> to vector<4x80xf32>
    %c0_588 = arith.constant 0 : index
    %c6_589 = arith.constant 6 : index
    %c0_590 = arith.constant 0 : index
    %c30_591 = arith.constant 30 : index
    %317 = vector.load %arg2[%c0_588, %c6_589, %c0_590, %c30_591] : memref<1x8x4x128xf32, #tpu.memory_space<vmem>>, vector<1x1x4x80xf32>
    %318 = vector.shape_cast %317 : vector<1x1x4x80xf32> to vector<4x80xf32>
    %c0_592 = arith.constant 0 : index
    %c6_593 = arith.constant 6 : index
    %c0_594 = arith.constant 0 : index
    %c31_595 = arith.constant 31 : index
    %319 = vector.load %arg2[%c0_592, %c6_593, %c0_594, %c31_595] : memref<1x8x4x128xf32, #tpu.memory_space<vmem>>, vector<1x1x4x80xf32>
    %320 = vector.shape_cast %319 : vector<1x1x4x80xf32> to vector<4x80xf32>
    %c0_596 = arith.constant 0 : index
    %c6_597 = arith.constant 6 : index
    %c0_598 = arith.constant 0 : index
    %c32_599 = arith.constant 32 : index
    %321 = vector.load %arg2[%c0_596, %c6_597, %c0_598, %c32_599] : memref<1x8x4x128xf32, #tpu.memory_space<vmem>>, vector<1x1x4x80xf32>
    %322 = vector.shape_cast %321 : vector<1x1x4x80xf32> to vector<4x80xf32>
    %c0_600 = arith.constant 0 : index
    %c7 = arith.constant 7 : index
    %c0_601 = arith.constant 0 : index
    %c10_602 = arith.constant 10 : index
    %323 = vector.load %arg2[%c0_600, %c7, %c0_601, %c10_602] : memref<1x8x4x128xf32, #tpu.memory_space<vmem>>, vector<1x1x4x80xf32>
    %324 = vector.shape_cast %323 : vector<1x1x4x80xf32> to vector<4x80xf32>
    %c0_603 = arith.constant 0 : index
    %c7_604 = arith.constant 7 : index
    %c0_605 = arith.constant 0 : index
    %c11_606 = arith.constant 11 : index
    %325 = vector.load %arg2[%c0_603, %c7_604, %c0_605, %c11_606] : memref<1x8x4x128xf32, #tpu.memory_space<vmem>>, vector<1x1x4x80xf32>
    %326 = vector.shape_cast %325 : vector<1x1x4x80xf32> to vector<4x80xf32>
    %c0_607 = arith.constant 0 : index
    %c7_608 = arith.constant 7 : index
    %c0_609 = arith.constant 0 : index
    %c12_610 = arith.constant 12 : index
    %327 = vector.load %arg2[%c0_607, %c7_608, %c0_609, %c12_610] : memref<1x8x4x128xf32, #tpu.memory_space<vmem>>, vector<1x1x4x80xf32>
    %328 = vector.shape_cast %327 : vector<1x1x4x80xf32> to vector<4x80xf32>
    %c0_611 = arith.constant 0 : index
    %c7_612 = arith.constant 7 : index
    %c0_613 = arith.constant 0 : index
    %c20_614 = arith.constant 20 : index
    %329 = vector.load %arg2[%c0_611, %c7_612, %c0_613, %c20_614] : memref<1x8x4x128xf32, #tpu.memory_space<vmem>>, vector<1x1x4x80xf32>
    %330 = vector.shape_cast %329 : vector<1x1x4x80xf32> to vector<4x80xf32>
    %c0_615 = arith.constant 0 : index
    %c7_616 = arith.constant 7 : index
    %c0_617 = arith.constant 0 : index
    %c21_618 = arith.constant 21 : index
    %331 = vector.load %arg2[%c0_615, %c7_616, %c0_617, %c21_618] : memref<1x8x4x128xf32, #tpu.memory_space<vmem>>, vector<1x1x4x80xf32>
    %332 = vector.shape_cast %331 : vector<1x1x4x80xf32> to vector<4x80xf32>
    %c0_619 = arith.constant 0 : index
    %c7_620 = arith.constant 7 : index
    %c0_621 = arith.constant 0 : index
    %c22_622 = arith.constant 22 : index
    %333 = vector.load %arg2[%c0_619, %c7_620, %c0_621, %c22_622] : memref<1x8x4x128xf32, #tpu.memory_space<vmem>>, vector<1x1x4x80xf32>
    %334 = vector.shape_cast %333 : vector<1x1x4x80xf32> to vector<4x80xf32>
    %c0_623 = arith.constant 0 : index
    %c7_624 = arith.constant 7 : index
    %c0_625 = arith.constant 0 : index
    %c30_626 = arith.constant 30 : index
    %335 = vector.load %arg2[%c0_623, %c7_624, %c0_625, %c30_626] : memref<1x8x4x128xf32, #tpu.memory_space<vmem>>, vector<1x1x4x80xf32>
    %336 = vector.shape_cast %335 : vector<1x1x4x80xf32> to vector<4x80xf32>
    %c0_627 = arith.constant 0 : index
    %c7_628 = arith.constant 7 : index
    %c0_629 = arith.constant 0 : index
    %c31_630 = arith.constant 31 : index
    %337 = vector.load %arg2[%c0_627, %c7_628, %c0_629, %c31_630] : memref<1x8x4x128xf32, #tpu.memory_space<vmem>>, vector<1x1x4x80xf32>
    %338 = vector.shape_cast %337 : vector<1x1x4x80xf32> to vector<4x80xf32>
    %c0_631 = arith.constant 0 : index
    %c7_632 = arith.constant 7 : index
    %c0_633 = arith.constant 0 : index
    %c32_634 = arith.constant 32 : index
    %339 = vector.load %arg2[%c0_631, %c7_632, %c0_633, %c32_634] : memref<1x8x4x128xf32, #tpu.memory_space<vmem>>, vector<1x1x4x80xf32>
    %340 = vector.shape_cast %339 : vector<1x1x4x80xf32> to vector<4x80xf32>
    %341 = tpu.concatenate %288, %290, %292, %294, %296, %298, %300, %302, %304, %306, %308, %310, %312, %314, %316, %318 in 0 : vector<4x80xf32>, vector<4x80xf32>, vector<4x80xf32>, vector<4x80xf32>, vector<4x80xf32>, vector<4x80xf32>, vector<4x80xf32>, vector<4x80xf32>, vector<4x80xf32>, vector<4x80xf32>, vector<4x80xf32>, vector<4x80xf32>, vector<4x80xf32>, vector<4x80xf32>, vector<4x80xf32>, vector<4x80xf32> -> vector<64x80xf32>
    %342 = tpu.concatenate %320, %322, %324, %326, %328, %330, %332, %334, %336, %338, %340 in 0 : vector<4x80xf32>, vector<4x80xf32>, vector<4x80xf32>, vector<4x80xf32>, vector<4x80xf32>, vector<4x80xf32>, vector<4x80xf32>, vector<4x80xf32>, vector<4x80xf32>, vector<4x80xf32>, vector<4x80xf32> -> vector<44x80xf32>
    %343 = tpu.concatenate %341, %342 in 0 : vector<64x80xf32>, vector<44x80xf32> -> vector<108x80xf32>
    %c0_635 = arith.constant 0 : index
    %c6_636 = arith.constant 6 : index
    %c0_637 = arith.constant 0 : index
    %c10_638 = arith.constant 10 : index
    %344 = vector.load %arg2[%c0_635, %c6_636, %c0_637, %c10_638] : memref<1x8x4x128xf32, #tpu.memory_space<vmem>>, vector<1x1x4x80xf32>
    %345 = vector.shape_cast %344 : vector<1x1x4x80xf32> to vector<4x80xf32>
    %c0_639 = arith.constant 0 : index
    %c6_640 = arith.constant 6 : index
    %c0_641 = arith.constant 0 : index
    %c11_642 = arith.constant 11 : index
    %346 = vector.load %arg2[%c0_639, %c6_640, %c0_641, %c11_642] : memref<1x8x4x128xf32, #tpu.memory_space<vmem>>, vector<1x1x4x80xf32>
    %347 = vector.shape_cast %346 : vector<1x1x4x80xf32> to vector<4x80xf32>
    %c0_643 = arith.constant 0 : index
    %c6_644 = arith.constant 6 : index
    %c0_645 = arith.constant 0 : index
    %c12_646 = arith.constant 12 : index
    %348 = vector.load %arg2[%c0_643, %c6_644, %c0_645, %c12_646] : memref<1x8x4x128xf32, #tpu.memory_space<vmem>>, vector<1x1x4x80xf32>
    %349 = vector.shape_cast %348 : vector<1x1x4x80xf32> to vector<4x80xf32>
    %c0_647 = arith.constant 0 : index
    %c6_648 = arith.constant 6 : index
    %c0_649 = arith.constant 0 : index
    %c20_650 = arith.constant 20 : index
    %350 = vector.load %arg2[%c0_647, %c6_648, %c0_649, %c20_650] : memref<1x8x4x128xf32, #tpu.memory_space<vmem>>, vector<1x1x4x80xf32>
    %351 = vector.shape_cast %350 : vector<1x1x4x80xf32> to vector<4x80xf32>
    %c0_651 = arith.constant 0 : index
    %c6_652 = arith.constant 6 : index
    %c0_653 = arith.constant 0 : index
    %c21_654 = arith.constant 21 : index
    %352 = vector.load %arg2[%c0_651, %c6_652, %c0_653, %c21_654] : memref<1x8x4x128xf32, #tpu.memory_space<vmem>>, vector<1x1x4x80xf32>
    %353 = vector.shape_cast %352 : vector<1x1x4x80xf32> to vector<4x80xf32>
    %c0_655 = arith.constant 0 : index
    %c6_656 = arith.constant 6 : index
    %c0_657 = arith.constant 0 : index
    %c22_658 = arith.constant 22 : index
    %354 = vector.load %arg2[%c0_655, %c6_656, %c0_657, %c22_658] : memref<1x8x4x128xf32, #tpu.memory_space<vmem>>, vector<1x1x4x80xf32>
    %355 = vector.shape_cast %354 : vector<1x1x4x80xf32> to vector<4x80xf32>
    %c0_659 = arith.constant 0 : index
    %c6_660 = arith.constant 6 : index
    %c0_661 = arith.constant 0 : index
    %c30_662 = arith.constant 30 : index
    %356 = vector.load %arg2[%c0_659, %c6_660, %c0_661, %c30_662] : memref<1x8x4x128xf32, #tpu.memory_space<vmem>>, vector<1x1x4x80xf32>
    %357 = vector.shape_cast %356 : vector<1x1x4x80xf32> to vector<4x80xf32>
    %c0_663 = arith.constant 0 : index
    %c6_664 = arith.constant 6 : index
    %c0_665 = arith.constant 0 : index
    %c31_666 = arith.constant 31 : index
    %358 = vector.load %arg2[%c0_663, %c6_664, %c0_665, %c31_666] : memref<1x8x4x128xf32, #tpu.memory_space<vmem>>, vector<1x1x4x80xf32>
    %359 = vector.shape_cast %358 : vector<1x1x4x80xf32> to vector<4x80xf32>
    %c0_667 = arith.constant 0 : index
    %c6_668 = arith.constant 6 : index
    %c0_669 = arith.constant 0 : index
    %c32_670 = arith.constant 32 : index
    %360 = vector.load %arg2[%c0_667, %c6_668, %c0_669, %c32_670] : memref<1x8x4x128xf32, #tpu.memory_space<vmem>>, vector<1x1x4x80xf32>
    %361 = vector.shape_cast %360 : vector<1x1x4x80xf32> to vector<4x80xf32>
    %c0_671 = arith.constant 0 : index
    %c7_672 = arith.constant 7 : index
    %c0_673 = arith.constant 0 : index
    %c10_674 = arith.constant 10 : index
    %362 = vector.load %arg2[%c0_671, %c7_672, %c0_673, %c10_674] : memref<1x8x4x128xf32, #tpu.memory_space<vmem>>, vector<1x1x4x80xf32>
    %363 = vector.shape_cast %362 : vector<1x1x4x80xf32> to vector<4x80xf32>
    %c0_675 = arith.constant 0 : index
    %c7_676 = arith.constant 7 : index
    %c0_677 = arith.constant 0 : index
    %c11_678 = arith.constant 11 : index
    %364 = vector.load %arg2[%c0_675, %c7_676, %c0_677, %c11_678] : memref<1x8x4x128xf32, #tpu.memory_space<vmem>>, vector<1x1x4x80xf32>
    %365 = vector.shape_cast %364 : vector<1x1x4x80xf32> to vector<4x80xf32>
    %c0_679 = arith.constant 0 : index
    %c7_680 = arith.constant 7 : index
    %c0_681 = arith.constant 0 : index
    %c12_682 = arith.constant 12 : index
    %366 = vector.load %arg2[%c0_679, %c7_680, %c0_681, %c12_682] : memref<1x8x4x128xf32, #tpu.memory_space<vmem>>, vector<1x1x4x80xf32>
    %367 = vector.shape_cast %366 : vector<1x1x4x80xf32> to vector<4x80xf32>
    %c0_683 = arith.constant 0 : index
    %c7_684 = arith.constant 7 : index
    %c0_685 = arith.constant 0 : index
    %c20_686 = arith.constant 20 : index
    %368 = vector.load %arg2[%c0_683, %c7_684, %c0_685, %c20_686] : memref<1x8x4x128xf32, #tpu.memory_space<vmem>>, vector<1x1x4x80xf32>
    %369 = vector.shape_cast %368 : vector<1x1x4x80xf32> to vector<4x80xf32>
    %c0_687 = arith.constant 0 : index
    %c7_688 = arith.constant 7 : index
    %c0_689 = arith.constant 0 : index
    %c21_690 = arith.constant 21 : index
    %370 = vector.load %arg2[%c0_687, %c7_688, %c0_689, %c21_690] : memref<1x8x4x128xf32, #tpu.memory_space<vmem>>, vector<1x1x4x80xf32>
    %371 = vector.shape_cast %370 : vector<1x1x4x80xf32> to vector<4x80xf32>
    %c0_691 = arith.constant 0 : index
    %c7_692 = arith.constant 7 : index
    %c0_693 = arith.constant 0 : index
    %c22_694 = arith.constant 22 : index
    %372 = vector.load %arg2[%c0_691, %c7_692, %c0_693, %c22_694] : memref<1x8x4x128xf32, #tpu.memory_space<vmem>>, vector<1x1x4x80xf32>
    %373 = vector.shape_cast %372 : vector<1x1x4x80xf32> to vector<4x80xf32>
    %c0_695 = arith.constant 0 : index
    %c7_696 = arith.constant 7 : index
    %c0_697 = arith.constant 0 : index
    %c30_698 = arith.constant 30 : index
    %374 = vector.load %arg2[%c0_695, %c7_696, %c0_697, %c30_698] : memref<1x8x4x128xf32, #tpu.memory_space<vmem>>, vector<1x1x4x80xf32>
    %375 = vector.shape_cast %374 : vector<1x1x4x80xf32> to vector<4x80xf32>
    %c0_699 = arith.constant 0 : index
    %c7_700 = arith.constant 7 : index
    %c0_701 = arith.constant 0 : index
    %c31_702 = arith.constant 31 : index
    %376 = vector.load %arg2[%c0_699, %c7_700, %c0_701, %c31_702] : memref<1x8x4x128xf32, #tpu.memory_space<vmem>>, vector<1x1x4x80xf32>
    %377 = vector.shape_cast %376 : vector<1x1x4x80xf32> to vector<4x80xf32>
    %c0_703 = arith.constant 0 : index
    %c7_704 = arith.constant 7 : index
    %c0_705 = arith.constant 0 : index
    %c32_706 = arith.constant 32 : index
    %378 = vector.load %arg2[%c0_703, %c7_704, %c0_705, %c32_706] : memref<1x8x4x128xf32, #tpu.memory_space<vmem>>, vector<1x1x4x80xf32>
    %379 = vector.shape_cast %378 : vector<1x1x4x80xf32> to vector<4x80xf32>
    %c0_707 = arith.constant 0 : index
    %c0_708 = arith.constant 0 : index
    %c0_709 = arith.constant 0 : index
    %c10_710 = arith.constant 10 : index
    %380 = vector.load %arg3[%c0_707, %c0_708, %c0_709, %c10_710] : memref<1x2x4x128xf32, #tpu.memory_space<vmem>>, vector<1x1x4x80xf32>
    %381 = vector.shape_cast %380 : vector<1x1x4x80xf32> to vector<4x80xf32>
    %c0_711 = arith.constant 0 : index
    %c0_712 = arith.constant 0 : index
    %c0_713 = arith.constant 0 : index
    %c11_714 = arith.constant 11 : index
    %382 = vector.load %arg3[%c0_711, %c0_712, %c0_713, %c11_714] : memref<1x2x4x128xf32, #tpu.memory_space<vmem>>, vector<1x1x4x80xf32>
    %383 = vector.shape_cast %382 : vector<1x1x4x80xf32> to vector<4x80xf32>
    %c0_715 = arith.constant 0 : index
    %c0_716 = arith.constant 0 : index
    %c0_717 = arith.constant 0 : index
    %c12_718 = arith.constant 12 : index
    %384 = vector.load %arg3[%c0_715, %c0_716, %c0_717, %c12_718] : memref<1x2x4x128xf32, #tpu.memory_space<vmem>>, vector<1x1x4x80xf32>
    %385 = vector.shape_cast %384 : vector<1x1x4x80xf32> to vector<4x80xf32>
    %c0_719 = arith.constant 0 : index
    %c0_720 = arith.constant 0 : index
    %c0_721 = arith.constant 0 : index
    %c20_722 = arith.constant 20 : index
    %386 = vector.load %arg3[%c0_719, %c0_720, %c0_721, %c20_722] : memref<1x2x4x128xf32, #tpu.memory_space<vmem>>, vector<1x1x4x80xf32>
    %387 = vector.shape_cast %386 : vector<1x1x4x80xf32> to vector<4x80xf32>
    %c0_723 = arith.constant 0 : index
    %c0_724 = arith.constant 0 : index
    %c0_725 = arith.constant 0 : index
    %c21_726 = arith.constant 21 : index
    %388 = vector.load %arg3[%c0_723, %c0_724, %c0_725, %c21_726] : memref<1x2x4x128xf32, #tpu.memory_space<vmem>>, vector<1x1x4x80xf32>
    %389 = vector.shape_cast %388 : vector<1x1x4x80xf32> to vector<4x80xf32>
    %c0_727 = arith.constant 0 : index
    %c0_728 = arith.constant 0 : index
    %c0_729 = arith.constant 0 : index
    %c22_730 = arith.constant 22 : index
    %390 = vector.load %arg3[%c0_727, %c0_728, %c0_729, %c22_730] : memref<1x2x4x128xf32, #tpu.memory_space<vmem>>, vector<1x1x4x80xf32>
    %391 = vector.shape_cast %390 : vector<1x1x4x80xf32> to vector<4x80xf32>
    %c0_731 = arith.constant 0 : index
    %c0_732 = arith.constant 0 : index
    %c0_733 = arith.constant 0 : index
    %c30_734 = arith.constant 30 : index
    %392 = vector.load %arg3[%c0_731, %c0_732, %c0_733, %c30_734] : memref<1x2x4x128xf32, #tpu.memory_space<vmem>>, vector<1x1x4x80xf32>
    %393 = vector.shape_cast %392 : vector<1x1x4x80xf32> to vector<4x80xf32>
    %c0_735 = arith.constant 0 : index
    %c0_736 = arith.constant 0 : index
    %c0_737 = arith.constant 0 : index
    %c31_738 = arith.constant 31 : index
    %394 = vector.load %arg3[%c0_735, %c0_736, %c0_737, %c31_738] : memref<1x2x4x128xf32, #tpu.memory_space<vmem>>, vector<1x1x4x80xf32>
    %395 = vector.shape_cast %394 : vector<1x1x4x80xf32> to vector<4x80xf32>
    %c0_739 = arith.constant 0 : index
    %c0_740 = arith.constant 0 : index
    %c0_741 = arith.constant 0 : index
    %c32_742 = arith.constant 32 : index
    %396 = vector.load %arg3[%c0_739, %c0_740, %c0_741, %c32_742] : memref<1x2x4x128xf32, #tpu.memory_space<vmem>>, vector<1x1x4x80xf32>
    %397 = vector.shape_cast %396 : vector<1x1x4x80xf32> to vector<4x80xf32>
    %398 = tpu.concatenate %345, %347, %349, %351, %353, %355, %357, %359, %361, %363, %365, %367, %369, %371, %373, %375 in 0 : vector<4x80xf32>, vector<4x80xf32>, vector<4x80xf32>, vector<4x80xf32>, vector<4x80xf32>, vector<4x80xf32>, vector<4x80xf32>, vector<4x80xf32>, vector<4x80xf32>, vector<4x80xf32>, vector<4x80xf32>, vector<4x80xf32>, vector<4x80xf32>, vector<4x80xf32>, vector<4x80xf32>, vector<4x80xf32> -> vector<64x80xf32>
    %399 = tpu.concatenate %377, %379, %381, %383, %385, %387, %389, %391, %393, %395, %397 in 0 : vector<4x80xf32>, vector<4x80xf32>, vector<4x80xf32>, vector<4x80xf32>, vector<4x80xf32>, vector<4x80xf32>, vector<4x80xf32>, vector<4x80xf32>, vector<4x80xf32>, vector<4x80xf32>, vector<4x80xf32> -> vector<44x80xf32>
    %400 = tpu.concatenate %398, %399 in 0 : vector<64x80xf32>, vector<44x80xf32> -> vector<108x80xf32>
    %c0_743 = arith.constant 0 : index
    %c7_744 = arith.constant 7 : index
    %c0_745 = arith.constant 0 : index
    %c10_746 = arith.constant 10 : index
    %401 = vector.load %arg2[%c0_743, %c7_744, %c0_745, %c10_746] : memref<1x8x4x128xf32, #tpu.memory_space<vmem>>, vector<1x1x4x80xf32>
    %402 = vector.shape_cast %401 : vector<1x1x4x80xf32> to vector<4x80xf32>
    %c0_747 = arith.constant 0 : index
    %c7_748 = arith.constant 7 : index
    %c0_749 = arith.constant 0 : index
    %c11_750 = arith.constant 11 : index
    %403 = vector.load %arg2[%c0_747, %c7_748, %c0_749, %c11_750] : memref<1x8x4x128xf32, #tpu.memory_space<vmem>>, vector<1x1x4x80xf32>
    %404 = vector.shape_cast %403 : vector<1x1x4x80xf32> to vector<4x80xf32>
    %c0_751 = arith.constant 0 : index
    %c7_752 = arith.constant 7 : index
    %c0_753 = arith.constant 0 : index
    %c12_754 = arith.constant 12 : index
    %405 = vector.load %arg2[%c0_751, %c7_752, %c0_753, %c12_754] : memref<1x8x4x128xf32, #tpu.memory_space<vmem>>, vector<1x1x4x80xf32>
    %406 = vector.shape_cast %405 : vector<1x1x4x80xf32> to vector<4x80xf32>
    %c0_755 = arith.constant 0 : index
    %c7_756 = arith.constant 7 : index
    %c0_757 = arith.constant 0 : index
    %c20_758 = arith.constant 20 : index
    %407 = vector.load %arg2[%c0_755, %c7_756, %c0_757, %c20_758] : memref<1x8x4x128xf32, #tpu.memory_space<vmem>>, vector<1x1x4x80xf32>
    %408 = vector.shape_cast %407 : vector<1x1x4x80xf32> to vector<4x80xf32>
    %c0_759 = arith.constant 0 : index
    %c7_760 = arith.constant 7 : index
    %c0_761 = arith.constant 0 : index
    %c21_762 = arith.constant 21 : index
    %409 = vector.load %arg2[%c0_759, %c7_760, %c0_761, %c21_762] : memref<1x8x4x128xf32, #tpu.memory_space<vmem>>, vector<1x1x4x80xf32>
    %410 = vector.shape_cast %409 : vector<1x1x4x80xf32> to vector<4x80xf32>
    %c0_763 = arith.constant 0 : index
    %c7_764 = arith.constant 7 : index
    %c0_765 = arith.constant 0 : index
    %c22_766 = arith.constant 22 : index
    %411 = vector.load %arg2[%c0_763, %c7_764, %c0_765, %c22_766] : memref<1x8x4x128xf32, #tpu.memory_space<vmem>>, vector<1x1x4x80xf32>
    %412 = vector.shape_cast %411 : vector<1x1x4x80xf32> to vector<4x80xf32>
    %c0_767 = arith.constant 0 : index
    %c7_768 = arith.constant 7 : index
    %c0_769 = arith.constant 0 : index
    %c30_770 = arith.constant 30 : index
    %413 = vector.load %arg2[%c0_767, %c7_768, %c0_769, %c30_770] : memref<1x8x4x128xf32, #tpu.memory_space<vmem>>, vector<1x1x4x80xf32>
    %414 = vector.shape_cast %413 : vector<1x1x4x80xf32> to vector<4x80xf32>
    %c0_771 = arith.constant 0 : index
    %c7_772 = arith.constant 7 : index
    %c0_773 = arith.constant 0 : index
    %c31_774 = arith.constant 31 : index
    %415 = vector.load %arg2[%c0_771, %c7_772, %c0_773, %c31_774] : memref<1x8x4x128xf32, #tpu.memory_space<vmem>>, vector<1x1x4x80xf32>
    %416 = vector.shape_cast %415 : vector<1x1x4x80xf32> to vector<4x80xf32>
    %c0_775 = arith.constant 0 : index
    %c7_776 = arith.constant 7 : index
    %c0_777 = arith.constant 0 : index
    %c32_778 = arith.constant 32 : index
    %417 = vector.load %arg2[%c0_775, %c7_776, %c0_777, %c32_778] : memref<1x8x4x128xf32, #tpu.memory_space<vmem>>, vector<1x1x4x80xf32>
    %418 = vector.shape_cast %417 : vector<1x1x4x80xf32> to vector<4x80xf32>
    %c0_779 = arith.constant 0 : index
    %c0_780 = arith.constant 0 : index
    %c0_781 = arith.constant 0 : index
    %c10_782 = arith.constant 10 : index
    %419 = vector.load %arg3[%c0_779, %c0_780, %c0_781, %c10_782] : memref<1x2x4x128xf32, #tpu.memory_space<vmem>>, vector<1x1x4x80xf32>
    %420 = vector.shape_cast %419 : vector<1x1x4x80xf32> to vector<4x80xf32>
    %c0_783 = arith.constant 0 : index
    %c0_784 = arith.constant 0 : index
    %c0_785 = arith.constant 0 : index
    %c11_786 = arith.constant 11 : index
    %421 = vector.load %arg3[%c0_783, %c0_784, %c0_785, %c11_786] : memref<1x2x4x128xf32, #tpu.memory_space<vmem>>, vector<1x1x4x80xf32>
    %422 = vector.shape_cast %421 : vector<1x1x4x80xf32> to vector<4x80xf32>
    %c0_787 = arith.constant 0 : index
    %c0_788 = arith.constant 0 : index
    %c0_789 = arith.constant 0 : index
    %c12_790 = arith.constant 12 : index
    %423 = vector.load %arg3[%c0_787, %c0_788, %c0_789, %c12_790] : memref<1x2x4x128xf32, #tpu.memory_space<vmem>>, vector<1x1x4x80xf32>
    %424 = vector.shape_cast %423 : vector<1x1x4x80xf32> to vector<4x80xf32>
    %c0_791 = arith.constant 0 : index
    %c0_792 = arith.constant 0 : index
    %c0_793 = arith.constant 0 : index
    %c20_794 = arith.constant 20 : index
    %425 = vector.load %arg3[%c0_791, %c0_792, %c0_793, %c20_794] : memref<1x2x4x128xf32, #tpu.memory_space<vmem>>, vector<1x1x4x80xf32>
    %426 = vector.shape_cast %425 : vector<1x1x4x80xf32> to vector<4x80xf32>
    %c0_795 = arith.constant 0 : index
    %c0_796 = arith.constant 0 : index
    %c0_797 = arith.constant 0 : index
    %c21_798 = arith.constant 21 : index
    %427 = vector.load %arg3[%c0_795, %c0_796, %c0_797, %c21_798] : memref<1x2x4x128xf32, #tpu.memory_space<vmem>>, vector<1x1x4x80xf32>
    %428 = vector.shape_cast %427 : vector<1x1x4x80xf32> to vector<4x80xf32>
    %c0_799 = arith.constant 0 : index
    %c0_800 = arith.constant 0 : index
    %c0_801 = arith.constant 0 : index
    %c22_802 = arith.constant 22 : index
    %429 = vector.load %arg3[%c0_799, %c0_800, %c0_801, %c22_802] : memref<1x2x4x128xf32, #tpu.memory_space<vmem>>, vector<1x1x4x80xf32>
    %430 = vector.shape_cast %429 : vector<1x1x4x80xf32> to vector<4x80xf32>
    %c0_803 = arith.constant 0 : index
    %c0_804 = arith.constant 0 : index
    %c0_805 = arith.constant 0 : index
    %c30_806 = arith.constant 30 : index
    %431 = vector.load %arg3[%c0_803, %c0_804, %c0_805, %c30_806] : memref<1x2x4x128xf32, #tpu.memory_space<vmem>>, vector<1x1x4x80xf32>
    %432 = vector.shape_cast %431 : vector<1x1x4x80xf32> to vector<4x80xf32>
    %c0_807 = arith.constant 0 : index
    %c0_808 = arith.constant 0 : index
    %c0_809 = arith.constant 0 : index
    %c31_810 = arith.constant 31 : index
    %433 = vector.load %arg3[%c0_807, %c0_808, %c0_809, %c31_810] : memref<1x2x4x128xf32, #tpu.memory_space<vmem>>, vector<1x1x4x80xf32>
    %434 = vector.shape_cast %433 : vector<1x1x4x80xf32> to vector<4x80xf32>
    %c0_811 = arith.constant 0 : index
    %c0_812 = arith.constant 0 : index
    %c0_813 = arith.constant 0 : index
    %c32_814 = arith.constant 32 : index
    %435 = vector.load %arg3[%c0_811, %c0_812, %c0_813, %c32_814] : memref<1x2x4x128xf32, #tpu.memory_space<vmem>>, vector<1x1x4x80xf32>
    %436 = vector.shape_cast %435 : vector<1x1x4x80xf32> to vector<4x80xf32>
    %c0_815 = arith.constant 0 : index
    %c1_816 = arith.constant 1 : index
    %c0_817 = arith.constant 0 : index
    %c10_818 = arith.constant 10 : index
    %437 = vector.load %arg3[%c0_815, %c1_816, %c0_817, %c10_818] : memref<1x2x4x128xf32, #tpu.memory_space<vmem>>, vector<1x1x4x80xf32>
    %438 = vector.shape_cast %437 : vector<1x1x4x80xf32> to vector<4x80xf32>
    %c0_819 = arith.constant 0 : index
    %c1_820 = arith.constant 1 : index
    %c0_821 = arith.constant 0 : index
    %c11_822 = arith.constant 11 : index
    %439 = vector.load %arg3[%c0_819, %c1_820, %c0_821, %c11_822] : memref<1x2x4x128xf32, #tpu.memory_space<vmem>>, vector<1x1x4x80xf32>
    %440 = vector.shape_cast %439 : vector<1x1x4x80xf32> to vector<4x80xf32>
    %c0_823 = arith.constant 0 : index
    %c1_824 = arith.constant 1 : index
    %c0_825 = arith.constant 0 : index
    %c12_826 = arith.constant 12 : index
    %441 = vector.load %arg3[%c0_823, %c1_824, %c0_825, %c12_826] : memref<1x2x4x128xf32, #tpu.memory_space<vmem>>, vector<1x1x4x80xf32>
    %442 = vector.shape_cast %441 : vector<1x1x4x80xf32> to vector<4x80xf32>
    %c0_827 = arith.constant 0 : index
    %c1_828 = arith.constant 1 : index
    %c0_829 = arith.constant 0 : index
    %c20_830 = arith.constant 20 : index
    %443 = vector.load %arg3[%c0_827, %c1_828, %c0_829, %c20_830] : memref<1x2x4x128xf32, #tpu.memory_space<vmem>>, vector<1x1x4x80xf32>
    %444 = vector.shape_cast %443 : vector<1x1x4x80xf32> to vector<4x80xf32>
    %c0_831 = arith.constant 0 : index
    %c1_832 = arith.constant 1 : index
    %c0_833 = arith.constant 0 : index
    %c21_834 = arith.constant 21 : index
    %445 = vector.load %arg3[%c0_831, %c1_832, %c0_833, %c21_834] : memref<1x2x4x128xf32, #tpu.memory_space<vmem>>, vector<1x1x4x80xf32>
    %446 = vector.shape_cast %445 : vector<1x1x4x80xf32> to vector<4x80xf32>
    %c0_835 = arith.constant 0 : index
    %c1_836 = arith.constant 1 : index
    %c0_837 = arith.constant 0 : index
    %c22_838 = arith.constant 22 : index
    %447 = vector.load %arg3[%c0_835, %c1_836, %c0_837, %c22_838] : memref<1x2x4x128xf32, #tpu.memory_space<vmem>>, vector<1x1x4x80xf32>
    %448 = vector.shape_cast %447 : vector<1x1x4x80xf32> to vector<4x80xf32>
    %c0_839 = arith.constant 0 : index
    %c1_840 = arith.constant 1 : index
    %c0_841 = arith.constant 0 : index
    %c30_842 = arith.constant 30 : index
    %449 = vector.load %arg3[%c0_839, %c1_840, %c0_841, %c30_842] : memref<1x2x4x128xf32, #tpu.memory_space<vmem>>, vector<1x1x4x80xf32>
    %450 = vector.shape_cast %449 : vector<1x1x4x80xf32> to vector<4x80xf32>
    %c0_843 = arith.constant 0 : index
    %c1_844 = arith.constant 1 : index
    %c0_845 = arith.constant 0 : index
    %c31_846 = arith.constant 31 : index
    %451 = vector.load %arg3[%c0_843, %c1_844, %c0_845, %c31_846] : memref<1x2x4x128xf32, #tpu.memory_space<vmem>>, vector<1x1x4x80xf32>
    %452 = vector.shape_cast %451 : vector<1x1x4x80xf32> to vector<4x80xf32>
    %c0_847 = arith.constant 0 : index
    %c1_848 = arith.constant 1 : index
    %c0_849 = arith.constant 0 : index
    %c32_850 = arith.constant 32 : index
    %453 = vector.load %arg3[%c0_847, %c1_848, %c0_849, %c32_850] : memref<1x2x4x128xf32, #tpu.memory_space<vmem>>, vector<1x1x4x80xf32>
    %454 = vector.shape_cast %453 : vector<1x1x4x80xf32> to vector<4x80xf32>
    %455 = tpu.concatenate %402, %404, %406, %408, %410, %412, %414, %416, %418, %420, %422, %424, %426, %428, %430, %432 in 0 : vector<4x80xf32>, vector<4x80xf32>, vector<4x80xf32>, vector<4x80xf32>, vector<4x80xf32>, vector<4x80xf32>, vector<4x80xf32>, vector<4x80xf32>, vector<4x80xf32>, vector<4x80xf32>, vector<4x80xf32>, vector<4x80xf32>, vector<4x80xf32>, vector<4x80xf32>, vector<4x80xf32>, vector<4x80xf32> -> vector<64x80xf32>
    %456 = tpu.concatenate %434, %436, %438, %440, %442, %444, %446, %448, %450, %452, %454 in 0 : vector<4x80xf32>, vector<4x80xf32>, vector<4x80xf32>, vector<4x80xf32>, vector<4x80xf32>, vector<4x80xf32>, vector<4x80xf32>, vector<4x80xf32>, vector<4x80xf32>, vector<4x80xf32>, vector<4x80xf32> -> vector<44x80xf32>
    %457 = tpu.concatenate %455, %456 in 0 : vector<64x80xf32>, vector<44x80xf32> -> vector<108x80xf32>
    %458 = tpu.concatenate %58, %115, %172, %229, %286, %343, %400, %457 in 1 : vector<108x80xf32>, vector<108x80xf32>, vector<108x80xf32>, vector<108x80xf32>, vector<108x80xf32>, vector<108x80xf32>, vector<108x80xf32>, vector<108x80xf32> -> vector<108x640xf32>
    %cst = arith.constant dense<0.000000e+00> : vector<4x640xf32>
    %459 = tpu.matmul %0, %458, %cst {dimension_numbers = #tpu.dot_dimension_numbers<[1], [0], [0], [1], [0, 0, 1, 1], [], []>} : vector<4x108xf32>, vector<108x640xf32>, vector<4x640xf32> -> vector<4x640xf32>
    %460 = vector.broadcast %1 : vector<4x1xf32> to vector<4x640xf32>
    %461 = arith.addf %459, %460 : vector<4x640xf32>
    %462 = vector.extract_strided_slice %461 {offsets = [0, 0], sizes = [4, 80], strides = [1, 1]} : vector<4x640xf32> to vector<4x80xf32>
    %463 = vector.extract_strided_slice %462 {offsets = [0, 1], sizes = [4, 8], strides = [1, 1]} : vector<4x80xf32> to vector<4x8xf32>
    %464 = vector.extract_strided_slice %462 {offsets = [0, 11], sizes = [4, 8], strides = [1, 1]} : vector<4x80xf32> to vector<4x8xf32>
    %465 = vector.extract_strided_slice %462 {offsets = [0, 21], sizes = [4, 8], strides = [1, 1]} : vector<4x80xf32> to vector<4x8xf32>
    %466 = vector.extract_strided_slice %462 {offsets = [0, 31], sizes = [4, 8], strides = [1, 1]} : vector<4x80xf32> to vector<4x8xf32>
    %467 = vector.extract_strided_slice %462 {offsets = [0, 41], sizes = [4, 8], strides = [1, 1]} : vector<4x80xf32> to vector<4x8xf32>
    %468 = vector.extract_strided_slice %462 {offsets = [0, 51], sizes = [4, 8], strides = [1, 1]} : vector<4x80xf32> to vector<4x8xf32>
    %469 = vector.extract_strided_slice %462 {offsets = [0, 61], sizes = [4, 8], strides = [1, 1]} : vector<4x80xf32> to vector<4x8xf32>
    %470 = vector.extract_strided_slice %462 {offsets = [0, 71], sizes = [4, 8], strides = [1, 1]} : vector<4x80xf32> to vector<4x8xf32>
    %471 = tpu.concatenate %463, %464, %465, %466, %467, %468, %469, %470 in 1 : vector<4x8xf32>, vector<4x8xf32>, vector<4x8xf32>, vector<4x8xf32>, vector<4x8xf32>, vector<4x8xf32>, vector<4x8xf32>, vector<4x8xf32> -> vector<4x64xf32>
    %c0_851 = arith.constant 0 : index
    %c0_852 = arith.constant 0 : index
    %c0_853 = arith.constant 0 : index
    %472 = vector.load %arg4[%c0_851, %c0_852, %c0_853] : memref<1x4x512xf32, #tpu.memory_space<vmem>>, vector<1x4x64xf32>
    %473 = vector.shape_cast %472 : vector<1x4x64xf32> to vector<4x64xf32>
    %cst_854 = arith.constant 1.000000e+00 : f32
    %474 = vector.broadcast %cst_854 : f32 to vector<4x64xf32>
    %475 = arith.mulf %471, %474 : vector<4x64xf32>
    %476 = arith.addf %475, %473 : vector<4x64xf32>
    %477 = vector.extract_strided_slice %461 {offsets = [0, 80], sizes = [4, 80], strides = [1, 1]} : vector<4x640xf32> to vector<4x80xf32>
    %478 = vector.extract_strided_slice %477 {offsets = [0, 1], sizes = [4, 8], strides = [1, 1]} : vector<4x80xf32> to vector<4x8xf32>
    %479 = vector.extract_strided_slice %477 {offsets = [0, 11], sizes = [4, 8], strides = [1, 1]} : vector<4x80xf32> to vector<4x8xf32>
    %480 = vector.extract_strided_slice %477 {offsets = [0, 21], sizes = [4, 8], strides = [1, 1]} : vector<4x80xf32> to vector<4x8xf32>
    %481 = vector.extract_strided_slice %477 {offsets = [0, 31], sizes = [4, 8], strides = [1, 1]} : vector<4x80xf32> to vector<4x8xf32>
    %482 = vector.extract_strided_slice %477 {offsets = [0, 41], sizes = [4, 8], strides = [1, 1]} : vector<4x80xf32> to vector<4x8xf32>
    %483 = vector.extract_strided_slice %477 {offsets = [0, 51], sizes = [4, 8], strides = [1, 1]} : vector<4x80xf32> to vector<4x8xf32>
    %484 = vector.extract_strided_slice %477 {offsets = [0, 61], sizes = [4, 8], strides = [1, 1]} : vector<4x80xf32> to vector<4x8xf32>
    %485 = vector.extract_strided_slice %477 {offsets = [0, 71], sizes = [4, 8], strides = [1, 1]} : vector<4x80xf32> to vector<4x8xf32>
    %486 = tpu.concatenate %478, %479, %480, %481, %482, %483, %484, %485 in 1 : vector<4x8xf32>, vector<4x8xf32>, vector<4x8xf32>, vector<4x8xf32>, vector<4x8xf32>, vector<4x8xf32>, vector<4x8xf32>, vector<4x8xf32> -> vector<4x64xf32>
    %c0_855 = arith.constant 0 : index
    %c0_856 = arith.constant 0 : index
    %c64 = arith.constant 64 : index
    %487 = vector.load %arg4[%c0_855, %c0_856, %c64] : memref<1x4x512xf32, #tpu.memory_space<vmem>>, vector<1x4x64xf32>
    %488 = vector.shape_cast %487 : vector<1x4x64xf32> to vector<4x64xf32>
    %cst_857 = arith.constant 1.000000e+00 : f32
    %489 = vector.broadcast %cst_857 : f32 to vector<4x64xf32>
    %490 = arith.mulf %486, %489 : vector<4x64xf32>
    %491 = arith.addf %490, %488 : vector<4x64xf32>
    %492 = vector.extract_strided_slice %461 {offsets = [0, 160], sizes = [4, 80], strides = [1, 1]} : vector<4x640xf32> to vector<4x80xf32>
    %493 = vector.extract_strided_slice %492 {offsets = [0, 1], sizes = [4, 8], strides = [1, 1]} : vector<4x80xf32> to vector<4x8xf32>
    %494 = vector.extract_strided_slice %492 {offsets = [0, 11], sizes = [4, 8], strides = [1, 1]} : vector<4x80xf32> to vector<4x8xf32>
    %495 = vector.extract_strided_slice %492 {offsets = [0, 21], sizes = [4, 8], strides = [1, 1]} : vector<4x80xf32> to vector<4x8xf32>
    %496 = vector.extract_strided_slice %492 {offsets = [0, 31], sizes = [4, 8], strides = [1, 1]} : vector<4x80xf32> to vector<4x8xf32>
    %497 = vector.extract_strided_slice %492 {offsets = [0, 41], sizes = [4, 8], strides = [1, 1]} : vector<4x80xf32> to vector<4x8xf32>
    %498 = vector.extract_strided_slice %492 {offsets = [0, 51], sizes = [4, 8], strides = [1, 1]} : vector<4x80xf32> to vector<4x8xf32>
    %499 = vector.extract_strided_slice %492 {offsets = [0, 61], sizes = [4, 8], strides = [1, 1]} : vector<4x80xf32> to vector<4x8xf32>
    %500 = vector.extract_strided_slice %492 {offsets = [0, 71], sizes = [4, 8], strides = [1, 1]} : vector<4x80xf32> to vector<4x8xf32>
    %501 = tpu.concatenate %493, %494, %495, %496, %497, %498, %499, %500 in 1 : vector<4x8xf32>, vector<4x8xf32>, vector<4x8xf32>, vector<4x8xf32>, vector<4x8xf32>, vector<4x8xf32>, vector<4x8xf32>, vector<4x8xf32> -> vector<4x64xf32>
    %c0_858 = arith.constant 0 : index
    %c0_859 = arith.constant 0 : index
    %c128 = arith.constant 128 : index
    %502 = vector.load %arg4[%c0_858, %c0_859, %c128] : memref<1x4x512xf32, #tpu.memory_space<vmem>>, vector<1x4x64xf32>
    %503 = vector.shape_cast %502 : vector<1x4x64xf32> to vector<4x64xf32>
    %cst_860 = arith.constant 1.000000e+00 : f32
    %504 = vector.broadcast %cst_860 : f32 to vector<4x64xf32>
    %505 = arith.mulf %501, %504 : vector<4x64xf32>
    %506 = arith.addf %505, %503 : vector<4x64xf32>
    %507 = vector.extract_strided_slice %461 {offsets = [0, 240], sizes = [4, 80], strides = [1, 1]} : vector<4x640xf32> to vector<4x80xf32>
    %508 = vector.extract_strided_slice %507 {offsets = [0, 1], sizes = [4, 8], strides = [1, 1]} : vector<4x80xf32> to vector<4x8xf32>
    %509 = vector.extract_strided_slice %507 {offsets = [0, 11], sizes = [4, 8], strides = [1, 1]} : vector<4x80xf32> to vector<4x8xf32>
    %510 = vector.extract_strided_slice %507 {offsets = [0, 21], sizes = [4, 8], strides = [1, 1]} : vector<4x80xf32> to vector<4x8xf32>
    %511 = vector.extract_strided_slice %507 {offsets = [0, 31], sizes = [4, 8], strides = [1, 1]} : vector<4x80xf32> to vector<4x8xf32>
    %512 = vector.extract_strided_slice %507 {offsets = [0, 41], sizes = [4, 8], strides = [1, 1]} : vector<4x80xf32> to vector<4x8xf32>
    %513 = vector.extract_strided_slice %507 {offsets = [0, 51], sizes = [4, 8], strides = [1, 1]} : vector<4x80xf32> to vector<4x8xf32>
    %514 = vector.extract_strided_slice %507 {offsets = [0, 61], sizes = [4, 8], strides = [1, 1]} : vector<4x80xf32> to vector<4x8xf32>
    %515 = vector.extract_strided_slice %507 {offsets = [0, 71], sizes = [4, 8], strides = [1, 1]} : vector<4x80xf32> to vector<4x8xf32>
    %516 = tpu.concatenate %508, %509, %510, %511, %512, %513, %514, %515 in 1 : vector<4x8xf32>, vector<4x8xf32>, vector<4x8xf32>, vector<4x8xf32>, vector<4x8xf32>, vector<4x8xf32>, vector<4x8xf32>, vector<4x8xf32> -> vector<4x64xf32>
    %c0_861 = arith.constant 0 : index
    %c0_862 = arith.constant 0 : index
    %c192 = arith.constant 192 : index
    %517 = vector.load %arg4[%c0_861, %c0_862, %c192] : memref<1x4x512xf32, #tpu.memory_space<vmem>>, vector<1x4x64xf32>
    %518 = vector.shape_cast %517 : vector<1x4x64xf32> to vector<4x64xf32>
    %cst_863 = arith.constant 1.000000e+00 : f32
    %519 = vector.broadcast %cst_863 : f32 to vector<4x64xf32>
    %520 = arith.mulf %516, %519 : vector<4x64xf32>
    %521 = arith.addf %520, %518 : vector<4x64xf32>
    %522 = vector.extract_strided_slice %461 {offsets = [0, 320], sizes = [4, 80], strides = [1, 1]} : vector<4x640xf32> to vector<4x80xf32>
    %523 = vector.extract_strided_slice %522 {offsets = [0, 1], sizes = [4, 8], strides = [1, 1]} : vector<4x80xf32> to vector<4x8xf32>
    %524 = vector.extract_strided_slice %522 {offsets = [0, 11], sizes = [4, 8], strides = [1, 1]} : vector<4x80xf32> to vector<4x8xf32>
    %525 = vector.extract_strided_slice %522 {offsets = [0, 21], sizes = [4, 8], strides = [1, 1]} : vector<4x80xf32> to vector<4x8xf32>
    %526 = vector.extract_strided_slice %522 {offsets = [0, 31], sizes = [4, 8], strides = [1, 1]} : vector<4x80xf32> to vector<4x8xf32>
    %527 = vector.extract_strided_slice %522 {offsets = [0, 41], sizes = [4, 8], strides = [1, 1]} : vector<4x80xf32> to vector<4x8xf32>
    %528 = vector.extract_strided_slice %522 {offsets = [0, 51], sizes = [4, 8], strides = [1, 1]} : vector<4x80xf32> to vector<4x8xf32>
    %529 = vector.extract_strided_slice %522 {offsets = [0, 61], sizes = [4, 8], strides = [1, 1]} : vector<4x80xf32> to vector<4x8xf32>
    %530 = vector.extract_strided_slice %522 {offsets = [0, 71], sizes = [4, 8], strides = [1, 1]} : vector<4x80xf32> to vector<4x8xf32>
    %531 = tpu.concatenate %523, %524, %525, %526, %527, %528, %529, %530 in 1 : vector<4x8xf32>, vector<4x8xf32>, vector<4x8xf32>, vector<4x8xf32>, vector<4x8xf32>, vector<4x8xf32>, vector<4x8xf32>, vector<4x8xf32> -> vector<4x64xf32>
    %c0_864 = arith.constant 0 : index
    %c0_865 = arith.constant 0 : index
    %c256 = arith.constant 256 : index
    %532 = vector.load %arg4[%c0_864, %c0_865, %c256] : memref<1x4x512xf32, #tpu.memory_space<vmem>>, vector<1x4x64xf32>
    %533 = vector.shape_cast %532 : vector<1x4x64xf32> to vector<4x64xf32>
    %cst_866 = arith.constant 1.000000e+00 : f32
    %534 = vector.broadcast %cst_866 : f32 to vector<4x64xf32>
    %535 = arith.mulf %531, %534 : vector<4x64xf32>
    %536 = arith.addf %535, %533 : vector<4x64xf32>
    %537 = vector.extract_strided_slice %461 {offsets = [0, 400], sizes = [4, 80], strides = [1, 1]} : vector<4x640xf32> to vector<4x80xf32>
    %538 = vector.extract_strided_slice %537 {offsets = [0, 1], sizes = [4, 8], strides = [1, 1]} : vector<4x80xf32> to vector<4x8xf32>
    %539 = vector.extract_strided_slice %537 {offsets = [0, 11], sizes = [4, 8], strides = [1, 1]} : vector<4x80xf32> to vector<4x8xf32>
    %540 = vector.extract_strided_slice %537 {offsets = [0, 21], sizes = [4, 8], strides = [1, 1]} : vector<4x80xf32> to vector<4x8xf32>
    %541 = vector.extract_strided_slice %537 {offsets = [0, 31], sizes = [4, 8], strides = [1, 1]} : vector<4x80xf32> to vector<4x8xf32>
    %542 = vector.extract_strided_slice %537 {offsets = [0, 41], sizes = [4, 8], strides = [1, 1]} : vector<4x80xf32> to vector<4x8xf32>
    %543 = vector.extract_strided_slice %537 {offsets = [0, 51], sizes = [4, 8], strides = [1, 1]} : vector<4x80xf32> to vector<4x8xf32>
    %544 = vector.extract_strided_slice %537 {offsets = [0, 61], sizes = [4, 8], strides = [1, 1]} : vector<4x80xf32> to vector<4x8xf32>
    %545 = vector.extract_strided_slice %537 {offsets = [0, 71], sizes = [4, 8], strides = [1, 1]} : vector<4x80xf32> to vector<4x8xf32>
    %546 = tpu.concatenate %538, %539, %540, %541, %542, %543, %544, %545 in 1 : vector<4x8xf32>, vector<4x8xf32>, vector<4x8xf32>, vector<4x8xf32>, vector<4x8xf32>, vector<4x8xf32>, vector<4x8xf32>, vector<4x8xf32> -> vector<4x64xf32>
    %c0_867 = arith.constant 0 : index
    %c0_868 = arith.constant 0 : index
    %c320 = arith.constant 320 : index
    %547 = vector.load %arg4[%c0_867, %c0_868, %c320] : memref<1x4x512xf32, #tpu.memory_space<vmem>>, vector<1x4x64xf32>
    %548 = vector.shape_cast %547 : vector<1x4x64xf32> to vector<4x64xf32>
    %cst_869 = arith.constant 1.000000e+00 : f32
    %549 = vector.broadcast %cst_869 : f32 to vector<4x64xf32>
    %550 = arith.mulf %546, %549 : vector<4x64xf32>
    %551 = arith.addf %550, %548 : vector<4x64xf32>
    %552 = vector.extract_strided_slice %461 {offsets = [0, 480], sizes = [4, 80], strides = [1, 1]} : vector<4x640xf32> to vector<4x80xf32>
    %553 = vector.extract_strided_slice %552 {offsets = [0, 1], sizes = [4, 8], strides = [1, 1]} : vector<4x80xf32> to vector<4x8xf32>
    %554 = vector.extract_strided_slice %552 {offsets = [0, 11], sizes = [4, 8], strides = [1, 1]} : vector<4x80xf32> to vector<4x8xf32>
    %555 = vector.extract_strided_slice %552 {offsets = [0, 21], sizes = [4, 8], strides = [1, 1]} : vector<4x80xf32> to vector<4x8xf32>
    %556 = vector.extract_strided_slice %552 {offsets = [0, 31], sizes = [4, 8], strides = [1, 1]} : vector<4x80xf32> to vector<4x8xf32>
    %557 = vector.extract_strided_slice %552 {offsets = [0, 41], sizes = [4, 8], strides = [1, 1]} : vector<4x80xf32> to vector<4x8xf32>
    %558 = vector.extract_strided_slice %552 {offsets = [0, 51], sizes = [4, 8], strides = [1, 1]} : vector<4x80xf32> to vector<4x8xf32>
    %559 = vector.extract_strided_slice %552 {offsets = [0, 61], sizes = [4, 8], strides = [1, 1]} : vector<4x80xf32> to vector<4x8xf32>
    %560 = vector.extract_strided_slice %552 {offsets = [0, 71], sizes = [4, 8], strides = [1, 1]} : vector<4x80xf32> to vector<4x8xf32>
    %561 = tpu.concatenate %553, %554, %555, %556, %557, %558, %559, %560 in 1 : vector<4x8xf32>, vector<4x8xf32>, vector<4x8xf32>, vector<4x8xf32>, vector<4x8xf32>, vector<4x8xf32>, vector<4x8xf32>, vector<4x8xf32> -> vector<4x64xf32>
    %c0_870 = arith.constant 0 : index
    %c0_871 = arith.constant 0 : index
    %c384 = arith.constant 384 : index
    %562 = vector.load %arg4[%c0_870, %c0_871, %c384] : memref<1x4x512xf32, #tpu.memory_space<vmem>>, vector<1x4x64xf32>
    %563 = vector.shape_cast %562 : vector<1x4x64xf32> to vector<4x64xf32>
    %cst_872 = arith.constant 1.000000e+00 : f32
    %564 = vector.broadcast %cst_872 : f32 to vector<4x64xf32>
    %565 = arith.mulf %561, %564 : vector<4x64xf32>
    %566 = arith.addf %565, %563 : vector<4x64xf32>
    %567 = vector.extract_strided_slice %461 {offsets = [0, 560], sizes = [4, 80], strides = [1, 1]} : vector<4x640xf32> to vector<4x80xf32>
    %568 = vector.extract_strided_slice %567 {offsets = [0, 1], sizes = [4, 8], strides = [1, 1]} : vector<4x80xf32> to vector<4x8xf32>
    %569 = vector.extract_strided_slice %567 {offsets = [0, 11], sizes = [4, 8], strides = [1, 1]} : vector<4x80xf32> to vector<4x8xf32>
    %570 = vector.extract_strided_slice %567 {offsets = [0, 21], sizes = [4, 8], strides = [1, 1]} : vector<4x80xf32> to vector<4x8xf32>
    %571 = vector.extract_strided_slice %567 {offsets = [0, 31], sizes = [4, 8], strides = [1, 1]} : vector<4x80xf32> to vector<4x8xf32>
    %572 = vector.extract_strided_slice %567 {offsets = [0, 41], sizes = [4, 8], strides = [1, 1]} : vector<4x80xf32> to vector<4x8xf32>
    %573 = vector.extract_strided_slice %567 {offsets = [0, 51], sizes = [4, 8], strides = [1, 1]} : vector<4x80xf32> to vector<4x8xf32>
    %574 = vector.extract_strided_slice %567 {offsets = [0, 61], sizes = [4, 8], strides = [1, 1]} : vector<4x80xf32> to vector<4x8xf32>
    %575 = vector.extract_strided_slice %567 {offsets = [0, 71], sizes = [4, 8], strides = [1, 1]} : vector<4x80xf32> to vector<4x8xf32>
    %576 = tpu.concatenate %568, %569, %570, %571, %572, %573, %574, %575 in 1 : vector<4x8xf32>, vector<4x8xf32>, vector<4x8xf32>, vector<4x8xf32>, vector<4x8xf32>, vector<4x8xf32>, vector<4x8xf32>, vector<4x8xf32> -> vector<4x64xf32>
    %c0_873 = arith.constant 0 : index
    %c0_874 = arith.constant 0 : index
    %c448 = arith.constant 448 : index
    %577 = vector.load %arg4[%c0_873, %c0_874, %c448] : memref<1x4x512xf32, #tpu.memory_space<vmem>>, vector<1x4x64xf32>
    %578 = vector.shape_cast %577 : vector<1x4x64xf32> to vector<4x64xf32>
    %cst_875 = arith.constant 1.000000e+00 : f32
    %579 = vector.broadcast %cst_875 : f32 to vector<4x64xf32>
    %580 = arith.mulf %576, %579 : vector<4x64xf32>
    %581 = arith.addf %580, %578 : vector<4x64xf32>
    %582 = tpu.concatenate %476, %491, %506, %521, %536, %551, %566, %581 in 1 : vector<4x64xf32>, vector<4x64xf32>, vector<4x64xf32>, vector<4x64xf32>, vector<4x64xf32>, vector<4x64xf32>, vector<4x64xf32>, vector<4x64xf32> -> vector<4x512xf32>
    %c0_876 = arith.constant 0 : index
    %c0_877 = arith.constant 0 : index
    %c0_878 = arith.constant 0 : index
    %583 = vector.load %arg7[%c0_876, %c0_877, %c0_878] : memref<1x4x512xf32, #tpu.memory_space<vmem>>, vector<1x4x512xf32>
    %584 = vector.shape_cast %583 : vector<1x4x512xf32> to vector<4x512xf32>
    %585 = vector.shape_cast %582 : vector<4x512xf32> to vector<1x4x512xf32>
    tpu.vector_store %arg7[%c0_876, %c0_877, %c0_878], %585 {strides = array<i32>} : memref<1x4x512xf32, #tpu.memory_space<vmem>>, vector<1x4x512xf32>,
    return
  }
  func.func @transform_0(%arg0: i32, %arg1: i32) -> (i32, i32, i32, i32) {
    %c0_i32 = arith.constant 0 : i32
    %c0_i32_0 = arith.constant 0 : i32
    %c0_i32_1 = arith.constant 0 : i32
    return %arg0, %arg1, %c0_i32, %c0_i32_0 : i32, i32, i32, i32
  }
  func.func @transform_1(%arg0: i32, %arg1: i32) -> (i32, i32, i32, i32) {
    %c1_i32 = arith.constant 1 : i32
    %0 = arith.addi %arg1, %c1_i32 : i32
    %c4_i32 = arith.constant 4 : i32
    %1 = arith.muli %0, %c4_i32 : i32
    %c0_i32 = arith.constant 0 : i32
    %c0_i32_0 = arith.constant 0 : i32
    %c0_i32_1 = arith.constant 0 : i32
    return %arg0, %1, %c0_i32, %c0_i32_0 : i32, i32, i32, i32
  }
  func.func @transform_2(%arg0: i32, %arg1: i32) -> (i32, i32, i32) {
    %c0_i32 = arith.constant 0 : i32
    %c0_i32_0 = arith.constant 0 : i32
    return %arg0, %c0_i32, %arg1 : i32, i32, i32
  }
  func.func @transform_3(%arg0: i32, %arg1: i32) -> (i32, i32) {
    %c0_i32 = arith.constant 0 : i32
    %c0_i32_0 = arith.constant 0 : i32
    %c0_i32_1 = arith.constant 0 : i32
    return %c0_i32, %c0_i32_0 : i32, i32
  }
  func.func @transform_4(%arg0: i32, %arg1: i32) -> (i32, i32) {
    %c0_i32 = arith.constant 0 : i32
    %c0_i32_0 = arith.constant 0 : i32
    %c0_i32_1 = arith.constant 0 : i32
    return %c0_i32, %c0_i32_0 : i32, i32
  }
  func.func @transform_5(%arg0: i32, %arg1: i32) -> (i32, i32, i32) {
    %c0_i32 = arith.constant 0 : i32
    %c0_i32_0 = arith.constant 0 : i32
    return %arg0, %c0_i32, %arg1 : i32, i32, i32
  }
}

module attributes {stable_mosaic.version = 11 : i64} {
  func.func @kernel(%arg0: i32, %arg1: i32, %arg2: memref<1x8x4x128xf32, #tpu.memory_space<vmem>>, %arg3: memref<1x2x4x128xf32, #tpu.memory_space<vmem>>, %arg4: memref<4x108xf32, #tpu.memory_space<vmem>>, %arg5: memref<4x1xf32, #tpu.memory_space<vmem>>, %arg6: memref<1x8x4x128xf32, #tpu.memory_space<vmem>>) attributes {dimension_semantics = [#tpu.dimension_semantics<parallel>, #tpu.dimension_semantics<parallel>], iteration_bounds = array<i64: 2, 2>, scalar_prefetch = 0 : i64, scratch_operands = 0 : i64, tpu.core_type = #tpu.core_type<tc>, window_params = [{transform_indices = @transform_0, window_bounds = array<i64: 1, 8, 4, 128>}, {transform_indices = @transform_1, window_bounds = array<i64: 1, 2, 4, 128>}, {pipeline_mode = #tpu.pipeline_mode<synchronous>, transform_indices = @transform_2, window_bounds = array<i64: 4, 108>}, {pipeline_mode = #tpu.pipeline_mode<synchronous>, transform_indices = @transform_3, window_bounds = array<i64: 4, 1>}, {transform_indices = @transform_4, window_bounds = array<i64: 1, 8, 4, 128>}]} {
    %0 = tpu.iota {dimensions = array<i32: 1>} : vector<1x80xi32>
    %c10_i32 = arith.constant 10 : i32
    %c0_i32 = arith.constant 0 : i32
    %1 = arith.cmpi eq, %c10_i32, %c0_i32 : i32
    %c1_i32 = arith.constant 1 : i32
    %2 = arith.select %1, %c1_i32, %c10_i32 : i32
    %3 = vector.broadcast %2 : i32 to vector<1x80xi32>
    %4 = arith.remsi %0, %3 : vector<1x80xi32>
    %c0_i32_0 = arith.constant 0 : i32
    %5 = vector.broadcast %c0_i32_0 : i32 to vector<1x80xi32>
    %6 = arith.cmpi ne, %4, %5 : vector<1x80xi32>
    %c0_i32_1 = arith.constant 0 : i32
    %7 = vector.broadcast %c0_i32_1 : i32 to vector<1x80xi32>
    %8 = arith.cmpi slt, %4, %7 : vector<1x80xi32>
    %c0_i32_2 = arith.constant 0 : i32
    %9 = arith.cmpi slt, %2, %c0_i32_2 : i32
    %10 = vector.broadcast %9 : i1 to vector<1x80xi1>
    %11 = vector.broadcast %10 : vector<1x80xi1> to vector<1x80xi1>
    %12 = arith.xori %8, %11 : vector<1x80xi1>
    %13 = arith.andi %12, %6 : vector<1x80xi1>
    %14 = vector.broadcast %2 : i32 to vector<1x80xi32>
    %15 = arith.addi %4, %14 : vector<1x80xi32>
    %16 = arith.select %13, %15, %4 : vector<1x80xi1>, vector<1x80xi32>
    %c1_i32_3 = arith.constant 1 : i32
    %17 = vector.broadcast %c1_i32_3 : i32 to vector<1x80xi32>
    %18 = arith.cmpi sge, %16, %17 : vector<1x80xi32>
    %c9_i32 = arith.constant 9 : i32
    %19 = vector.broadcast %c9_i32 : i32 to vector<1x80xi32>
    %20 = arith.cmpi slt, %16, %19 : vector<1x80xi32>
    %21 = arith.andi %18, %20 : vector<1x80xi1>
    %22 = arith.extui %21 : vector<1x80xi1> to vector<1x80xi32>
    %23 = arith.sitofp %22 : vector<1x80xi32> to vector<1x80xf32>
    %c0 = arith.constant 0 : index
    %c0_4 = arith.constant 0 : index
    %24 = vector.load %arg4[%c0, %c0_4] : memref<4x108xf32, #tpu.memory_space<vmem>>, vector<4x108xf32>
    %c0_5 = arith.constant 0 : index
    %c0_6 = arith.constant 0 : index
    %25 = vector.load %arg5[%c0_5, %c0_6] : memref<4x1xf32, #tpu.memory_space<vmem>>, vector<4x1xf32>
    %c0_7 = arith.constant 0 : index
    %c0_8 = arith.constant 0 : index
    %c0_9 = arith.constant 0 : index
    %c10 = arith.constant 10 : index
    %26 = vector.load %arg2[%c0_7, %c0_8, %c0_9, %c10] : memref<1x8x4x128xf32, #tpu.memory_space<vmem>>, vector<1x1x4x80xf32>
    %27 = vector.shape_cast %26 : vector<1x1x4x80xf32> to vector<4x80xf32>
    %c0_10 = arith.constant 0 : index
    %c0_11 = arith.constant 0 : index
    %c0_12 = arith.constant 0 : index
    %c11 = arith.constant 11 : index
    %28 = vector.load %arg2[%c0_10, %c0_11, %c0_12, %c11] : memref<1x8x4x128xf32, #tpu.memory_space<vmem>>, vector<1x1x4x80xf32>
    %29 = vector.shape_cast %28 : vector<1x1x4x80xf32> to vector<4x80xf32>
    %c0_13 = arith.constant 0 : index
    %c0_14 = arith.constant 0 : index
    %c0_15 = arith.constant 0 : index
    %c12 = arith.constant 12 : index
    %30 = vector.load %arg2[%c0_13, %c0_14, %c0_15, %c12] : memref<1x8x4x128xf32, #tpu.memory_space<vmem>>, vector<1x1x4x80xf32>
    %31 = vector.shape_cast %30 : vector<1x1x4x80xf32> to vector<4x80xf32>
    %c0_16 = arith.constant 0 : index
    %c0_17 = arith.constant 0 : index
    %c0_18 = arith.constant 0 : index
    %c20 = arith.constant 20 : index
    %32 = vector.load %arg2[%c0_16, %c0_17, %c0_18, %c20] : memref<1x8x4x128xf32, #tpu.memory_space<vmem>>, vector<1x1x4x80xf32>
    %33 = vector.shape_cast %32 : vector<1x1x4x80xf32> to vector<4x80xf32>
    %c0_19 = arith.constant 0 : index
    %c0_20 = arith.constant 0 : index
    %c0_21 = arith.constant 0 : index
    %c21 = arith.constant 21 : index
    %34 = vector.load %arg2[%c0_19, %c0_20, %c0_21, %c21] : memref<1x8x4x128xf32, #tpu.memory_space<vmem>>, vector<1x1x4x80xf32>
    %35 = vector.shape_cast %34 : vector<1x1x4x80xf32> to vector<4x80xf32>
    %c0_22 = arith.constant 0 : index
    %c0_23 = arith.constant 0 : index
    %c0_24 = arith.constant 0 : index
    %c22 = arith.constant 22 : index
    %36 = vector.load %arg2[%c0_22, %c0_23, %c0_24, %c22] : memref<1x8x4x128xf32, #tpu.memory_space<vmem>>, vector<1x1x4x80xf32>
    %37 = vector.shape_cast %36 : vector<1x1x4x80xf32> to vector<4x80xf32>
    %c0_25 = arith.constant 0 : index
    %c0_26 = arith.constant 0 : index
    %c0_27 = arith.constant 0 : index
    %c30 = arith.constant 30 : index
    %38 = vector.load %arg2[%c0_25, %c0_26, %c0_27, %c30] : memref<1x8x4x128xf32, #tpu.memory_space<vmem>>, vector<1x1x4x80xf32>
    %39 = vector.shape_cast %38 : vector<1x1x4x80xf32> to vector<4x80xf32>
    %c0_28 = arith.constant 0 : index
    %c0_29 = arith.constant 0 : index
    %c0_30 = arith.constant 0 : index
    %c31 = arith.constant 31 : index
    %40 = vector.load %arg2[%c0_28, %c0_29, %c0_30, %c31] : memref<1x8x4x128xf32, #tpu.memory_space<vmem>>, vector<1x1x4x80xf32>
    %41 = vector.shape_cast %40 : vector<1x1x4x80xf32> to vector<4x80xf32>
    %c0_31 = arith.constant 0 : index
    %c0_32 = arith.constant 0 : index
    %c0_33 = arith.constant 0 : index
    %c32 = arith.constant 32 : index
    %42 = vector.load %arg2[%c0_31, %c0_32, %c0_33, %c32] : memref<1x8x4x128xf32, #tpu.memory_space<vmem>>, vector<1x1x4x80xf32>
    %43 = vector.shape_cast %42 : vector<1x1x4x80xf32> to vector<4x80xf32>
    %c0_34 = arith.constant 0 : index
    %c1 = arith.constant 1 : index
    %c0_35 = arith.constant 0 : index
    %c10_36 = arith.constant 10 : index
    %44 = vector.load %arg2[%c0_34, %c1, %c0_35, %c10_36] : memref<1x8x4x128xf32, #tpu.memory_space<vmem>>, vector<1x1x4x80xf32>
    %45 = vector.shape_cast %44 : vector<1x1x4x80xf32> to vector<4x80xf32>
    %c0_37 = arith.constant 0 : index
    %c1_38 = arith.constant 1 : index
    %c0_39 = arith.constant 0 : index
    %c11_40 = arith.constant 11 : index
    %46 = vector.load %arg2[%c0_37, %c1_38, %c0_39, %c11_40] : memref<1x8x4x128xf32, #tpu.memory_space<vmem>>, vector<1x1x4x80xf32>
    %47 = vector.shape_cast %46 : vector<1x1x4x80xf32> to vector<4x80xf32>
    %c0_41 = arith.constant 0 : index
    %c1_42 = arith.constant 1 : index
    %c0_43 = arith.constant 0 : index
    %c12_44 = arith.constant 12 : index
    %48 = vector.load %arg2[%c0_41, %c1_42, %c0_43, %c12_44] : memref<1x8x4x128xf32, #tpu.memory_space<vmem>>, vector<1x1x4x80xf32>
    %49 = vector.shape_cast %48 : vector<1x1x4x80xf32> to vector<4x80xf32>
    %c0_45 = arith.constant 0 : index
    %c1_46 = arith.constant 1 : index
    %c0_47 = arith.constant 0 : index
    %c20_48 = arith.constant 20 : index
    %50 = vector.load %arg2[%c0_45, %c1_46, %c0_47, %c20_48] : memref<1x8x4x128xf32, #tpu.memory_space<vmem>>, vector<1x1x4x80xf32>
    %51 = vector.shape_cast %50 : vector<1x1x4x80xf32> to vector<4x80xf32>
    %c0_49 = arith.constant 0 : index
    %c1_50 = arith.constant 1 : index
    %c0_51 = arith.constant 0 : index
    %c21_52 = arith.constant 21 : index
    %52 = vector.load %arg2[%c0_49, %c1_50, %c0_51, %c21_52] : memref<1x8x4x128xf32, #tpu.memory_space<vmem>>, vector<1x1x4x80xf32>
    %53 = vector.shape_cast %52 : vector<1x1x4x80xf32> to vector<4x80xf32>
    %c0_53 = arith.constant 0 : index
    %c1_54 = arith.constant 1 : index
    %c0_55 = arith.constant 0 : index
    %c22_56 = arith.constant 22 : index
    %54 = vector.load %arg2[%c0_53, %c1_54, %c0_55, %c22_56] : memref<1x8x4x128xf32, #tpu.memory_space<vmem>>, vector<1x1x4x80xf32>
    %55 = vector.shape_cast %54 : vector<1x1x4x80xf32> to vector<4x80xf32>
    %c0_57 = arith.constant 0 : index
    %c1_58 = arith.constant 1 : index
    %c0_59 = arith.constant 0 : index
    %c30_60 = arith.constant 30 : index
    %56 = vector.load %arg2[%c0_57, %c1_58, %c0_59, %c30_60] : memref<1x8x4x128xf32, #tpu.memory_space<vmem>>, vector<1x1x4x80xf32>
    %57 = vector.shape_cast %56 : vector<1x1x4x80xf32> to vector<4x80xf32>
    %c0_61 = arith.constant 0 : index
    %c1_62 = arith.constant 1 : index
    %c0_63 = arith.constant 0 : index
    %c31_64 = arith.constant 31 : index
    %58 = vector.load %arg2[%c0_61, %c1_62, %c0_63, %c31_64] : memref<1x8x4x128xf32, #tpu.memory_space<vmem>>, vector<1x1x4x80xf32>
    %59 = vector.shape_cast %58 : vector<1x1x4x80xf32> to vector<4x80xf32>
    %c0_65 = arith.constant 0 : index
    %c1_66 = arith.constant 1 : index
    %c0_67 = arith.constant 0 : index
    %c32_68 = arith.constant 32 : index
    %60 = vector.load %arg2[%c0_65, %c1_66, %c0_67, %c32_68] : memref<1x8x4x128xf32, #tpu.memory_space<vmem>>, vector<1x1x4x80xf32>
    %61 = vector.shape_cast %60 : vector<1x1x4x80xf32> to vector<4x80xf32>
    %c0_69 = arith.constant 0 : index
    %c2 = arith.constant 2 : index
    %c0_70 = arith.constant 0 : index
    %c10_71 = arith.constant 10 : index
    %62 = vector.load %arg2[%c0_69, %c2, %c0_70, %c10_71] : memref<1x8x4x128xf32, #tpu.memory_space<vmem>>, vector<1x1x4x80xf32>
    %63 = vector.shape_cast %62 : vector<1x1x4x80xf32> to vector<4x80xf32>
    %c0_72 = arith.constant 0 : index
    %c2_73 = arith.constant 2 : index
    %c0_74 = arith.constant 0 : index
    %c11_75 = arith.constant 11 : index
    %64 = vector.load %arg2[%c0_72, %c2_73, %c0_74, %c11_75] : memref<1x8x4x128xf32, #tpu.memory_space<vmem>>, vector<1x1x4x80xf32>
    %65 = vector.shape_cast %64 : vector<1x1x4x80xf32> to vector<4x80xf32>
    %c0_76 = arith.constant 0 : index
    %c2_77 = arith.constant 2 : index
    %c0_78 = arith.constant 0 : index
    %c12_79 = arith.constant 12 : index
    %66 = vector.load %arg2[%c0_76, %c2_77, %c0_78, %c12_79] : memref<1x8x4x128xf32, #tpu.memory_space<vmem>>, vector<1x1x4x80xf32>
    %67 = vector.shape_cast %66 : vector<1x1x4x80xf32> to vector<4x80xf32>
    %c0_80 = arith.constant 0 : index
    %c2_81 = arith.constant 2 : index
    %c0_82 = arith.constant 0 : index
    %c20_83 = arith.constant 20 : index
    %68 = vector.load %arg2[%c0_80, %c2_81, %c0_82, %c20_83] : memref<1x8x4x128xf32, #tpu.memory_space<vmem>>, vector<1x1x4x80xf32>
    %69 = vector.shape_cast %68 : vector<1x1x4x80xf32> to vector<4x80xf32>
    %c0_84 = arith.constant 0 : index
    %c2_85 = arith.constant 2 : index
    %c0_86 = arith.constant 0 : index
    %c21_87 = arith.constant 21 : index
    %70 = vector.load %arg2[%c0_84, %c2_85, %c0_86, %c21_87] : memref<1x8x4x128xf32, #tpu.memory_space<vmem>>, vector<1x1x4x80xf32>
    %71 = vector.shape_cast %70 : vector<1x1x4x80xf32> to vector<4x80xf32>
    %c0_88 = arith.constant 0 : index
    %c2_89 = arith.constant 2 : index
    %c0_90 = arith.constant 0 : index
    %c22_91 = arith.constant 22 : index
    %72 = vector.load %arg2[%c0_88, %c2_89, %c0_90, %c22_91] : memref<1x8x4x128xf32, #tpu.memory_space<vmem>>, vector<1x1x4x80xf32>
    %73 = vector.shape_cast %72 : vector<1x1x4x80xf32> to vector<4x80xf32>
    %c0_92 = arith.constant 0 : index
    %c2_93 = arith.constant 2 : index
    %c0_94 = arith.constant 0 : index
    %c30_95 = arith.constant 30 : index
    %74 = vector.load %arg2[%c0_92, %c2_93, %c0_94, %c30_95] : memref<1x8x4x128xf32, #tpu.memory_space<vmem>>, vector<1x1x4x80xf32>
    %75 = vector.shape_cast %74 : vector<1x1x4x80xf32> to vector<4x80xf32>
    %c0_96 = arith.constant 0 : index
    %c2_97 = arith.constant 2 : index
    %c0_98 = arith.constant 0 : index
    %c31_99 = arith.constant 31 : index
    %76 = vector.load %arg2[%c0_96, %c2_97, %c0_98, %c31_99] : memref<1x8x4x128xf32, #tpu.memory_space<vmem>>, vector<1x1x4x80xf32>
    %77 = vector.shape_cast %76 : vector<1x1x4x80xf32> to vector<4x80xf32>
    %c0_100 = arith.constant 0 : index
    %c2_101 = arith.constant 2 : index
    %c0_102 = arith.constant 0 : index
    %c32_103 = arith.constant 32 : index
    %78 = vector.load %arg2[%c0_100, %c2_101, %c0_102, %c32_103] : memref<1x8x4x128xf32, #tpu.memory_space<vmem>>, vector<1x1x4x80xf32>
    %79 = vector.shape_cast %78 : vector<1x1x4x80xf32> to vector<4x80xf32>
    %80 = tpu.concatenate %27, %29, %31, %33, %35, %37, %39, %41, %43, %45, %47, %49, %51, %53, %55, %57 in 0 : vector<4x80xf32>, vector<4x80xf32>, vector<4x80xf32>, vector<4x80xf32>, vector<4x80xf32>, vector<4x80xf32>, vector<4x80xf32>, vector<4x80xf32>, vector<4x80xf32>, vector<4x80xf32>, vector<4x80xf32>, vector<4x80xf32>, vector<4x80xf32>, vector<4x80xf32>, vector<4x80xf32>, vector<4x80xf32> -> vector<64x80xf32>
    %81 = tpu.concatenate %59, %61, %63, %65, %67, %69, %71, %73, %75, %77, %79 in 0 : vector<4x80xf32>, vector<4x80xf32>, vector<4x80xf32>, vector<4x80xf32>, vector<4x80xf32>, vector<4x80xf32>, vector<4x80xf32>, vector<4x80xf32>, vector<4x80xf32>, vector<4x80xf32>, vector<4x80xf32> -> vector<44x80xf32>
    %82 = tpu.concatenate %80, %81 in 0 : vector<64x80xf32>, vector<44x80xf32> -> vector<108x80xf32>
    %c0_104 = arith.constant 0 : index
    %c1_105 = arith.constant 1 : index
    %c0_106 = arith.constant 0 : index
    %c10_107 = arith.constant 10 : index
    %83 = vector.load %arg2[%c0_104, %c1_105, %c0_106, %c10_107] : memref<1x8x4x128xf32, #tpu.memory_space<vmem>>, vector<1x1x4x80xf32>
    %84 = vector.shape_cast %83 : vector<1x1x4x80xf32> to vector<4x80xf32>
    %c0_108 = arith.constant 0 : index
    %c1_109 = arith.constant 1 : index
    %c0_110 = arith.constant 0 : index
    %c11_111 = arith.constant 11 : index
    %85 = vector.load %arg2[%c0_108, %c1_109, %c0_110, %c11_111] : memref<1x8x4x128xf32, #tpu.memory_space<vmem>>, vector<1x1x4x80xf32>
    %86 = vector.shape_cast %85 : vector<1x1x4x80xf32> to vector<4x80xf32>
    %c0_112 = arith.constant 0 : index
    %c1_113 = arith.constant 1 : index
    %c0_114 = arith.constant 0 : index
    %c12_115 = arith.constant 12 : index
    %87 = vector.load %arg2[%c0_112, %c1_113, %c0_114, %c12_115] : memref<1x8x4x128xf32, #tpu.memory_space<vmem>>, vector<1x1x4x80xf32>
    %88 = vector.shape_cast %87 : vector<1x1x4x80xf32> to vector<4x80xf32>
    %c0_116 = arith.constant 0 : index
    %c1_117 = arith.constant 1 : index
    %c0_118 = arith.constant 0 : index
    %c20_119 = arith.constant 20 : index
    %89 = vector.load %arg2[%c0_116, %c1_117, %c0_118, %c20_119] : memref<1x8x4x128xf32, #tpu.memory_space<vmem>>, vector<1x1x4x80xf32>
    %90 = vector.shape_cast %89 : vector<1x1x4x80xf32> to vector<4x80xf32>
    %c0_120 = arith.constant 0 : index
    %c1_121 = arith.constant 1 : index
    %c0_122 = arith.constant 0 : index
    %c21_123 = arith.constant 21 : index
    %91 = vector.load %arg2[%c0_120, %c1_121, %c0_122, %c21_123] : memref<1x8x4x128xf32, #tpu.memory_space<vmem>>, vector<1x1x4x80xf32>
    %92 = vector.shape_cast %91 : vector<1x1x4x80xf32> to vector<4x80xf32>
    %c0_124 = arith.constant 0 : index
    %c1_125 = arith.constant 1 : index
    %c0_126 = arith.constant 0 : index
    %c22_127 = arith.constant 22 : index
    %93 = vector.load %arg2[%c0_124, %c1_125, %c0_126, %c22_127] : memref<1x8x4x128xf32, #tpu.memory_space<vmem>>, vector<1x1x4x80xf32>
    %94 = vector.shape_cast %93 : vector<1x1x4x80xf32> to vector<4x80xf32>
    %c0_128 = arith.constant 0 : index
    %c1_129 = arith.constant 1 : index
    %c0_130 = arith.constant 0 : index
    %c30_131 = arith.constant 30 : index
    %95 = vector.load %arg2[%c0_128, %c1_129, %c0_130, %c30_131] : memref<1x8x4x128xf32, #tpu.memory_space<vmem>>, vector<1x1x4x80xf32>
    %96 = vector.shape_cast %95 : vector<1x1x4x80xf32> to vector<4x80xf32>
    %c0_132 = arith.constant 0 : index
    %c1_133 = arith.constant 1 : index
    %c0_134 = arith.constant 0 : index
    %c31_135 = arith.constant 31 : index
    %97 = vector.load %arg2[%c0_132, %c1_133, %c0_134, %c31_135] : memref<1x8x4x128xf32, #tpu.memory_space<vmem>>, vector<1x1x4x80xf32>
    %98 = vector.shape_cast %97 : vector<1x1x4x80xf32> to vector<4x80xf32>
    %c0_136 = arith.constant 0 : index
    %c1_137 = arith.constant 1 : index
    %c0_138 = arith.constant 0 : index
    %c32_139 = arith.constant 32 : index
    %99 = vector.load %arg2[%c0_136, %c1_137, %c0_138, %c32_139] : memref<1x8x4x128xf32, #tpu.memory_space<vmem>>, vector<1x1x4x80xf32>
    %100 = vector.shape_cast %99 : vector<1x1x4x80xf32> to vector<4x80xf32>
    %c0_140 = arith.constant 0 : index
    %c2_141 = arith.constant 2 : index
    %c0_142 = arith.constant 0 : index
    %c10_143 = arith.constant 10 : index
    %101 = vector.load %arg2[%c0_140, %c2_141, %c0_142, %c10_143] : memref<1x8x4x128xf32, #tpu.memory_space<vmem>>, vector<1x1x4x80xf32>
    %102 = vector.shape_cast %101 : vector<1x1x4x80xf32> to vector<4x80xf32>
    %c0_144 = arith.constant 0 : index
    %c2_145 = arith.constant 2 : index
    %c0_146 = arith.constant 0 : index
    %c11_147 = arith.constant 11 : index
    %103 = vector.load %arg2[%c0_144, %c2_145, %c0_146, %c11_147] : memref<1x8x4x128xf32, #tpu.memory_space<vmem>>, vector<1x1x4x80xf32>
    %104 = vector.shape_cast %103 : vector<1x1x4x80xf32> to vector<4x80xf32>
    %c0_148 = arith.constant 0 : index
    %c2_149 = arith.constant 2 : index
    %c0_150 = arith.constant 0 : index
    %c12_151 = arith.constant 12 : index
    %105 = vector.load %arg2[%c0_148, %c2_149, %c0_150, %c12_151] : memref<1x8x4x128xf32, #tpu.memory_space<vmem>>, vector<1x1x4x80xf32>
    %106 = vector.shape_cast %105 : vector<1x1x4x80xf32> to vector<4x80xf32>
    %c0_152 = arith.constant 0 : index
    %c2_153 = arith.constant 2 : index
    %c0_154 = arith.constant 0 : index
    %c20_155 = arith.constant 20 : index
    %107 = vector.load %arg2[%c0_152, %c2_153, %c0_154, %c20_155] : memref<1x8x4x128xf32, #tpu.memory_space<vmem>>, vector<1x1x4x80xf32>
    %108 = vector.shape_cast %107 : vector<1x1x4x80xf32> to vector<4x80xf32>
    %c0_156 = arith.constant 0 : index
    %c2_157 = arith.constant 2 : index
    %c0_158 = arith.constant 0 : index
    %c21_159 = arith.constant 21 : index
    %109 = vector.load %arg2[%c0_156, %c2_157, %c0_158, %c21_159] : memref<1x8x4x128xf32, #tpu.memory_space<vmem>>, vector<1x1x4x80xf32>
    %110 = vector.shape_cast %109 : vector<1x1x4x80xf32> to vector<4x80xf32>
    %c0_160 = arith.constant 0 : index
    %c2_161 = arith.constant 2 : index
    %c0_162 = arith.constant 0 : index
    %c22_163 = arith.constant 22 : index
    %111 = vector.load %arg2[%c0_160, %c2_161, %c0_162, %c22_163] : memref<1x8x4x128xf32, #tpu.memory_space<vmem>>, vector<1x1x4x80xf32>
    %112 = vector.shape_cast %111 : vector<1x1x4x80xf32> to vector<4x80xf32>
    %c0_164 = arith.constant 0 : index
    %c2_165 = arith.constant 2 : index
    %c0_166 = arith.constant 0 : index
    %c30_167 = arith.constant 30 : index
    %113 = vector.load %arg2[%c0_164, %c2_165, %c0_166, %c30_167] : memref<1x8x4x128xf32, #tpu.memory_space<vmem>>, vector<1x1x4x80xf32>
    %114 = vector.shape_cast %113 : vector<1x1x4x80xf32> to vector<4x80xf32>
    %c0_168 = arith.constant 0 : index
    %c2_169 = arith.constant 2 : index
    %c0_170 = arith.constant 0 : index
    %c31_171 = arith.constant 31 : index
    %115 = vector.load %arg2[%c0_168, %c2_169, %c0_170, %c31_171] : memref<1x8x4x128xf32, #tpu.memory_space<vmem>>, vector<1x1x4x80xf32>
    %116 = vector.shape_cast %115 : vector<1x1x4x80xf32> to vector<4x80xf32>
    %c0_172 = arith.constant 0 : index
    %c2_173 = arith.constant 2 : index
    %c0_174 = arith.constant 0 : index
    %c32_175 = arith.constant 32 : index
    %117 = vector.load %arg2[%c0_172, %c2_173, %c0_174, %c32_175] : memref<1x8x4x128xf32, #tpu.memory_space<vmem>>, vector<1x1x4x80xf32>
    %118 = vector.shape_cast %117 : vector<1x1x4x80xf32> to vector<4x80xf32>
    %c0_176 = arith.constant 0 : index
    %c3 = arith.constant 3 : index
    %c0_177 = arith.constant 0 : index
    %c10_178 = arith.constant 10 : index
    %119 = vector.load %arg2[%c0_176, %c3, %c0_177, %c10_178] : memref<1x8x4x128xf32, #tpu.memory_space<vmem>>, vector<1x1x4x80xf32>
    %120 = vector.shape_cast %119 : vector<1x1x4x80xf32> to vector<4x80xf32>
    %c0_179 = arith.constant 0 : index
    %c3_180 = arith.constant 3 : index
    %c0_181 = arith.constant 0 : index
    %c11_182 = arith.constant 11 : index
    %121 = vector.load %arg2[%c0_179, %c3_180, %c0_181, %c11_182] : memref<1x8x4x128xf32, #tpu.memory_space<vmem>>, vector<1x1x4x80xf32>
    %122 = vector.shape_cast %121 : vector<1x1x4x80xf32> to vector<4x80xf32>
    %c0_183 = arith.constant 0 : index
    %c3_184 = arith.constant 3 : index
    %c0_185 = arith.constant 0 : index
    %c12_186 = arith.constant 12 : index
    %123 = vector.load %arg2[%c0_183, %c3_184, %c0_185, %c12_186] : memref<1x8x4x128xf32, #tpu.memory_space<vmem>>, vector<1x1x4x80xf32>
    %124 = vector.shape_cast %123 : vector<1x1x4x80xf32> to vector<4x80xf32>
    %c0_187 = arith.constant 0 : index
    %c3_188 = arith.constant 3 : index
    %c0_189 = arith.constant 0 : index
    %c20_190 = arith.constant 20 : index
    %125 = vector.load %arg2[%c0_187, %c3_188, %c0_189, %c20_190] : memref<1x8x4x128xf32, #tpu.memory_space<vmem>>, vector<1x1x4x80xf32>
    %126 = vector.shape_cast %125 : vector<1x1x4x80xf32> to vector<4x80xf32>
    %c0_191 = arith.constant 0 : index
    %c3_192 = arith.constant 3 : index
    %c0_193 = arith.constant 0 : index
    %c21_194 = arith.constant 21 : index
    %127 = vector.load %arg2[%c0_191, %c3_192, %c0_193, %c21_194] : memref<1x8x4x128xf32, #tpu.memory_space<vmem>>, vector<1x1x4x80xf32>
    %128 = vector.shape_cast %127 : vector<1x1x4x80xf32> to vector<4x80xf32>
    %c0_195 = arith.constant 0 : index
    %c3_196 = arith.constant 3 : index
    %c0_197 = arith.constant 0 : index
    %c22_198 = arith.constant 22 : index
    %129 = vector.load %arg2[%c0_195, %c3_196, %c0_197, %c22_198] : memref<1x8x4x128xf32, #tpu.memory_space<vmem>>, vector<1x1x4x80xf32>
    %130 = vector.shape_cast %129 : vector<1x1x4x80xf32> to vector<4x80xf32>
    %c0_199 = arith.constant 0 : index
    %c3_200 = arith.constant 3 : index
    %c0_201 = arith.constant 0 : index
    %c30_202 = arith.constant 30 : index
    %131 = vector.load %arg2[%c0_199, %c3_200, %c0_201, %c30_202] : memref<1x8x4x128xf32, #tpu.memory_space<vmem>>, vector<1x1x4x80xf32>
    %132 = vector.shape_cast %131 : vector<1x1x4x80xf32> to vector<4x80xf32>
    %c0_203 = arith.constant 0 : index
    %c3_204 = arith.constant 3 : index
    %c0_205 = arith.constant 0 : index
    %c31_206 = arith.constant 31 : index
    %133 = vector.load %arg2[%c0_203, %c3_204, %c0_205, %c31_206] : memref<1x8x4x128xf32, #tpu.memory_space<vmem>>, vector<1x1x4x80xf32>
    %134 = vector.shape_cast %133 : vector<1x1x4x80xf32> to vector<4x80xf32>
    %c0_207 = arith.constant 0 : index
    %c3_208 = arith.constant 3 : index
    %c0_209 = arith.constant 0 : index
    %c32_210 = arith.constant 32 : index
    %135 = vector.load %arg2[%c0_207, %c3_208, %c0_209, %c32_210] : memref<1x8x4x128xf32, #tpu.memory_space<vmem>>, vector<1x1x4x80xf32>
    %136 = vector.shape_cast %135 : vector<1x1x4x80xf32> to vector<4x80xf32>
    %137 = tpu.concatenate %84, %86, %88, %90, %92, %94, %96, %98, %100, %102, %104, %106, %108, %110, %112, %114 in 0 : vector<4x80xf32>, vector<4x80xf32>, vector<4x80xf32>, vector<4x80xf32>, vector<4x80xf32>, vector<4x80xf32>, vector<4x80xf32>, vector<4x80xf32>, vector<4x80xf32>, vector<4x80xf32>, vector<4x80xf32>, vector<4x80xf32>, vector<4x80xf32>, vector<4x80xf32>, vector<4x80xf32>, vector<4x80xf32> -> vector<64x80xf32>
    %138 = tpu.concatenate %116, %118, %120, %122, %124, %126, %128, %130, %132, %134, %136 in 0 : vector<4x80xf32>, vector<4x80xf32>, vector<4x80xf32>, vector<4x80xf32>, vector<4x80xf32>, vector<4x80xf32>, vector<4x80xf32>, vector<4x80xf32>, vector<4x80xf32>, vector<4x80xf32>, vector<4x80xf32> -> vector<44x80xf32>
    %139 = tpu.concatenate %137, %138 in 0 : vector<64x80xf32>, vector<44x80xf32> -> vector<108x80xf32>
    %c0_211 = arith.constant 0 : index
    %c2_212 = arith.constant 2 : index
    %c0_213 = arith.constant 0 : index
    %c10_214 = arith.constant 10 : index
    %140 = vector.load %arg2[%c0_211, %c2_212, %c0_213, %c10_214] : memref<1x8x4x128xf32, #tpu.memory_space<vmem>>, vector<1x1x4x80xf32>
    %141 = vector.shape_cast %140 : vector<1x1x4x80xf32> to vector<4x80xf32>
    %c0_215 = arith.constant 0 : index
    %c2_216 = arith.constant 2 : index
    %c0_217 = arith.constant 0 : index
    %c11_218 = arith.constant 11 : index
    %142 = vector.load %arg2[%c0_215, %c2_216, %c0_217, %c11_218] : memref<1x8x4x128xf32, #tpu.memory_space<vmem>>, vector<1x1x4x80xf32>
    %143 = vector.shape_cast %142 : vector<1x1x4x80xf32> to vector<4x80xf32>
    %c0_219 = arith.constant 0 : index
    %c2_220 = arith.constant 2 : index
    %c0_221 = arith.constant 0 : index
    %c12_222 = arith.constant 12 : index
    %144 = vector.load %arg2[%c0_219, %c2_220, %c0_221, %c12_222] : memref<1x8x4x128xf32, #tpu.memory_space<vmem>>, vector<1x1x4x80xf32>
    %145 = vector.shape_cast %144 : vector<1x1x4x80xf32> to vector<4x80xf32>
    %c0_223 = arith.constant 0 : index
    %c2_224 = arith.constant 2 : index
    %c0_225 = arith.constant 0 : index
    %c20_226 = arith.constant 20 : index
    %146 = vector.load %arg2[%c0_223, %c2_224, %c0_225, %c20_226] : memref<1x8x4x128xf32, #tpu.memory_space<vmem>>, vector<1x1x4x80xf32>
    %147 = vector.shape_cast %146 : vector<1x1x4x80xf32> to vector<4x80xf32>
    %c0_227 = arith.constant 0 : index
    %c2_228 = arith.constant 2 : index
    %c0_229 = arith.constant 0 : index
    %c21_230 = arith.constant 21 : index
    %148 = vector.load %arg2[%c0_227, %c2_228, %c0_229, %c21_230] : memref<1x8x4x128xf32, #tpu.memory_space<vmem>>, vector<1x1x4x80xf32>
    %149 = vector.shape_cast %148 : vector<1x1x4x80xf32> to vector<4x80xf32>
    %c0_231 = arith.constant 0 : index
    %c2_232 = arith.constant 2 : index
    %c0_233 = arith.constant 0 : index
    %c22_234 = arith.constant 22 : index
    %150 = vector.load %arg2[%c0_231, %c2_232, %c0_233, %c22_234] : memref<1x8x4x128xf32, #tpu.memory_space<vmem>>, vector<1x1x4x80xf32>
    %151 = vector.shape_cast %150 : vector<1x1x4x80xf32> to vector<4x80xf32>
    %c0_235 = arith.constant 0 : index
    %c2_236 = arith.constant 2 : index
    %c0_237 = arith.constant 0 : index
    %c30_238 = arith.constant 30 : index
    %152 = vector.load %arg2[%c0_235, %c2_236, %c0_237, %c30_238] : memref<1x8x4x128xf32, #tpu.memory_space<vmem>>, vector<1x1x4x80xf32>
    %153 = vector.shape_cast %152 : vector<1x1x4x80xf32> to vector<4x80xf32>
    %c0_239 = arith.constant 0 : index
    %c2_240 = arith.constant 2 : index
    %c0_241 = arith.constant 0 : index
    %c31_242 = arith.constant 31 : index
    %154 = vector.load %arg2[%c0_239, %c2_240, %c0_241, %c31_242] : memref<1x8x4x128xf32, #tpu.memory_space<vmem>>, vector<1x1x4x80xf32>
    %155 = vector.shape_cast %154 : vector<1x1x4x80xf32> to vector<4x80xf32>
    %c0_243 = arith.constant 0 : index
    %c2_244 = arith.constant 2 : index
    %c0_245 = arith.constant 0 : index
    %c32_246 = arith.constant 32 : index
    %156 = vector.load %arg2[%c0_243, %c2_244, %c0_245, %c32_246] : memref<1x8x4x128xf32, #tpu.memory_space<vmem>>, vector<1x1x4x80xf32>
    %157 = vector.shape_cast %156 : vector<1x1x4x80xf32> to vector<4x80xf32>
    %c0_247 = arith.constant 0 : index
    %c3_248 = arith.constant 3 : index
    %c0_249 = arith.constant 0 : index
    %c10_250 = arith.constant 10 : index
    %158 = vector.load %arg2[%c0_247, %c3_248, %c0_249, %c10_250] : memref<1x8x4x128xf32, #tpu.memory_space<vmem>>, vector<1x1x4x80xf32>
    %159 = vector.shape_cast %158 : vector<1x1x4x80xf32> to vector<4x80xf32>
    %c0_251 = arith.constant 0 : index
    %c3_252 = arith.constant 3 : index
    %c0_253 = arith.constant 0 : index
    %c11_254 = arith.constant 11 : index
    %160 = vector.load %arg2[%c0_251, %c3_252, %c0_253, %c11_254] : memref<1x8x4x128xf32, #tpu.memory_space<vmem>>, vector<1x1x4x80xf32>
    %161 = vector.shape_cast %160 : vector<1x1x4x80xf32> to vector<4x80xf32>
    %c0_255 = arith.constant 0 : index
    %c3_256 = arith.constant 3 : index
    %c0_257 = arith.constant 0 : index
    %c12_258 = arith.constant 12 : index
    %162 = vector.load %arg2[%c0_255, %c3_256, %c0_257, %c12_258] : memref<1x8x4x128xf32, #tpu.memory_space<vmem>>, vector<1x1x4x80xf32>
    %163 = vector.shape_cast %162 : vector<1x1x4x80xf32> to vector<4x80xf32>
    %c0_259 = arith.constant 0 : index
    %c3_260 = arith.constant 3 : index
    %c0_261 = arith.constant 0 : index
    %c20_262 = arith.constant 20 : index
    %164 = vector.load %arg2[%c0_259, %c3_260, %c0_261, %c20_262] : memref<1x8x4x128xf32, #tpu.memory_space<vmem>>, vector<1x1x4x80xf32>
    %165 = vector.shape_cast %164 : vector<1x1x4x80xf32> to vector<4x80xf32>
    %c0_263 = arith.constant 0 : index
    %c3_264 = arith.constant 3 : index
    %c0_265 = arith.constant 0 : index
    %c21_266 = arith.constant 21 : index
    %166 = vector.load %arg2[%c0_263, %c3_264, %c0_265, %c21_266] : memref<1x8x4x128xf32, #tpu.memory_space<vmem>>, vector<1x1x4x80xf32>
    %167 = vector.shape_cast %166 : vector<1x1x4x80xf32> to vector<4x80xf32>
    %c0_267 = arith.constant 0 : index
    %c3_268 = arith.constant 3 : index
    %c0_269 = arith.constant 0 : index
    %c22_270 = arith.constant 22 : index
    %168 = vector.load %arg2[%c0_267, %c3_268, %c0_269, %c22_270] : memref<1x8x4x128xf32, #tpu.memory_space<vmem>>, vector<1x1x4x80xf32>
    %169 = vector.shape_cast %168 : vector<1x1x4x80xf32> to vector<4x80xf32>
    %c0_271 = arith.constant 0 : index
    %c3_272 = arith.constant 3 : index
    %c0_273 = arith.constant 0 : index
    %c30_274 = arith.constant 30 : index
    %170 = vector.load %arg2[%c0_271, %c3_272, %c0_273, %c30_274] : memref<1x8x4x128xf32, #tpu.memory_space<vmem>>, vector<1x1x4x80xf32>
    %171 = vector.shape_cast %170 : vector<1x1x4x80xf32> to vector<4x80xf32>
    %c0_275 = arith.constant 0 : index
    %c3_276 = arith.constant 3 : index
    %c0_277 = arith.constant 0 : index
    %c31_278 = arith.constant 31 : index
    %172 = vector.load %arg2[%c0_275, %c3_276, %c0_277, %c31_278] : memref<1x8x4x128xf32, #tpu.memory_space<vmem>>, vector<1x1x4x80xf32>
    %173 = vector.shape_cast %172 : vector<1x1x4x80xf32> to vector<4x80xf32>
    %c0_279 = arith.constant 0 : index
    %c3_280 = arith.constant 3 : index
    %c0_281 = arith.constant 0 : index
    %c32_282 = arith.constant 32 : index
    %174 = vector.load %arg2[%c0_279, %c3_280, %c0_281, %c32_282] : memref<1x8x4x128xf32, #tpu.memory_space<vmem>>, vector<1x1x4x80xf32>
    %175 = vector.shape_cast %174 : vector<1x1x4x80xf32> to vector<4x80xf32>
    %c0_283 = arith.constant 0 : index
    %c4 = arith.constant 4 : index
    %c0_284 = arith.constant 0 : index
    %c10_285 = arith.constant 10 : index
    %176 = vector.load %arg2[%c0_283, %c4, %c0_284, %c10_285] : memref<1x8x4x128xf32, #tpu.memory_space<vmem>>, vector<1x1x4x80xf32>
    %177 = vector.shape_cast %176 : vector<1x1x4x80xf32> to vector<4x80xf32>
    %c0_286 = arith.constant 0 : index
    %c4_287 = arith.constant 4 : index
    %c0_288 = arith.constant 0 : index
    %c11_289 = arith.constant 11 : index
    %178 = vector.load %arg2[%c0_286, %c4_287, %c0_288, %c11_289] : memref<1x8x4x128xf32, #tpu.memory_space<vmem>>, vector<1x1x4x80xf32>
    %179 = vector.shape_cast %178 : vector<1x1x4x80xf32> to vector<4x80xf32>
    %c0_290 = arith.constant 0 : index
    %c4_291 = arith.constant 4 : index
    %c0_292 = arith.constant 0 : index
    %c12_293 = arith.constant 12 : index
    %180 = vector.load %arg2[%c0_290, %c4_291, %c0_292, %c12_293] : memref<1x8x4x128xf32, #tpu.memory_space<vmem>>, vector<1x1x4x80xf32>
    %181 = vector.shape_cast %180 : vector<1x1x4x80xf32> to vector<4x80xf32>
    %c0_294 = arith.constant 0 : index
    %c4_295 = arith.constant 4 : index
    %c0_296 = arith.constant 0 : index
    %c20_297 = arith.constant 20 : index
    %182 = vector.load %arg2[%c0_294, %c4_295, %c0_296, %c20_297] : memref<1x8x4x128xf32, #tpu.memory_space<vmem>>, vector<1x1x4x80xf32>
    %183 = vector.shape_cast %182 : vector<1x1x4x80xf32> to vector<4x80xf32>
    %c0_298 = arith.constant 0 : index
    %c4_299 = arith.constant 4 : index
    %c0_300 = arith.constant 0 : index
    %c21_301 = arith.constant 21 : index
    %184 = vector.load %arg2[%c0_298, %c4_299, %c0_300, %c21_301] : memref<1x8x4x128xf32, #tpu.memory_space<vmem>>, vector<1x1x4x80xf32>
    %185 = vector.shape_cast %184 : vector<1x1x4x80xf32> to vector<4x80xf32>
    %c0_302 = arith.constant 0 : index
    %c4_303 = arith.constant 4 : index
    %c0_304 = arith.constant 0 : index
    %c22_305 = arith.constant 22 : index
    %186 = vector.load %arg2[%c0_302, %c4_303, %c0_304, %c22_305] : memref<1x8x4x128xf32, #tpu.memory_space<vmem>>, vector<1x1x4x80xf32>
    %187 = vector.shape_cast %186 : vector<1x1x4x80xf32> to vector<4x80xf32>
    %c0_306 = arith.constant 0 : index
    %c4_307 = arith.constant 4 : index
    %c0_308 = arith.constant 0 : index
    %c30_309 = arith.constant 30 : index
    %188 = vector.load %arg2[%c0_306, %c4_307, %c0_308, %c30_309] : memref<1x8x4x128xf32, #tpu.memory_space<vmem>>, vector<1x1x4x80xf32>
    %189 = vector.shape_cast %188 : vector<1x1x4x80xf32> to vector<4x80xf32>
    %c0_310 = arith.constant 0 : index
    %c4_311 = arith.constant 4 : index
    %c0_312 = arith.constant 0 : index
    %c31_313 = arith.constant 31 : index
    %190 = vector.load %arg2[%c0_310, %c4_311, %c0_312, %c31_313] : memref<1x8x4x128xf32, #tpu.memory_space<vmem>>, vector<1x1x4x80xf32>
    %191 = vector.shape_cast %190 : vector<1x1x4x80xf32> to vector<4x80xf32>
    %c0_314 = arith.constant 0 : index
    %c4_315 = arith.constant 4 : index
    %c0_316 = arith.constant 0 : index
    %c32_317 = arith.constant 32 : index
    %192 = vector.load %arg2[%c0_314, %c4_315, %c0_316, %c32_317] : memref<1x8x4x128xf32, #tpu.memory_space<vmem>>, vector<1x1x4x80xf32>
    %193 = vector.shape_cast %192 : vector<1x1x4x80xf32> to vector<4x80xf32>
    %194 = tpu.concatenate %141, %143, %145, %147, %149, %151, %153, %155, %157, %159, %161, %163, %165, %167, %169, %171 in 0 : vector<4x80xf32>, vector<4x80xf32>, vector<4x80xf32>, vector<4x80xf32>, vector<4x80xf32>, vector<4x80xf32>, vector<4x80xf32>, vector<4x80xf32>, vector<4x80xf32>, vector<4x80xf32>, vector<4x80xf32>, vector<4x80xf32>, vector<4x80xf32>, vector<4x80xf32>, vector<4x80xf32>, vector<4x80xf32> -> vector<64x80xf32>
    %195 = tpu.concatenate %173, %175, %177, %179, %181, %183, %185, %187, %189, %191, %193 in 0 : vector<4x80xf32>, vector<4x80xf32>, vector<4x80xf32>, vector<4x80xf32>, vector<4x80xf32>, vector<4x80xf32>, vector<4x80xf32>, vector<4x80xf32>, vector<4x80xf32>, vector<4x80xf32>, vector<4x80xf32> -> vector<44x80xf32>
    %196 = tpu.concatenate %194, %195 in 0 : vector<64x80xf32>, vector<44x80xf32> -> vector<108x80xf32>
    %c0_318 = arith.constant 0 : index
    %c3_319 = arith.constant 3 : index
    %c0_320 = arith.constant 0 : index
    %c10_321 = arith.constant 10 : index
    %197 = vector.load %arg2[%c0_318, %c3_319, %c0_320, %c10_321] : memref<1x8x4x128xf32, #tpu.memory_space<vmem>>, vector<1x1x4x80xf32>
    %198 = vector.shape_cast %197 : vector<1x1x4x80xf32> to vector<4x80xf32>
    %c0_322 = arith.constant 0 : index
    %c3_323 = arith.constant 3 : index
    %c0_324 = arith.constant 0 : index
    %c11_325 = arith.constant 11 : index
    %199 = vector.load %arg2[%c0_322, %c3_323, %c0_324, %c11_325] : memref<1x8x4x128xf32, #tpu.memory_space<vmem>>, vector<1x1x4x80xf32>
    %200 = vector.shape_cast %199 : vector<1x1x4x80xf32> to vector<4x80xf32>
    %c0_326 = arith.constant 0 : index
    %c3_327 = arith.constant 3 : index
    %c0_328 = arith.constant 0 : index
    %c12_329 = arith.constant 12 : index
    %201 = vector.load %arg2[%c0_326, %c3_327, %c0_328, %c12_329] : memref<1x8x4x128xf32, #tpu.memory_space<vmem>>, vector<1x1x4x80xf32>
    %202 = vector.shape_cast %201 : vector<1x1x4x80xf32> to vector<4x80xf32>
    %c0_330 = arith.constant 0 : index
    %c3_331 = arith.constant 3 : index
    %c0_332 = arith.constant 0 : index
    %c20_333 = arith.constant 20 : index
    %203 = vector.load %arg2[%c0_330, %c3_331, %c0_332, %c20_333] : memref<1x8x4x128xf32, #tpu.memory_space<vmem>>, vector<1x1x4x80xf32>
    %204 = vector.shape_cast %203 : vector<1x1x4x80xf32> to vector<4x80xf32>
    %c0_334 = arith.constant 0 : index
    %c3_335 = arith.constant 3 : index
    %c0_336 = arith.constant 0 : index
    %c21_337 = arith.constant 21 : index
    %205 = vector.load %arg2[%c0_334, %c3_335, %c0_336, %c21_337] : memref<1x8x4x128xf32, #tpu.memory_space<vmem>>, vector<1x1x4x80xf32>
    %206 = vector.shape_cast %205 : vector<1x1x4x80xf32> to vector<4x80xf32>
    %c0_338 = arith.constant 0 : index
    %c3_339 = arith.constant 3 : index
    %c0_340 = arith.constant 0 : index
    %c22_341 = arith.constant 22 : index
    %207 = vector.load %arg2[%c0_338, %c3_339, %c0_340, %c22_341] : memref<1x8x4x128xf32, #tpu.memory_space<vmem>>, vector<1x1x4x80xf32>
    %208 = vector.shape_cast %207 : vector<1x1x4x80xf32> to vector<4x80xf32>
    %c0_342 = arith.constant 0 : index
    %c3_343 = arith.constant 3 : index
    %c0_344 = arith.constant 0 : index
    %c30_345 = arith.constant 30 : index
    %209 = vector.load %arg2[%c0_342, %c3_343, %c0_344, %c30_345] : memref<1x8x4x128xf32, #tpu.memory_space<vmem>>, vector<1x1x4x80xf32>
    %210 = vector.shape_cast %209 : vector<1x1x4x80xf32> to vector<4x80xf32>
    %c0_346 = arith.constant 0 : index
    %c3_347 = arith.constant 3 : index
    %c0_348 = arith.constant 0 : index
    %c31_349 = arith.constant 31 : index
    %211 = vector.load %arg2[%c0_346, %c3_347, %c0_348, %c31_349] : memref<1x8x4x128xf32, #tpu.memory_space<vmem>>, vector<1x1x4x80xf32>
    %212 = vector.shape_cast %211 : vector<1x1x4x80xf32> to vector<4x80xf32>
    %c0_350 = arith.constant 0 : index
    %c3_351 = arith.constant 3 : index
    %c0_352 = arith.constant 0 : index
    %c32_353 = arith.constant 32 : index
    %213 = vector.load %arg2[%c0_350, %c3_351, %c0_352, %c32_353] : memref<1x8x4x128xf32, #tpu.memory_space<vmem>>, vector<1x1x4x80xf32>
    %214 = vector.shape_cast %213 : vector<1x1x4x80xf32> to vector<4x80xf32>
    %c0_354 = arith.constant 0 : index
    %c4_355 = arith.constant 4 : index
    %c0_356 = arith.constant 0 : index
    %c10_357 = arith.constant 10 : index
    %215 = vector.load %arg2[%c0_354, %c4_355, %c0_356, %c10_357] : memref<1x8x4x128xf32, #tpu.memory_space<vmem>>, vector<1x1x4x80xf32>
    %216 = vector.shape_cast %215 : vector<1x1x4x80xf32> to vector<4x80xf32>
    %c0_358 = arith.constant 0 : index
    %c4_359 = arith.constant 4 : index
    %c0_360 = arith.constant 0 : index
    %c11_361 = arith.constant 11 : index
    %217 = vector.load %arg2[%c0_358, %c4_359, %c0_360, %c11_361] : memref<1x8x4x128xf32, #tpu.memory_space<vmem>>, vector<1x1x4x80xf32>
    %218 = vector.shape_cast %217 : vector<1x1x4x80xf32> to vector<4x80xf32>
    %c0_362 = arith.constant 0 : index
    %c4_363 = arith.constant 4 : index
    %c0_364 = arith.constant 0 : index
    %c12_365 = arith.constant 12 : index
    %219 = vector.load %arg2[%c0_362, %c4_363, %c0_364, %c12_365] : memref<1x8x4x128xf32, #tpu.memory_space<vmem>>, vector<1x1x4x80xf32>
    %220 = vector.shape_cast %219 : vector<1x1x4x80xf32> to vector<4x80xf32>
    %c0_366 = arith.constant 0 : index
    %c4_367 = arith.constant 4 : index
    %c0_368 = arith.constant 0 : index
    %c20_369 = arith.constant 20 : index
    %221 = vector.load %arg2[%c0_366, %c4_367, %c0_368, %c20_369] : memref<1x8x4x128xf32, #tpu.memory_space<vmem>>, vector<1x1x4x80xf32>
    %222 = vector.shape_cast %221 : vector<1x1x4x80xf32> to vector<4x80xf32>
    %c0_370 = arith.constant 0 : index
    %c4_371 = arith.constant 4 : index
    %c0_372 = arith.constant 0 : index
    %c21_373 = arith.constant 21 : index
    %223 = vector.load %arg2[%c0_370, %c4_371, %c0_372, %c21_373] : memref<1x8x4x128xf32, #tpu.memory_space<vmem>>, vector<1x1x4x80xf32>
    %224 = vector.shape_cast %223 : vector<1x1x4x80xf32> to vector<4x80xf32>
    %c0_374 = arith.constant 0 : index
    %c4_375 = arith.constant 4 : index
    %c0_376 = arith.constant 0 : index
    %c22_377 = arith.constant 22 : index
    %225 = vector.load %arg2[%c0_374, %c4_375, %c0_376, %c22_377] : memref<1x8x4x128xf32, #tpu.memory_space<vmem>>, vector<1x1x4x80xf32>
    %226 = vector.shape_cast %225 : vector<1x1x4x80xf32> to vector<4x80xf32>
    %c0_378 = arith.constant 0 : index
    %c4_379 = arith.constant 4 : index
    %c0_380 = arith.constant 0 : index
    %c30_381 = arith.constant 30 : index
    %227 = vector.load %arg2[%c0_378, %c4_379, %c0_380, %c30_381] : memref<1x8x4x128xf32, #tpu.memory_space<vmem>>, vector<1x1x4x80xf32>
    %228 = vector.shape_cast %227 : vector<1x1x4x80xf32> to vector<4x80xf32>
    %c0_382 = arith.constant 0 : index
    %c4_383 = arith.constant 4 : index
    %c0_384 = arith.constant 0 : index
    %c31_385 = arith.constant 31 : index
    %229 = vector.load %arg2[%c0_382, %c4_383, %c0_384, %c31_385] : memref<1x8x4x128xf32, #tpu.memory_space<vmem>>, vector<1x1x4x80xf32>
    %230 = vector.shape_cast %229 : vector<1x1x4x80xf32> to vector<4x80xf32>
    %c0_386 = arith.constant 0 : index
    %c4_387 = arith.constant 4 : index
    %c0_388 = arith.constant 0 : index
    %c32_389 = arith.constant 32 : index
    %231 = vector.load %arg2[%c0_386, %c4_387, %c0_388, %c32_389] : memref<1x8x4x128xf32, #tpu.memory_space<vmem>>, vector<1x1x4x80xf32>
    %232 = vector.shape_cast %231 : vector<1x1x4x80xf32> to vector<4x80xf32>
    %c0_390 = arith.constant 0 : index
    %c5 = arith.constant 5 : index
    %c0_391 = arith.constant 0 : index
    %c10_392 = arith.constant 10 : index
    %233 = vector.load %arg2[%c0_390, %c5, %c0_391, %c10_392] : memref<1x8x4x128xf32, #tpu.memory_space<vmem>>, vector<1x1x4x80xf32>
    %234 = vector.shape_cast %233 : vector<1x1x4x80xf32> to vector<4x80xf32>
    %c0_393 = arith.constant 0 : index
    %c5_394 = arith.constant 5 : index
    %c0_395 = arith.constant 0 : index
    %c11_396 = arith.constant 11 : index
    %235 = vector.load %arg2[%c0_393, %c5_394, %c0_395, %c11_396] : memref<1x8x4x128xf32, #tpu.memory_space<vmem>>, vector<1x1x4x80xf32>
    %236 = vector.shape_cast %235 : vector<1x1x4x80xf32> to vector<4x80xf32>
    %c0_397 = arith.constant 0 : index
    %c5_398 = arith.constant 5 : index
    %c0_399 = arith.constant 0 : index
    %c12_400 = arith.constant 12 : index
    %237 = vector.load %arg2[%c0_397, %c5_398, %c0_399, %c12_400] : memref<1x8x4x128xf32, #tpu.memory_space<vmem>>, vector<1x1x4x80xf32>
    %238 = vector.shape_cast %237 : vector<1x1x4x80xf32> to vector<4x80xf32>
    %c0_401 = arith.constant 0 : index
    %c5_402 = arith.constant 5 : index
    %c0_403 = arith.constant 0 : index
    %c20_404 = arith.constant 20 : index
    %239 = vector.load %arg2[%c0_401, %c5_402, %c0_403, %c20_404] : memref<1x8x4x128xf32, #tpu.memory_space<vmem>>, vector<1x1x4x80xf32>
    %240 = vector.shape_cast %239 : vector<1x1x4x80xf32> to vector<4x80xf32>
    %c0_405 = arith.constant 0 : index
    %c5_406 = arith.constant 5 : index
    %c0_407 = arith.constant 0 : index
    %c21_408 = arith.constant 21 : index
    %241 = vector.load %arg2[%c0_405, %c5_406, %c0_407, %c21_408] : memref<1x8x4x128xf32, #tpu.memory_space<vmem>>, vector<1x1x4x80xf32>
    %242 = vector.shape_cast %241 : vector<1x1x4x80xf32> to vector<4x80xf32>
    %c0_409 = arith.constant 0 : index
    %c5_410 = arith.constant 5 : index
    %c0_411 = arith.constant 0 : index
    %c22_412 = arith.constant 22 : index
    %243 = vector.load %arg2[%c0_409, %c5_410, %c0_411, %c22_412] : memref<1x8x4x128xf32, #tpu.memory_space<vmem>>, vector<1x1x4x80xf32>
    %244 = vector.shape_cast %243 : vector<1x1x4x80xf32> to vector<4x80xf32>
    %c0_413 = arith.constant 0 : index
    %c5_414 = arith.constant 5 : index
    %c0_415 = arith.constant 0 : index
    %c30_416 = arith.constant 30 : index
    %245 = vector.load %arg2[%c0_413, %c5_414, %c0_415, %c30_416] : memref<1x8x4x128xf32, #tpu.memory_space<vmem>>, vector<1x1x4x80xf32>
    %246 = vector.shape_cast %245 : vector<1x1x4x80xf32> to vector<4x80xf32>
    %c0_417 = arith.constant 0 : index
    %c5_418 = arith.constant 5 : index
    %c0_419 = arith.constant 0 : index
    %c31_420 = arith.constant 31 : index
    %247 = vector.load %arg2[%c0_417, %c5_418, %c0_419, %c31_420] : memref<1x8x4x128xf32, #tpu.memory_space<vmem>>, vector<1x1x4x80xf32>
    %248 = vector.shape_cast %247 : vector<1x1x4x80xf32> to vector<4x80xf32>
    %c0_421 = arith.constant 0 : index
    %c5_422 = arith.constant 5 : index
    %c0_423 = arith.constant 0 : index
    %c32_424 = arith.constant 32 : index
    %249 = vector.load %arg2[%c0_421, %c5_422, %c0_423, %c32_424] : memref<1x8x4x128xf32, #tpu.memory_space<vmem>>, vector<1x1x4x80xf32>
    %250 = vector.shape_cast %249 : vector<1x1x4x80xf32> to vector<4x80xf32>
    %251 = tpu.concatenate %198, %200, %202, %204, %206, %208, %210, %212, %214, %216, %218, %220, %222, %224, %226, %228 in 0 : vector<4x80xf32>, vector<4x80xf32>, vector<4x80xf32>, vector<4x80xf32>, vector<4x80xf32>, vector<4x80xf32>, vector<4x80xf32>, vector<4x80xf32>, vector<4x80xf32>, vector<4x80xf32>, vector<4x80xf32>, vector<4x80xf32>, vector<4x80xf32>, vector<4x80xf32>, vector<4x80xf32>, vector<4x80xf32> -> vector<64x80xf32>
    %252 = tpu.concatenate %230, %232, %234, %236, %238, %240, %242, %244, %246, %248, %250 in 0 : vector<4x80xf32>, vector<4x80xf32>, vector<4x80xf32>, vector<4x80xf32>, vector<4x80xf32>, vector<4x80xf32>, vector<4x80xf32>, vector<4x80xf32>, vector<4x80xf32>, vector<4x80xf32>, vector<4x80xf32> -> vector<44x80xf32>
    %253 = tpu.concatenate %251, %252 in 0 : vector<64x80xf32>, vector<44x80xf32> -> vector<108x80xf32>
    %c0_425 = arith.constant 0 : index
    %c4_426 = arith.constant 4 : index
    %c0_427 = arith.constant 0 : index
    %c10_428 = arith.constant 10 : index
    %254 = vector.load %arg2[%c0_425, %c4_426, %c0_427, %c10_428] : memref<1x8x4x128xf32, #tpu.memory_space<vmem>>, vector<1x1x4x80xf32>
    %255 = vector.shape_cast %254 : vector<1x1x4x80xf32> to vector<4x80xf32>
    %c0_429 = arith.constant 0 : index
    %c4_430 = arith.constant 4 : index
    %c0_431 = arith.constant 0 : index
    %c11_432 = arith.constant 11 : index
    %256 = vector.load %arg2[%c0_429, %c4_430, %c0_431, %c11_432] : memref<1x8x4x128xf32, #tpu.memory_space<vmem>>, vector<1x1x4x80xf32>
    %257 = vector.shape_cast %256 : vector<1x1x4x80xf32> to vector<4x80xf32>
    %c0_433 = arith.constant 0 : index
    %c4_434 = arith.constant 4 : index
    %c0_435 = arith.constant 0 : index
    %c12_436 = arith.constant 12 : index
    %258 = vector.load %arg2[%c0_433, %c4_434, %c0_435, %c12_436] : memref<1x8x4x128xf32, #tpu.memory_space<vmem>>, vector<1x1x4x80xf32>
    %259 = vector.shape_cast %258 : vector<1x1x4x80xf32> to vector<4x80xf32>
    %c0_437 = arith.constant 0 : index
    %c4_438 = arith.constant 4 : index
    %c0_439 = arith.constant 0 : index
    %c20_440 = arith.constant 20 : index
    %260 = vector.load %arg2[%c0_437, %c4_438, %c0_439, %c20_440] : memref<1x8x4x128xf32, #tpu.memory_space<vmem>>, vector<1x1x4x80xf32>
    %261 = vector.shape_cast %260 : vector<1x1x4x80xf32> to vector<4x80xf32>
    %c0_441 = arith.constant 0 : index
    %c4_442 = arith.constant 4 : index
    %c0_443 = arith.constant 0 : index
    %c21_444 = arith.constant 21 : index
    %262 = vector.load %arg2[%c0_441, %c4_442, %c0_443, %c21_444] : memref<1x8x4x128xf32, #tpu.memory_space<vmem>>, vector<1x1x4x80xf32>
    %263 = vector.shape_cast %262 : vector<1x1x4x80xf32> to vector<4x80xf32>
    %c0_445 = arith.constant 0 : index
    %c4_446 = arith.constant 4 : index
    %c0_447 = arith.constant 0 : index
    %c22_448 = arith.constant 22 : index
    %264 = vector.load %arg2[%c0_445, %c4_446, %c0_447, %c22_448] : memref<1x8x4x128xf32, #tpu.memory_space<vmem>>, vector<1x1x4x80xf32>
    %265 = vector.shape_cast %264 : vector<1x1x4x80xf32> to vector<4x80xf32>
    %c0_449 = arith.constant 0 : index
    %c4_450 = arith.constant 4 : index
    %c0_451 = arith.constant 0 : index
    %c30_452 = arith.constant 30 : index
    %266 = vector.load %arg2[%c0_449, %c4_450, %c0_451, %c30_452] : memref<1x8x4x128xf32, #tpu.memory_space<vmem>>, vector<1x1x4x80xf32>
    %267 = vector.shape_cast %266 : vector<1x1x4x80xf32> to vector<4x80xf32>
    %c0_453 = arith.constant 0 : index
    %c4_454 = arith.constant 4 : index
    %c0_455 = arith.constant 0 : index
    %c31_456 = arith.constant 31 : index
    %268 = vector.load %arg2[%c0_453, %c4_454, %c0_455, %c31_456] : memref<1x8x4x128xf32, #tpu.memory_space<vmem>>, vector<1x1x4x80xf32>
    %269 = vector.shape_cast %268 : vector<1x1x4x80xf32> to vector<4x80xf32>
    %c0_457 = arith.constant 0 : index
    %c4_458 = arith.constant 4 : index
    %c0_459 = arith.constant 0 : index
    %c32_460 = arith.constant 32 : index
    %270 = vector.load %arg2[%c0_457, %c4_458, %c0_459, %c32_460] : memref<1x8x4x128xf32, #tpu.memory_space<vmem>>, vector<1x1x4x80xf32>
    %271 = vector.shape_cast %270 : vector<1x1x4x80xf32> to vector<4x80xf32>
    %c0_461 = arith.constant 0 : index
    %c5_462 = arith.constant 5 : index
    %c0_463 = arith.constant 0 : index
    %c10_464 = arith.constant 10 : index
    %272 = vector.load %arg2[%c0_461, %c5_462, %c0_463, %c10_464] : memref<1x8x4x128xf32, #tpu.memory_space<vmem>>, vector<1x1x4x80xf32>
    %273 = vector.shape_cast %272 : vector<1x1x4x80xf32> to vector<4x80xf32>
    %c0_465 = arith.constant 0 : index
    %c5_466 = arith.constant 5 : index
    %c0_467 = arith.constant 0 : index
    %c11_468 = arith.constant 11 : index
    %274 = vector.load %arg2[%c0_465, %c5_466, %c0_467, %c11_468] : memref<1x8x4x128xf32, #tpu.memory_space<vmem>>, vector<1x1x4x80xf32>
    %275 = vector.shape_cast %274 : vector<1x1x4x80xf32> to vector<4x80xf32>
    %c0_469 = arith.constant 0 : index
    %c5_470 = arith.constant 5 : index
    %c0_471 = arith.constant 0 : index
    %c12_472 = arith.constant 12 : index
    %276 = vector.load %arg2[%c0_469, %c5_470, %c0_471, %c12_472] : memref<1x8x4x128xf32, #tpu.memory_space<vmem>>, vector<1x1x4x80xf32>
    %277 = vector.shape_cast %276 : vector<1x1x4x80xf32> to vector<4x80xf32>
    %c0_473 = arith.constant 0 : index
    %c5_474 = arith.constant 5 : index
    %c0_475 = arith.constant 0 : index
    %c20_476 = arith.constant 20 : index
    %278 = vector.load %arg2[%c0_473, %c5_474, %c0_475, %c20_476] : memref<1x8x4x128xf32, #tpu.memory_space<vmem>>, vector<1x1x4x80xf32>
    %279 = vector.shape_cast %278 : vector<1x1x4x80xf32> to vector<4x80xf32>
    %c0_477 = arith.constant 0 : index
    %c5_478 = arith.constant 5 : index
    %c0_479 = arith.constant 0 : index
    %c21_480 = arith.constant 21 : index
    %280 = vector.load %arg2[%c0_477, %c5_478, %c0_479, %c21_480] : memref<1x8x4x128xf32, #tpu.memory_space<vmem>>, vector<1x1x4x80xf32>
    %281 = vector.shape_cast %280 : vector<1x1x4x80xf32> to vector<4x80xf32>
    %c0_481 = arith.constant 0 : index
    %c5_482 = arith.constant 5 : index
    %c0_483 = arith.constant 0 : index
    %c22_484 = arith.constant 22 : index
    %282 = vector.load %arg2[%c0_481, %c5_482, %c0_483, %c22_484] : memref<1x8x4x128xf32, #tpu.memory_space<vmem>>, vector<1x1x4x80xf32>
    %283 = vector.shape_cast %282 : vector<1x1x4x80xf32> to vector<4x80xf32>
    %c0_485 = arith.constant 0 : index
    %c5_486 = arith.constant 5 : index
    %c0_487 = arith.constant 0 : index
    %c30_488 = arith.constant 30 : index
    %284 = vector.load %arg2[%c0_485, %c5_486, %c0_487, %c30_488] : memref<1x8x4x128xf32, #tpu.memory_space<vmem>>, vector<1x1x4x80xf32>
    %285 = vector.shape_cast %284 : vector<1x1x4x80xf32> to vector<4x80xf32>
    %c0_489 = arith.constant 0 : index
    %c5_490 = arith.constant 5 : index
    %c0_491 = arith.constant 0 : index
    %c31_492 = arith.constant 31 : index
    %286 = vector.load %arg2[%c0_489, %c5_490, %c0_491, %c31_492] : memref<1x8x4x128xf32, #tpu.memory_space<vmem>>, vector<1x1x4x80xf32>
    %287 = vector.shape_cast %286 : vector<1x1x4x80xf32> to vector<4x80xf32>
    %c0_493 = arith.constant 0 : index
    %c5_494 = arith.constant 5 : index
    %c0_495 = arith.constant 0 : index
    %c32_496 = arith.constant 32 : index
    %288 = vector.load %arg2[%c0_493, %c5_494, %c0_495, %c32_496] : memref<1x8x4x128xf32, #tpu.memory_space<vmem>>, vector<1x1x4x80xf32>
    %289 = vector.shape_cast %288 : vector<1x1x4x80xf32> to vector<4x80xf32>
    %c0_497 = arith.constant 0 : index
    %c6 = arith.constant 6 : index
    %c0_498 = arith.constant 0 : index
    %c10_499 = arith.constant 10 : index
    %290 = vector.load %arg2[%c0_497, %c6, %c0_498, %c10_499] : memref<1x8x4x128xf32, #tpu.memory_space<vmem>>, vector<1x1x4x80xf32>
    %291 = vector.shape_cast %290 : vector<1x1x4x80xf32> to vector<4x80xf32>
    %c0_500 = arith.constant 0 : index
    %c6_501 = arith.constant 6 : index
    %c0_502 = arith.constant 0 : index
    %c11_503 = arith.constant 11 : index
    %292 = vector.load %arg2[%c0_500, %c6_501, %c0_502, %c11_503] : memref<1x8x4x128xf32, #tpu.memory_space<vmem>>, vector<1x1x4x80xf32>
    %293 = vector.shape_cast %292 : vector<1x1x4x80xf32> to vector<4x80xf32>
    %c0_504 = arith.constant 0 : index
    %c6_505 = arith.constant 6 : index
    %c0_506 = arith.constant 0 : index
    %c12_507 = arith.constant 12 : index
    %294 = vector.load %arg2[%c0_504, %c6_505, %c0_506, %c12_507] : memref<1x8x4x128xf32, #tpu.memory_space<vmem>>, vector<1x1x4x80xf32>
    %295 = vector.shape_cast %294 : vector<1x1x4x80xf32> to vector<4x80xf32>
    %c0_508 = arith.constant 0 : index
    %c6_509 = arith.constant 6 : index
    %c0_510 = arith.constant 0 : index
    %c20_511 = arith.constant 20 : index
    %296 = vector.load %arg2[%c0_508, %c6_509, %c0_510, %c20_511] : memref<1x8x4x128xf32, #tpu.memory_space<vmem>>, vector<1x1x4x80xf32>
    %297 = vector.shape_cast %296 : vector<1x1x4x80xf32> to vector<4x80xf32>
    %c0_512 = arith.constant 0 : index
    %c6_513 = arith.constant 6 : index
    %c0_514 = arith.constant 0 : index
    %c21_515 = arith.constant 21 : index
    %298 = vector.load %arg2[%c0_512, %c6_513, %c0_514, %c21_515] : memref<1x8x4x128xf32, #tpu.memory_space<vmem>>, vector<1x1x4x80xf32>
    %299 = vector.shape_cast %298 : vector<1x1x4x80xf32> to vector<4x80xf32>
    %c0_516 = arith.constant 0 : index
    %c6_517 = arith.constant 6 : index
    %c0_518 = arith.constant 0 : index
    %c22_519 = arith.constant 22 : index
    %300 = vector.load %arg2[%c0_516, %c6_517, %c0_518, %c22_519] : memref<1x8x4x128xf32, #tpu.memory_space<vmem>>, vector<1x1x4x80xf32>
    %301 = vector.shape_cast %300 : vector<1x1x4x80xf32> to vector<4x80xf32>
    %c0_520 = arith.constant 0 : index
    %c6_521 = arith.constant 6 : index
    %c0_522 = arith.constant 0 : index
    %c30_523 = arith.constant 30 : index
    %302 = vector.load %arg2[%c0_520, %c6_521, %c0_522, %c30_523] : memref<1x8x4x128xf32, #tpu.memory_space<vmem>>, vector<1x1x4x80xf32>
    %303 = vector.shape_cast %302 : vector<1x1x4x80xf32> to vector<4x80xf32>
    %c0_524 = arith.constant 0 : index
    %c6_525 = arith.constant 6 : index
    %c0_526 = arith.constant 0 : index
    %c31_527 = arith.constant 31 : index
    %304 = vector.load %arg2[%c0_524, %c6_525, %c0_526, %c31_527] : memref<1x8x4x128xf32, #tpu.memory_space<vmem>>, vector<1x1x4x80xf32>
    %305 = vector.shape_cast %304 : vector<1x1x4x80xf32> to vector<4x80xf32>
    %c0_528 = arith.constant 0 : index
    %c6_529 = arith.constant 6 : index
    %c0_530 = arith.constant 0 : index
    %c32_531 = arith.constant 32 : index
    %306 = vector.load %arg2[%c0_528, %c6_529, %c0_530, %c32_531] : memref<1x8x4x128xf32, #tpu.memory_space<vmem>>, vector<1x1x4x80xf32>
    %307 = vector.shape_cast %306 : vector<1x1x4x80xf32> to vector<4x80xf32>
    %308 = tpu.concatenate %255, %257, %259, %261, %263, %265, %267, %269, %271, %273, %275, %277, %279, %281, %283, %285 in 0 : vector<4x80xf32>, vector<4x80xf32>, vector<4x80xf32>, vector<4x80xf32>, vector<4x80xf32>, vector<4x80xf32>, vector<4x80xf32>, vector<4x80xf32>, vector<4x80xf32>, vector<4x80xf32>, vector<4x80xf32>, vector<4x80xf32>, vector<4x80xf32>, vector<4x80xf32>, vector<4x80xf32>, vector<4x80xf32> -> vector<64x80xf32>
    %309 = tpu.concatenate %287, %289, %291, %293, %295, %297, %299, %301, %303, %305, %307 in 0 : vector<4x80xf32>, vector<4x80xf32>, vector<4x80xf32>, vector<4x80xf32>, vector<4x80xf32>, vector<4x80xf32>, vector<4x80xf32>, vector<4x80xf32>, vector<4x80xf32>, vector<4x80xf32>, vector<4x80xf32> -> vector<44x80xf32>
    %310 = tpu.concatenate %308, %309 in 0 : vector<64x80xf32>, vector<44x80xf32> -> vector<108x80xf32>
    %c0_532 = arith.constant 0 : index
    %c5_533 = arith.constant 5 : index
    %c0_534 = arith.constant 0 : index
    %c10_535 = arith.constant 10 : index
    %311 = vector.load %arg2[%c0_532, %c5_533, %c0_534, %c10_535] : memref<1x8x4x128xf32, #tpu.memory_space<vmem>>, vector<1x1x4x80xf32>
    %312 = vector.shape_cast %311 : vector<1x1x4x80xf32> to vector<4x80xf32>
    %c0_536 = arith.constant 0 : index
    %c5_537 = arith.constant 5 : index
    %c0_538 = arith.constant 0 : index
    %c11_539 = arith.constant 11 : index
    %313 = vector.load %arg2[%c0_536, %c5_537, %c0_538, %c11_539] : memref<1x8x4x128xf32, #tpu.memory_space<vmem>>, vector<1x1x4x80xf32>
    %314 = vector.shape_cast %313 : vector<1x1x4x80xf32> to vector<4x80xf32>
    %c0_540 = arith.constant 0 : index
    %c5_541 = arith.constant 5 : index
    %c0_542 = arith.constant 0 : index
    %c12_543 = arith.constant 12 : index
    %315 = vector.load %arg2[%c0_540, %c5_541, %c0_542, %c12_543] : memref<1x8x4x128xf32, #tpu.memory_space<vmem>>, vector<1x1x4x80xf32>
    %316 = vector.shape_cast %315 : vector<1x1x4x80xf32> to vector<4x80xf32>
    %c0_544 = arith.constant 0 : index
    %c5_545 = arith.constant 5 : index
    %c0_546 = arith.constant 0 : index
    %c20_547 = arith.constant 20 : index
    %317 = vector.load %arg2[%c0_544, %c5_545, %c0_546, %c20_547] : memref<1x8x4x128xf32, #tpu.memory_space<vmem>>, vector<1x1x4x80xf32>
    %318 = vector.shape_cast %317 : vector<1x1x4x80xf32> to vector<4x80xf32>
    %c0_548 = arith.constant 0 : index
    %c5_549 = arith.constant 5 : index
    %c0_550 = arith.constant 0 : index
    %c21_551 = arith.constant 21 : index
    %319 = vector.load %arg2[%c0_548, %c5_549, %c0_550, %c21_551] : memref<1x8x4x128xf32, #tpu.memory_space<vmem>>, vector<1x1x4x80xf32>
    %320 = vector.shape_cast %319 : vector<1x1x4x80xf32> to vector<4x80xf32>
    %c0_552 = arith.constant 0 : index
    %c5_553 = arith.constant 5 : index
    %c0_554 = arith.constant 0 : index
    %c22_555 = arith.constant 22 : index
    %321 = vector.load %arg2[%c0_552, %c5_553, %c0_554, %c22_555] : memref<1x8x4x128xf32, #tpu.memory_space<vmem>>, vector<1x1x4x80xf32>
    %322 = vector.shape_cast %321 : vector<1x1x4x80xf32> to vector<4x80xf32>
    %c0_556 = arith.constant 0 : index
    %c5_557 = arith.constant 5 : index
    %c0_558 = arith.constant 0 : index
    %c30_559 = arith.constant 30 : index
    %323 = vector.load %arg2[%c0_556, %c5_557, %c0_558, %c30_559] : memref<1x8x4x128xf32, #tpu.memory_space<vmem>>, vector<1x1x4x80xf32>
    %324 = vector.shape_cast %323 : vector<1x1x4x80xf32> to vector<4x80xf32>
    %c0_560 = arith.constant 0 : index
    %c5_561 = arith.constant 5 : index
    %c0_562 = arith.constant 0 : index
    %c31_563 = arith.constant 31 : index
    %325 = vector.load %arg2[%c0_560, %c5_561, %c0_562, %c31_563] : memref<1x8x4x128xf32, #tpu.memory_space<vmem>>, vector<1x1x4x80xf32>
    %326 = vector.shape_cast %325 : vector<1x1x4x80xf32> to vector<4x80xf32>
    %c0_564 = arith.constant 0 : index
    %c5_565 = arith.constant 5 : index
    %c0_566 = arith.constant 0 : index
    %c32_567 = arith.constant 32 : index
    %327 = vector.load %arg2[%c0_564, %c5_565, %c0_566, %c32_567] : memref<1x8x4x128xf32, #tpu.memory_space<vmem>>, vector<1x1x4x80xf32>
    %328 = vector.shape_cast %327 : vector<1x1x4x80xf32> to vector<4x80xf32>
    %c0_568 = arith.constant 0 : index
    %c6_569 = arith.constant 6 : index
    %c0_570 = arith.constant 0 : index
    %c10_571 = arith.constant 10 : index
    %329 = vector.load %arg2[%c0_568, %c6_569, %c0_570, %c10_571] : memref<1x8x4x128xf32, #tpu.memory_space<vmem>>, vector<1x1x4x80xf32>
    %330 = vector.shape_cast %329 : vector<1x1x4x80xf32> to vector<4x80xf32>
    %c0_572 = arith.constant 0 : index
    %c6_573 = arith.constant 6 : index
    %c0_574 = arith.constant 0 : index
    %c11_575 = arith.constant 11 : index
    %331 = vector.load %arg2[%c0_572, %c6_573, %c0_574, %c11_575] : memref<1x8x4x128xf32, #tpu.memory_space<vmem>>, vector<1x1x4x80xf32>
    %332 = vector.shape_cast %331 : vector<1x1x4x80xf32> to vector<4x80xf32>
    %c0_576 = arith.constant 0 : index
    %c6_577 = arith.constant 6 : index
    %c0_578 = arith.constant 0 : index
    %c12_579 = arith.constant 12 : index
    %333 = vector.load %arg2[%c0_576, %c6_577, %c0_578, %c12_579] : memref<1x8x4x128xf32, #tpu.memory_space<vmem>>, vector<1x1x4x80xf32>
    %334 = vector.shape_cast %333 : vector<1x1x4x80xf32> to vector<4x80xf32>
    %c0_580 = arith.constant 0 : index
    %c6_581 = arith.constant 6 : index
    %c0_582 = arith.constant 0 : index
    %c20_583 = arith.constant 20 : index
    %335 = vector.load %arg2[%c0_580, %c6_581, %c0_582, %c20_583] : memref<1x8x4x128xf32, #tpu.memory_space<vmem>>, vector<1x1x4x80xf32>
    %336 = vector.shape_cast %335 : vector<1x1x4x80xf32> to vector<4x80xf32>
    %c0_584 = arith.constant 0 : index
    %c6_585 = arith.constant 6 : index
    %c0_586 = arith.constant 0 : index
    %c21_587 = arith.constant 21 : index
    %337 = vector.load %arg2[%c0_584, %c6_585, %c0_586, %c21_587] : memref<1x8x4x128xf32, #tpu.memory_space<vmem>>, vector<1x1x4x80xf32>
    %338 = vector.shape_cast %337 : vector<1x1x4x80xf32> to vector<4x80xf32>
    %c0_588 = arith.constant 0 : index
    %c6_589 = arith.constant 6 : index
    %c0_590 = arith.constant 0 : index
    %c22_591 = arith.constant 22 : index
    %339 = vector.load %arg2[%c0_588, %c6_589, %c0_590, %c22_591] : memref<1x8x4x128xf32, #tpu.memory_space<vmem>>, vector<1x1x4x80xf32>
    %340 = vector.shape_cast %339 : vector<1x1x4x80xf32> to vector<4x80xf32>
    %c0_592 = arith.constant 0 : index
    %c6_593 = arith.constant 6 : index
    %c0_594 = arith.constant 0 : index
    %c30_595 = arith.constant 30 : index
    %341 = vector.load %arg2[%c0_592, %c6_593, %c0_594, %c30_595] : memref<1x8x4x128xf32, #tpu.memory_space<vmem>>, vector<1x1x4x80xf32>
    %342 = vector.shape_cast %341 : vector<1x1x4x80xf32> to vector<4x80xf32>
    %c0_596 = arith.constant 0 : index
    %c6_597 = arith.constant 6 : index
    %c0_598 = arith.constant 0 : index
    %c31_599 = arith.constant 31 : index
    %343 = vector.load %arg2[%c0_596, %c6_597, %c0_598, %c31_599] : memref<1x8x4x128xf32, #tpu.memory_space<vmem>>, vector<1x1x4x80xf32>
    %344 = vector.shape_cast %343 : vector<1x1x4x80xf32> to vector<4x80xf32>
    %c0_600 = arith.constant 0 : index
    %c6_601 = arith.constant 6 : index
    %c0_602 = arith.constant 0 : index
    %c32_603 = arith.constant 32 : index
    %345 = vector.load %arg2[%c0_600, %c6_601, %c0_602, %c32_603] : memref<1x8x4x128xf32, #tpu.memory_space<vmem>>, vector<1x1x4x80xf32>
    %346 = vector.shape_cast %345 : vector<1x1x4x80xf32> to vector<4x80xf32>
    %c0_604 = arith.constant 0 : index
    %c7 = arith.constant 7 : index
    %c0_605 = arith.constant 0 : index
    %c10_606 = arith.constant 10 : index
    %347 = vector.load %arg2[%c0_604, %c7, %c0_605, %c10_606] : memref<1x8x4x128xf32, #tpu.memory_space<vmem>>, vector<1x1x4x80xf32>
    %348 = vector.shape_cast %347 : vector<1x1x4x80xf32> to vector<4x80xf32>
    %c0_607 = arith.constant 0 : index
    %c7_608 = arith.constant 7 : index
    %c0_609 = arith.constant 0 : index
    %c11_610 = arith.constant 11 : index
    %349 = vector.load %arg2[%c0_607, %c7_608, %c0_609, %c11_610] : memref<1x8x4x128xf32, #tpu.memory_space<vmem>>, vector<1x1x4x80xf32>
    %350 = vector.shape_cast %349 : vector<1x1x4x80xf32> to vector<4x80xf32>
    %c0_611 = arith.constant 0 : index
    %c7_612 = arith.constant 7 : index
    %c0_613 = arith.constant 0 : index
    %c12_614 = arith.constant 12 : index
    %351 = vector.load %arg2[%c0_611, %c7_612, %c0_613, %c12_614] : memref<1x8x4x128xf32, #tpu.memory_space<vmem>>, vector<1x1x4x80xf32>
    %352 = vector.shape_cast %351 : vector<1x1x4x80xf32> to vector<4x80xf32>
    %c0_615 = arith.constant 0 : index
    %c7_616 = arith.constant 7 : index
    %c0_617 = arith.constant 0 : index
    %c20_618 = arith.constant 20 : index
    %353 = vector.load %arg2[%c0_615, %c7_616, %c0_617, %c20_618] : memref<1x8x4x128xf32, #tpu.memory_space<vmem>>, vector<1x1x4x80xf32>
    %354 = vector.shape_cast %353 : vector<1x1x4x80xf32> to vector<4x80xf32>
    %c0_619 = arith.constant 0 : index
    %c7_620 = arith.constant 7 : index
    %c0_621 = arith.constant 0 : index
    %c21_622 = arith.constant 21 : index
    %355 = vector.load %arg2[%c0_619, %c7_620, %c0_621, %c21_622] : memref<1x8x4x128xf32, #tpu.memory_space<vmem>>, vector<1x1x4x80xf32>
    %356 = vector.shape_cast %355 : vector<1x1x4x80xf32> to vector<4x80xf32>
    %c0_623 = arith.constant 0 : index
    %c7_624 = arith.constant 7 : index
    %c0_625 = arith.constant 0 : index
    %c22_626 = arith.constant 22 : index
    %357 = vector.load %arg2[%c0_623, %c7_624, %c0_625, %c22_626] : memref<1x8x4x128xf32, #tpu.memory_space<vmem>>, vector<1x1x4x80xf32>
    %358 = vector.shape_cast %357 : vector<1x1x4x80xf32> to vector<4x80xf32>
    %c0_627 = arith.constant 0 : index
    %c7_628 = arith.constant 7 : index
    %c0_629 = arith.constant 0 : index
    %c30_630 = arith.constant 30 : index
    %359 = vector.load %arg2[%c0_627, %c7_628, %c0_629, %c30_630] : memref<1x8x4x128xf32, #tpu.memory_space<vmem>>, vector<1x1x4x80xf32>
    %360 = vector.shape_cast %359 : vector<1x1x4x80xf32> to vector<4x80xf32>
    %c0_631 = arith.constant 0 : index
    %c7_632 = arith.constant 7 : index
    %c0_633 = arith.constant 0 : index
    %c31_634 = arith.constant 31 : index
    %361 = vector.load %arg2[%c0_631, %c7_632, %c0_633, %c31_634] : memref<1x8x4x128xf32, #tpu.memory_space<vmem>>, vector<1x1x4x80xf32>
    %362 = vector.shape_cast %361 : vector<1x1x4x80xf32> to vector<4x80xf32>
    %c0_635 = arith.constant 0 : index
    %c7_636 = arith.constant 7 : index
    %c0_637 = arith.constant 0 : index
    %c32_638 = arith.constant 32 : index
    %363 = vector.load %arg2[%c0_635, %c7_636, %c0_637, %c32_638] : memref<1x8x4x128xf32, #tpu.memory_space<vmem>>, vector<1x1x4x80xf32>
    %364 = vector.shape_cast %363 : vector<1x1x4x80xf32> to vector<4x80xf32>
    %365 = tpu.concatenate %312, %314, %316, %318, %320, %322, %324, %326, %328, %330, %332, %334, %336, %338, %340, %342 in 0 : vector<4x80xf32>, vector<4x80xf32>, vector<4x80xf32>, vector<4x80xf32>, vector<4x80xf32>, vector<4x80xf32>, vector<4x80xf32>, vector<4x80xf32>, vector<4x80xf32>, vector<4x80xf32>, vector<4x80xf32>, vector<4x80xf32>, vector<4x80xf32>, vector<4x80xf32>, vector<4x80xf32>, vector<4x80xf32> -> vector<64x80xf32>
    %366 = tpu.concatenate %344, %346, %348, %350, %352, %354, %356, %358, %360, %362, %364 in 0 : vector<4x80xf32>, vector<4x80xf32>, vector<4x80xf32>, vector<4x80xf32>, vector<4x80xf32>, vector<4x80xf32>, vector<4x80xf32>, vector<4x80xf32>, vector<4x80xf32>, vector<4x80xf32>, vector<4x80xf32> -> vector<44x80xf32>
    %367 = tpu.concatenate %365, %366 in 0 : vector<64x80xf32>, vector<44x80xf32> -> vector<108x80xf32>
    %c0_639 = arith.constant 0 : index
    %c6_640 = arith.constant 6 : index
    %c0_641 = arith.constant 0 : index
    %c10_642 = arith.constant 10 : index
    %368 = vector.load %arg2[%c0_639, %c6_640, %c0_641, %c10_642] : memref<1x8x4x128xf32, #tpu.memory_space<vmem>>, vector<1x1x4x80xf32>
    %369 = vector.shape_cast %368 : vector<1x1x4x80xf32> to vector<4x80xf32>
    %c0_643 = arith.constant 0 : index
    %c6_644 = arith.constant 6 : index
    %c0_645 = arith.constant 0 : index
    %c11_646 = arith.constant 11 : index
    %370 = vector.load %arg2[%c0_643, %c6_644, %c0_645, %c11_646] : memref<1x8x4x128xf32, #tpu.memory_space<vmem>>, vector<1x1x4x80xf32>
    %371 = vector.shape_cast %370 : vector<1x1x4x80xf32> to vector<4x80xf32>
    %c0_647 = arith.constant 0 : index
    %c6_648 = arith.constant 6 : index
    %c0_649 = arith.constant 0 : index
    %c12_650 = arith.constant 12 : index
    %372 = vector.load %arg2[%c0_647, %c6_648, %c0_649, %c12_650] : memref<1x8x4x128xf32, #tpu.memory_space<vmem>>, vector<1x1x4x80xf32>
    %373 = vector.shape_cast %372 : vector<1x1x4x80xf32> to vector<4x80xf32>
    %c0_651 = arith.constant 0 : index
    %c6_652 = arith.constant 6 : index
    %c0_653 = arith.constant 0 : index
    %c20_654 = arith.constant 20 : index
    %374 = vector.load %arg2[%c0_651, %c6_652, %c0_653, %c20_654] : memref<1x8x4x128xf32, #tpu.memory_space<vmem>>, vector<1x1x4x80xf32>
    %375 = vector.shape_cast %374 : vector<1x1x4x80xf32> to vector<4x80xf32>
    %c0_655 = arith.constant 0 : index
    %c6_656 = arith.constant 6 : index
    %c0_657 = arith.constant 0 : index
    %c21_658 = arith.constant 21 : index
    %376 = vector.load %arg2[%c0_655, %c6_656, %c0_657, %c21_658] : memref<1x8x4x128xf32, #tpu.memory_space<vmem>>, vector<1x1x4x80xf32>
    %377 = vector.shape_cast %376 : vector<1x1x4x80xf32> to vector<4x80xf32>
    %c0_659 = arith.constant 0 : index
    %c6_660 = arith.constant 6 : index
    %c0_661 = arith.constant 0 : index
    %c22_662 = arith.constant 22 : index
    %378 = vector.load %arg2[%c0_659, %c6_660, %c0_661, %c22_662] : memref<1x8x4x128xf32, #tpu.memory_space<vmem>>, vector<1x1x4x80xf32>
    %379 = vector.shape_cast %378 : vector<1x1x4x80xf32> to vector<4x80xf32>
    %c0_663 = arith.constant 0 : index
    %c6_664 = arith.constant 6 : index
    %c0_665 = arith.constant 0 : index
    %c30_666 = arith.constant 30 : index
    %380 = vector.load %arg2[%c0_663, %c6_664, %c0_665, %c30_666] : memref<1x8x4x128xf32, #tpu.memory_space<vmem>>, vector<1x1x4x80xf32>
    %381 = vector.shape_cast %380 : vector<1x1x4x80xf32> to vector<4x80xf32>
    %c0_667 = arith.constant 0 : index
    %c6_668 = arith.constant 6 : index
    %c0_669 = arith.constant 0 : index
    %c31_670 = arith.constant 31 : index
    %382 = vector.load %arg2[%c0_667, %c6_668, %c0_669, %c31_670] : memref<1x8x4x128xf32, #tpu.memory_space<vmem>>, vector<1x1x4x80xf32>
    %383 = vector.shape_cast %382 : vector<1x1x4x80xf32> to vector<4x80xf32>
    %c0_671 = arith.constant 0 : index
    %c6_672 = arith.constant 6 : index
    %c0_673 = arith.constant 0 : index
    %c32_674 = arith.constant 32 : index
    %384 = vector.load %arg2[%c0_671, %c6_672, %c0_673, %c32_674] : memref<1x8x4x128xf32, #tpu.memory_space<vmem>>, vector<1x1x4x80xf32>
    %385 = vector.shape_cast %384 : vector<1x1x4x80xf32> to vector<4x80xf32>
    %c0_675 = arith.constant 0 : index
    %c7_676 = arith.constant 7 : index
    %c0_677 = arith.constant 0 : index
    %c10_678 = arith.constant 10 : index
    %386 = vector.load %arg2[%c0_675, %c7_676, %c0_677, %c10_678] : memref<1x8x4x128xf32, #tpu.memory_space<vmem>>, vector<1x1x4x80xf32>
    %387 = vector.shape_cast %386 : vector<1x1x4x80xf32> to vector<4x80xf32>
    %c0_679 = arith.constant 0 : index
    %c7_680 = arith.constant 7 : index
    %c0_681 = arith.constant 0 : index
    %c11_682 = arith.constant 11 : index
    %388 = vector.load %arg2[%c0_679, %c7_680, %c0_681, %c11_682] : memref<1x8x4x128xf32, #tpu.memory_space<vmem>>, vector<1x1x4x80xf32>
    %389 = vector.shape_cast %388 : vector<1x1x4x80xf32> to vector<4x80xf32>
    %c0_683 = arith.constant 0 : index
    %c7_684 = arith.constant 7 : index
    %c0_685 = arith.constant 0 : index
    %c12_686 = arith.constant 12 : index
    %390 = vector.load %arg2[%c0_683, %c7_684, %c0_685, %c12_686] : memref<1x8x4x128xf32, #tpu.memory_space<vmem>>, vector<1x1x4x80xf32>
    %391 = vector.shape_cast %390 : vector<1x1x4x80xf32> to vector<4x80xf32>
    %c0_687 = arith.constant 0 : index
    %c7_688 = arith.constant 7 : index
    %c0_689 = arith.constant 0 : index
    %c20_690 = arith.constant 20 : index
    %392 = vector.load %arg2[%c0_687, %c7_688, %c0_689, %c20_690] : memref<1x8x4x128xf32, #tpu.memory_space<vmem>>, vector<1x1x4x80xf32>
    %393 = vector.shape_cast %392 : vector<1x1x4x80xf32> to vector<4x80xf32>
    %c0_691 = arith.constant 0 : index
    %c7_692 = arith.constant 7 : index
    %c0_693 = arith.constant 0 : index
    %c21_694 = arith.constant 21 : index
    %394 = vector.load %arg2[%c0_691, %c7_692, %c0_693, %c21_694] : memref<1x8x4x128xf32, #tpu.memory_space<vmem>>, vector<1x1x4x80xf32>
    %395 = vector.shape_cast %394 : vector<1x1x4x80xf32> to vector<4x80xf32>
    %c0_695 = arith.constant 0 : index
    %c7_696 = arith.constant 7 : index
    %c0_697 = arith.constant 0 : index
    %c22_698 = arith.constant 22 : index
    %396 = vector.load %arg2[%c0_695, %c7_696, %c0_697, %c22_698] : memref<1x8x4x128xf32, #tpu.memory_space<vmem>>, vector<1x1x4x80xf32>
    %397 = vector.shape_cast %396 : vector<1x1x4x80xf32> to vector<4x80xf32>
    %c0_699 = arith.constant 0 : index
    %c7_700 = arith.constant 7 : index
    %c0_701 = arith.constant 0 : index
    %c30_702 = arith.constant 30 : index
    %398 = vector.load %arg2[%c0_699, %c7_700, %c0_701, %c30_702] : memref<1x8x4x128xf32, #tpu.memory_space<vmem>>, vector<1x1x4x80xf32>
    %399 = vector.shape_cast %398 : vector<1x1x4x80xf32> to vector<4x80xf32>
    %c0_703 = arith.constant 0 : index
    %c7_704 = arith.constant 7 : index
    %c0_705 = arith.constant 0 : index
    %c31_706 = arith.constant 31 : index
    %400 = vector.load %arg2[%c0_703, %c7_704, %c0_705, %c31_706] : memref<1x8x4x128xf32, #tpu.memory_space<vmem>>, vector<1x1x4x80xf32>
    %401 = vector.shape_cast %400 : vector<1x1x4x80xf32> to vector<4x80xf32>
    %c0_707 = arith.constant 0 : index
    %c7_708 = arith.constant 7 : index
    %c0_709 = arith.constant 0 : index
    %c32_710 = arith.constant 32 : index
    %402 = vector.load %arg2[%c0_707, %c7_708, %c0_709, %c32_710] : memref<1x8x4x128xf32, #tpu.memory_space<vmem>>, vector<1x1x4x80xf32>
    %403 = vector.shape_cast %402 : vector<1x1x4x80xf32> to vector<4x80xf32>
    %c0_711 = arith.constant 0 : index
    %c0_712 = arith.constant 0 : index
    %c0_713 = arith.constant 0 : index
    %c10_714 = arith.constant 10 : index
    %404 = vector.load %arg3[%c0_711, %c0_712, %c0_713, %c10_714] : memref<1x2x4x128xf32, #tpu.memory_space<vmem>>, vector<1x1x4x80xf32>
    %405 = vector.shape_cast %404 : vector<1x1x4x80xf32> to vector<4x80xf32>
    %c0_715 = arith.constant 0 : index
    %c0_716 = arith.constant 0 : index
    %c0_717 = arith.constant 0 : index
    %c11_718 = arith.constant 11 : index
    %406 = vector.load %arg3[%c0_715, %c0_716, %c0_717, %c11_718] : memref<1x2x4x128xf32, #tpu.memory_space<vmem>>, vector<1x1x4x80xf32>
    %407 = vector.shape_cast %406 : vector<1x1x4x80xf32> to vector<4x80xf32>
    %c0_719 = arith.constant 0 : index
    %c0_720 = arith.constant 0 : index
    %c0_721 = arith.constant 0 : index
    %c12_722 = arith.constant 12 : index
    %408 = vector.load %arg3[%c0_719, %c0_720, %c0_721, %c12_722] : memref<1x2x4x128xf32, #tpu.memory_space<vmem>>, vector<1x1x4x80xf32>
    %409 = vector.shape_cast %408 : vector<1x1x4x80xf32> to vector<4x80xf32>
    %c0_723 = arith.constant 0 : index
    %c0_724 = arith.constant 0 : index
    %c0_725 = arith.constant 0 : index
    %c20_726 = arith.constant 20 : index
    %410 = vector.load %arg3[%c0_723, %c0_724, %c0_725, %c20_726] : memref<1x2x4x128xf32, #tpu.memory_space<vmem>>, vector<1x1x4x80xf32>
    %411 = vector.shape_cast %410 : vector<1x1x4x80xf32> to vector<4x80xf32>
    %c0_727 = arith.constant 0 : index
    %c0_728 = arith.constant 0 : index
    %c0_729 = arith.constant 0 : index
    %c21_730 = arith.constant 21 : index
    %412 = vector.load %arg3[%c0_727, %c0_728, %c0_729, %c21_730] : memref<1x2x4x128xf32, #tpu.memory_space<vmem>>, vector<1x1x4x80xf32>
    %413 = vector.shape_cast %412 : vector<1x1x4x80xf32> to vector<4x80xf32>
    %c0_731 = arith.constant 0 : index
    %c0_732 = arith.constant 0 : index
    %c0_733 = arith.constant 0 : index
    %c22_734 = arith.constant 22 : index
    %414 = vector.load %arg3[%c0_731, %c0_732, %c0_733, %c22_734] : memref<1x2x4x128xf32, #tpu.memory_space<vmem>>, vector<1x1x4x80xf32>
    %415 = vector.shape_cast %414 : vector<1x1x4x80xf32> to vector<4x80xf32>
    %c0_735 = arith.constant 0 : index
    %c0_736 = arith.constant 0 : index
    %c0_737 = arith.constant 0 : index
    %c30_738 = arith.constant 30 : index
    %416 = vector.load %arg3[%c0_735, %c0_736, %c0_737, %c30_738] : memref<1x2x4x128xf32, #tpu.memory_space<vmem>>, vector<1x1x4x80xf32>
    %417 = vector.shape_cast %416 : vector<1x1x4x80xf32> to vector<4x80xf32>
    %c0_739 = arith.constant 0 : index
    %c0_740 = arith.constant 0 : index
    %c0_741 = arith.constant 0 : index
    %c31_742 = arith.constant 31 : index
    %418 = vector.load %arg3[%c0_739, %c0_740, %c0_741, %c31_742] : memref<1x2x4x128xf32, #tpu.memory_space<vmem>>, vector<1x1x4x80xf32>
    %419 = vector.shape_cast %418 : vector<1x1x4x80xf32> to vector<4x80xf32>
    %c0_743 = arith.constant 0 : index
    %c0_744 = arith.constant 0 : index
    %c0_745 = arith.constant 0 : index
    %c32_746 = arith.constant 32 : index
    %420 = vector.load %arg3[%c0_743, %c0_744, %c0_745, %c32_746] : memref<1x2x4x128xf32, #tpu.memory_space<vmem>>, vector<1x1x4x80xf32>
    %421 = vector.shape_cast %420 : vector<1x1x4x80xf32> to vector<4x80xf32>
    %422 = tpu.concatenate %369, %371, %373, %375, %377, %379, %381, %383, %385, %387, %389, %391, %393, %395, %397, %399 in 0 : vector<4x80xf32>, vector<4x80xf32>, vector<4x80xf32>, vector<4x80xf32>, vector<4x80xf32>, vector<4x80xf32>, vector<4x80xf32>, vector<4x80xf32>, vector<4x80xf32>, vector<4x80xf32>, vector<4x80xf32>, vector<4x80xf32>, vector<4x80xf32>, vector<4x80xf32>, vector<4x80xf32>, vector<4x80xf32> -> vector<64x80xf32>
    %423 = tpu.concatenate %401, %403, %405, %407, %409, %411, %413, %415, %417, %419, %421 in 0 : vector<4x80xf32>, vector<4x80xf32>, vector<4x80xf32>, vector<4x80xf32>, vector<4x80xf32>, vector<4x80xf32>, vector<4x80xf32>, vector<4x80xf32>, vector<4x80xf32>, vector<4x80xf32>, vector<4x80xf32> -> vector<44x80xf32>
    %424 = tpu.concatenate %422, %423 in 0 : vector<64x80xf32>, vector<44x80xf32> -> vector<108x80xf32>
    %c0_747 = arith.constant 0 : index
    %c7_748 = arith.constant 7 : index
    %c0_749 = arith.constant 0 : index
    %c10_750 = arith.constant 10 : index
    %425 = vector.load %arg2[%c0_747, %c7_748, %c0_749, %c10_750] : memref<1x8x4x128xf32, #tpu.memory_space<vmem>>, vector<1x1x4x80xf32>
    %426 = vector.shape_cast %425 : vector<1x1x4x80xf32> to vector<4x80xf32>
    %c0_751 = arith.constant 0 : index
    %c7_752 = arith.constant 7 : index
    %c0_753 = arith.constant 0 : index
    %c11_754 = arith.constant 11 : index
    %427 = vector.load %arg2[%c0_751, %c7_752, %c0_753, %c11_754] : memref<1x8x4x128xf32, #tpu.memory_space<vmem>>, vector<1x1x4x80xf32>
    %428 = vector.shape_cast %427 : vector<1x1x4x80xf32> to vector<4x80xf32>
    %c0_755 = arith.constant 0 : index
    %c7_756 = arith.constant 7 : index
    %c0_757 = arith.constant 0 : index
    %c12_758 = arith.constant 12 : index
    %429 = vector.load %arg2[%c0_755, %c7_756, %c0_757, %c12_758] : memref<1x8x4x128xf32, #tpu.memory_space<vmem>>, vector<1x1x4x80xf32>
    %430 = vector.shape_cast %429 : vector<1x1x4x80xf32> to vector<4x80xf32>
    %c0_759 = arith.constant 0 : index
    %c7_760 = arith.constant 7 : index
    %c0_761 = arith.constant 0 : index
    %c20_762 = arith.constant 20 : index
    %431 = vector.load %arg2[%c0_759, %c7_760, %c0_761, %c20_762] : memref<1x8x4x128xf32, #tpu.memory_space<vmem>>, vector<1x1x4x80xf32>
    %432 = vector.shape_cast %431 : vector<1x1x4x80xf32> to vector<4x80xf32>
    %c0_763 = arith.constant 0 : index
    %c7_764 = arith.constant 7 : index
    %c0_765 = arith.constant 0 : index
    %c21_766 = arith.constant 21 : index
    %433 = vector.load %arg2[%c0_763, %c7_764, %c0_765, %c21_766] : memref<1x8x4x128xf32, #tpu.memory_space<vmem>>, vector<1x1x4x80xf32>
    %434 = vector.shape_cast %433 : vector<1x1x4x80xf32> to vector<4x80xf32>
    %c0_767 = arith.constant 0 : index
    %c7_768 = arith.constant 7 : index
    %c0_769 = arith.constant 0 : index
    %c22_770 = arith.constant 22 : index
    %435 = vector.load %arg2[%c0_767, %c7_768, %c0_769, %c22_770] : memref<1x8x4x128xf32, #tpu.memory_space<vmem>>, vector<1x1x4x80xf32>
    %436 = vector.shape_cast %435 : vector<1x1x4x80xf32> to vector<4x80xf32>
    %c0_771 = arith.constant 0 : index
    %c7_772 = arith.constant 7 : index
    %c0_773 = arith.constant 0 : index
    %c30_774 = arith.constant 30 : index
    %437 = vector.load %arg2[%c0_771, %c7_772, %c0_773, %c30_774] : memref<1x8x4x128xf32, #tpu.memory_space<vmem>>, vector<1x1x4x80xf32>
    %438 = vector.shape_cast %437 : vector<1x1x4x80xf32> to vector<4x80xf32>
    %c0_775 = arith.constant 0 : index
    %c7_776 = arith.constant 7 : index
    %c0_777 = arith.constant 0 : index
    %c31_778 = arith.constant 31 : index
    %439 = vector.load %arg2[%c0_775, %c7_776, %c0_777, %c31_778] : memref<1x8x4x128xf32, #tpu.memory_space<vmem>>, vector<1x1x4x80xf32>
    %440 = vector.shape_cast %439 : vector<1x1x4x80xf32> to vector<4x80xf32>
    %c0_779 = arith.constant 0 : index
    %c7_780 = arith.constant 7 : index
    %c0_781 = arith.constant 0 : index
    %c32_782 = arith.constant 32 : index
    %441 = vector.load %arg2[%c0_779, %c7_780, %c0_781, %c32_782] : memref<1x8x4x128xf32, #tpu.memory_space<vmem>>, vector<1x1x4x80xf32>
    %442 = vector.shape_cast %441 : vector<1x1x4x80xf32> to vector<4x80xf32>
    %c0_783 = arith.constant 0 : index
    %c0_784 = arith.constant 0 : index
    %c0_785 = arith.constant 0 : index
    %c10_786 = arith.constant 10 : index
    %443 = vector.load %arg3[%c0_783, %c0_784, %c0_785, %c10_786] : memref<1x2x4x128xf32, #tpu.memory_space<vmem>>, vector<1x1x4x80xf32>
    %444 = vector.shape_cast %443 : vector<1x1x4x80xf32> to vector<4x80xf32>
    %c0_787 = arith.constant 0 : index
    %c0_788 = arith.constant 0 : index
    %c0_789 = arith.constant 0 : index
    %c11_790 = arith.constant 11 : index
    %445 = vector.load %arg3[%c0_787, %c0_788, %c0_789, %c11_790] : memref<1x2x4x128xf32, #tpu.memory_space<vmem>>, vector<1x1x4x80xf32>
    %446 = vector.shape_cast %445 : vector<1x1x4x80xf32> to vector<4x80xf32>
    %c0_791 = arith.constant 0 : index
    %c0_792 = arith.constant 0 : index
    %c0_793 = arith.constant 0 : index
    %c12_794 = arith.constant 12 : index
    %447 = vector.load %arg3[%c0_791, %c0_792, %c0_793, %c12_794] : memref<1x2x4x128xf32, #tpu.memory_space<vmem>>, vector<1x1x4x80xf32>
    %448 = vector.shape_cast %447 : vector<1x1x4x80xf32> to vector<4x80xf32>
    %c0_795 = arith.constant 0 : index
    %c0_796 = arith.constant 0 : index
    %c0_797 = arith.constant 0 : index
    %c20_798 = arith.constant 20 : index
    %449 = vector.load %arg3[%c0_795, %c0_796, %c0_797, %c20_798] : memref<1x2x4x128xf32, #tpu.memory_space<vmem>>, vector<1x1x4x80xf32>
    %450 = vector.shape_cast %449 : vector<1x1x4x80xf32> to vector<4x80xf32>
    %c0_799 = arith.constant 0 : index
    %c0_800 = arith.constant 0 : index
    %c0_801 = arith.constant 0 : index
    %c21_802 = arith.constant 21 : index
    %451 = vector.load %arg3[%c0_799, %c0_800, %c0_801, %c21_802] : memref<1x2x4x128xf32, #tpu.memory_space<vmem>>, vector<1x1x4x80xf32>
    %452 = vector.shape_cast %451 : vector<1x1x4x80xf32> to vector<4x80xf32>
    %c0_803 = arith.constant 0 : index
    %c0_804 = arith.constant 0 : index
    %c0_805 = arith.constant 0 : index
    %c22_806 = arith.constant 22 : index
    %453 = vector.load %arg3[%c0_803, %c0_804, %c0_805, %c22_806] : memref<1x2x4x128xf32, #tpu.memory_space<vmem>>, vector<1x1x4x80xf32>
    %454 = vector.shape_cast %453 : vector<1x1x4x80xf32> to vector<4x80xf32>
    %c0_807 = arith.constant 0 : index
    %c0_808 = arith.constant 0 : index
    %c0_809 = arith.constant 0 : index
    %c30_810 = arith.constant 30 : index
    %455 = vector.load %arg3[%c0_807, %c0_808, %c0_809, %c30_810] : memref<1x2x4x128xf32, #tpu.memory_space<vmem>>, vector<1x1x4x80xf32>
    %456 = vector.shape_cast %455 : vector<1x1x4x80xf32> to vector<4x80xf32>
    %c0_811 = arith.constant 0 : index
    %c0_812 = arith.constant 0 : index
    %c0_813 = arith.constant 0 : index
    %c31_814 = arith.constant 31 : index
    %457 = vector.load %arg3[%c0_811, %c0_812, %c0_813, %c31_814] : memref<1x2x4x128xf32, #tpu.memory_space<vmem>>, vector<1x1x4x80xf32>
    %458 = vector.shape_cast %457 : vector<1x1x4x80xf32> to vector<4x80xf32>
    %c0_815 = arith.constant 0 : index
    %c0_816 = arith.constant 0 : index
    %c0_817 = arith.constant 0 : index
    %c32_818 = arith.constant 32 : index
    %459 = vector.load %arg3[%c0_815, %c0_816, %c0_817, %c32_818] : memref<1x2x4x128xf32, #tpu.memory_space<vmem>>, vector<1x1x4x80xf32>
    %460 = vector.shape_cast %459 : vector<1x1x4x80xf32> to vector<4x80xf32>
    %c0_819 = arith.constant 0 : index
    %c1_820 = arith.constant 1 : index
    %c0_821 = arith.constant 0 : index
    %c10_822 = arith.constant 10 : index
    %461 = vector.load %arg3[%c0_819, %c1_820, %c0_821, %c10_822] : memref<1x2x4x128xf32, #tpu.memory_space<vmem>>, vector<1x1x4x80xf32>
    %462 = vector.shape_cast %461 : vector<1x1x4x80xf32> to vector<4x80xf32>
    %c0_823 = arith.constant 0 : index
    %c1_824 = arith.constant 1 : index
    %c0_825 = arith.constant 0 : index
    %c11_826 = arith.constant 11 : index
    %463 = vector.load %arg3[%c0_823, %c1_824, %c0_825, %c11_826] : memref<1x2x4x128xf32, #tpu.memory_space<vmem>>, vector<1x1x4x80xf32>
    %464 = vector.shape_cast %463 : vector<1x1x4x80xf32> to vector<4x80xf32>
    %c0_827 = arith.constant 0 : index
    %c1_828 = arith.constant 1 : index
    %c0_829 = arith.constant 0 : index
    %c12_830 = arith.constant 12 : index
    %465 = vector.load %arg3[%c0_827, %c1_828, %c0_829, %c12_830] : memref<1x2x4x128xf32, #tpu.memory_space<vmem>>, vector<1x1x4x80xf32>
    %466 = vector.shape_cast %465 : vector<1x1x4x80xf32> to vector<4x80xf32>
    %c0_831 = arith.constant 0 : index
    %c1_832 = arith.constant 1 : index
    %c0_833 = arith.constant 0 : index
    %c20_834 = arith.constant 20 : index
    %467 = vector.load %arg3[%c0_831, %c1_832, %c0_833, %c20_834] : memref<1x2x4x128xf32, #tpu.memory_space<vmem>>, vector<1x1x4x80xf32>
    %468 = vector.shape_cast %467 : vector<1x1x4x80xf32> to vector<4x80xf32>
    %c0_835 = arith.constant 0 : index
    %c1_836 = arith.constant 1 : index
    %c0_837 = arith.constant 0 : index
    %c21_838 = arith.constant 21 : index
    %469 = vector.load %arg3[%c0_835, %c1_836, %c0_837, %c21_838] : memref<1x2x4x128xf32, #tpu.memory_space<vmem>>, vector<1x1x4x80xf32>
    %470 = vector.shape_cast %469 : vector<1x1x4x80xf32> to vector<4x80xf32>
    %c0_839 = arith.constant 0 : index
    %c1_840 = arith.constant 1 : index
    %c0_841 = arith.constant 0 : index
    %c22_842 = arith.constant 22 : index
    %471 = vector.load %arg3[%c0_839, %c1_840, %c0_841, %c22_842] : memref<1x2x4x128xf32, #tpu.memory_space<vmem>>, vector<1x1x4x80xf32>
    %472 = vector.shape_cast %471 : vector<1x1x4x80xf32> to vector<4x80xf32>
    %c0_843 = arith.constant 0 : index
    %c1_844 = arith.constant 1 : index
    %c0_845 = arith.constant 0 : index
    %c30_846 = arith.constant 30 : index
    %473 = vector.load %arg3[%c0_843, %c1_844, %c0_845, %c30_846] : memref<1x2x4x128xf32, #tpu.memory_space<vmem>>, vector<1x1x4x80xf32>
    %474 = vector.shape_cast %473 : vector<1x1x4x80xf32> to vector<4x80xf32>
    %c0_847 = arith.constant 0 : index
    %c1_848 = arith.constant 1 : index
    %c0_849 = arith.constant 0 : index
    %c31_850 = arith.constant 31 : index
    %475 = vector.load %arg3[%c0_847, %c1_848, %c0_849, %c31_850] : memref<1x2x4x128xf32, #tpu.memory_space<vmem>>, vector<1x1x4x80xf32>
    %476 = vector.shape_cast %475 : vector<1x1x4x80xf32> to vector<4x80xf32>
    %c0_851 = arith.constant 0 : index
    %c1_852 = arith.constant 1 : index
    %c0_853 = arith.constant 0 : index
    %c32_854 = arith.constant 32 : index
    %477 = vector.load %arg3[%c0_851, %c1_852, %c0_853, %c32_854] : memref<1x2x4x128xf32, #tpu.memory_space<vmem>>, vector<1x1x4x80xf32>
    %478 = vector.shape_cast %477 : vector<1x1x4x80xf32> to vector<4x80xf32>
    %479 = tpu.concatenate %426, %428, %430, %432, %434, %436, %438, %440, %442, %444, %446, %448, %450, %452, %454, %456 in 0 : vector<4x80xf32>, vector<4x80xf32>, vector<4x80xf32>, vector<4x80xf32>, vector<4x80xf32>, vector<4x80xf32>, vector<4x80xf32>, vector<4x80xf32>, vector<4x80xf32>, vector<4x80xf32>, vector<4x80xf32>, vector<4x80xf32>, vector<4x80xf32>, vector<4x80xf32>, vector<4x80xf32>, vector<4x80xf32> -> vector<64x80xf32>
    %480 = tpu.concatenate %458, %460, %462, %464, %466, %468, %470, %472, %474, %476, %478 in 0 : vector<4x80xf32>, vector<4x80xf32>, vector<4x80xf32>, vector<4x80xf32>, vector<4x80xf32>, vector<4x80xf32>, vector<4x80xf32>, vector<4x80xf32>, vector<4x80xf32>, vector<4x80xf32>, vector<4x80xf32> -> vector<44x80xf32>
    %481 = tpu.concatenate %479, %480 in 0 : vector<64x80xf32>, vector<44x80xf32> -> vector<108x80xf32>
    %482 = tpu.concatenate %82, %139, %196, %253, %310, %367, %424, %481 in 1 : vector<108x80xf32>, vector<108x80xf32>, vector<108x80xf32>, vector<108x80xf32>, vector<108x80xf32>, vector<108x80xf32>, vector<108x80xf32>, vector<108x80xf32> -> vector<108x640xf32>
    %cst = arith.constant dense<0.000000e+00> : vector<4x640xf32>
    %483 = tpu.matmul %24, %482, %cst {dimension_numbers = #tpu.dot_dimension_numbers<[1], [0], [0], [1], [0, 0, 1, 1], [], []>} : vector<4x108xf32>, vector<108x640xf32>, vector<4x640xf32> -> vector<4x640xf32>
    %484 = vector.broadcast %25 : vector<4x1xf32> to vector<4x640xf32>
    %485 = arith.addf %483, %484 : vector<4x640xf32>
    %cst_855 = arith.constant 0.000000e+00 : f32
    %486 = vector.broadcast %cst_855 : f32 to vector<4x21xf32>
    %cst_856 = arith.constant 0.000000e+00 : f32
    %487 = vector.broadcast %cst_856 : f32 to vector<4x27xf32>
    %c8_i32 = arith.constant 8 : i32
    %488 = arith.muli %arg1, %c8_i32 : i32
    %c0_i32_857 = arith.constant 0 : i32
    %489 = arith.addi %488, %c0_i32_857 : i32
    %c1_i32_858 = arith.constant 1 : i32
    %490 = arith.cmpi sge, %489, %c1_i32_858 : i32
    %c9_i32_859 = arith.constant 9 : i32
    %491 = arith.cmpi slt, %489, %c9_i32_859 : i32
    %492 = arith.andi %490, %491 : i1
    %493 = arith.extui %492 : i1 to i32
    %494 = arith.sitofp %493 : i32 to f32
    %495 = vector.extract_strided_slice %485 {offsets = [0, 0], sizes = [4, 80], strides = [1, 1]} : vector<4x640xf32> to vector<4x80xf32>
    %496 = vector.broadcast %494 : f32 to vector<1x80xf32>
    %497 = arith.mulf %23, %496 : vector<1x80xf32>
    %498 = vector.broadcast %497 : vector<1x80xf32> to vector<4x80xf32>
    %499 = arith.mulf %495, %498 : vector<4x80xf32>
    %cst_860 = arith.constant 0.000000e+00 : f32
    %500 = vector.broadcast %cst_860 : f32 to vector<4x80xf32>
    %501 = arith.maximumf %499, %500 : vector<4x80xf32>
    %502 = tpu.concatenate %486, %501, %487 in 1 : vector<4x21xf32>, vector<4x80xf32>, vector<4x27xf32> -> vector<4x128xf32>
    %c0_861 = arith.constant 0 : index
    %c0_862 = arith.constant 0 : index
    %c0_863 = arith.constant 0 : index
    %c0_864 = arith.constant 0 : index
    %503 = vector.load %arg6[%c0_861, %c0_862, %c0_863, %c0_864] : memref<1x8x4x128xf32, #tpu.memory_space<vmem>>, vector<1x1x4x128xf32>
    %504 = vector.shape_cast %503 : vector<1x1x4x128xf32> to vector<4x128xf32>
    %505 = vector.shape_cast %502 : vector<4x128xf32> to vector<1x1x4x128xf32>
    tpu.vector_store %arg6[%c0_861, %c0_862, %c0_863, %c0_864], %505 {strides = array<i32>} : memref<1x8x4x128xf32, #tpu.memory_space<vmem>>, vector<1x1x4x128xf32>,
    %c8_i32_865 = arith.constant 8 : i32
    %506 = arith.muli %arg1, %c8_i32_865 : i32
    %c1_i32_866 = arith.constant 1 : i32
    %507 = arith.addi %506, %c1_i32_866 : i32
    %c1_i32_867 = arith.constant 1 : i32
    %508 = arith.cmpi sge, %507, %c1_i32_867 : i32
    %c9_i32_868 = arith.constant 9 : i32
    %509 = arith.cmpi slt, %507, %c9_i32_868 : i32
    %510 = arith.andi %508, %509 : i1
    %511 = arith.extui %510 : i1 to i32
    %512 = arith.sitofp %511 : i32 to f32
    %513 = vector.extract_strided_slice %485 {offsets = [0, 80], sizes = [4, 80], strides = [1, 1]} : vector<4x640xf32> to vector<4x80xf32>
    %514 = vector.broadcast %512 : f32 to vector<1x80xf32>
    %515 = arith.mulf %23, %514 : vector<1x80xf32>
    %516 = vector.broadcast %515 : vector<1x80xf32> to vector<4x80xf32>
    %517 = arith.mulf %513, %516 : vector<4x80xf32>
    %cst_869 = arith.constant 0.000000e+00 : f32
    %518 = vector.broadcast %cst_869 : f32 to vector<4x80xf32>
    %519 = arith.maximumf %517, %518 : vector<4x80xf32>
    %520 = tpu.concatenate %486, %519, %487 in 1 : vector<4x21xf32>, vector<4x80xf32>, vector<4x27xf32> -> vector<4x128xf32>
    %c0_870 = arith.constant 0 : index
    %c1_871 = arith.constant 1 : index
    %c0_872 = arith.constant 0 : index
    %c0_873 = arith.constant 0 : index
    %521 = vector.load %arg6[%c0_870, %c1_871, %c0_872, %c0_873] : memref<1x8x4x128xf32, #tpu.memory_space<vmem>>, vector<1x1x4x128xf32>
    %522 = vector.shape_cast %521 : vector<1x1x4x128xf32> to vector<4x128xf32>
    %523 = vector.shape_cast %520 : vector<4x128xf32> to vector<1x1x4x128xf32>
    tpu.vector_store %arg6[%c0_870, %c1_871, %c0_872, %c0_873], %523 {strides = array<i32>} : memref<1x8x4x128xf32, #tpu.memory_space<vmem>>, vector<1x1x4x128xf32>,
    %c8_i32_874 = arith.constant 8 : i32
    %524 = arith.muli %arg1, %c8_i32_874 : i32
    %c2_i32 = arith.constant 2 : i32
    %525 = arith.addi %524, %c2_i32 : i32
    %c1_i32_875 = arith.constant 1 : i32
    %526 = arith.cmpi sge, %525, %c1_i32_875 : i32
    %c9_i32_876 = arith.constant 9 : i32
    %527 = arith.cmpi slt, %525, %c9_i32_876 : i32
    %528 = arith.andi %526, %527 : i1
    %529 = arith.extui %528 : i1 to i32
    %530 = arith.sitofp %529 : i32 to f32
    %531 = vector.extract_strided_slice %485 {offsets = [0, 160], sizes = [4, 80], strides = [1, 1]} : vector<4x640xf32> to vector<4x80xf32>
    %532 = vector.broadcast %530 : f32 to vector<1x80xf32>
    %533 = arith.mulf %23, %532 : vector<1x80xf32>
    %534 = vector.broadcast %533 : vector<1x80xf32> to vector<4x80xf32>
    %535 = arith.mulf %531, %534 : vector<4x80xf32>
    %cst_877 = arith.constant 0.000000e+00 : f32
    %536 = vector.broadcast %cst_877 : f32 to vector<4x80xf32>
    %537 = arith.maximumf %535, %536 : vector<4x80xf32>
    %538 = tpu.concatenate %486, %537, %487 in 1 : vector<4x21xf32>, vector<4x80xf32>, vector<4x27xf32> -> vector<4x128xf32>
    %c0_878 = arith.constant 0 : index
    %c2_879 = arith.constant 2 : index
    %c0_880 = arith.constant 0 : index
    %c0_881 = arith.constant 0 : index
    %539 = vector.load %arg6[%c0_878, %c2_879, %c0_880, %c0_881] : memref<1x8x4x128xf32, #tpu.memory_space<vmem>>, vector<1x1x4x128xf32>
    %540 = vector.shape_cast %539 : vector<1x1x4x128xf32> to vector<4x128xf32>
    %541 = vector.shape_cast %538 : vector<4x128xf32> to vector<1x1x4x128xf32>
    tpu.vector_store %arg6[%c0_878, %c2_879, %c0_880, %c0_881], %541 {strides = array<i32>} : memref<1x8x4x128xf32, #tpu.memory_space<vmem>>, vector<1x1x4x128xf32>,
    %c8_i32_882 = arith.constant 8 : i32
    %542 = arith.muli %arg1, %c8_i32_882 : i32
    %c3_i32 = arith.constant 3 : i32
    %543 = arith.addi %542, %c3_i32 : i32
    %c1_i32_883 = arith.constant 1 : i32
    %544 = arith.cmpi sge, %543, %c1_i32_883 : i32
    %c9_i32_884 = arith.constant 9 : i32
    %545 = arith.cmpi slt, %543, %c9_i32_884 : i32
    %546 = arith.andi %544, %545 : i1
    %547 = arith.extui %546 : i1 to i32
    %548 = arith.sitofp %547 : i32 to f32
    %549 = vector.extract_strided_slice %485 {offsets = [0, 240], sizes = [4, 80], strides = [1, 1]} : vector<4x640xf32> to vector<4x80xf32>
    %550 = vector.broadcast %548 : f32 to vector<1x80xf32>
    %551 = arith.mulf %23, %550 : vector<1x80xf32>
    %552 = vector.broadcast %551 : vector<1x80xf32> to vector<4x80xf32>
    %553 = arith.mulf %549, %552 : vector<4x80xf32>
    %cst_885 = arith.constant 0.000000e+00 : f32
    %554 = vector.broadcast %cst_885 : f32 to vector<4x80xf32>
    %555 = arith.maximumf %553, %554 : vector<4x80xf32>
    %556 = tpu.concatenate %486, %555, %487 in 1 : vector<4x21xf32>, vector<4x80xf32>, vector<4x27xf32> -> vector<4x128xf32>
    %c0_886 = arith.constant 0 : index
    %c3_887 = arith.constant 3 : index
    %c0_888 = arith.constant 0 : index
    %c0_889 = arith.constant 0 : index
    %557 = vector.load %arg6[%c0_886, %c3_887, %c0_888, %c0_889] : memref<1x8x4x128xf32, #tpu.memory_space<vmem>>, vector<1x1x4x128xf32>
    %558 = vector.shape_cast %557 : vector<1x1x4x128xf32> to vector<4x128xf32>
    %559 = vector.shape_cast %556 : vector<4x128xf32> to vector<1x1x4x128xf32>
    tpu.vector_store %arg6[%c0_886, %c3_887, %c0_888, %c0_889], %559 {strides = array<i32>} : memref<1x8x4x128xf32, #tpu.memory_space<vmem>>, vector<1x1x4x128xf32>,
    %c8_i32_890 = arith.constant 8 : i32
    %560 = arith.muli %arg1, %c8_i32_890 : i32
    %c4_i32 = arith.constant 4 : i32
    %561 = arith.addi %560, %c4_i32 : i32
    %c1_i32_891 = arith.constant 1 : i32
    %562 = arith.cmpi sge, %561, %c1_i32_891 : i32
    %c9_i32_892 = arith.constant 9 : i32
    %563 = arith.cmpi slt, %561, %c9_i32_892 : i32
    %564 = arith.andi %562, %563 : i1
    %565 = arith.extui %564 : i1 to i32
    %566 = arith.sitofp %565 : i32 to f32
    %567 = vector.extract_strided_slice %485 {offsets = [0, 320], sizes = [4, 80], strides = [1, 1]} : vector<4x640xf32> to vector<4x80xf32>
    %568 = vector.broadcast %566 : f32 to vector<1x80xf32>
    %569 = arith.mulf %23, %568 : vector<1x80xf32>
    %570 = vector.broadcast %569 : vector<1x80xf32> to vector<4x80xf32>
    %571 = arith.mulf %567, %570 : vector<4x80xf32>
    %cst_893 = arith.constant 0.000000e+00 : f32
    %572 = vector.broadcast %cst_893 : f32 to vector<4x80xf32>
    %573 = arith.maximumf %571, %572 : vector<4x80xf32>
    %574 = tpu.concatenate %486, %573, %487 in 1 : vector<4x21xf32>, vector<4x80xf32>, vector<4x27xf32> -> vector<4x128xf32>
    %c0_894 = arith.constant 0 : index
    %c4_895 = arith.constant 4 : index
    %c0_896 = arith.constant 0 : index
    %c0_897 = arith.constant 0 : index
    %575 = vector.load %arg6[%c0_894, %c4_895, %c0_896, %c0_897] : memref<1x8x4x128xf32, #tpu.memory_space<vmem>>, vector<1x1x4x128xf32>
    %576 = vector.shape_cast %575 : vector<1x1x4x128xf32> to vector<4x128xf32>
    %577 = vector.shape_cast %574 : vector<4x128xf32> to vector<1x1x4x128xf32>
    tpu.vector_store %arg6[%c0_894, %c4_895, %c0_896, %c0_897], %577 {strides = array<i32>} : memref<1x8x4x128xf32, #tpu.memory_space<vmem>>, vector<1x1x4x128xf32>,
    %c8_i32_898 = arith.constant 8 : i32
    %578 = arith.muli %arg1, %c8_i32_898 : i32
    %c5_i32 = arith.constant 5 : i32
    %579 = arith.addi %578, %c5_i32 : i32
    %c1_i32_899 = arith.constant 1 : i32
    %580 = arith.cmpi sge, %579, %c1_i32_899 : i32
    %c9_i32_900 = arith.constant 9 : i32
    %581 = arith.cmpi slt, %579, %c9_i32_900 : i32
    %582 = arith.andi %580, %581 : i1
    %583 = arith.extui %582 : i1 to i32
    %584 = arith.sitofp %583 : i32 to f32
    %585 = vector.extract_strided_slice %485 {offsets = [0, 400], sizes = [4, 80], strides = [1, 1]} : vector<4x640xf32> to vector<4x80xf32>
    %586 = vector.broadcast %584 : f32 to vector<1x80xf32>
    %587 = arith.mulf %23, %586 : vector<1x80xf32>
    %588 = vector.broadcast %587 : vector<1x80xf32> to vector<4x80xf32>
    %589 = arith.mulf %585, %588 : vector<4x80xf32>
    %cst_901 = arith.constant 0.000000e+00 : f32
    %590 = vector.broadcast %cst_901 : f32 to vector<4x80xf32>
    %591 = arith.maximumf %589, %590 : vector<4x80xf32>
    %592 = tpu.concatenate %486, %591, %487 in 1 : vector<4x21xf32>, vector<4x80xf32>, vector<4x27xf32> -> vector<4x128xf32>
    %c0_902 = arith.constant 0 : index
    %c5_903 = arith.constant 5 : index
    %c0_904 = arith.constant 0 : index
    %c0_905 = arith.constant 0 : index
    %593 = vector.load %arg6[%c0_902, %c5_903, %c0_904, %c0_905] : memref<1x8x4x128xf32, #tpu.memory_space<vmem>>, vector<1x1x4x128xf32>
    %594 = vector.shape_cast %593 : vector<1x1x4x128xf32> to vector<4x128xf32>
    %595 = vector.shape_cast %592 : vector<4x128xf32> to vector<1x1x4x128xf32>
    tpu.vector_store %arg6[%c0_902, %c5_903, %c0_904, %c0_905], %595 {strides = array<i32>} : memref<1x8x4x128xf32, #tpu.memory_space<vmem>>, vector<1x1x4x128xf32>,
    %c8_i32_906 = arith.constant 8 : i32
    %596 = arith.muli %arg1, %c8_i32_906 : i32
    %c6_i32 = arith.constant 6 : i32
    %597 = arith.addi %596, %c6_i32 : i32
    %c1_i32_907 = arith.constant 1 : i32
    %598 = arith.cmpi sge, %597, %c1_i32_907 : i32
    %c9_i32_908 = arith.constant 9 : i32
    %599 = arith.cmpi slt, %597, %c9_i32_908 : i32
    %600 = arith.andi %598, %599 : i1
    %601 = arith.extui %600 : i1 to i32
    %602 = arith.sitofp %601 : i32 to f32
    %603 = vector.extract_strided_slice %485 {offsets = [0, 480], sizes = [4, 80], strides = [1, 1]} : vector<4x640xf32> to vector<4x80xf32>
    %604 = vector.broadcast %602 : f32 to vector<1x80xf32>
    %605 = arith.mulf %23, %604 : vector<1x80xf32>
    %606 = vector.broadcast %605 : vector<1x80xf32> to vector<4x80xf32>
    %607 = arith.mulf %603, %606 : vector<4x80xf32>
    %cst_909 = arith.constant 0.000000e+00 : f32
    %608 = vector.broadcast %cst_909 : f32 to vector<4x80xf32>
    %609 = arith.maximumf %607, %608 : vector<4x80xf32>
    %610 = tpu.concatenate %486, %609, %487 in 1 : vector<4x21xf32>, vector<4x80xf32>, vector<4x27xf32> -> vector<4x128xf32>
    %c0_910 = arith.constant 0 : index
    %c6_911 = arith.constant 6 : index
    %c0_912 = arith.constant 0 : index
    %c0_913 = arith.constant 0 : index
    %611 = vector.load %arg6[%c0_910, %c6_911, %c0_912, %c0_913] : memref<1x8x4x128xf32, #tpu.memory_space<vmem>>, vector<1x1x4x128xf32>
    %612 = vector.shape_cast %611 : vector<1x1x4x128xf32> to vector<4x128xf32>
    %613 = vector.shape_cast %610 : vector<4x128xf32> to vector<1x1x4x128xf32>
    tpu.vector_store %arg6[%c0_910, %c6_911, %c0_912, %c0_913], %613 {strides = array<i32>} : memref<1x8x4x128xf32, #tpu.memory_space<vmem>>, vector<1x1x4x128xf32>,
    %c8_i32_914 = arith.constant 8 : i32
    %614 = arith.muli %arg1, %c8_i32_914 : i32
    %c7_i32 = arith.constant 7 : i32
    %615 = arith.addi %614, %c7_i32 : i32
    %c1_i32_915 = arith.constant 1 : i32
    %616 = arith.cmpi sge, %615, %c1_i32_915 : i32
    %c9_i32_916 = arith.constant 9 : i32
    %617 = arith.cmpi slt, %615, %c9_i32_916 : i32
    %618 = arith.andi %616, %617 : i1
    %619 = arith.extui %618 : i1 to i32
    %620 = arith.sitofp %619 : i32 to f32
    %621 = vector.extract_strided_slice %485 {offsets = [0, 560], sizes = [4, 80], strides = [1, 1]} : vector<4x640xf32> to vector<4x80xf32>
    %622 = vector.broadcast %620 : f32 to vector<1x80xf32>
    %623 = arith.mulf %23, %622 : vector<1x80xf32>
    %624 = vector.broadcast %623 : vector<1x80xf32> to vector<4x80xf32>
    %625 = arith.mulf %621, %624 : vector<4x80xf32>
    %cst_917 = arith.constant 0.000000e+00 : f32
    %626 = vector.broadcast %cst_917 : f32 to vector<4x80xf32>
    %627 = arith.maximumf %625, %626 : vector<4x80xf32>
    %628 = tpu.concatenate %486, %627, %487 in 1 : vector<4x21xf32>, vector<4x80xf32>, vector<4x27xf32> -> vector<4x128xf32>
    %c0_918 = arith.constant 0 : index
    %c7_919 = arith.constant 7 : index
    %c0_920 = arith.constant 0 : index
    %c0_921 = arith.constant 0 : index
    %629 = vector.load %arg6[%c0_918, %c7_919, %c0_920, %c0_921] : memref<1x8x4x128xf32, #tpu.memory_space<vmem>>, vector<1x1x4x128xf32>
    %630 = vector.shape_cast %629 : vector<1x1x4x128xf32> to vector<4x128xf32>
    %631 = vector.shape_cast %628 : vector<4x128xf32> to vector<1x1x4x128xf32>
    tpu.vector_store %arg6[%c0_918, %c7_919, %c0_920, %c0_921], %631 {strides = array<i32>} : memref<1x8x4x128xf32, #tpu.memory_space<vmem>>, vector<1x1x4x128xf32>,
    return
  }
  func.func @transform_0(%arg0: i32, %arg1: i32) -> (i32, i32, i32, i32) {
    %c0_i32 = arith.constant 0 : i32
    %c0_i32_0 = arith.constant 0 : i32
    %c0_i32_1 = arith.constant 0 : i32
    return %arg0, %arg1, %c0_i32, %c0_i32_0 : i32, i32, i32, i32
  }
  func.func @transform_1(%arg0: i32, %arg1: i32) -> (i32, i32, i32, i32) {
    %c1_i32 = arith.constant 1 : i32
    %0 = arith.addi %arg1, %c1_i32 : i32
    %c4_i32 = arith.constant 4 : i32
    %1 = arith.muli %0, %c4_i32 : i32
    %c0_i32 = arith.constant 0 : i32
    %c0_i32_0 = arith.constant 0 : i32
    %c0_i32_1 = arith.constant 0 : i32
    return %arg0, %1, %c0_i32, %c0_i32_0 : i32, i32, i32, i32
  }
  func.func @transform_2(%arg0: i32, %arg1: i32) -> (i32, i32) {
    %c0_i32 = arith.constant 0 : i32
    %c0_i32_0 = arith.constant 0 : i32
    %c0_i32_1 = arith.constant 0 : i32
    return %c0_i32, %c0_i32_0 : i32, i32
  }
  func.func @transform_3(%arg0: i32, %arg1: i32) -> (i32, i32) {
    %c0_i32 = arith.constant 0 : i32
    %c0_i32_0 = arith.constant 0 : i32
    %c0_i32_1 = arith.constant 0 : i32
    return %c0_i32, %c0_i32_0 : i32, i32
  }
  func.func @transform_4(%arg0: i32, %arg1: i32) -> (i32, i32, i32, i32) {
    %c0_i32 = arith.constant 0 : i32
    %c0_i32_0 = arith.constant 0 : i32
    %c0_i32_1 = arith.constant 0 : i32
    return %arg0, %arg1, %c0_i32, %c0_i32_0 : i32, i32, i32, i32
  }
}

</mosaic_0001>

<bundles_post_ra>
// kernel: res_block_forward.2
= control target key start
LH: loop header
LB: loop body
LE: loop exit
PB: predicated region body
PF: predicated region fallthrough
CT: control target
= control target key end

     0   :  { %s2464_s15 = smov 0   ;;  %s2466_s16 = smov 0   ;;  %s4034_s0 = inlined_call_operand.vmem [shape: f32[2,18,4,128], index: 0, kind: input, shape index: {}, may-alias: {0,1}]   ;;  %s4035_s1 = inlined_call_operand.vmem [shape: f32[2,18,4,128], index: 1, kind: input, shape index: {}, may-alias: {0,1}]   ;;  %s4036_s2 = inlined_call_operand.vmem [shape: f32[4,108], index: 2, kind: input, shape index: {}]   ;;  %s4037_s3 = inlined_call_operand.vmem [shape: f32[4,1], index: 3, kind: input, shape index: {}]   ;;  %s4038_s4 = inlined_call_operand.vmem [shape: f32[2,16,4,128], index: 4, kind: output, shape index: {}]  }
   0x1   :  { %s2468_s17 = smov 0   ;;  %s2470_s18 = smov 0  }
   0x2   :  { %s2472_s19 = smov 0  }
   0x3 LB: > { %s23_s20 = sadd.s32 1, %s2391_s17  ;;  %s26_s21 = sadd.s32 1, %s2395_s18  ;;  %s2399_s19 = sphi %s2472_s19, %s14_s19   ;;  %s2395_s18 = sphi %s2470_s18, %s4220_s18   ;;  %s2391_s17 = sphi %s2468_s17, %s4219_s17   ;;  %s2387_s16 = sphi %s2466_s16, %s4218_s16   ;;  %s2383_s15 = sphi %s2464_s15, %s4217_s15  }
   0x4   : > { %p24_p0 = scmp.ge.s32.totalorder %s23_s20, 2  ;;  %p2179_p1 = scmp.ge.s32.totalorder %s2399_s19, 1 }
   0x5   : > { %p216_p2 = scmp.lt.s32.totalorder %s2399_s19, 5 }
   0x6   : > { %s4222_s20 = smov (%p24_p0, %s23_s20), 0  ;;  %s4224_s21 = smov (!%p24_p0, %s26_s21), %s2395_s18 }
   0x7   : > { %p217_p3 = pnand %p2179_p1, %p216_p2  ;;  %p28_p4 = scmp.ge.s32.totalorder %s4224_s21, 2 }
   0x9   : > { %s4226_s21 = smov (%p28_p4, %s4224_s21), 0  ;;  %220 = sbr.rel (%p217_p3) target bundleno = 1490 (0x5d2), region = 36 }
   0xe   : > { %s2494_s22 = sshll.u32 %s2383_s15, 3  ;;  %p270_p5 = scmp.lt.s32.totalorder %s2387_s16, 1  ;;  %vm384_vm0 = vcmask 1043456   ;;  %vm1530_vm1 = vcmask 261120   ;;  %vm1545_vm2 = vcmask 916480   ;;  %vm1515_vm3 = vcmask 654336  }
   0xf   : > { %p272_p6 = scmp.lt.s32.totalorder %s2494_s22, 17  ;;  %s4042_s30 = smov 117   ;;  %vm1575_vm4 = vcmask 130048   ;;  %vm1590_vm5 = vcmask 785408   ;;  %vm1560_vm6 = vcmask 523264   ;;  %vm1625_vm13 = vcmask 883712  }
  0x10   : > { %s4228_s16 = smov (!%p270_p5, %s2387_s16), 1  ;;  %s2402_s5 = smov 126   ;;  %vm2425_vm14 = vmmov 0   ;;  %vm1605_vm15 = vcmask 392192  }
  0x11   : > { %s273_s23 = scalar_select %p272_p6, %s2494_s22, 17 }
  0x12   : > { %s2278_s24 = smul.u32 18, %s4228_s16  ;;  %s4046_s6 = smov 108  }
  0x13   : > { %s2404_s7 = smov 127   ;;  %s4048_s8 = smov 106  }
  0x14   : > { %s275_s25 = sadd.s32 %s2278_s24, %s273_s23  ;;  %s2406_s9 = smov 116  }
  0x15   : > { %s2181_s26 = sshll.u32 %s275_s25, 2  ;;  %s4044_s10 = smov 118  }
  0x16   : > { %s2506_s29 = scalar_lea.vmem %s4034_s0, %s2181_s26  ;;  %s2408_s11 = smov 107  }
  0x17   : > { %v332_v0 = vld [vmem:[%s2506_s29] sm:$0xf]  ;;  %v2515_v2 = vld [vmem:[%s2506_s29 + $0x4] sm:$0xf]  ;;  %v2534_v4 = vld [vmem:[%s2506_s29 + $0x8] sm:$0xf] }
  0x18   : > { %348 = vrot.lane.b32.xlu1 %v332_v0, %s4042_s30  ;;  %342 = vrot.lane.b32.xlu0 %v332_v0, %s2402_s5  ;;  %v338_v1 = vrot.slane %v332_v0, 4  ;;  %v2520_v3 = vrot.slane %v2515_v2, 4  ;;  %s2409_s12 = smov 21   ;;  %v2543_v5 = vrot.slane %v2534_v4, 4  ;;  %s2410_s13 = smov 19  }
  0x19   : > { %s2411_s14 = smov 20   ;;  %s2412_s15 = smov 10   ;;  %v2580_v6 = vld [vmem:[%s2506_s29 + $0xc] sm:$0xf]  ;;  %v2720_v62 = vld [vmem:[%s2506_s29 + $0x10] sm:$0xf] }
  0x1a   : > { %4065 = vst [vmem:[#allocation2_spill] sm:$0xff] %v2520_v3  ;;  %4066 = vst [vmem:[#allocation3_spill] sm:$0xff] %v2543_v5  ;;  %s2413_s23 = smov 11   ;;  %s2414_s25 = smov 1   ;;  %v2587_v7 = vrot.slane %v2580_v6, 4  ;;  %v2727_v63 = vrot.slane %v2720_v62, 4 }
  0x1b   : > { %s2415_s26 = smov 9   ;;  %s2231_s27 = sadd.s32 8, %s2494_s22 }
  0x1c   : > { %354 = vrot.lane.b32.xlu1 %v332_v0, %s4046_s6  ;;  %339 = vrot.lane.b32.xlu0 %v338_v1, %s2404_s7  ;;  %4067 = vst [vmem:[#allocation4_spill] sm:$0xff] %v2587_v7  ;;  %4088 = vst [vmem:[#allocation25_spill] sm:$0xff] %v2727_v63  ;;  %p288_p7 = scmp.lt.s32.totalorder %s2231_s27, 17 }
  0x1e   : > { %s4230_s27 = smov (!%p288_p7, %s2231_s27), 17 }
  0x1f   : > { %s291_s28 = sadd.s32 %s2278_s24, %s4230_s27  ;;  %s4122_s24 = smov 108  }
  0x20   : > { %360 = vrot.lane.b32.xlu1 %v332_v0, %s4048_s8  ;;  %351 = vrot.lane.b32.xlu0 %v338_v1, %s2406_s9  ;;  %s2428_s27 = smov 112  }
  0x24   : > { %345 = vrot.lane.b32.xlu1 %v338_v1, %s4044_s10  ;;  %357 = vrot.lane.b32.xlu0 %v338_v1, %s2408_s11 }
  0x28   : > { %369 = vrot.lane.b32.xlu1 %v2520_v3, %s2402_s5  ;;  %366 = vrot.lane.b32.xlu0 %v2515_v2, %s2404_s7 }
  0x2c   : > { %375 = vrot.lane.b32.xlu1 %v2520_v3, %s4042_s30  ;;  %372 = vrot.lane.b32.xlu0 %v2515_v2, %s4044_s10 }
  0x30   : > { %381 = vrot.lane.b32.xlu1 %v2520_v3, %s4046_s6  ;;  %378 = vrot.lane.b32.xlu0 %v2515_v2, %s2406_s9 }
  0x34   : > { %397 = vrot.lane.b32.xlu1 %v2534_v4, %s2409_s12  ;;  %393 = vrot.lane.b32.xlu0 %v2520_v3, %s2404_s7 }
  0x38   : > { %404 = vrot.lane.b32.xlu1 %v2534_v4, %s2410_s13  ;;  %401 = vrot.lane.b32.xlu0 %v2543_v5, %s2411_s14 }
  0x3c   : > { %410 = vrot.lane.b32.xlu1 %v2534_v4, %s2412_s15  ;;  %407 = vrot.lane.b32.xlu0 %v2543_v5, %s2413_s23 }
  0x40   : > { %416 = vrot.lane.b32.xlu1 %v2534_v4, %s2414_s25  ;;  %413 = vrot.lane.b32.xlu0 %v2543_v5, %s2415_s26 }
  0x44   : > { %446 = vrot.lane.b32.xlu1 %v2515_v2, %s2402_s5  ;;  %420 = vrot.lane.b32.xlu0 %v2534_v4, %s2404_s7 }
  0x48   : > { %452 = vrot.lane.b32.xlu1 %v2515_v2, %s4042_s30  ;;  %449 = vrot.lane.b32.xlu0 %v2520_v3, %s4044_s10 }
  0x4c   : > { %458 = vrot.lane.b32.xlu1 %v2515_v2, %s4046_s6  ;;  %455 = vrot.lane.b32.xlu0 %v2520_v3, %s2406_s9 }
  0x50   : > { %464 = vrot.lane.b32.xlu1 %v2515_v2, %s4048_s8  ;;  %461 = vrot.lane.b32.xlu0 %v2520_v3, %s2408_s11 }
  0x54   : > { %471 = vrot.lane.b32.xlu1 %v2534_v4, %s4044_s10  ;;  %468 = vrot.lane.b32.xlu0 %v2543_v5, %s2402_s5 }
  0x58   : > { %477 = vrot.lane.b32.xlu1 %v2534_v4, %s2406_s9  ;;  %474 = vrot.lane.b32.xlu0 %v2543_v5, %s4042_s30 }
  0x5c   : > { %490 = vrot.lane.b32.xlu1 %v2543_v5, %s2404_s7  ;;  %480 = vrot.lane.b32.xlu0 %v2543_v5, %s4046_s6 }
  0x60   : > { %498 = vrot.lane.b32.xlu1 %v2587_v7, %s2411_s14  ;;  %494 = vrot.lane.b32.xlu0 %v2580_v6, %s2409_s12 }
  0x64   : > { %504 = vrot.lane.b32.xlu1 %v2587_v7, %s2413_s23  ;;  %501 = vrot.lane.b32.xlu0 %v2580_v6, %s2410_s13 }
  0x68   : > { %510 = vrot.lane.b32.xlu1 %v2587_v7, %s2415_s26  ;;  %507 = vrot.lane.b32.xlu0 %v2580_v6, %s2412_s15 }
  0x6c   : > { %517 = vrot.lane.b32.xlu1 %v2580_v6, %s2404_s7  ;;  %513 = vrot.lane.b32.xlu0 %v2580_v6, %s2414_s25 }
  0x70   : > { %546 = vrot.lane.b32.xlu1 %v2543_v5, %s4044_s10  ;;  %543 = vrot.lane.b32.xlu0 %v2534_v4, %s2402_s5 }
  0x74   : > { %552 = vrot.lane.b32.xlu1 %v2543_v5, %s2406_s9  ;;  %549 = vrot.lane.b32.xlu0 %v2534_v4, %s4042_s30 }
  0x78   : > { %558 = vrot.lane.b32.xlu1 %v2543_v5, %s2408_s11  ;;  %555 = vrot.lane.b32.xlu0 %v2534_v4, %s4046_s6 }
  0x7c   : > { %565 = vrot.lane.b32.xlu1 %v2587_v7, %s2402_s5  ;;  %561 = vrot.lane.b32.xlu0 %v2534_v4, %s4048_s8 }
  0x80   : > { %571 = vrot.lane.b32.xlu1 %v2587_v7, %s4042_s30  ;;  %568 = vrot.lane.b32.xlu0 %v2580_v6, %s4044_s10 }
  0x8a   : > { %v2627_v8 = vpop.permute.xlu1 %348  ;;  %v2629_v9 = vpop.permute.xlu0 %342 }
  0x8b   : > { %4068 = vst [vmem:[#allocation5_spill] sm:$0xff] %v2627_v8  ;;  %4069 = vst [vmem:[#allocation6_spill] sm:$0xff] %v2629_v9 }
  0x8e   : > { %v2631_v10 = vpop.permute.xlu1 %354  ;;  %v2633_v11 = vpop.permute.xlu0 %339 }
  0x8f   : > { %4070 = vst [vmem:[#allocation7_spill] sm:$0xff] %v2631_v10  ;;  %4071 = vst [vmem:[#allocation8_spill] sm:$0xff] %v2633_v11 }
  0x92   : > { %v2635_v12 = vpop.permute.xlu1 %360  ;;  %v2637_v13 = vpop.permute.xlu0 %351 }
  0x93   : > { %4072 = vst [vmem:[#allocation9_spill] sm:$0xff] %v2635_v12  ;;  %4073 = vst [vmem:[#allocation10_spill] sm:$0xff] %v2637_v13 }
  0x96   : > { %v2639_v14 = vpop.permute.xlu1 %345  ;;  %v2641_v15 = vpop.permute.xlu0 %357 }
  0x97   : > { %4074 = vst [vmem:[#allocation11_spill] sm:$0xff] %v2639_v14  ;;  %4075 = vst [vmem:[#allocation12_spill] sm:$0xff] %v2641_v15 }
  0x9a   : > { %v2643_v16 = vpop.permute.xlu1 %369  ;;  %v2645_v17 = vpop.permute.xlu0 %366 }
  0x9b   : > { %4076 = vst [vmem:[#allocation13_spill] sm:$0xff] %v2643_v16  ;;  %4077 = vst [vmem:[#allocation14_spill] sm:$0xff] %v2645_v17 }
  0x9e   : > { %v2647_v18 = vpop.permute.xlu1 %375  ;;  %v2649_v19 = vpop.permute.xlu0 %372 }
  0xa2   : > { %v2651_v20 = vpop.permute.xlu1 %381  ;;  %v2653_v21 = vpop.permute.xlu0 %378 }
  0xa6   : > { %v398_v22 = vpop.permute.xlu1 %397  ;;  %v394_v23 = vpop.permute.xlu0 %393 }
  0xa7   : > { %v2697_v55 = vsel %vm384_vm0, %v2515_v2, %v394_v23 }
  0xa8   : > { %4086 = vst [vmem:[#allocation23_spill] sm:$0xff] %v2697_v55 }
  0xaa   : > { %v405_v24 = vpop.permute.xlu1 %404  ;;  %v402_v25 = vpop.permute.xlu0 %401 }
  0xab   : > { %v423_v54 = vsel %vm384_vm0, %v398_v22, %v402_v25 }
  0xae   : > { %v411_v26 = vpop.permute.xlu1 %410  ;;  %v408_v27 = vpop.permute.xlu0 %407 }
  0xaf   : > { %v424_v57 = vsel %vm384_vm0, %v405_v24, %v408_v27 }
  0xb2   : > { %v417_v28 = vpop.permute.xlu1 %416  ;;  %v414_v29 = vpop.permute.xlu0 %413 }
  0xb3   : > { %v426_v53 = vsel %vm384_vm0, %v417_v28, %v2543_v5  ;;  %v425_v56 = vsel %vm384_vm0, %v411_v26, %v414_v29 }
  0xb6   : > { %v2655_v30 = vpop.permute.xlu1 %446  ;;  %v2657_v31 = vpop.permute.xlu0 %420 }
  0xb7   : > { %4078 = vst [vmem:[#allocation15_spill] sm:$0xff] %v2655_v30  ;;  %442 = vrot.lane.b32.xlu0 %v2657_v31, %s2408_s11 }
  0xba   : > { %v2661_v32 = vpop.permute.xlu1 %452  ;;  %v2663_v33 = vpop.permute.xlu0 %449 }
  0xbb   : > { %4079 = vst [vmem:[#allocation16_spill] sm:$0xff] %v2661_v32  ;;  %4080 = vst [vmem:[#allocation17_spill] sm:$0xff] %v2663_v33 }
  0xbe   : > { %v2665_v34 = vpop.permute.xlu1 %458  ;;  %v2667_v35 = vpop.permute.xlu0 %455 }
  0xbf   : > { %4081 = vst [vmem:[#allocation18_spill] sm:$0xff] %v2665_v34  ;;  %4082 = vst [vmem:[#allocation19_spill] sm:$0xff] %v2667_v35 }
  0xc2   : > { %v2669_v36 = vpop.permute.xlu1 %464  ;;  %v2671_v37 = vpop.permute.xlu0 %461 }
  0xc3   : > { %4083 = vst [vmem:[#allocation20_spill] sm:$0xff] %v2669_v36  ;;  %4084 = vst [vmem:[#allocation21_spill] sm:$0xff] %v2671_v37 }
  0xc6   : > { %v2673_v38 = vpop.permute.xlu1 %471  ;;  %v2675_v39 = vpop.permute.xlu0 %468 }
  0xca   : > { %v2677_v40 = vpop.permute.xlu1 %477  ;;  %v2679_v41 = vpop.permute.xlu0 %474 }
  0xce   : > { %v491_v42 = vpop.permute.xlu1 %490  ;;  %v2681_v43 = vpop.permute.xlu0 %480 }
  0xcf   : > { %v2707_v58 = vsel %vm384_vm0, %v2534_v4, %v491_v42 }
  0xd0   : > { %4087 = vst [vmem:[#allocation24_spill] sm:$0xff] %v2707_v58 }
  0xd2   : > { %v499_v44 = vpop.permute.xlu1 %498  ;;  %v495_v45 = vpop.permute.xlu0 %494 }
  0xd3   : > { %v520_v59 = vsel %vm384_vm0, %v495_v45, %v499_v44 }
  0xd6   : > { %v505_v46 = vpop.permute.xlu1 %504  ;;  %v502_v47 = vpop.permute.xlu0 %501 }
  0xd7   : > { %v521_v60 = vsel %vm384_vm0, %v502_v47, %v505_v46 }
  0xda   : > { %v511_v48 = vpop.permute.xlu1 %510  ;;  %v508_v49 = vpop.permute.xlu0 %507 }
  0xdb   : > { %v522_v61 = vsel %vm384_vm0, %v508_v49, %v511_v48 }
  0xde   : > { %v2683_v50 = vpop.permute.xlu1 %517  ;;  %v514_v51 = vpop.permute.xlu0 %513 }
  0xdf   : > { %4085 = vst [vmem:[#allocation22_spill] sm:$0xff] %v2683_v50  ;;  %539 = vrot.lane.b32.xlu1 %v2683_v50, %s2408_s11  ;;  %v523_v52 = vsel %vm384_vm0, %v514_v51, %v2587_v7 }
  0xe0   : > { %537 = vrot.lane.b32.xlu0 %v523_v52, %s2408_s11 }
  0xe2   : > { %v2745_v0 = vpop.permute.xlu0 %543  ;;  %v2747_v1 = vpop.permute.xlu1 %546 }
  0xe3   : > { %440 = vrot.lane.b32.xlu1 %v426_v53, %s2408_s11  ;;  %4089 = vst [vmem:[#allocation26_spill] sm:$0xff] %v2745_v0  ;;  %4090 = vst [vmem:[#allocation27_spill] sm:$0xff] %v2747_v1 }
  0xe4   : > { %434 = vrot.lane.b32.xlu0 %v423_v54, %s2408_s11 }
  0xe6   : > { %v2749_v2 = vpop.permute.xlu0 %549  ;;  %v2751_v4 = vpop.permute.xlu1 %552 }
  0xe7   : > { %432 = vrot.lane.b32.xlu1 %v2697_v55, %s2408_s11  ;;  %4091 = vst [vmem:[#allocation28_spill] sm:$0xff] %v2749_v2  ;;  %4092 = vst [vmem:[#allocation29_spill] sm:$0xff] %v2751_v4 }
  0xe8   : > { %438 = vrot.lane.b32.xlu0 %v425_v56, %s2408_s11 }
  0xea   : > { %v2753_v22 = vpop.permute.xlu0 %555  ;;  %v2755_v23 = vpop.permute.xlu1 %558 }
  0xeb   : > { %436 = vrot.lane.b32.xlu1 %v424_v57, %s2408_s11  ;;  %4093 = vst [vmem:[#allocation30_spill] sm:$0xff] %v2753_v22  ;;  %4094 = vst [vmem:[#allocation31_spill] sm:$0xff] %v2755_v23 }
  0xec   : > { %529 = vrot.lane.b32.xlu0 %v2707_v58, %s2408_s11 }
  0xee   : > { %v2757_v24 = vpop.permute.xlu0 %561  ;;  %v2759_v25 = vpop.permute.xlu1 %565 }
  0xef   : > { %531 = vrot.lane.b32.xlu1 %v520_v59, %s2408_s11  ;;  %4095 = vst [vmem:[#allocation32_spill] sm:$0xff] %v2757_v24 }
  0xf0   : > { %533 = vrot.lane.b32.xlu0 %v521_v60, %s2408_s11 }
  0xf2   : > { %v2761_v26 = vpop.permute.xlu0 %568  ;;  %v2763_v27 = vpop.permute.xlu1 %571 }
  0xf3   : > { %535 = vrot.lane.b32.xlu1 %v522_v61, %s2408_s11 }
  0xf4   : > { %574 = vrot.lane.b32.xlu0 %v2580_v6, %s2406_s9 }
  0xf7   : > { %577 = vrot.lane.b32.xlu1 %v2587_v7, %s4046_s6 }
  0xf8   : > { %587 = vrot.lane.b32.xlu0 %v2587_v7, %s2404_s7 }
  0xfb   : > { %591 = vrot.lane.b32.xlu1 %v2720_v62, %s2409_s12 }
  0xfc   : > { %595 = vrot.lane.b32.xlu0 %v2727_v63, %s2411_s14 }
  0xff   : > { %598 = vrot.lane.b32.xlu1 %v2720_v62, %s2410_s13 }
 0x100   : > { %601 = vrot.lane.b32.xlu0 %v2727_v63, %s2413_s23 }
 0x103   : > { %604 = vrot.lane.b32.xlu1 %v2720_v62, %s2412_s15 }
 0x104   : > { %607 = vrot.lane.b32.xlu0 %v2727_v63, %s2415_s26 }
 0x107   : > { %610 = vrot.lane.b32.xlu1 %v2720_v62, %s2414_s25 }
 0x108   : > { %614 = vrot.lane.b32.xlu0 %v2720_v62, %s2404_s7 }
 0x129   : > { %v2765_v28 = vpop.permute.xlu0 %442 }
 0x151   : > { %v2767_v29 = vpop.permute.xlu1 %539 }
 0x152   : > { %v2769_v42 = vpop.permute.xlu0 %537 }
 0x155   : > { %v2771_v44 = vpop.permute.xlu1 %440 }
 0x156   : > { %v2773_v45 = vpop.permute.xlu0 %434 }
 0x159   : > { %v2775_v46 = vpop.permute.xlu1 %432 }
 0x15a   : > { %v2777_v47 = vpop.permute.xlu0 %438 }
 0x15d   : > { %v2779_v48 = vpop.permute.xlu1 %436 }
 0x15e   : > { %v2781_v49 = vpop.permute.xlu0 %529 }
 0x161   : > { %v2783_v51 = vpop.permute.xlu1 %531 }
 0x162   : > { %v2785_v52 = vpop.permute.xlu0 %533 }
 0x165   : > { %v2787_v53 = vpop.permute.xlu1 %535 }
 0x166   : > { %v2789_v54 = vpop.permute.xlu0 %574 }
 0x169   : > { %v2791_v56 = vpop.permute.xlu1 %577 }
 0x16a   : > { %v588_v57 = vpop.permute.xlu0 %587 }
 0x16b   : > { %v2795_v59 = vsel %vm384_vm0, %v2580_v6, %v588_v57 }
 0x16c   : > { %4096 = vst [vmem:[#allocation33_spill] sm:$0xff] %v2795_v59  ;;  %626 = vrot.lane.b32.xlu1 %v2795_v59, %s2408_s11 }
 0x16d   : > { %v592_v60 = vpop.permute.xlu1 %591 }
 0x16e   : > { %v596_v61 = vpop.permute.xlu0 %595 }
 0x16f   : > { %v617_v11 = vsel %vm384_vm0, %v592_v60, %v596_v61 }
 0x170   : > { %628 = vrot.lane.b32.xlu0 %v617_v11, %s2408_s11 }
 0x171   : > { %v599_v55 = vpop.permute.xlu1 %598 }
 0x172   : > { %v602_v58 = vpop.permute.xlu0 %601 }
 0x173   : > { %v618_v9 = vsel %vm384_vm0, %v599_v55, %v602_v58 }
 0x174   : > { %630 = vrot.lane.b32.xlu1 %v618_v9, %s2408_s11  ;;  %v2835_v9 = vld [vmem:[%s2506_s29 + $0x14] sm:$0xf] }
 0x175   : > { %v605_v14 = vpop.permute.xlu1 %604 }
 0x176   : > { %v608_v0 = vpop.permute.xlu0 %607 }
 0x177   : > { %v619_v57 = vsel %vm384_vm0, %v605_v14, %v608_v0 }
 0x178   : > { %632 = vrot.lane.b32.xlu0 %v619_v57, %s2408_s11 }
 0x179   : > { %v611_v1 = vpop.permute.xlu1 %610 }
 0x17a   : > { %v620_v59 = vsel %vm384_vm0, %v611_v1, %v2727_v63  ;;  %v2808_v11 = vpop.permute.xlu0 %614 }
 0x17b   : > { %634 = vrot.lane.b32.xlu1 %v620_v59, %s2408_s11  ;;  %4097 = vst [vmem:[#allocation34_spill] sm:$0xff] %v2808_v11 }
 0x17c   : > { %636 = vrot.lane.b32.xlu0 %v2808_v11, %s2408_s11 }
 0x17f   : > { %640 = vrot.lane.b32.xlu1 %v2580_v6, %s2402_s5 }
 0x180   : > { %643 = vrot.lane.b32.xlu0 %v2587_v7, %s4044_s10 }
 0x183   : > { %646 = vrot.lane.b32.xlu1 %v2580_v6, %s4042_s30 }
 0x184   : > { %649 = vrot.lane.b32.xlu0 %v2587_v7, %s2406_s9 }
 0x187   : > { %652 = vrot.lane.b32.xlu1 %v2580_v6, %s4046_s6 }
 0x188   : > { %655 = vrot.lane.b32.xlu0 %v2587_v7, %s2408_s11 }
 0x18b   : > { %658 = vrot.lane.b32.xlu1 %v2580_v6, %s4048_s8  ;;  %v2842_v6 = vrot.slane %v2835_v9, 4 }
 0x18c   : > { %662 = vrot.lane.b32.xlu0 %v2727_v63, %s2402_s5 }
 0x18f   : > { %665 = vrot.lane.b32.xlu1 %v2720_v62, %s4044_s10 }
 0x190   : > { %668 = vrot.lane.b32.xlu0 %v2727_v63, %s4042_s30 }
 0x193   : > { %671 = vrot.lane.b32.xlu1 %v2720_v62, %s2406_s9 }
 0x194   : > { %674 = vrot.lane.b32.xlu0 %v2727_v63, %s4046_s6 }
 0x197   : > { %684 = vrot.lane.b32.xlu1 %v2727_v63, %s2404_s7 }
 0x198   : > { %688 = vrot.lane.b32.xlu0 %v2835_v9, %s2409_s12 }
 0x19b   : > { %692 = vrot.lane.b32.xlu1 %v2842_v6, %s2411_s14 }
 0x19c   : > { %695 = vrot.lane.b32.xlu0 %v2835_v9, %s2410_s13 }
 0x19f   : > { %698 = vrot.lane.b32.xlu1 %v2842_v6, %s2413_s23 }
 0x1a0   : > { %701 = vrot.lane.b32.xlu0 %v2835_v9, %s2412_s15 }
 0x1a3   : > { %704 = vrot.lane.b32.xlu1 %v2842_v6, %s2415_s26 }
 0x1a4   : > { %707 = vrot.lane.b32.xlu0 %v2835_v9, %s2414_s25 }
 0x1a7   : > { %711 = vrot.lane.b32.xlu1 %v2835_v9, %s2404_s7 }
 0x1de   : > { %v2860_v14 = vpop.permute.xlu1 %626 }
 0x1e2   : > { %v2862_v55 = vpop.permute.xlu0 %628 }
 0x1e6   : > { %v2864_v58 = vpop.permute.xlu1 %630 }
 0x1ea   : > { %v2866_v0 = vpop.permute.xlu0 %632 }
 0x1ed   : > { %v2868_v1 = vpop.permute.xlu1 %634 }
 0x1ee   : > { %v2870_v59 = vpop.permute.xlu0 %636 }
 0x1f1   : > { %v2872_v60 = vpop.permute.xlu1 %640 }
 0x1f2   : > { %4098 = vst [vmem:[#allocation35_spill] sm:$0xff] %v2872_v60  ;;  %v2874_v61 = vpop.permute.xlu0 %643 }
 0x1f3   : > { %4099 = vst [vmem:[#allocation36_spill] sm:$0xff] %v2874_v61 }
 0x1f5   : > { %v2876_v57 = vpop.permute.xlu1 %646 }
 0x1f6   : > { %4100 = vst [vmem:[#allocation37_spill] sm:$0xff] %v2876_v57  ;;  %v2878_v30 = vpop.permute.xlu0 %649 }
 0x1f7   : > { %4101 = vst [vmem:[#allocation38_spill] sm:$0xff] %v2878_v30 }
 0x1f9   : > { %v2880_v33 = vpop.permute.xlu1 %652 }
 0x1fa   : > { %4102 = vst [vmem:[#allocation39_spill] sm:$0xff] %v2880_v33  ;;  %v2882_v8 = vpop.permute.xlu0 %655 }
 0x1fb   : > { %4103 = vst [vmem:[#allocation40_spill] sm:$0xff] %v2882_v8 }
 0x1fd   : > { %v2884_v13 = vpop.permute.xlu1 %658 }
 0x1fe   : > { %4104 = vst [vmem:[#allocation41_spill] sm:$0xff] %v2884_v13  ;;  %v2886_v2 = vpop.permute.xlu0 %662 }
 0x1ff   : > { %4105 = vst [vmem:[#allocation42_spill] sm:$0xff] %v2886_v2 }
 0x201   : > { %v2888_v4 = vpop.permute.xlu1 %665 }
 0x202   : > { %v2890_v32 = vpop.permute.xlu0 %668 }
 0x205   : > { %v2892_v35 = vpop.permute.xlu1 %671 }
 0x206   : > { %v2894_v60 = vpop.permute.xlu0 %674 }
 0x209   : > { %v685_v61 = vpop.permute.xlu1 %684 }
 0x20a   : > { %v2898_v57 = vsel %vm384_vm0, %v2720_v62, %v685_v61  ;;  %v689_v30 = vpop.permute.xlu0 %688 }
 0x20b   : > { %4106 = vst [vmem:[#allocation43_spill] sm:$0xff] %v2898_v57  ;;  %723 = vrot.lane.b32.xlu0 %v2898_v57, %s2408_s11 }
 0x20d   : > { %v693_v33 = vpop.permute.xlu1 %692 }
 0x20e   : > { %v714_v8 = vsel %vm384_vm0, %v689_v30, %v693_v33  ;;  %v696_v10 = vpop.permute.xlu0 %695 }
 0x20f   : > { %725 = vrot.lane.b32.xlu1 %v714_v8, %s2408_s11 }
 0x211   : > { %v699_v15 = vpop.permute.xlu1 %698 }
 0x212   : > { %v715_v22 = vsel %vm384_vm0, %v696_v10, %v699_v15  ;;  %v702_v23 = vpop.permute.xlu0 %701  ;;  %v2933_v10 = vld [vmem:[%s2506_s29 + $0x18] sm:$0xf]  ;;  %v2938_v15 = vld [vmem:[%s2506_s29 + $0x1c] sm:$0xf] }
 0x213   : > { %727 = vrot.lane.b32.xlu0 %v715_v22, %s2408_s11 }
 0x215   : > { %v705_v34 = vpop.permute.xlu1 %704 }
 0x216   : > { %v716_v61 = vsel %vm384_vm0, %v702_v23, %v705_v34  ;;  %v708_v37 = vpop.permute.xlu0 %707  ;;  %v2958_v34 = vrot.slane %v2933_v10, 4 }
 0x217   : > { %729 = vrot.lane.b32.xlu1 %v716_v61, %s2408_s11  ;;  %v717_v30 = vsel %vm384_vm0, %v708_v37, %v2842_v6  ;;  %v2965_v37 = vrot.slane %v2938_v15, 4 }
 0x218   : > { %731 = vrot.lane.b32.xlu0 %v717_v30, %s2408_s11 }
 0x219   : > { %v2911_v8 = vpop.permute.xlu1 %711 }
 0x21a   : > { %4107 = vst [vmem:[#allocation44_spill] sm:$0xff] %v2911_v8 }
 0x21b   : > { %733 = vrot.lane.b32.xlu1 %v2911_v8, %s2408_s11 }
 0x21c   : > { %737 = vrot.lane.b32.xlu0 %v2720_v62, %s2402_s5 }
 0x21f   : > { %740 = vrot.lane.b32.xlu1 %v2727_v63, %s4044_s10  ;;  %s2418_s10 = smov 102  }
 0x220   : > { %743 = vrot.lane.b32.xlu0 %v2720_v62, %s4042_s30  ;;  %s2184_s30 = sshll.u32 %s291_s28, 2  ;;  %s1929_s28 = sadd.s32 3, %s2494_s22 }
 0x221   : > { %p3775_p0 = scmp.ge.s32.totalorder %s1929_s28, 1  ;;  %p3779_p1 = scmp.lt.s32.totalorder %s1929_s28, 9 }
 0x223   : > { %746 = vrot.lane.b32.xlu1 %v2727_v63, %s2406_s9  ;;  %p1932_p2 = pnand %p3779_p1, %p3775_p0  ;;  %p1857_p1 = scmp.ge.s32.totalorder %s2494_s22, 1 }
 0x224   : > { %749 = vrot.lane.b32.xlu0 %v2720_v62, %s4046_s6  ;;  %s4125_s6 = smov 117  }
 0x227   : > { %752 = vrot.lane.b32.xlu1 %v2727_v63, %s2408_s11 }
 0x228   : > { %755 = vrot.lane.b32.xlu0 %v2720_v62, %s4048_s8  ;;  %s293_s8 = scalar_lea.vmem %s4035_s1, %s2184_s30  ;;  %s4124_s30 = smov 118  }
 0x229   : > { %v2949_v33 = vld [vmem:[%s293_s8] sm:$0xf]  ;;  %v2196_v22 = vld [vmem:[%s293_s8 + $0x4] sm:$0xf]  ;;  %s2416_s8 = smov 22  }
 0x22a   : > { %v2972_v62 = vrot.slane %v2949_v33, 4  ;;  %v3000_v23 = vrot.slane %v2196_v22, 4 }
 0x22b   : > { %759 = vrot.lane.b32.xlu1 %v2842_v6, %s2402_s5 }
 0x22c   : > { %808 = vrot.lane.b32.xlu0 %v2933_v10, %s2404_s7  ;;  %4108 = vst [vmem:[#allocation45_spill] sm:$0xff] %v2972_v62 }
 0x22f   : > { %905 = vrot.lane.b32.xlu1 %v2938_v15, %s2404_s7 }
 0x230   : > { %804 = vrot.lane.b32.xlu0 %v2933_v10, %s2414_s25 }
 0x233   : > { %901 = vrot.lane.b32.xlu1 %v2938_v15, %s2414_s25 }
 0x234   : > { %1001 = vrot.lane.b32.xlu0 %v2949_v33, %s2404_s7 }
 0x237   : > { %997 = vrot.lane.b32.xlu1 %v2949_v33, %s2414_s25 }
 0x238   : > { %798 = vrot.lane.b32.xlu0 %v2933_v10, %s2412_s15 }
 0x23b   : > { %801 = vrot.lane.b32.xlu1 %v2958_v34, %s2415_s26 }
 0x23c   : > { %895 = vrot.lane.b32.xlu0 %v2938_v15, %s2412_s15 }
 0x23f   : > { %898 = vrot.lane.b32.xlu1 %v2965_v37, %s2415_s26 }
 0x240   : > { %991 = vrot.lane.b32.xlu0 %v2949_v33, %s2412_s15 }
 0x243   : > { %994 = vrot.lane.b32.xlu1 %v2972_v62, %s2415_s26 }
 0x244   : > { %1098 = vrot.lane.b32.xlu0 %v2196_v22, %s2404_s7 }
 0x247   : > { %792 = vrot.lane.b32.xlu1 %v2933_v10, %s2410_s13 }
 0x248   : > { %795 = vrot.lane.b32.xlu0 %v2958_v34, %s2413_s23 }
 0x24b   : > { %889 = vrot.lane.b32.xlu1 %v2938_v15, %s2410_s13 }
 0x24c   : > { %892 = vrot.lane.b32.xlu0 %v2965_v37, %s2413_s23 }
 0x24f   : > { %1094 = vrot.lane.b32.xlu1 %v2196_v22, %s2414_s25  ;;  %s1959_s25 = sadd.s32 4, %s2494_s22 }
 0x250   : > { %985 = vrot.lane.b32.xlu0 %v2949_v33, %s2410_s13  ;;  %p3751_p11 = scmp.ge.s32.totalorder %s1959_s25, 1  ;;  %p3761_p12 = scmp.lt.s32.totalorder %s1959_s25, 9 }
 0x251   : > { %s2012_s25 = sadd.s32 6, %s2494_s22 }
 0x252   : > { %p1962_p13 = pnand %p3761_p12, %p3751_p11  ;;  %p3824_p6 = scmp.ge.s32.totalorder %s2012_s25, 1 }
 0x253   : > { %988 = vrot.lane.b32.xlu1 %v2972_v62, %s2413_s23  ;;  %p3828_p7 = scmp.lt.s32.totalorder %s2012_s25, 9 }
 0x254   : > { %785 = vrot.lane.b32.xlu0 %v2933_v10, %s2409_s12 }
 0x257   : > { %789 = vrot.lane.b32.xlu1 %v2958_v34, %s2411_s14 }
 0x258   : > { %882 = vrot.lane.b32.xlu0 %v2938_v15, %s2409_s12 }
 0x25b   : > { %886 = vrot.lane.b32.xlu1 %v2965_v37, %s2411_s14 }
 0x25c   : > { %1088 = vrot.lane.b32.xlu0 %v2196_v22, %s2412_s15 }
 0x25f   : > { %1091 = vrot.lane.b32.xlu1 %v3000_v23, %s2415_s26 }
 0x260   : > { %978 = vrot.lane.b32.xlu0 %v2949_v33, %s2409_s12 }
 0x263   : > { %982 = vrot.lane.b32.xlu1 %v2972_v62, %s2411_s14 }
 0x264   : > { %781 = vrot.lane.b32.xlu0 %v2842_v6, %s2404_s7 }
 0x267   : > { %878 = vrot.lane.b32.xlu1 %v2958_v34, %s2404_s7 }
 0x268   : > { %1082 = vrot.lane.b32.xlu0 %v2196_v22, %s2410_s13  ;;  %s2421_s13 = smov 86  }
 0x26b   : > { %1085 = vrot.lane.b32.xlu1 %v3000_v23, %s2413_s23 }
 0x26c   : > { %974 = vrot.lane.b32.xlu0 %v2965_v37, %s2404_s7 }
 0x26f   : > { %1075 = vrot.lane.b32.xlu1 %v2196_v22, %s2409_s12 }
 0x270   : > { %1079 = vrot.lane.b32.xlu0 %v3000_v23, %s2411_s14  ;;  %s1876_s14 = sadd.s32 1, %s2494_s22 }
 0x271   : > { %p3732_p8 = scmp.ge.s32.totalorder %s1876_s14, 1  ;;  %p3736_p9 = scmp.lt.s32.totalorder %s1876_s14, 9 }
 0x272   : > { %s2436_s14 = smov 53  }
 0x273   : > { %1071 = vrot.lane.b32.xlu1 %v2972_v62, %s2404_s7  ;;  %s4126_s7 = smov 106   ;;  %p1879_p10 = pnand %p3736_p9, %p3732_p8 }
 0x274   : > { %p2015_p8 = pnand %p3828_p7, %p3824_p6 }
 0x27d   : > { %v3023_v61 = vpop.permute.xlu0 %723 }
 0x281   : > { %v3025_v30 = vpop.permute.xlu1 %725 }
 0x285   : > { %v3027_v57 = vpop.permute.xlu0 %727 }
 0x289   : > { %v3029_v8 = vpop.permute.xlu1 %729 }
 0x28a   : > { %v3031_v13 = vpop.permute.xlu0 %731 }
 0x28d   : > { %v3033_v63 = vpop.permute.xlu1 %733 }
 0x28e   : > { %v3035_v12 = vpop.permute.xlu0 %737 }
 0x28f   : > { %4109 = vst [vmem:[#allocation46_spill] sm:$0xff] %v3035_v12 }
 0x291   : > { %v3037_v22 = vpop.permute.xlu1 %740 }
 0x292   : > { %4110 = vst [vmem:[#allocation47_spill] sm:$0xff] %v3037_v22  ;;  %v3039_v3 = vpop.permute.xlu0 %743 }
 0x293   : > { %4111 = vst [vmem:[#allocation48_spill] sm:$0xff] %v3039_v3 }
 0x295   : > { %v3041_v24 = vpop.permute.xlu1 %746 }
 0x296   : > { %4112 = vst [vmem:[#allocation49_spill] sm:$0xff] %v3041_v24  ;;  %v3043_v7 = vpop.permute.xlu0 %749 }
 0x297   : > { %4113 = vst [vmem:[#allocation50_spill] sm:$0xff] %v3043_v7 }
 0x299   : > { %v3045_v36 = vpop.permute.xlu1 %752 }
 0x29a   : > { %4114 = vst [vmem:[#allocation51_spill] sm:$0xff] %v3045_v36  ;;  %v3047_v5 = vpop.permute.xlu0 %755 }
 0x29b   : > { %4115 = vst [vmem:[#allocation52_spill] sm:$0xff] %v3047_v5 }
 0x29d   : > { %v3049_v11 = vpop.permute.xlu1 %759 }
 0x29e   : > { %4116 = vst [vmem:[#allocation53_spill] sm:$0xff] %v3049_v11  ;;  %v3051_v2 = vpop.permute.xlu0 %808 }
 0x29f   : > { %4117 = vst [vmem:[#allocation54_spill] sm:$0xff] %v3051_v2  ;;  %830 = vrot.lane.b32.xlu0 %v3051_v2, %s2408_s11 }
 0x2a1   : > { %v3055_v12 = vpop.permute.xlu1 %905 }
 0x2a2   : > { %4118 = vst [vmem:[#allocation55_spill] sm:$0xff] %v3055_v12  ;;  %927 = vrot.lane.b32.xlu1 %v3055_v12, %s2408_s11  ;;  %v805_v22 = vpop.permute.xlu0 %804 }
 0x2a3   : > { %v814_v3 = vsel %vm384_vm0, %v805_v22, %v2958_v34 }
 0x2a5   : > { %v902_v24 = vpop.permute.xlu1 %901 }
 0x2a6   : > { %828 = vrot.lane.b32.xlu1 %v814_v3, %s2408_s11  ;;  %v3062_v7 = vpop.permute.xlu0 %1001  ;;  %v911_v2 = vsel %vm384_vm0, %v902_v24, %v2965_v37 }
 0x2a7   : > { %4119 = vst [vmem:[#allocation56_spill] sm:$0xff] %v3062_v7  ;;  %1023 = vrot.lane.b32.xlu0 %v3062_v7, %s2408_s11 }
 0x2a9   : > { %v998_v36 = vpop.permute.xlu1 %997 }
 0x2aa   : > { %v1007_v5 = vsel %vm384_vm0, %v998_v36, %v2972_v62  ;;  %v799_v12 = vpop.permute.xlu0 %798 }
 0x2ab   : > { %1021 = vrot.lane.b32.xlu1 %v1007_v5, %s2408_s11  ;;  %925 = vrot.lane.b32.xlu0 %v911_v2, %s2408_s11 }
 0x2ad   : > { %v802_v22 = vpop.permute.xlu1 %801 }
 0x2ae   : > { %v813_v3 = vsel %vm384_vm0, %v799_v12, %v802_v22  ;;  %v896_v11 = vpop.permute.xlu0 %895 }
 0x2af   : > { %826 = vrot.lane.b32.xlu0 %v813_v3, %s2408_s11 }
 0x2b1   : > { %v899_v17 = vpop.permute.xlu1 %898 }
 0x2b2   : > { %v910_v7 = vsel %vm384_vm0, %v896_v11, %v899_v17  ;;  %v992_v16 = vpop.permute.xlu0 %991 }
 0x2b3   : > { %923 = vrot.lane.b32.xlu1 %v910_v7, %s2408_s11 }
 0x2b5   : > { %v995_v36 = vpop.permute.xlu1 %994 }
 0x2b6   : > { %v1006_v24 = vsel %vm384_vm0, %v992_v16, %v995_v36  ;;  %v1099_v50 = vpop.permute.xlu0 %1098 }
 0x2b7   : > { %1019 = vrot.lane.b32.xlu1 %v1006_v24, %s2408_s11  ;;  %1120 = vrot.lane.b32.xlu0 %v1099_v50, %s2408_s11 }
 0x2b9   : > { %v793_v5 = vpop.permute.xlu1 %792 }
 0x2ba   : > { %v796_v2 = vpop.permute.xlu0 %795 }
 0x2bb   : > { %v812_v12 = vsel %vm384_vm0, %v793_v5, %v796_v2 }
 0x2bc   : > { %824 = vrot.lane.b32.xlu0 %v812_v12, %s2408_s11 }
 0x2bd   : > { %v890_v22 = vpop.permute.xlu1 %889 }
 0x2be   : > { %v893_v3 = vpop.permute.xlu0 %892 }
 0x2bf   : > { %v909_v17 = vsel %vm384_vm0, %v890_v22, %v893_v3 }
 0x2c0   : > { %921 = vrot.lane.b32.xlu1 %v909_v17, %s2408_s11 }
 0x2c1   : > { %v1095_v7 = vpop.permute.xlu1 %1094 }
 0x2c2   : > { %v1104_v16 = vsel %vm384_vm0, %v1095_v7, %v3000_v23  ;;  %v986_v11 = vpop.permute.xlu0 %985 }
 0x2c3   : > { %1118 = vrot.lane.b32.xlu0 %v1104_v16, %s2408_s11 }
 0x2c5   : > { %v989_v50 = vpop.permute.xlu1 %988 }
 0x2c6   : > { %v1005_v36 = vsel %vm384_vm0, %v986_v11, %v989_v50  ;;  %v786_v24 = vpop.permute.xlu0 %785 }
 0x2c7   : > { %1017 = vrot.lane.b32.xlu1 %v1005_v36, %s2408_s11 }
 0x2c9   : > { %v790_v5 = vpop.permute.xlu1 %789 }
 0x2ca   : > { %v811_v2 = vsel %vm384_vm0, %v786_v24, %v790_v5  ;;  %v883_v12 = vpop.permute.xlu0 %882 }
 0x2cb   : > { %822 = vrot.lane.b32.xlu0 %v811_v2, %s2408_s11 }
 0x2cd   : > { %v887_v22 = vpop.permute.xlu1 %886 }
 0x2ce   : > { %v908_v3 = vsel %vm384_vm0, %v883_v12, %v887_v22  ;;  %v1089_v23 = vpop.permute.xlu0 %1088 }
 0x2cf   : > { %919 = vrot.lane.b32.xlu1 %v908_v3, %s2408_s11 }
 0x2d1   : > { %v1092_v17 = vpop.permute.xlu1 %1091 }
 0x2d2   : > { %v1103_v7 = vsel %vm384_vm0, %v1089_v23, %v1092_v17  ;;  %v979_v16 = vpop.permute.xlu0 %978 }
 0x2d3   : > { %1116 = vrot.lane.b32.xlu0 %v1103_v7, %s2408_s11 }
 0x2d5   : > { %v983_v11 = vpop.permute.xlu1 %982 }
 0x2d6   : > { %v1004_v50 = vsel %vm384_vm0, %v979_v16, %v983_v11  ;;  %v782_v36 = vpop.permute.xlu0 %781 }
 0x2d7   : > { %1015 = vrot.lane.b32.xlu1 %v1004_v50, %s2408_s11  ;;  %v3098_v24 = vsel %vm384_vm0, %v2835_v9, %v782_v36 }
 0x2d8   : > { %4120 = vst [vmem:[#allocation57_spill] sm:$0xff] %v3098_v24  ;;  %820 = vrot.lane.b32.xlu0 %v3098_v24, %s2408_s11  ;;  %v4148_v24 = vld [vmem:[#allocation40_spill] sm:$0xff] }
 0x2d9   : > { %v879_v5 = vpop.permute.xlu1 %878 }
 0x2da   : > { %v3104_v2 = vsel %vm384_vm0, %v2933_v10, %v879_v5  ;;  %v1083_v12 = vpop.permute.xlu0 %1082 }
 0x2db   : > { %4121 = vst [vmem:[#allocation58_spill] sm:$0xff] %v3104_v2  ;;  %917 = vrot.lane.b32.xlu1 %v3104_v2, %s2408_s11  ;;  %v4144_v2 = vld [vmem:[#allocation30_spill] sm:$0xff] }
 0x2dd   : > { %v1086_v22 = vpop.permute.xlu1 %1085 }
 0x2de   : > { %v1102_v3 = vsel %vm384_vm0, %v1083_v12, %v1086_v22  ;;  %v975_v23 = vpop.permute.xlu0 %974 }
 0x2df   : > { %768 = vrot.lane.b32.xlu1 %v2835_v9, %s2406_s9  ;;  %1114 = vrot.lane.b32.xlu0 %v1102_v3, %s2408_s11  ;;  %v3118_v17 = vsel %vm384_vm0, %v2938_v15, %v975_v23 }
 0x2e0   : > { %4123 = vst [vmem:[#allocation59_spill] sm:$0xff] %v3118_v17 }
 0x2e1   : > { %v1076_v7 = vpop.permute.xlu1 %1075 }
 0x2e2   : > { %v1080_v16 = vpop.permute.xlu0 %1079 }
 0x2e3   : > { %865 = vrot.lane.b32.xlu1 %v2933_v10, %s2406_s9  ;;  %771 = vrot.lane.b32.xlu0 %v2842_v6, %s4122_s24  ;;  %v1101_v11 = vsel %vm384_vm0, %v1076_v7, %v1080_v16 }
 0x2e5   : > { %v1072_v50 = vpop.permute.xlu1 %1071 }
 0x2e6   : > { %v1100_v36 = vsel %vm384_vm0, %v2949_v33, %v1072_v50 }
 0x2e7   : > { %868 = vrot.lane.b32.xlu0 %v2958_v34, %s4122_s24  ;;  %1013 = vrot.lane.b32.xlu1 %v3118_v17, %s2408_s11  ;;  %v4143_v17 = vld [vmem:[#allocation31_spill] sm:$0xff] }
 0x2eb   : > { %961 = vrot.lane.b32.xlu0 %v2938_v15, %s2406_s9  ;;  %964 = vrot.lane.b32.xlu1 %v2965_v37, %s4122_s24 }
 0x2ef   : > { %762 = vrot.lane.b32.xlu1 %v2835_v9, %s4124_s30  ;;  %1112 = vrot.lane.b32.xlu0 %v1101_v11, %s2408_s11 }
 0x2f3   : > { %859 = vrot.lane.b32.xlu1 %v2933_v10, %s4124_s30  ;;  %765 = vrot.lane.b32.xlu0 %v2842_v6, %s4125_s6 }
 0x2f7   : > { %955 = vrot.lane.b32.xlu1 %v2938_v15, %s4124_s30  ;;  %862 = vrot.lane.b32.xlu0 %v2958_v34, %s4125_s6 }
 0x2fb   : > { %1110 = vrot.lane.b32.xlu1 %v1100_v36, %s2408_s11  ;;  %958 = vrot.lane.b32.xlu0 %v2965_v37, %s4125_s6  ;;  %v4127_v36 = vld [vmem:[#allocation22_spill] sm:$0xff] }
 0x2ff   : > { %1058 = vrot.lane.b32.xlu1 %v2949_v33, %s2406_s9  ;;  %856 = vrot.lane.b32.xlu0 %v2958_v34, %s2402_s5 }
 0x303   : > { %952 = vrot.lane.b32.xlu1 %v2965_v37, %s2402_s5  ;;  %1061 = vrot.lane.b32.xlu0 %v2972_v62, %s4122_s24 }
 0x307   : > { %1052 = vrot.lane.b32.xlu1 %v2949_v33, %s4124_s30  ;;  %852 = vrot.lane.b32.xlu0 %v2835_v9, %s4126_s7 }
 0x30b   : > { %948 = vrot.lane.b32.xlu1 %v2933_v10, %s4126_s7  ;;  %1055 = vrot.lane.b32.xlu0 %v2972_v62, %s4125_s6 }
 0x30f   : > { %849 = vrot.lane.b32.xlu1 %v2842_v6, %s2408_s11  ;;  %846 = vrot.lane.b32.xlu0 %v2835_v9, %s4122_s24 }
 0x311   : > { %v3177_v33 = vpop.permute.xlu0 %830 }
 0x313   : > { %942 = vrot.lane.b32.xlu1 %v2933_v10, %s4122_s24  ;;  %1049 = vrot.lane.b32.xlu0 %v2972_v62, %s2402_s5  ;;  %v4149_v62 = vld [vmem:[#allocation39_spill] sm:$0xff] }
 0x314   : > { %v3183_v5 = vpop.permute.xlu1 %927 }
 0x317   : > { %840 = vrot.lane.b32.xlu1 %v2835_v9, %s4125_s6  ;;  %945 = vrot.lane.b32.xlu0 %v2958_v34, %s2408_s11 }
 0x318   : > { %v3195_v22 = vpop.permute.xlu1 %828 }
 0x319   : > { %v3189_v12 = vpop.permute.xlu0 %1023 }
 0x31b   : > { %1045 = vrot.lane.b32.xlu1 %v2938_v15, %s4126_s7  ;;  %843 = vrot.lane.b32.xlu0 %v2842_v6, %s2406_s9 }
 0x31d   : > { %v3197_v3 = vpop.permute.xlu0 %925  ;;  %v3203_v23 = vpop.permute.xlu1 %1021 }
 0x31f   : > { %939 = vrot.lane.b32.xlu1 %v2958_v34, %s2406_s9  ;;  %936 = vrot.lane.b32.xlu0 %v2933_v10, %s4125_s6 }
 0x323   : > { %837 = vrot.lane.b32.xlu1 %v2842_v6, %s4124_s30  ;;  %834 = vrot.lane.b32.xlu0 %v2835_v9, %s2402_s5  ;;  %v3209_v9 = vpop.permute.xlu0 %826 }
 0x325   : > { %v3211_v7 = vpop.permute.xlu1 %923 }
 0x327   : > { %1042 = vrot.lane.b32.xlu1 %v2965_v37, %s2408_s11  ;;  %1039 = vrot.lane.b32.xlu0 %v2938_v15, %s4122_s24  ;;  %s2420_s11 = smov 54  }
 0x328   : > { %s3769_s24 = scalar_select %p1879_p10, 0, 1 }
 0x329   : > { %v3217_v16 = vpop.permute.xlu0 %1120 }
 0x32b   : > { %933 = vrot.lane.b32.xlu1 %v2958_v34, %s4124_s30  ;;  %930 = vrot.lane.b32.xlu0 %v2933_v10, %s2402_s5  ;;  %v3223_v10 = vpop.permute.xlu1 %1019 }
 0x32e   : > { %v3225_v11 = vpop.permute.xlu0 %824 }
 0x32f   : > { %1036 = vrot.lane.b32.xlu1 %v2965_v37, %s2406_s9  ;;  %1033 = vrot.lane.b32.xlu0 %v2938_v15, %s4125_s6  ;;  %s2417_s9 = smov 70  }
 0x333   : > { %1030 = vrot.lane.b32.xlu1 %v2965_v37, %s4124_s30  ;;  %1027 = vrot.lane.b32.xlu0 %v2938_v15, %s2402_s5  ;;  %v3231_v15 = vpop.permute.xlu1 %921  ;;  %s2419_s5 = smov 6  }
 0x335   : > { %v3233_v50 = vpop.permute.xlu0 %1118 }
 0x337   : > { %1254 = vrot.lane.b32.xlu1 %v2870_v59, %s2416_s8  ;;  %1205 = vrot.lane.b32.xlu0 %v2767_v29, %s2417_s9 }
 0x339   : > { %v3239_v29 = vpop.permute.xlu1 %1017 }
 0x33b   : > { %1156 = vrot.lane.b32.xlu1 %v2765_v28, %s4124_s30  ;;  %1303 = vrot.lane.b32.xlu0 %v3033_v63, %s2418_s10 }
 0x33d   : > { %v3241_v59 = vpop.permute.xlu0 %822 }
 0x33f   : > { %1252 = vrot.lane.b32.xlu1 %v2868_v1, %s2416_s8  ;;  %1203 = vrot.lane.b32.xlu0 %v2769_v42, %s2417_s9 }
 0x341   : > { %v3247_v63 = vpop.permute.xlu1 %919 }
 0x343   : > { %1154 = vrot.lane.b32.xlu1 %v2771_v44, %s4124_s30  ;;  %1301 = vrot.lane.b32.xlu0 %v3031_v13, %s2418_s10 }
 0x345   : > { %v3249_v28 = vpop.permute.xlu0 %1116 }
 0x347   : > { %1250 = vrot.lane.b32.xlu1 %v2866_v0, %s2416_s8  ;;  %1201 = vrot.lane.b32.xlu0 %v2787_v53, %s2417_s9 }
 0x349   : > { %v3255_v42 = vpop.permute.xlu1 %1015 }
 0x34a   : > { %v3261_v44 = vpop.permute.xlu0 %820 }
 0x34b   : > { %1152 = vrot.lane.b32.xlu1 %v2777_v47, %s4124_s30  ;;  %1299 = vrot.lane.b32.xlu0 %v3029_v8, %s2418_s10 }
 0x34d   : > { %v3263_v13 = vpop.permute.xlu1 %917 }
 0x34f   : > { %1248 = vrot.lane.b32.xlu1 %v2864_v58, %s2416_s8  ;;  %1199 = vrot.lane.b32.xlu0 %v2785_v52, %s2417_s9 }
 0x351   : > { %v3269_v0 = vpop.permute.xlu1 %768  ;;  %v3271_v53 = vpop.permute.xlu0 %1114 }
 0x353   : > { %1150 = vrot.lane.b32.xlu1 %v2779_v48, %s4124_s30  ;;  %1297 = vrot.lane.b32.xlu0 %v3027_v57, %s2418_s10 }
 0x355   : > { %v3277_v47 = vpop.permute.xlu1 %865  ;;  %v3279_v1 = vpop.permute.xlu0 %771 }
 0x357   : > { %1246 = vrot.lane.b32.xlu1 %v2862_v55, %s2416_s8  ;;  %1197 = vrot.lane.b32.xlu0 %v2783_v51, %s2417_s9 }
 0x359   : > { %v3285_v52 = vpop.permute.xlu1 %1013  ;;  %v3287_v58 = vpop.permute.xlu0 %868 }
 0x35b   : > { %1148 = vrot.lane.b32.xlu1 %v2773_v45, %s4124_s30  ;;  %1295 = vrot.lane.b32.xlu0 %v3025_v30, %s2418_s10 }
 0x35d   : > { %v3293_v48 = vpop.permute.xlu1 %964  ;;  %v3295_v57 = vpop.permute.xlu0 %961 }
 0x35f   : > { %1244 = vrot.lane.b32.xlu1 %v2860_v14, %s2416_s8  ;;  %1195 = vrot.lane.b32.xlu0 %v2781_v49, %s2417_s9  ;;  %v489_v14 = vsel %vm384_vm0, %v2677_v40, %v2681_v43  ;;  %v586_v49 = vsel %vm384_vm0, %v2789_v54, %v2791_v56  ;;  %v683_v40 = vsel %vm384_vm0, %v2892_v35, %v2894_v60 }
 0x360   : > { %v488_v56 = vsel %vm384_vm0, %v2673_v38, %v2679_v41  ;;  %v391_v60 = vsel %vm384_vm0, %v2649_v19, %v2647_v18  ;;  %v682_v38 = vsel %vm384_vm0, %v2888_v4, %v2890_v32  ;;  %v584_v18 = vsel %vm384_vm0, %v4127_v36, %v2759_v25  ;;  %v4128_v4 = vld [vmem:[#allocation13_spill] sm:$0xff] }
 0x361   : > { %v3301_v51 = vpop.permute.xlu1 %762  ;;  %v3303_v55 = vpop.permute.xlu0 %1112 }
 0x363   : > { %1146 = vrot.lane.b32.xlu1 %v2775_v46, %s4124_s30  ;;  %1293 = vrot.lane.b32.xlu0 %v3023_v61, %s2418_s10  ;;  %v392_v61 = vsel %vm384_vm0, %v2653_v21, %v2651_v20  ;;  %v585_v20 = vsel %vm384_vm0, %v2761_v26, %v2763_v27  ;;  %v487_v27 = vsel %vm384_vm0, %v2657_v31, %v2675_v39 }
 0x365   : > { %v3309_v45 = vpop.permute.xlu1 %859  ;;  %v3311_v8 = vpop.permute.xlu0 %765 }
 0x367   : > { %1242 = vrot.lane.b32.xlu1 %v586_v49, %s2416_s8  ;;  %1193 = vrot.lane.b32.xlu0 %v489_v14, %s2417_s9  ;;  %v4129_v14 = vld [vmem:[#allocation14_spill] sm:$0xff] }
 0x368   : > { %v390_v49 = vsel %vm384_vm0, %v4129_v14, %v4128_v4  ;;  %v4136_v14 = vld [vmem:[#allocation2_spill] sm:$0xff] }
 0x369   : > { %v3321_v46 = vpop.permute.xlu1 %955  ;;  %v3323_v30 = vpop.permute.xlu0 %862 }
 0x36b   : > { %1144 = vrot.lane.b32.xlu1 %v392_v61, %s4124_s30  ;;  %1291 = vrot.lane.b32.xlu0 %v683_v40, %s2418_s10  ;;  %v4130_v61 = vld [vmem:[#allocation42_spill] sm:$0xff] }
 0x36c   : > { %v4131_v40 = vld [vmem:[#allocation34_spill] sm:$0xff] }
 0x36d   : > { %v3333_v43 = vpop.permute.xlu1 %1110  ;;  %v3335_v54 = vpop.permute.xlu0 %958  ;;  %v681_v31 = vsel %vm384_vm0, %v4131_v40, %v4130_v61  ;;  %v4138_v40 = vld [vmem:[#allocation25_spill] sm:$0xff] }
 0x36f   : > { %1240 = vrot.lane.b32.xlu1 %v585_v20, %s2416_s8  ;;  %1191 = vrot.lane.b32.xlu0 %v488_v56, %s2417_s9  ;;  %v4132_v56 = vld [vmem:[#allocation3_spill] sm:$0xff]  ;;  %v4133_v20 = vld [vmem:[#allocation20_spill] sm:$0xff] }
 0x371   : > { %v3345_v21 = vpop.permute.xlu1 %1058  ;;  %v3347_v35 = vpop.permute.xlu0 %856 }
 0x373   : > { %1142 = vrot.lane.b32.xlu1 %v391_v60, %s4124_s30  ;;  %1289 = vrot.lane.b32.xlu0 %v682_v38, %s2418_s10  ;;  %v486_v60 = vsel %vm384_vm0, %v4133_v20, %v4132_v56  ;;  %v4134_v38 = vld [vmem:[#allocation4_spill] sm:$0xff] }
 0x375   : > { %v3357_v41 = vpop.permute.xlu1 %952  ;;  %v3359_v26 = vpop.permute.xlu0 %1061 }
 0x377   : > { %1238 = vrot.lane.b32.xlu1 %v584_v18, %s2416_s8  ;;  %1189 = vrot.lane.b32.xlu0 %v487_v27, %s2417_s9  ;;  %v4135_v27 = vld [vmem:[#allocation32_spill] sm:$0xff] }
 0x378   : > { %v583_v36 = vsel %vm384_vm0, %v4135_v27, %v4134_v38  ;;  %v4142_v27 = vld [vmem:[#allocation18_spill] sm:$0xff] }
 0x379   : > { %v3369_v19 = vpop.permute.xlu1 %1052  ;;  %v3371_v32 = vpop.permute.xlu0 %852 }
 0x37b   : > { %1140 = vrot.lane.b32.xlu1 %v390_v49, %s4124_s30  ;;  %1287 = vrot.lane.b32.xlu0 %v681_v31, %s2418_s10  ;;  %v4137_v49 = vld [vmem:[#allocation9_spill] sm:$0xff] }
 0x37c   : > { %v389_v61 = vsel %vm384_vm0, %v4137_v49, %v4136_v14  ;;  %v4139_v31 = vld [vmem:[#allocation41_spill] sm:$0xff]  ;;  %v582_v14 = vsel %vm384_vm0, %v4144_v2, %v4143_v17 }
 0x37d   : > { %v3381_v39 = vpop.permute.xlu1 %948  ;;  %v3383_v25 = vpop.permute.xlu0 %1055  ;;  %v680_v56 = vsel %vm384_vm0, %v4139_v31, %v4138_v40  ;;  %v4146_v40 = vld [vmem:[#allocation12_spill] sm:$0xff]  ;;  %v4147_v31 = vld [vmem:[#allocation7_spill] sm:$0xff] }
 0x37f   : > { %1236 = vrot.lane.b32.xlu1 %v583_v36, %s2416_s8  ;;  %1187 = vrot.lane.b32.xlu0 %v486_v60, %s2417_s9  ;;  %v4141_v60 = vld [vmem:[#allocation21_spill] sm:$0xff] }
 0x380   : > { %v485_v36 = vsel %vm384_vm0, %v4142_v27, %v4141_v60  ;;  %v679_v60 = vsel %vm384_vm0, %v4149_v62, %v4148_v24  ;;  %v4152_v27 = vld [vmem:[#allocation19_spill] sm:$0xff] }
 0x381   : > { %v3393_v18 = vpop.permute.xlu1 %849  ;;  %v3395_v4 = vpop.permute.xlu0 %846 }
 0x383   : > { %1138 = vrot.lane.b32.xlu1 %v389_v61, %s4124_s30  ;;  %1285 = vrot.lane.b32.xlu0 %v680_v56, %s2418_s10  ;;  %v388_v56 = vsel %vm384_vm0, %v4147_v31, %v4146_v40  ;;  %v4158_v31 = vld [vmem:[#allocation10_spill] sm:$0xff] }
 0x385   : > { %v3405_v20 = vpop.permute.xlu1 %942  ;;  %v3407_v38 = vpop.permute.xlu0 %1049 }
 0x386   : > { %4140 = vst [vmem:[#allocation22_spill] sm:$0xff] %v3405_v20  ;;  %v4155_v20 = vld [vmem:[#allocation28_spill] sm:$0xff] }
 0x387   : > { %1234 = vrot.lane.b32.xlu1 %v582_v14, %s2416_s8  ;;  %1185 = vrot.lane.b32.xlu0 %v485_v36, %s2417_s9  ;;  %v4153_v36 = vld [vmem:[#allocation16_spill] sm:$0xff] }
 0x388   : > { %v484_v14 = vsel %vm384_vm0, %v4153_v36, %v4152_v27  ;;  %v4164_v36 = vld [vmem:[#allocation17_spill] sm:$0xff] }
 0x389   : > { %v3417_v49 = vpop.permute.xlu1 %840  ;;  %v3419_v61 = vpop.permute.xlu0 %945 }
 0x38a   : > { %4145 = vst [vmem:[#allocation13_spill] sm:$0xff] %v3417_v49  ;;  %v4154_v49 = vld [vmem:[#allocation29_spill] sm:$0xff] }
 0x38b   : > { %1136 = vrot.lane.b32.xlu1 %v388_v56, %s4124_s30  ;;  %1283 = vrot.lane.b32.xlu0 %v679_v60, %s2418_s10  ;;  %v581_v40 = vsel %vm384_vm0, %v4155_v20, %v4154_v49  ;;  %v4159_v56 = vld [vmem:[#allocation5_spill] sm:$0xff] }
 0x38c   : > { %v387_v60 = vsel %vm384_vm0, %v4159_v56, %v4158_v31  ;;  %v4168_v56 = vld [vmem:[#allocation11_spill] sm:$0xff] }
 0x38d   : > { %v3429_v2 = vpop.permute.xlu1 %1045  ;;  %v3431_v17 = vpop.permute.xlu0 %843 }
 0x38e   : > { %4150 = vst [vmem:[#allocation14_spill] sm:$0xff] %v3429_v2  ;;  %4151 = vst [vmem:[#allocation42_spill] sm:$0xff] %v3431_v17  ;;  %v4160_v2 = vld [vmem:[#allocation38_spill] sm:$0xff]  ;;  %v4161_v17 = vld [vmem:[#allocation37_spill] sm:$0xff] }
 0x38f   : > { %1232 = vrot.lane.b32.xlu1 %v581_v40, %s2416_s8  ;;  %1183 = vrot.lane.b32.xlu0 %v484_v14, %s2417_s9  ;;  %v678_v27 = vsel %vm384_vm0, %v4161_v17, %v4160_v2  ;;  %v4165_v14 = vld [vmem:[#allocation15_spill] sm:$0xff] }
 0x390   : > { %v483_v40 = vsel %vm384_vm0, %v4165_v14, %v4164_v36  ;;  %v4172_v14 = vld [vmem:[#allocation24_spill] sm:$0xff] }
 0x391   : > { %v3441_v62 = vpop.permute.xlu1 %939  ;;  %v3443_v24 = vpop.permute.xlu0 %936 }
 0x392   : > { %4156 = vst [vmem:[#allocation34_spill] sm:$0xff] %v3441_v62  ;;  %4157 = vst [vmem:[#allocation3_spill] sm:$0xff] %v3443_v24  ;;  %v4166_v24 = vld [vmem:[#allocation27_spill] sm:$0xff]  ;;  %v4167_v62 = vld [vmem:[#allocation26_spill] sm:$0xff] }
 0x393   : > { %1134 = vrot.lane.b32.xlu1 %v387_v60, %s4124_s30  ;;  %1281 = vrot.lane.b32.xlu0 %v678_v27, %s2418_s10  ;;  %v580_v31 = vsel %vm384_vm0, %v4167_v62, %v4166_v24  ;;  %v4169_v60 = vld [vmem:[#allocation6_spill] sm:$0xff] }
 0x394   : > { %v386_v27 = vsel %vm384_vm0, %v4169_v60, %v4168_v56  ;;  %v4175_v60 = vld [vmem:[#allocation33_spill] sm:$0xff] }
 0x395   : > { %v3453_v20 = vpop.permute.xlu1 %837  ;;  %v3455_v49 = vpop.permute.xlu0 %834 }
 0x396   : > { %4162 = vst [vmem:[#allocation20_spill] sm:$0xff] %v3453_v20  ;;  %4163 = vst [vmem:[#allocation4_spill] sm:$0xff] %v3455_v49  ;;  %v4170_v49 = vld [vmem:[#allocation36_spill] sm:$0xff]  ;;  %v4171_v20 = vld [vmem:[#allocation35_spill] sm:$0xff] }
 0x397   : > { %1230 = vrot.lane.b32.xlu1 %v580_v31, %s2416_s8  ;;  %1181 = vrot.lane.b32.xlu0 %v483_v40, %s2417_s9  ;;  %v677_v36 = vsel %vm384_vm0, %v4171_v20, %v4170_v49  ;;  %v4173_v40 = vld [vmem:[#allocation23_spill] sm:$0xff] }
 0x399   : > { %v3465_v2 = vpop.permute.xlu1 %1042  ;;  %v3467_v17 = vpop.permute.xlu0 %1039 }
 0x39b   : > { %1132 = vrot.lane.b32.xlu1 %v386_v27, %s4124_s30  ;;  %1279 = vrot.lane.b32.xlu0 %v677_v36, %s2418_s10 }
 0x39d   : > { %v3477_v62 = vpop.permute.xlu1 %933  ;;  %v3479_v24 = vpop.permute.xlu0 %930 }
 0x39f   : > { %1228 = vrot.lane.b32.xlu1 %v4172_v14, %s2416_s8  ;;  %1179 = vrot.lane.b32.xlu0 %v4173_v40, %s2417_s9  ;;  %v2360_v14 = vld [vmem:[%s2506_s29] sm:$0xf]  ;;  %v4176_v40 = vld [vmem:[#allocation8_spill] sm:$0xff]  ;;  %s2423_s29 = smov 38  }
 0x3a0   : > { %s3787_s8 = scalar_select %p1962_p13, 0, 1 }
 0x3a1   : > { %v3485_v31 = vpop.permute.xlu1 %1036  ;;  %v3487_v56 = vpop.permute.xlu0 %1033  ;;  %s2217_s9 = scalar_select %p2015_p8, 0, 1 }
 0x3a2   : > { %s1965_s15 = scvt.s32.f32 %s3787_s8  ;;  %s1989_s8 = sadd.s32 5, %s2494_s22 }
 0x3a3   : > { %1401 = vrot.lane.b32.xlu1 %v3183_v5, %s2419_s5  ;;  %1352 = vrot.lane.b32.xlu0 %v3177_v33, %s2420_s11  ;;  %v385_v5 = vsel %vm384_vm0, %v2360_v14, %v4176_v40  ;;  %v2422_v33 = vmov 0.0   ;;  %p3858_p9 = scmp.ge.s32.totalorder %s1989_s8, 1  ;;  %p3862_p10 = scmp.lt.s32.totalorder %s1989_s8, 9 }
 0x3a4   : > { %1708 = vmatprep.mubr.f32.mxu0 %v2422_v33  ;;  %1779 = vmatprep.mubr.f32.mxu1 %v2422_v33  ;;  %s2431_s8 = smov 16  }
 0x3a5   : > { %v3493_v20 = vpop.permute.xlu1 %1030  ;;  %v3495_v49 = vpop.permute.xlu0 %1027  ;;  %p1992_p11 = pnand %p3862_p10, %p3858_p9 }
 0x3a6   : > { %4174 = vst [vmem:[#allocation32_spill] sm:$0xff] %v3495_v49 }
 0x3a7   : > { %1450 = vrot.lane.b32.xlu1 %v3189_v12, %s2421_s13  ;;  %1277 = vrot.lane.b32.xlu0 %v4175_v60, %s2418_s10  ;;  %s2215_s25 = scalar_select %p1992_p11, 0, 1 }
 0x3a8   : > { %s2433_s10 = smov 69  }
 0x3a9   : > { %v1255_v27 = vpop.permute.xlu1 %1254  ;;  %v1206_v36 = vpop.permute.xlu0 %1205  ;;  %s1995_s26 = scvt.s32.f32 %s2215_s25  ;;  %s2437_s25 = smov 5  }
 0x3aa   : > { %v1544_v49 = vsel %vm1530_vm1, %v1206_v36, %v1255_v27 }
 0x3ab   : > { %1350 = vrot.lane.b32.xlu1 %v3195_v22, %s2420_s11  ;;  %1130 = vrot.lane.b32.xlu0 %v385_v5, %s4124_s30 }
 0x3ad   : > { %v1157_v12 = vpop.permute.xlu1 %1156  ;;  %v3509_v60 = vpop.permute.xlu0 %1303 }
 0x3ae   : > { %v1559_v14 = vsel %vm1545_vm2, %v1544_v49, %v3509_v60  ;;  %v1529_v40 = vsel %vm1515_vm3, %v1157_v12, %v1206_v36 }
 0x3af   : > { %1448 = vrot.lane.b32.xlu1 %v3203_v23, %s2421_s13  ;;  %1399 = vrot.lane.b32.xlu0 %v3197_v3, %s2419_s5 }
 0x3b0   : > { %2197 = vmatprep.subr.msk.mxu0 %vm384_vm0, %v1559_v14 }
 0x3b1   : > { %2198 = vmatpush1.msk.msra.mxu0 %vm384_vm0, %v1529_v40  ;;  %v1253_v22 = vpop.permute.xlu1 %1252  ;;  %v1204_v5 = vpop.permute.xlu0 %1203 }
 0x3b2   : > { %v1543_v49 = vsel %vm1530_vm1, %v1204_v5, %v1253_v22 }
 0x3b3   : > { %1397 = vrot.lane.b32.xlu1 %v3211_v7, %s2419_s5  ;;  %1348 = vrot.lane.b32.xlu0 %v3209_v9, %s2420_s11 }
 0x3b5   : > { %v1155_v27 = vpop.permute.xlu1 %1154  ;;  %v3526_v36 = vpop.permute.xlu0 %1301 }
 0x3b6   : > { %v1558_v3 = vsel %vm1545_vm2, %v1543_v49, %v3526_v36  ;;  %v1528_v23 = vsel %vm1515_vm3, %v1155_v27, %v1204_v5 }
 0x3b7   : > { %1446 = vrot.lane.b32.xlu1 %v3223_v10, %s2421_s13  ;;  %1499 = vrot.lane.b32.xlu0 %v3217_v16, %s2423_s29 }
 0x3b8   : > { %1650 = vmatprep.subr.mxu0 %v1558_v3 }
 0x3b9   : > { %1651 = vmatpush1.msra.mxu0 %v1528_v23  ;;  %v1251_v9 = vpop.permute.xlu1 %1250  ;;  %v1202_v7 = vpop.permute.xlu0 %1201 }
 0x3ba   : > { %v1542_v12 = vsel %vm1530_vm1, %v1202_v7, %v1251_v9  ;;  %v780_v9 = vsel %vm384_vm0, %v3269_v0, %v3279_v1 }
 0x3bb   : > { %1395 = vrot.lane.b32.xlu1 %v3231_v15, %s2419_s5  ;;  %1346 = vrot.lane.b32.xlu0 %v3225_v11, %s2420_s11 }
 0x3bd   : > { %v1153_v14 = vpop.permute.xlu1 %1152  ;;  %v3540_v40 = vpop.permute.xlu0 %1299 }
 0x3be   : > { %v1557_v10 = vsel %vm1545_vm2, %v1542_v12, %v3540_v40  ;;  %v1527_v16 = vsel %vm1515_vm3, %v1153_v14, %v1202_v7  ;;  %v877_v7 = vsel %vm384_vm0, %v3277_v47, %v3287_v58  ;;  %v973_v14 = vsel %vm384_vm0, %v3295_v57, %v3293_v48 }
 0x3bf   : > { %1444 = vrot.lane.b32.xlu1 %v3239_v29, %s2421_s13  ;;  %1497 = vrot.lane.b32.xlu0 %v3233_v50, %s2423_s29  ;;  %v876_v48 = vsel %vm384_vm0, %v3309_v45, %v3323_v30 }
 0x3c0   : > { %1652 = vmatprep.subr.mxu0 %v1557_v10  ;;  %v779_v10 = vsel %vm384_vm0, %v3301_v51, %v3311_v8 }
 0x3c1   : > { %1653 = vmatpush1.msra.mxu0 %v1527_v16  ;;  %v1249_v15 = vpop.permute.xlu1 %1248  ;;  %v1200_v11 = vpop.permute.xlu0 %1199 }
 0x3c2   : > { %v1541_v22 = vsel %vm1530_vm1, %v1200_v11, %v1249_v15  ;;  %v972_v15 = vsel %vm384_vm0, %v3321_v46, %v3335_v54  ;;  %v4179_v46 = vld [vmem:[#allocation54_spill] sm:$0xff] }
 0x3c3   : > { %1393 = vrot.lane.b32.xlu1 %v3247_v63, %s2419_s5  ;;  %1344 = vrot.lane.b32.xlu0 %v3241_v59, %s2420_s11  ;;  %v875_v54 = vsel %vm384_vm0, %v4179_v46, %v3347_v35  ;;  %v4191_v46 = vld [vmem:[#allocation14_spill] sm:$0xff] }
 0x3c5   : > { %v1151_v5 = vpop.permute.xlu1 %1150  ;;  %v3554_v49 = vpop.permute.xlu0 %1297 }
 0x3c6   : > { %v1556_v29 = vsel %vm1545_vm2, %v1541_v22, %v3554_v49  ;;  %v1526_v50 = vsel %vm1515_vm3, %v1151_v5, %v1200_v11  ;;  %v4177_v11 = vld [vmem:[#allocation53_spill] sm:$0xff]  ;;  %v4178_v22 = vld [vmem:[#allocation44_spill] sm:$0xff] }
 0x3c7   : > { %1442 = vrot.lane.b32.xlu1 %v3255_v42, %s2421_s13  ;;  %1495 = vrot.lane.b32.xlu0 %v3249_v28, %s2423_s29  ;;  %v778_v5 = vsel %vm384_vm0, %v4178_v22, %v4177_v11 }
 0x3c8   : > { %1654 = vmatprep.subr.mxu0 %v1556_v29 }
 0x3c9   : > { %1655 = vmatpush1.msra.mxu0 %v1526_v50  ;;  %v1247_v63 = vpop.permute.xlu1 %1246  ;;  %v1198_v59 = vpop.permute.xlu0 %1197 }
 0x3ca   : > { %v1540_v27 = vsel %vm1530_vm1, %v1198_v59, %v1247_v63  ;;  %v4180_v63 = vld [vmem:[#allocation55_spill] sm:$0xff] }
 0x3cb   : > { %1391 = vrot.lane.b32.xlu1 %v3263_v13, %s2419_s5  ;;  %1342 = vrot.lane.b32.xlu0 %v3261_v44, %s2420_s11 }
 0x3cd   : > { %v1149_v3 = vpop.permute.xlu1 %1148  ;;  %v3568_v23 = vpop.permute.xlu0 %1295 }
 0x3ce   : > { %v1555_v42 = vsel %vm1545_vm2, %v1540_v27, %v3568_v23  ;;  %v1525_v28 = vsel %vm1515_vm3, %v1149_v3, %v1198_v59  ;;  %v971_v59 = vsel %vm384_vm0, %v4180_v63, %v3357_v41  ;;  %v1070_v27 = vsel %vm384_vm0, %v3345_v21, %v3359_v26 }
 0x3cf   : > { %1440 = vrot.lane.b32.xlu1 %v3285_v52, %s2421_s13  ;;  %1493 = vrot.lane.b32.xlu0 %v3271_v53, %s2423_s29  ;;  %v874_v21 = vsel %vm384_vm0, %v3371_v32, %v2958_v34 }
 0x3d0   : > { %1656 = vmatprep.subr.mxu0 %v1555_v42 }
 0x3d1   : > { %1657 = vmatpush1.msra.mxu0 %v1525_v28  ;;  %v1245_v13 = vpop.permute.xlu1 %1244  ;;  %v1196_v44 = vpop.permute.xlu0 %1195 }
 0x3d2   : > { %v1539_v52 = vsel %vm1530_vm1, %v1196_v44, %v1245_v13  ;;  %v4181_v13 = vld [vmem:[#allocation52_spill] sm:$0xff] }
 0x3d3   : > { %1389 = vrot.lane.b32.xlu1 %v877_v7, %s2419_s5  ;;  %1340 = vrot.lane.b32.xlu0 %v780_v9, %s2420_s11  ;;  %v777_v41 = vsel %vm384_vm0, %v4181_v13, %v2842_v6  ;;  %v970_v7 = vsel %vm384_vm0, %v3381_v39, %v2965_v37  ;;  %v1069_v6 = vsel %vm384_vm0, %v3369_v19, %v3383_v25 }
 0x3d4   : > { %v873_v19 = vsel %vm384_vm0, %v3395_v4, %v3393_v18 }
 0x3d5   : > { %v1147_v12 = vpop.permute.xlu1 %1146  ;;  %v3586_v53 = vpop.permute.xlu0 %1293 }
 0x3d6   : > { %v1554_v0 = vsel %vm1545_vm2, %v1539_v52, %v3586_v53  ;;  %v1524_v1 = vsel %vm1515_vm3, %v1147_v12, %v1196_v44 }
 0x3d7   : > { %1438 = vrot.lane.b32.xlu1 %v973_v14, %s2421_s13  ;;  %1491 = vrot.lane.b32.xlu0 %v3303_v55, %s2423_s29  ;;  %v4182_v14 = vld [vmem:[#allocation51_spill] sm:$0xff] }
 0x3d8   : > { %1658 = vmatprep.subr.mxu0 %v1554_v0  ;;  %v4183_v0 = vld [vmem:[#allocation50_spill] sm:$0xff] }
 0x3d9   : > { %1659 = vmatpush1.msra.mxu0 %v1524_v1  ;;  %v1243_v47 = vpop.permute.xlu1 %1242  ;;  %v1194_v58 = vpop.permute.xlu0 %1193  ;;  %v776_v37 = vsel %vm384_vm0, %v4183_v0, %v4182_v14 }
 0x3da   : > { %v1538_v57 = vsel %vm1530_vm1, %v1194_v58, %v1243_v47  ;;  %v4184_v47 = vld [vmem:[#allocation56_spill] sm:$0xff] }
 0x3db   : > { %1387 = vrot.lane.b32.xlu1 %v876_v48, %s2419_s5  ;;  %1338 = vrot.lane.b32.xlu0 %v779_v10, %s2420_s11  ;;  %v4185_v10 = vld [vmem:[#allocation22_spill] sm:$0xff] }
 0x3dc   : > { %v969_v48 = vsel %vm384_vm0, %v4185_v10, %v3419_v61 }
 0x3dd   : > { %v1145_v16 = vpop.permute.xlu1 %1144  ;;  %v3606_v55 = vpop.permute.xlu0 %1291 }
 0x3de   : > { %v1553_v51 = vsel %vm1545_vm2, %v1538_v57, %v3606_v55  ;;  %v1523_v8 = vsel %vm1515_vm3, %v1145_v16, %v1194_v58  ;;  %v1068_v58 = vsel %vm384_vm0, %v4184_v47, %v3407_v38 }
 0x3df   : > { %1436 = vrot.lane.b32.xlu1 %v972_v15, %s2421_s13  ;;  %1489 = vrot.lane.b32.xlu0 %v3333_v43, %s2423_s29  ;;  %v4186_v15 = vld [vmem:[#allocation49_spill] sm:$0xff] }
 0x3e0   : > { %1660 = vmatprep.subr.mxu0 %v1553_v51  ;;  %v4187_v51 = vld [vmem:[#allocation48_spill] sm:$0xff] }
 0x3e1   : > { %1661 = vmatpush1.msra.mxu0 %v1523_v8  ;;  %v1241_v45 = vpop.permute.xlu1 %1240  ;;  %v1192_v30 = vpop.permute.xlu0 %1191  ;;  %v775_v38 = vsel %vm384_vm0, %v4187_v51, %v4186_v15  ;;  %v4188_v8 = vld [vmem:[#allocation42_spill] sm:$0xff]  ;;  %v4208_v51 = vld [vmem:[#allocation59_spill] sm:$0xff] }
 0x3e2   : > { %v1537_v29 = vsel %vm1530_vm1, %v1192_v30, %v1241_v45  ;;  %v4189_v45 = vld [vmem:[#allocation13_spill] sm:$0xff] }
 0x3e3   : > { %1385 = vrot.lane.b32.xlu1 %v875_v54, %s2419_s5  ;;  %1336 = vrot.lane.b32.xlu0 %v778_v5, %s2420_s11  ;;  %v872_v61 = vsel %vm384_vm0, %v4189_v45, %v4188_v8  ;;  %v4190_v5 = vld [vmem:[#allocation45_spill] sm:$0xff] }
 0x3e4   : > { %v1067_v54 = vsel %vm384_vm0, %v4191_v46, %v4190_v5 }
 0x3e5   : > { %v1143_v50 = vpop.permute.xlu1 %1142  ;;  %v3626_v43 = vpop.permute.xlu0 %1289 }
 0x3e6   : > { %v1552_v35 = vsel %vm1545_vm2, %v1537_v29, %v3626_v43  ;;  %v1522_v3 = vsel %vm1515_vm3, %v1143_v50, %v1192_v30  ;;  %v4192_v29 = vld [vmem:[#allocation34_spill] sm:$0xff]  ;;  %v4193_v50 = vld [vmem:[#allocation3_spill] sm:$0xff] }
 0x3e7   : > { %1434 = vrot.lane.b32.xlu1 %v971_v59, %s2421_s13  ;;  %1487 = vrot.lane.b32.xlu0 %v1070_v27, %s2423_s29  ;;  %v968_v63 = vsel %vm384_vm0, %v4193_v50, %v4192_v29 }
 0x3e8   : > { %1662 = vmatprep.subr.mxu0 %v1552_v35 }
 0x3e9   : > { %1663 = vmatpush1.msra.mxu0 %v1522_v3  ;;  %v1239_v42 = vpop.permute.xlu1 %1238  ;;  %v1190_v28 = vpop.permute.xlu0 %1189 }
 0x3ea   : > { %v1536_v26 = vsel %vm1530_vm1, %v1190_v28, %v1239_v42  ;;  %v4194_v42 = vld [vmem:[#allocation47_spill] sm:$0xff] }
 0x3eb   : > { %1383 = vrot.lane.b32.xlu1 %v874_v21, %s2419_s5  ;;  %1334 = vrot.lane.b32.xlu0 %v777_v41, %s2420_s11  ;;  %v4196_v41 = vld [vmem:[#allocation20_spill] sm:$0xff] }
 0x3ec   : > { %v4197_v21 = vld [vmem:[#allocation4_spill] sm:$0xff] }
 0x3ed   : > { %v1141_v44 = vpop.permute.xlu1 %1140  ;;  %v3648_v9 = vpop.permute.xlu0 %1287 }
 0x3ee   : > { %v1551_v34 = vsel %vm1545_vm2, %v1536_v26, %v3648_v9  ;;  %v1521_v32 = vsel %vm1515_vm3, %v1141_v44, %v1190_v28  ;;  %v4195_v28 = vld [vmem:[#allocation46_spill] sm:$0xff]  ;;  %v871_v26 = vsel %vm384_vm0, %v4197_v21, %v4196_v41 }
 0x3ef   : > { %1432 = vrot.lane.b32.xlu1 %v970_v7, %s2421_s13  ;;  %1485 = vrot.lane.b32.xlu0 %v1069_v6, %s2423_s29  ;;  %v774_v13 = vsel %vm384_vm0, %v4195_v28, %v4194_v42 }
 0x3f0   : > { %1664 = vmatprep.subr.mxu0 %v1551_v34  ;;  %v1066_v34 = vsel %vm384_vm0, %v3467_v17, %v3465_v2  ;;  %v4198_v2 = vld [vmem:[#allocation57_spill] sm:$0xff]  ;;  %v4199_v17 = vld [vmem:[#allocation43_spill] sm:$0xff] }
 0x3f1   : > { %1665 = vmatpush1.msra.mxu0 %v1521_v32  ;;  %v1237_v52 = vpop.permute.xlu1 %1236  ;;  %v1188_v12 = vpop.permute.xlu0 %1187  ;;  %v967_v32 = vsel %vm384_vm0, %v3479_v24, %v3477_v62  ;;  %v2424_v62 = vmov 0  }
 0x3f2   : > { %v1535_v39 = vsel %vm1530_vm1, %v1188_v12, %v1237_v52  ;;  %2359 = vset.pattern.permute.xlu0 %v2424_v62 }
 0x3f3   : > { %1381 = vrot.lane.b32.xlu1 %v873_v19, %s2419_s5  ;;  %1332 = vrot.lane.b32.xlu0 %v776_v37, %s2420_s11  ;;  %v307_v37 = vlaneseq  ;;  %v1065_v19 = vsel %vm384_vm0, %v3487_v56, %v3485_v31  ;;  %v4204_v56 = vld [vmem:[#allocation58_spill] sm:$0xff] }
 0x3f5   : > { %v1139_v25 = vpop.permute.xlu1 %1138  ;;  %v3670_v1 = vpop.permute.xlu0 %1285  ;;  %v308_v24 = vand.u32 127, %v307_v37 }
 0x3f6   : > { %v1550_v18 = vsel %vm1545_vm2, %v1535_v39, %v3670_v1  ;;  %v1520_v4 = vsel %vm1515_vm3, %v1139_v25, %v1188_v12 }
 0x3f7   : > { %1430 = vrot.lane.b32.xlu1 %v969_v48, %s2421_s13  ;;  %1483 = vrot.lane.b32.xlu0 %v1068_v58, %s2423_s29  ;;  %v3758_v48 = vmul.u32.u64.low 3435973837, %v308_v24  ;;  %v3759_v31 = vmul.u32.u64.high 3435973837, %v308_v24, %v3758_v48 }
 0x3f8   : > { %1666 = vmatprep.subr.mxu0 %v1550_v18 }
 0x3f9   : > { %1667 = vmatpush1.msra.mxu0 %v1520_v4  ;;  %v1235_v57 = vpop.permute.xlu1 %1234  ;;  %v1186_v16 = vpop.permute.xlu0 %1185  ;;  %v315_v15 = vshrl.u32 %v3759_v31, 3 }
 0x3fa   : > { %v1534_v30 = vsel %vm1530_vm1, %v1186_v16, %v1235_v57  ;;  %v4207_v57 = vld [vmem:[#allocation32_spill] sm:$0xff] }
 0x3fb   : > { %1379 = vrot.lane.b32.xlu1 %v872_v61, %s2419_s5  ;;  %1330 = vrot.lane.b32.xlu0 %v775_v38, %s2420_s11  ;;  %v331_v38 = vld [vmem:[%s4037_s3] sm:$0xf]  ;;  %v316_v8 = vmul.u32 10, %v315_v15 }
 0x3fd   : > { %v1137_v11 = vpop.permute.xlu1 %1136  ;;  %v3692_v22 = vpop.permute.xlu0 %1283  ;;  %v317_v61 = vsub.s32 %v308_v24, %v316_v8  ;;  %v1996_v24 = vstv %s1995_s26 }
 0x3fe   : > { %v1549_v59 = vsel %vm1545_vm2, %v1534_v30, %v3692_v22  ;;  %v1519_v27 = vsel %vm1515_vm3, %v1137_v11, %v1186_v16  ;;  %v1064_v16 = vsel %vm384_vm0, %v4207_v57, %v3493_v20 }
 0x3ff   : > { %1428 = vrot.lane.b32.xlu1 %v968_v63, %s2421_s13  ;;  %1481 = vrot.lane.b32.xlu0 %v1067_v54, %s2423_s29  ;;  %vm320_vm7 = vcmp.ne.s32.totalorder %v317_v61, 0  ;;  %vm321_vm8 = vcmp.lt.s32.totalorder %v317_v61, 0  ;;  %v323_v30 = vadd.s32 10, %v317_v61 }
 0x400   : > { %1668 = vmatprep.subr.mxu0 %v1549_v59  ;;  %vm322_vm9 = vmand %vm321_vm8, %vm320_vm7 }
 0x401   : > { %1669 = vmatpush1.msra.mxu0 %v1519_v27  ;;  %v1233_v35 = vpop.permute.xlu1 %1232  ;;  %v1184_v3 = vpop.permute.xlu0 %1183  ;;  %v324_v63 = vsel %vm322_vm9, %v323_v30, %v317_v61 }
 0x402   : > { %v1533_v44 = vsel %vm1530_vm1, %v1184_v3, %v1233_v35  ;;  %vm325_vm10 = vcmp.ge.s32.totalorder %v324_v63, 1  ;;  %vm326_vm11 = vcmp.lt.s32.totalorder %v324_v63, 9  ;;  %v1966_v35 = vstv %s1965_s15  ;;  %s2186_s15 = sshll.u32 %s4228_s16, 4 }
 0x403   : > { %1377 = vrot.lane.b32.xlu1 %v871_v26, %s2419_s5  ;;  %1328 = vrot.lane.b32.xlu0 %v774_v13, %s2420_s11  ;;  %vm327_vm12 = vmand %vm325_vm10, %vm326_vm11 }
 0x405   : > { %v1135_v7 = vpop.permute.xlu1 %1134  ;;  %v3714_v6 = vpop.permute.xlu0 %1281 }
 0x406   : > { %v1548_v52 = vsel %vm1545_vm2, %v1533_v44, %v3714_v6  ;;  %v1518_v12 = vsel %vm1515_vm3, %v1135_v7, %v1184_v3  ;;  %v3847_v3 = vld [vmem:[%s4036_s2] sm:$0xf] }
 0x407   : > { %1426 = vrot.lane.b32.xlu1 %v967_v32, %s2421_s13  ;;  %1479 = vrot.lane.b32.xlu0 %v1066_v34, %s2423_s29 }
 0x408   : > { %1670 = vmatprep.subr.mxu0 %v1548_v52 }
 0x409   : > { %1671 = vmatpush1.msra.mxu0 %v1518_v12  ;;  %v1231_v14 = vpop.permute.xlu1 %1230  ;;  %v1182_v0 = vpop.permute.xlu0 %1181 }
 0x40a   : > { %v1532_v39 = vsel %vm1530_vm1, %v1182_v0, %v1231_v14 }
 0x40b   : > { %1375 = vrot.lane.b32.xlu1 %v4198_v2, %s2419_s5  ;;  %1326 = vrot.lane.b32.xlu0 %v4199_v17, %s2420_s11  ;;  %s1882_s5 = scvt.s32.f32 %s3769_s24  ;;  %s1906_s11 = sadd.s32 2, %s2494_s22 }
 0x40c   : > { %p3803_p3 = scmp.ge.s32.totalorder %s1906_s11, 1  ;;  %p3807_p4 = scmp.lt.s32.totalorder %s1906_s11, 9 }
 0x40d   : > { %v1133_v25 = vpop.permute.xlu1 %1132  ;;  %v3745_v47 = vpop.permute.xlu0 %1279  ;;  %v1883_v59 = vstv %s1882_s5  ;;  %s2018_s11 = scvt.s32.f32 %s2217_s9  ;;  %s2429_s24 = smov 32  }
 0x40e   : > { %v1547_v58 = vsel %vm1545_vm2, %v1532_v39, %v3745_v47  ;;  %v1517_v10 = vsel %vm1515_vm3, %v1133_v25, %v1182_v0  ;;  %p1909_p5 = pnand %p3807_p4, %p3803_p3  ;;  %s2432_s9 = smov 48  }
 0x40f   : > { %1424 = vrot.lane.b32.xlu1 %v4204_v56, %s2421_s13  ;;  %1477 = vrot.lane.b32.xlu0 %v1065_v19, %s2423_s29  ;;  %s3801_s13 = scalar_select %p1932_p2, 0, 1  ;;  %v2019_v14 = vstv %s2018_s11 }
 0x410   : > { %1672 = vmatprep.subr.mxu0 %v1547_v58  ;;  %s2209_s28 = scalar_select %p1909_p5, 0, 1 }
 0x411   : > { %1673 = vmatpush1.msra.mxu0 %v1517_v10  ;;  %v1229_v18 = vpop.permute.xlu1 %1228  ;;  %v1180_v4 = vpop.permute.xlu0 %1179  ;;  %s1935_s23 = scvt.s32.f32 %s3801_s13  ;;  %s2042_s13 = sadd.s32 7, %s2494_s22 }
 0x412   : > { %v1531_v11 = vsel %vm1530_vm1, %v1180_v4, %v1229_v18  ;;  %s1912_s7 = scvt.s32.f32 %s2209_s28  ;;  %p3876_p12 = scmp.ge.s32.totalorder %s2042_s13, 1  ;;  %vm1871_vm1 = vcmask 171008  }
 0x413   : > { %1473 = vrot.lane.b32.xlu1 %v4208_v51, %s2423_s29  ;;  %1475 = vrot.lane.b32.xlu0 %v1064_v16, %s2423_s29  ;;  %v1936_v26 = vstv %s1935_s23  ;;  %s2426_s29 = smov 80   ;;  %p3880_p13 = scmp.lt.s32.totalorder %s2042_s13, 9 }
 0x414   : > { %v1913_v44 = vstv %s1912_s7  ;;  %s2427_s23 = smov 64   ;;  %s2430_s7 = smov 96  }
 0x415   : > { %v1402_v20 = vpop.permute.xlu1 %1401  ;;  %v1353_v45 = vpop.permute.xlu0 %1352  ;;  %p2045_p0 = pnand %p3880_p13, %p3876_p12  ;;  %s2434_s5 = smov 37  }
 0x416   : > { %v1589_v5 = vsel %vm1575_vm4, %v1353_v45, %v1402_v20  ;;  %v1574_v27 = vsel %vm1560_vm6, %v3509_v60, %v1353_v45  ;;  %v3851_v60 = vsel %vm327_vm12, 1.0, %v2422_v33  ;;  %p1858_p2 = scmp.lt.s32.totalorder %s2494_s22, 9  ;;  %p300_p4 = scmp.lt.s32.totalorder %s2494_s22, 15 }
 0x417   : > { %1622 = vperm.xlu0 %2359, %v331_v38   ;;  %v1884_v41 = vmul.f32 %v3851_v60, %v1883_v59  ;;  %v1967_v21 = vmul.f32 %v3851_v60, %v1966_v35  ;;  %v1937_v32 = vmul.f32 %v3851_v60, %v1936_v26  ;;  %v1914_v12 = vmul.f32 %v3851_v60, %v1913_v44  ;;  %s2219_s28 = scalar_select %p2045_p0, 0, 1 }
 0x418   : > { %v2020_v62 = vmul.f32 %v3851_v60, %v2019_v14  ;;  %p1859_p3 = pnand %p1858_p2, %p1857_p1  ;;  %s4232_s22 = smov (!%p300_p4, %s2494_s22), 15 }
 0x419   : > { %v3820_v46 = vpop.permute.xlu1 %1450  ;;  %v3822_v54 = vpop.permute.xlu0 %1277  ;;  %1886 = vrot.lane.b32.xlu1 %v1884_v41, %s2426_s29  ;;  %s2048_s30 = scvt.s32.f32 %s2219_s28  ;;  %s2435_s29 = smov 85  }
 0x41a   : > { %v1546_v29 = vsel %vm1545_vm2, %v1531_v11, %v3822_v54  ;;  %v1604_v50 = vsel %vm1590_vm5, %v1589_v5, %v3820_v46  ;;  %s2206_s11 = scalar_select %p1859_p3, 0, 1  ;;  %vm1873_vm2 = vcmask 826368  }
 0x41b   : > { %1674 = vmatprep.subr.mxu0 %v1546_v29  ;;  %2200 = vmatprep.subr.msk.mxu1 %vm384_vm0, %v1604_v50  ;;  %v2049_v58 = vstv %s2048_s30 }
 0x41c   : > { %2201 = vmatpush1.msk.msra.mxu1 %vm384_vm0, %v1574_v27  ;;  %1969 = vrot.lane.b32.xlu0 %v1967_v21, %s2427_s23  ;;  %v2050_v31 = vmul.f32 %v3851_v60, %v2049_v58  ;;  %s1862_s13 = scvt.s32.f32 %s2206_s11  ;;  %s303_s23 = sadd.s32 %s2186_s15, %s4232_s22 }
 0x41d   : > { %v1351_v42 = vpop.permute.xlu1 %1350  ;;  %v1131_v28 = vpop.permute.xlu0 %1130  ;;  %1939 = vrot.lane.b32.xlu1 %v1937_v32, %s2428_s27  ;;  %s2187_s26 = sshll.u32 %s303_s23, 2  ;;  %s2438_s27 = smov 101  }
 0x41e   : > { %v1516_v13 = vsel %vm1515_vm3, %v1131_v28, %v1180_v4  ;;  %v1573_v37 = vsel %vm1560_vm6, %v3526_v36, %v1351_v42  ;;  %v1997_v36 = vmul.f32 %v3851_v60, %v1996_v24  ;;  %vm1952_vm3 = vcmask 302080  }
 0x41f   : > { %1675 = vmatpush1.msra.mxu0 %v1516_v13 }
 0x420   : > { %2247 = vmatprep.subr.mxu0 %v2422_v33  ;;  %2199 = vmatmul.mubr.msk.f32.vlgmr.msra.gmra.mxu0 %vm1625_vm13, %v3847_v3 }
 0x421   : > { %v1449_v7 = vpop.permute.xlu1 %1448  ;;  %v1400_v34 = vpop.permute.xlu0 %1399  ;;  %2275 = vmatprep.mubr.msk.f32.mxu0 %vm2425_vm14, %v2422_v33  ;;  %1916 = vrot.lane.b32.xlu0 %v1914_v12, %s2429_s24 }
 0x422   : > { %v1588_v52 = vsel %vm1575_vm4, %v1351_v42, %v1400_v34  ;;  %2022 = vrot.lane.b32.xlu1 %v2020_v62, %s2430_s7 }
 0x423   : > { %v1603_v0 = vsel %vm1590_vm5, %v1588_v52, %v1449_v7 }
 0x424   : > { %1721 = vmatprep.subr.mxu1 %v1603_v0 }
 0x425   : > { %v1398_v2 = vpop.permute.xlu1 %1397  ;;  %1722 = vmatpush1.msra.mxu1 %v1573_v37  ;;  %v1349_v17 = vpop.permute.xlu0 %1348  ;;  %2052 = vrot.lane.b32.xlu0 %v2050_v31, %s2432_s9 }
 0x426   : > { %v1587_v19 = vsel %vm1575_vm4, %v1349_v17, %v1398_v2  ;;  %v1572_v56 = vsel %vm1560_vm6, %v3540_v40, %v1349_v17  ;;  %1999 = vrot.lane.b32.xlu1 %v1997_v36, %s2431_s8 }
 0x429   : > { %v1447_v39 = vpop.permute.xlu1 %1446  ;;  %v1500_v25 = vpop.permute.xlu0 %1499 }
 0x42a   : > { %v1619_v10 = vsel %vm1605_vm15, %v3820_v46, %v1500_v25  ;;  %v1602_v48 = vsel %vm1590_vm5, %v1587_v19, %v1447_v39 }
 0x42b   : > { %1723 = vmatprep.subr.mxu1 %v1602_v48  ;;  %2248 = vmatpush3.msk.msra.mxu0 %vm384_vm0, %v1619_v10  ;;  %vm1899_vm0 = vcmask 564224  }
 0x42c   : > { %1724 = vmatpush1.msra.mxu1 %v1572_v56  ;;  %2249 = vmatprep.subr.mxu0 %v2422_v33 }
 0x42d   : > { %v1396_v18 = vpop.permute.xlu1 %1395  ;;  %v1347_v4 = vpop.permute.xlu0 %1346 }
 0x42e   : > { %v1586_v57 = vsel %vm1575_vm4, %v1347_v4, %v1396_v18  ;;  %v1571_v40 = vsel %vm1560_vm6, %v3554_v49, %v1347_v4 }
 0x431   : > { %v1445_v16 = vpop.permute.xlu1 %1444  ;;  %v1498_v15 = vpop.permute.xlu0 %1497 }
 0x432   : > { %v1618_v51 = vsel %vm1605_vm15, %v1449_v7, %v1498_v15  ;;  %v1601_v38 = vsel %vm1590_vm5, %v1586_v57, %v1445_v16 }
 0x433   : > { %1725 = vmatprep.subr.mxu1 %v1601_v38  ;;  %2250 = vmatpush3.msra.mxu0 %v1618_v51 }
 0x434   : > { %1726 = vmatpush1.msra.mxu1 %v1571_v40  ;;  %2251 = vmatprep.subr.mxu0 %v2422_v33 }
 0x435   : > { %v1394_v8 = vpop.permute.xlu1 %1393  ;;  %v1345_v20 = vpop.permute.xlu0 %1344 }
 0x436   : > { %v1585_v45 = vsel %vm1575_vm4, %v1345_v20, %v1394_v8  ;;  %v1570_v46 = vsel %vm1560_vm6, %v3568_v23, %v1345_v20 }
 0x439   : > { %v1443_v61 = vpop.permute.xlu1 %1442  ;;  %v1496_v30 = vpop.permute.xlu0 %1495 }
 0x43a   : > { %v1617_v11 = vsel %vm1605_vm15, %v1447_v39, %v1496_v30  ;;  %v1600_v5 = vsel %vm1590_vm5, %v1585_v45, %v1443_v61 }
 0x43b   : > { %1727 = vmatprep.subr.mxu1 %v1600_v5  ;;  %2252 = vmatpush3.msra.mxu0 %v1617_v11 }
 0x43c   : > { %1728 = vmatpush1.msra.mxu1 %v1570_v46  ;;  %2253 = vmatprep.subr.mxu0 %v2422_v33 }
 0x43d   : > { %v1392_v49 = vpop.permute.xlu1 %1391  ;;  %v1343_v29 = vpop.permute.xlu0 %1342 }
 0x43e   : > { %v1584_v50 = vsel %vm1575_vm4, %v1343_v29, %v1392_v49  ;;  %v1569_v42 = vsel %vm1560_vm6, %v3586_v53, %v1343_v29 }
 0x441   : > { %v1441_v63 = vpop.permute.xlu1 %1440  ;;  %v1494_v59 = vpop.permute.xlu0 %1493 }
 0x442   : > { %v1616_v27 = vsel %vm1605_vm15, %v1445_v16, %v1494_v59  ;;  %v1599_v35 = vsel %vm1590_vm5, %v1584_v50, %v1441_v63 }
 0x443   : > { %1729 = vmatprep.subr.mxu1 %v1599_v35  ;;  %2254 = vmatpush3.msra.mxu0 %v1616_v27 }
 0x444   : > { %1730 = vmatpush1.msra.mxu1 %v1569_v42  ;;  %2255 = vmatprep.subr.mxu0 %v2422_v33 }
 0x445   : > { %v1390_v23 = vpop.permute.xlu1 %1389  ;;  %v1341_v28 = vpop.permute.xlu0 %1340 }
 0x446   : > { %v1583_v13 = vsel %vm1575_vm4, %v1341_v28, %v1390_v23  ;;  %v1568_v7 = vsel %vm1560_vm6, %v3606_v55, %v1341_v28 }
 0x449   : > { %v1439_v41 = vpop.permute.xlu1 %1438  ;;  %v1492_v21 = vpop.permute.xlu0 %1491 }
 0x44a   : > { %v1615_v26 = vsel %vm1605_vm15, %v1443_v61, %v1492_v21  ;;  %v1598_v44 = vsel %vm1590_vm5, %v1583_v13, %v1439_v41 }
 0x44b   : > { %1731 = vmatprep.subr.mxu1 %v1598_v44  ;;  %2256 = vmatpush3.msra.mxu0 %v1615_v26 }
 0x44c   : > { %1732 = vmatpush1.msra.mxu1 %v1568_v7  ;;  %2257 = vmatprep.subr.mxu0 %v2422_v33 }
 0x44d   : > { %v1388_v53 = vpop.permute.xlu1 %1387  ;;  %v1339_v34 = vpop.permute.xlu0 %1338 }
 0x44e   : > { %v1582_v32 = vsel %vm1575_vm4, %v1339_v34, %v1388_v53  ;;  %v1567_v37 = vsel %vm1560_vm6, %v3626_v43, %v1339_v34 }
 0x451   : > { %v1437_v52 = vpop.permute.xlu1 %1436  ;;  %v1490_v12 = vpop.permute.xlu0 %1489 }
 0x452   : > { %v1614_v14 = vsel %vm1605_vm15, %v1441_v63, %v1490_v12  ;;  %v1597_v0 = vsel %vm1590_vm5, %v1582_v32, %v1437_v52 }
 0x453   : > { %1733 = vmatprep.subr.mxu1 %v1597_v0  ;;  %2258 = vmatpush3.msra.mxu0 %v1614_v14 }
 0x454   : > { %1734 = vmatpush1.msra.mxu1 %v1567_v37  ;;  %2259 = vmatprep.subr.mxu0 %v2422_v33 }
 0x455   : > { %v1386_v55 = vpop.permute.xlu1 %1385  ;;  %v1337_v2 = vpop.permute.xlu0 %1336 }
 0x456   : > { %v1581_v17 = vsel %vm1575_vm4, %v1337_v2, %v1386_v55  ;;  %v1566_v25 = vsel %vm1560_vm6, %v3648_v9, %v1337_v2 }
 0x459   : > { %v1435_v62 = vpop.permute.xlu1 %1434  ;;  %v1488_v24 = vpop.permute.xlu0 %1487 }
 0x45a   : > { %v1613_v19 = vsel %vm1605_vm15, %v1439_v41, %v1488_v24  ;;  %v1596_v39 = vsel %vm1590_vm5, %v1581_v17, %v1435_v62 }
 0x45b   : > { %1735 = vmatprep.subr.mxu1 %v1596_v39  ;;  %2260 = vmatpush3.msra.mxu0 %v1613_v19 }
 0x45c   : > { %1736 = vmatpush1.msra.mxu1 %v1566_v25  ;;  %2261 = vmatprep.subr.mxu0 %v2422_v33 }
 0x45d   : > { %v1384_v43 = vpop.permute.xlu1 %1383  ;;  %v1335_v36 = vpop.permute.xlu0 %1334 }
 0x45e   : > { %v1580_v58 = vsel %vm1575_vm4, %v1335_v36, %v1384_v43  ;;  %v1565_v18 = vsel %vm1560_vm6, %v3670_v1, %v1335_v36 }
 0x461   : > { %v1433_v10 = vpop.permute.xlu1 %1432  ;;  %v1486_v48 = vpop.permute.xlu0 %1485 }
 0x462   : > { %v1612_v31 = vsel %vm1605_vm15, %v1437_v52, %v1486_v48  ;;  %v1595_v56 = vsel %vm1590_vm5, %v1580_v58, %v1433_v10 }
 0x463   : > { %1737 = vmatprep.subr.mxu1 %v1595_v56  ;;  %2262 = vmatpush3.msra.mxu0 %v1612_v31 }
 0x464   : > { %1738 = vmatpush1.msra.mxu1 %v1565_v18  ;;  %2263 = vmatprep.subr.mxu0 %v2422_v33 }
 0x465   : > { %v1382_v9 = vpop.permute.xlu1 %1381  ;;  %v1333_v4 = vpop.permute.xlu0 %1332 }
 0x466   : > { %v1579_v57 = vsel %vm1575_vm4, %v1333_v4, %v1382_v9  ;;  %v1564_v40 = vsel %vm1560_vm6, %v3692_v22, %v1333_v4 }
 0x469   : > { %v1431_v16 = vpop.permute.xlu1 %1430  ;;  %v1484_v15 = vpop.permute.xlu0 %1483 }
 0x46a   : > { %v1611_v51 = vsel %vm1605_vm15, %v1435_v62, %v1484_v15  ;;  %v1594_v38 = vsel %vm1590_vm5, %v1579_v57, %v1431_v16 }
 0x46b   : > { %1739 = vmatprep.subr.mxu1 %v1594_v38  ;;  %2264 = vmatpush3.msra.mxu0 %v1611_v51 }
 0x46c   : > { %1740 = vmatpush1.msra.mxu1 %v1564_v40  ;;  %2265 = vmatprep.subr.mxu0 %v2422_v33 }
 0x46d   : > { %v1380_v1 = vpop.permute.xlu1 %1379  ;;  %v1331_v8 = vpop.permute.xlu0 %1330 }
 0x46e   : > { %v1578_v20 = vsel %vm1575_vm4, %v1331_v8, %v1380_v1  ;;  %v1563_v5 = vsel %vm1560_vm6, %v3714_v6, %v1331_v8 }
 0x471   : > { %v1429_v45 = vpop.permute.xlu1 %1428  ;;  %v1482_v61 = vpop.permute.xlu0 %1481 }
 0x472   : > { %v1610_v30 = vsel %vm1605_vm15, %v1433_v10, %v1482_v61  ;;  %v1593_v11 = vsel %vm1590_vm5, %v1578_v20, %v1429_v45 }
 0x473   : > { %1741 = vmatprep.subr.mxu1 %v1593_v11  ;;  %2266 = vmatpush3.msra.mxu0 %v1610_v30 }
 0x474   : > { %1742 = vmatpush1.msra.mxu1 %v1563_v5  ;;  %2267 = vmatprep.subr.mxu0 %v2422_v33 }
 0x475   : > { %v1378_v22 = vpop.permute.xlu1 %1377  ;;  %v1329_v46 = vpop.permute.xlu0 %1328 }
 0x476   : > { %v1577_v49 = vsel %vm1575_vm4, %v1329_v46, %v1378_v22  ;;  %v1562_v27 = vsel %vm1560_vm6, %v3745_v47, %v1329_v46 }
 0x479   : > { %v1427_v29 = vpop.permute.xlu1 %1426  ;;  %v1480_v50 = vpop.permute.xlu0 %1479 }
 0x47a   : > { %v1609_v63 = vsel %vm1605_vm15, %v1431_v16, %v1480_v50  ;;  %v1592_v59 = vsel %vm1590_vm5, %v1577_v49, %v1427_v29 }
 0x47b   : > { %1743 = vmatprep.subr.mxu1 %v1592_v59  ;;  %2268 = vmatpush3.msra.mxu0 %v1609_v63 }
 0x47c   : > { %1744 = vmatpush1.msra.mxu1 %v1562_v27  ;;  %2269 = vmatprep.subr.mxu0 %v2422_v33 }
 0x47d   : > { %v1376_v6 = vpop.permute.xlu1 %1375  ;;  %v1327_v35 = vpop.permute.xlu0 %1326 }
 0x47e   : > { %v1576_v42 = vsel %vm1575_vm4, %v1327_v35, %v1376_v6  ;;  %v1561_v21 = vsel %vm1560_vm6, %v3822_v54, %v1327_v35  ;;  %vm1982_vm4 = vcmask 695296  }
 0x481   : > { %v1425_v23 = vpop.permute.xlu1 %1424  ;;  %v1478_v28 = vpop.permute.xlu0 %1477 }
 0x482   : > { %v1608_v13 = vsel %vm1605_vm15, %v1429_v45, %v1478_v28  ;;  %v1591_v41 = vsel %vm1590_vm5, %v1576_v42, %v1425_v23  ;;  %vm2035_vm5 = vcmask 433152  }
 0x483   : > { %1745 = vmatprep.subr.mxu1 %v1591_v41  ;;  %2270 = vmatpush3.msra.mxu0 %v1608_v13 }
 0x484   : > { %1746 = vmatpush1.msra.mxu1 %v1561_v21  ;;  %2271 = vmatprep.subr.mxu0 %v2422_v33 }
 0x485   : > { %v1474_v47 = vpop.permute.xlu1 %1473  ;;  %2202 = vmatmul.mubr.msk.f32.vlgmr.msra.gmra.mxu1 %vm1625_vm13, %v3847_v3  ;;  %v1476_v26 = vpop.permute.xlu0 %1475 }
 0x486   : > { %v1607_v44 = vsel %vm1605_vm15, %v1427_v29, %v1476_v26  ;;  %v1606_v7 = vsel %vm1605_vm15, %v1425_v23, %v1474_v47 }
 0x487   : > { %2272 = vmatpush3.msra.mxu0 %v1607_v44 }
 0x488   : > { %2273 = vmatprep.subr.mxu0 %v2422_v33 }
 0x489   : > { %2274 = vmatpush3.msra.mxu0 %v1606_v7 }
 0x48a   : > { %2276 = vmatmul.mubr.msk.f32.vlgmr.msra.gmra.mxu0 %vm1625_vm13, %v3847_v3  ;;  %v1863_v3 = vstv %s1862_s13 }
 0x48b   : > { %v1887_v54 = vpop.permute.xlu1 %1886  ;;  %v1864_v58 = vmul.f32 %v3851_v60, %v1863_v3 }
 0x48f   : > { %v1940_v12 = vpop.permute.xlu1 %1939 }
 0x492   : > { %v1623_v53 = vpop.permute.xlu0 %1622 }
 0x494   : > { %v2023_v10 = vpop.permute.xlu1 %2022 }
 0x496   : > { %v1970_v19 = vpop.permute.xlu0 %1969 }
 0x498   : > { %v2000_v40 = vpop.permute.xlu1 %1999 }
 0x49a   : > { %v1917_v60 = vpop.permute.xlu0 %1916 }
 0x49e   : > { %v2053_v61 = vpop.permute.xlu0 %2052 }
 0x4e0   : > { %v1710_v34 = vpop.f32.mrf.mxu0 }
 0x4e1   : > { %v1711_v32 = vadd.f32 %v1710_v34, %v1623_v53 }
 0x4e2   : > { %v1712_v52 = vpop.f32.mrf.mxu0 }
 0x4e3   : > { %v1889_v14 = vmul.f32 %v1887_v54, %v1711_v32  ;;  %v1713_v0 = vadd.f32 %v1712_v52, %v1623_v53  ;;  %v1865_v16 = vmul.f32 %v1864_v58, %v1711_v32 }
 0x4e5   : > { %v1891_v37 = vmax.f32 %v1889_v14, 0.0  ;;  %v1890_v55 = vmul.f32 %v1887_v54, %v1713_v0  ;;  %v1942_v2 = vmul.f32 %v1940_v12, %v1713_v0  ;;  %v1866_v1 = vmax.f32 %v1865_v16, 0.0 }
 0x4e6   : > { %v1919_v8 = vmul.f32 %v1917_v60, %v1713_v0 }
 0x4e7   : > { %v1892_v17 = vmax.f32 %v1890_v55, 0.0  ;;  %v1944_v62 = vmax.f32 %v1942_v2, 0.0  ;;  %1895 = vrot.lane.b32.xlu1 %v1891_v37, %s2433_s10 }
 0x4e8   : > { %v1920_v30 = vmax.f32 %v1919_v8, 0.0 }
 0x4e9   : > { %1897 = vrot.lane.b32.xlu0 %v1892_v17, %s2433_s10 }
 0x4eb   : > { %1948 = vrot.lane.b32.xlu1 %v1944_v62, %s2434_s5 }
 0x545   : > { %v1781_v33 = vpop.f32.mrf.mxu1 }
 0x546   : > { %v1782_v24 = vadd.f32 %v1781_v33, %v1623_v53 }
 0x547   : > { %v1783_v39 = vpop.f32.mrf.mxu1 }
 0x548   : > { %v1943_v25 = vmul.f32 %v1940_v12, %v1782_v24  ;;  %v1972_v43 = vmul.f32 %v1970_v19, %v1782_v24  ;;  %v1784_v36 = vadd.f32 %v1783_v39, %v1623_v53 }
 0x54a   : > { %v1945_v48 = vmax.f32 %v1943_v25, 0.0  ;;  %v1974_v31 = vmax.f32 %v1972_v43, 0.0  ;;  %v1973_v56 = vmul.f32 %v1970_v19, %v1784_v36  ;;  %v2025_v18 = vmul.f32 %v2023_v10, %v1784_v36  ;;  %v1852_v9 = vpop.f32.mrf.mxu0 }
 0x54b   : > { %v1853_v4 = vadd.f32 %v1852_v9, %v1623_v53  ;;  %v2002_v20 = vmul.f32 %v2000_v40, %v1784_v36 }
 0x54c   : > { %1950 = vrot.lane.b32.xlu0 %v1945_v48, %s2434_s5  ;;  %1978 = vrot.lane.b32.xlu1 %v1974_v31, %s2435_s29  ;;  %v2277_v57 = vpop.f32.mrf.mxu0  ;;  %v1975_v15 = vmax.f32 %v1973_v56, 0.0  ;;  %v2027_v51 = vmax.f32 %v2025_v18, 0.0 }
 0x54d   : > { %v2026_v38 = vmul.f32 %v2023_v10, %v1853_v4  ;;  %v2003_v11 = vmax.f32 %v2002_v20, 0.0  ;;  %v2055_v5 = vmul.f32 %v2053_v61, %v1853_v4 }
 0x54f   : > { %v2028_v45 = vmax.f32 %v2026_v38, 0.0  ;;  %v2056_v22 = vmax.f32 %v2055_v5, 0.0 }
 0x550   : > { %1980 = vrot.lane.b32.xlu0 %v1975_v15, %s2435_s29  ;;  %2031 = vrot.lane.b32.xlu1 %v2027_v51, %s2436_s14 }
 0x554   : > { %2033 = vrot.lane.b32.xlu0 %v2028_v45, %s2436_s14  ;;  %1868 = vrot.lane.b32.xlu1 %v1866_v1, %s2409_s12  ;;  %s3993_s12 = scalar_lea.vmem %s4038_s4, %s2187_s26 }
 0x558   : > { %2005 = vrot.lane.b32.xlu1 %v2003_v11, %s2437_s25  ;;  %1922 = vrot.lane.b32.xlu0 %v1920_v30, %s4125_s6 }
 0x559   : > { %v1896_v46 = vpop.permute.xlu1 %1895 }
 0x55b   : > { %v1898_v49 = vpop.permute.xlu0 %1897 }
 0x55c   : > { %2058 = vrot.lane.b32.xlu0 %v2056_v22, %s2438_s27  ;;  %v1900_v29 = vsel %vm1899_vm0, %v1896_v46, %v1898_v49 }
 0x55d   : > { %v1902_v50 = vsel %vm1871_vm1, 0.0, %v1900_v29  ;;  %v1949_v59 = vpop.permute.xlu1 %1948 }
 0x55e   : > { %v1903_v63 = vsel %vm1873_vm2, %v1902_v50, 0.0 }
 0x55f   : > { %2208 = vst [vmem:[%s3993_s12 + $0x4] sm:$0xf] %v1903_v63 }
 0x5be   : > { %v1979_v27 = vpop.permute.xlu1 %1978  ;;  %v1951_v6 = vpop.permute.xlu0 %1950 }
 0x5bf   : > { %v1953_v35 = vsel %vm1952_vm3, %v1949_v59, %v1951_v6 }
 0x5c0   : > { %v1955_v42 = vsel %vm1871_vm1, 0.0, %v1953_v35 }
 0x5c1   : > { %v1956_v23 = vsel %vm1873_vm2, %v1955_v42, 0.0 }
 0x5c2   : > { %2212 = vst [vmem:[%s3993_s12 + $0xc] sm:$0xf] %v1956_v23  ;;  %v2032_v28 = vpop.permute.xlu1 %2031  ;;  %v1981_v13 = vpop.permute.xlu0 %1980 }
 0x5c3   : > { %v1983_v41 = vsel %vm1982_vm4, %v1979_v27, %v1981_v13 }
 0x5c4   : > { %v1985_v21 = vsel %vm1871_vm1, 0.0, %v1983_v41 }
 0x5c5   : > { %v1986_v47 = vsel %vm1873_vm2, %v1985_v21, 0.0 }
 0x5c6   : > { %2214 = vst [vmem:[%s3993_s12 + $0x10] sm:$0xf] %v1986_v47  ;;  %v1869_v26 = vpop.permute.xlu1 %1868  ;;  %v2034_v44 = vpop.permute.xlu0 %2033 }
 0x5c7   : > { %v1872_v7 = vsel %vm1871_vm1, 0.0, %v1869_v26  ;;  %v2036_v54 = vsel %vm2035_vm5, %v2032_v28, %v2034_v44 }
 0x5c8   : > { %v1874_v53 = vsel %vm1873_vm2, %v1872_v7, 0.0  ;;  %v2038_v34 = vsel %vm1871_vm1, 0.0, %v2036_v54 }
 0x5c9   : > { %1875 = vst [vmem:[%s3993_s12] sm:$0xf] %v1874_v53  ;;  %v2039_v32 = vsel %vm1873_vm2, %v2038_v34, 0.0 }
 0x5ca   : > { %2218 = vst [vmem:[%s3993_s12 + $0x18] sm:$0xf] %v2039_v32  ;;  %v2006_v52 = vpop.permute.xlu1 %2005  ;;  %v1923_v12 = vpop.permute.xlu0 %1922 }
 0x5cb   : > { %v2008_v14 = vsel %vm1871_vm1, 0.0, %v2006_v52  ;;  %v1925_v0 = vsel %vm1871_vm1, 0.0, %v1923_v12 }
 0x5cc   : > { %v2009_v37 = vsel %vm1873_vm2, %v2008_v14, 0.0  ;;  %v1926_v55 = vsel %vm1873_vm2, %v1925_v0, 0.0 }
 0x5cd   : > { %2216 = vst [vmem:[%s3993_s12 + $0x14] sm:$0xf] %v2009_v37  ;;  %2210 = vst [vmem:[%s3993_s12 + $0x8] sm:$0xf] %v1926_v55 }
 0x5ce   : > { %v2059_v2 = vpop.permute.xlu0 %2058 }
 0x5cf   : > { %v2061_v17 = vsel %vm1871_vm1, 0.0, %v2059_v2 }
 0x5d0   : > { %v2062_v62 = vsel %vm1873_vm2, %v2061_v17, 0.0 }
 0x5d1   : > { %2220 = vst [vmem:[%s3993_s12 + $0x1c] sm:$0xf] %v2062_v62 }
 0x5d2 PF: > { %s14_s19 = sadd.s32 1, %s2399_s19   ;;  %s4217_s15 = smov %s2391_s17 }
 0x5d3   : > { %p11_p5 = scmp.ge.s32.totalorder %s14_s19, 6   ;;  %s4218_s16 = smov %s2395_s18 }
 0x5d4   : > { %s4219_s17 = smov %s4222_s20  ;;  %s4220_s18 = smov %s4226_s21 }
 0x5d5   :  { %13 = sbr.rel (!%p11_p5) target bundleno = 3 (0x3), region = 84 }

// kernel: res_block_forward.3
= control target key start
LH: loop header
LB: loop body
LE: loop exit
PB: predicated region body
PF: predicated region fallthrough
CT: control target
= control target key end

     0   :  { %s2657_s18 = smov 0   ;;  %s2659_s19 = smov 0   ;;  %s4207_s0 = inlined_call_operand.vmem [shape: f32[2,16,4,128], index: 0, kind: input, shape index: {}, may-alias: {0,1}]   ;;  %s4208_s1 = inlined_call_operand.vmem [shape: f32[2,16,4,128], index: 1, kind: input, shape index: {}, may-alias: {0,1}]   ;;  %s4209_s2 = inlined_call_operand.vmem [shape: f32[2,4,512], index: 2, kind: input, shape index: {}]   ;;  %s4210_s3 = inlined_call_operand.vmem [shape: f32[4,108], index: 3, kind: input, shape index: {}]   ;;  %s4211_s4 = inlined_call_operand.vmem [shape: f32[4,1], index: 4, kind: input, shape index: {}]   ;;  %s4212_s5 = inlined_call_operand.vmem [shape: f32[2,4,512], index: 5, kind: output, shape index: {}]  }
   0x1   :  { %s2661_s20 = smov 0  }
   0x2 LB: > { %s27_s21 = sadd.s32 1, %s2539_s19  ;;  %p2334_p0 = scmp.ge.s32.totalorder %s2543_s20, 1  ;;  %s2543_s20 = sphi %s2661_s20, %s15_s20   ;;  %s2539_s19 = sphi %s2659_s19, %s4371_s19   ;;  %s2535_s18 = sphi %s2657_s18, %s4370_s18  }
   0x3   : > { %p29_p1 = scmp.ge.s32.totalorder %s27_s21, 2  ;;  %p250_p2 = scmp.lt.s32.totalorder %s2543_s20, 3 }
   0x5   : > { %s4373_s21 = smov (%p29_p1, %s27_s21), 0  ;;  %p251_p3 = pnand %p2334_p0, %p250_p2 }
   0x7   : > { %254 = sbr.rel (%p251_p3) target bundleno = 1763 (0x6e3), region = 40 }
   0xc   : > { %p307_p4 = scmp.lt.s32.totalorder %s2535_s18, 1  ;;  %s2545_s26 = smov 117   ;;  %vm404_vm0 = vcmask 1043456   ;;  %vm1550_vm1 = vcmask 261120   ;;  %vm1565_vm2 = vcmask 916480   ;;  %vm1535_vm3 = vcmask 654336  }
   0xd   : > { %s2546_s27 = smov 126   ;;  %s2547_s28 = smov 108   ;;  %vm1595_vm4 = vcmask 130048   ;;  %vm1610_vm5 = vcmask 785408   ;;  %vm1580_vm6 = vcmask 523264   ;;  %vm1645_vm7 = vcmask 883712  }
   0xe   : > { %s4375_s18 = smov (!%p307_p4, %s2535_s18), 1  ;;  %s2548_s29 = smov 127   ;;  %vm2569_vm8 = vmmov 0   ;;  %vm1625_vm9 = vcmask 392192   ;;  %vm1901_vm10 = vcmask 64512   ;;  %vm1904_vm11 = vcmask 195584  }
   0xf   : > { %s2361_s22 = sshll.u32 %s4375_s18, 6  ;;  %s2549_s30 = smov 118   ;;  %vm1907_vm12 = vcmask 326656   ;;  %vm1910_vm13 = vcmask 457728   ;;  %vm1931_vm14 = vcmask 318464   ;;  %vm1996_vm15 = vcmask 105472  }
  0x10   : > { %s2683_s25 = scalar_lea.vmem %s4207_s0, %s2361_s22  ;;  %s2550_s6 = smov 116  }
  0x11   : > { %v352_v0 = vld [vmem:[%s2683_s25] sm:$0xf]  ;;  %v2692_v2 = vld [vmem:[%s2683_s25 + $0x4] sm:$0xf]  ;;  %s2551_s7 = smov 106   ;;  %s2552_s8 = smov 107  }
  0x12   : > { %368 = vrot.lane.b32.xlu1 %v352_v0, %s2545_s26  ;;  %362 = vrot.lane.b32.xlu0 %v352_v0, %s2546_s27  ;;  %v358_v1 = vrot.slane %v352_v0, 4  ;;  %v2697_v3 = vrot.slane %v2692_v2, 4  ;;  %v2711_v4 = vld [vmem:[%s2683_s25 + $0x8] sm:$0xf]  ;;  %s2553_s9 = smov 21   ;;  %s2554_s10 = smov 19  }
  0x13   : > { %v2720_v5 = vrot.slane %v2711_v4, 4  ;;  %s2555_s11 = smov 20   ;;  %s2556_s12 = smov 10   ;;  %v2757_v6 = vld [vmem:[%s2683_s25 + $0xc] sm:$0xf] }
  0x14   : > { %4228 = vst [vmem:[#allocation2_spill] sm:$0xff] %v2697_v3  ;;  %s2557_s13 = smov 11   ;;  %s2558_s14 = smov 1   ;;  %v2764_v7 = vrot.slane %v2757_v6, 4  ;;  %v2897_v62 = vld [vmem:[%s2683_s25 + $0x10] sm:$0xf] }
  0x15   : > { %4229 = vst [vmem:[#allocation3_spill] sm:$0xff] %v2720_v5  ;;  %s2559_s15 = smov 9   ;;  %v2904_v63 = vrot.slane %v2897_v62, 4  ;;  %s2363_s16 = sadd.s32 32, %s2361_s22 }
  0x16   : > { %374 = vrot.lane.b32.xlu1 %v352_v0, %s2547_s28  ;;  %359 = vrot.lane.b32.xlu0 %v358_v1, %s2548_s29  ;;  %4230 = vst [vmem:[#allocation4_spill] sm:$0xff] %v2764_v7  ;;  %s326_s24 = scalar_lea.vmem %s4208_s1, %s2363_s16  ;;  %s2560_s22 = smov 70  }
  0x17   : > { %4250 = vst [vmem:[#allocation24_spill] sm:$0xff] %v2904_v63  ;;  %s2570_s23 = smov 123   ;;  %s2583_s16 = smov 111  }
  0x18   : > { %s2584_s17 = smov 77  }
  0x1a   : > { %365 = vrot.lane.b32.xlu1 %v358_v1, %s2549_s30  ;;  %371 = vrot.lane.b32.xlu0 %v358_v1, %s2550_s6 }
  0x1e   : > { %380 = vrot.lane.b32.xlu1 %v352_v0, %s2551_s7  ;;  %377 = vrot.lane.b32.xlu0 %v358_v1, %s2552_s8 }
  0x22   : > { %389 = vrot.lane.b32.xlu1 %v2697_v3, %s2546_s27  ;;  %386 = vrot.lane.b32.xlu0 %v2692_v2, %s2548_s29 }
  0x26   : > { %395 = vrot.lane.b32.xlu1 %v2697_v3, %s2545_s26  ;;  %392 = vrot.lane.b32.xlu0 %v2692_v2, %s2549_s30 }
  0x2a   : > { %401 = vrot.lane.b32.xlu1 %v2697_v3, %s2547_s28  ;;  %398 = vrot.lane.b32.xlu0 %v2692_v2, %s2550_s6 }
  0x2e   : > { %417 = vrot.lane.b32.xlu1 %v2711_v4, %s2553_s9  ;;  %413 = vrot.lane.b32.xlu0 %v2697_v3, %s2548_s29 }
  0x32   : > { %424 = vrot.lane.b32.xlu1 %v2711_v4, %s2554_s10  ;;  %421 = vrot.lane.b32.xlu0 %v2720_v5, %s2555_s11 }
  0x36   : > { %430 = vrot.lane.b32.xlu1 %v2711_v4, %s2556_s12  ;;  %427 = vrot.lane.b32.xlu0 %v2720_v5, %s2557_s13 }
  0x3a   : > { %436 = vrot.lane.b32.xlu1 %v2711_v4, %s2558_s14  ;;  %433 = vrot.lane.b32.xlu0 %v2720_v5, %s2559_s15 }
  0x3e   : > { %466 = vrot.lane.b32.xlu1 %v2692_v2, %s2546_s27  ;;  %440 = vrot.lane.b32.xlu0 %v2711_v4, %s2548_s29 }
  0x42   : > { %472 = vrot.lane.b32.xlu1 %v2692_v2, %s2545_s26  ;;  %469 = vrot.lane.b32.xlu0 %v2697_v3, %s2549_s30 }
  0x46   : > { %478 = vrot.lane.b32.xlu1 %v2692_v2, %s2547_s28  ;;  %475 = vrot.lane.b32.xlu0 %v2697_v3, %s2550_s6 }
  0x4a   : > { %484 = vrot.lane.b32.xlu1 %v2692_v2, %s2551_s7  ;;  %481 = vrot.lane.b32.xlu0 %v2697_v3, %s2552_s8 }
  0x4e   : > { %491 = vrot.lane.b32.xlu1 %v2711_v4, %s2549_s30  ;;  %488 = vrot.lane.b32.xlu0 %v2720_v5, %s2546_s27 }
  0x52   : > { %497 = vrot.lane.b32.xlu1 %v2711_v4, %s2550_s6  ;;  %494 = vrot.lane.b32.xlu0 %v2720_v5, %s2545_s26 }
  0x56   : > { %510 = vrot.lane.b32.xlu1 %v2720_v5, %s2548_s29  ;;  %500 = vrot.lane.b32.xlu0 %v2720_v5, %s2547_s28 }
  0x5a   : > { %518 = vrot.lane.b32.xlu1 %v2764_v7, %s2555_s11  ;;  %514 = vrot.lane.b32.xlu0 %v2757_v6, %s2553_s9 }
  0x5e   : > { %524 = vrot.lane.b32.xlu1 %v2764_v7, %s2557_s13  ;;  %521 = vrot.lane.b32.xlu0 %v2757_v6, %s2554_s10 }
  0x62   : > { %530 = vrot.lane.b32.xlu1 %v2764_v7, %s2559_s15  ;;  %527 = vrot.lane.b32.xlu0 %v2757_v6, %s2556_s12 }
  0x66   : > { %537 = vrot.lane.b32.xlu1 %v2757_v6, %s2548_s29  ;;  %533 = vrot.lane.b32.xlu0 %v2757_v6, %s2558_s14 }
  0x6a   : > { %566 = vrot.lane.b32.xlu1 %v2720_v5, %s2549_s30  ;;  %563 = vrot.lane.b32.xlu0 %v2711_v4, %s2546_s27 }
  0x6e   : > { %572 = vrot.lane.b32.xlu1 %v2720_v5, %s2550_s6  ;;  %569 = vrot.lane.b32.xlu0 %v2711_v4, %s2545_s26 }
  0x72   : > { %578 = vrot.lane.b32.xlu1 %v2720_v5, %s2552_s8  ;;  %575 = vrot.lane.b32.xlu0 %v2711_v4, %s2547_s28 }
  0x76   : > { %585 = vrot.lane.b32.xlu1 %v2764_v7, %s2546_s27  ;;  %581 = vrot.lane.b32.xlu0 %v2711_v4, %s2551_s7 }
  0x84   : > { %v2800_v8 = vpop.permute.xlu1 %368  ;;  %v2802_v9 = vpop.permute.xlu0 %362 }
  0x85   : > { %4231 = vst [vmem:[#allocation5_spill] sm:$0xff] %v2800_v8  ;;  %4232 = vst [vmem:[#allocation6_spill] sm:$0xff] %v2802_v9 }
  0x88   : > { %v2804_v10 = vpop.permute.xlu1 %374  ;;  %v2806_v11 = vpop.permute.xlu0 %359 }
  0x89   : > { %4233 = vst [vmem:[#allocation7_spill] sm:$0xff] %v2804_v10  ;;  %4234 = vst [vmem:[#allocation8_spill] sm:$0xff] %v2806_v11 }
  0x8c   : > { %v2808_v12 = vpop.permute.xlu1 %365  ;;  %v2810_v13 = vpop.permute.xlu0 %371 }
  0x8d   : > { %4235 = vst [vmem:[#allocation9_spill] sm:$0xff] %v2808_v12  ;;  %4236 = vst [vmem:[#allocation10_spill] sm:$0xff] %v2810_v13 }
  0x90   : > { %v2812_v14 = vpop.permute.xlu1 %380  ;;  %v2814_v15 = vpop.permute.xlu0 %377 }
  0x91   : > { %4237 = vst [vmem:[#allocation11_spill] sm:$0xff] %v2812_v14  ;;  %4238 = vst [vmem:[#allocation12_spill] sm:$0xff] %v2814_v15 }
  0x94   : > { %v2816_v16 = vpop.permute.xlu1 %389  ;;  %v2818_v17 = vpop.permute.xlu0 %386 }
  0x95   : > { %4239 = vst [vmem:[#allocation13_spill] sm:$0xff] %v2816_v16  ;;  %4240 = vst [vmem:[#allocation14_spill] sm:$0xff] %v2818_v17 }
  0x98   : > { %v2820_v18 = vpop.permute.xlu1 %395  ;;  %v2822_v19 = vpop.permute.xlu0 %392 }
  0x9c   : > { %v2824_v20 = vpop.permute.xlu1 %401  ;;  %v2826_v21 = vpop.permute.xlu0 %398 }
  0xa0   : > { %v418_v22 = vpop.permute.xlu1 %417  ;;  %v414_v23 = vpop.permute.xlu0 %413 }
  0xa1   : > { %v2870_v55 = vsel %vm404_vm0, %v2692_v2, %v414_v23 }
  0xa2   : > { %4248 = vst [vmem:[#allocation22_spill] sm:$0xff] %v2870_v55 }
  0xa4   : > { %v425_v24 = vpop.permute.xlu1 %424  ;;  %v422_v25 = vpop.permute.xlu0 %421 }
  0xa5   : > { %v443_v54 = vsel %vm404_vm0, %v418_v22, %v422_v25 }
  0xa8   : > { %v431_v26 = vpop.permute.xlu1 %430  ;;  %v428_v27 = vpop.permute.xlu0 %427 }
  0xa9   : > { %v444_v57 = vsel %vm404_vm0, %v425_v24, %v428_v27 }
  0xac   : > { %v437_v28 = vpop.permute.xlu1 %436  ;;  %v434_v29 = vpop.permute.xlu0 %433 }
  0xad   : > { %v446_v53 = vsel %vm404_vm0, %v437_v28, %v2720_v5  ;;  %v445_v56 = vsel %vm404_vm0, %v431_v26, %v434_v29 }
  0xb0   : > { %v2828_v30 = vpop.permute.xlu1 %466  ;;  %v2830_v31 = vpop.permute.xlu0 %440 }
  0xb1   : > { %4241 = vst [vmem:[#allocation15_spill] sm:$0xff] %v2828_v30  ;;  %462 = vrot.lane.b32.xlu0 %v2830_v31, %s2552_s8 }
  0xb4   : > { %v2834_v32 = vpop.permute.xlu1 %472  ;;  %v2836_v33 = vpop.permute.xlu0 %469 }
  0xb5   : > { %4242 = vst [vmem:[#allocation16_spill] sm:$0xff] %v2834_v32  ;;  %4243 = vst [vmem:[#allocation17_spill] sm:$0xff] %v2836_v33 }
  0xb8   : > { %v2838_v34 = vpop.permute.xlu1 %478  ;;  %v2840_v35 = vpop.permute.xlu0 %475 }
  0xb9   : > { %4244 = vst [vmem:[#allocation18_spill] sm:$0xff] %v2838_v34  ;;  %4245 = vst [vmem:[#allocation19_spill] sm:$0xff] %v2840_v35 }
  0xbc   : > { %v2842_v36 = vpop.permute.xlu1 %484  ;;  %v2844_v37 = vpop.permute.xlu0 %481 }
  0xbd   : > { %4246 = vst [vmem:[#allocation20_spill] sm:$0xff] %v2842_v36  ;;  %4247 = vst [vmem:[#allocation21_spill] sm:$0xff] %v2844_v37 }
  0xc0   : > { %v2846_v38 = vpop.permute.xlu1 %491  ;;  %v2848_v39 = vpop.permute.xlu0 %488 }
  0xc4   : > { %v2850_v40 = vpop.permute.xlu1 %497  ;;  %v2852_v41 = vpop.permute.xlu0 %494 }
  0xc8   : > { %v511_v42 = vpop.permute.xlu1 %510  ;;  %v2854_v43 = vpop.permute.xlu0 %500 }
  0xc9   : > { %v2880_v58 = vsel %vm404_vm0, %v2711_v4, %v511_v42 }
  0xca   : > { %4249 = vst [vmem:[#allocation23_spill] sm:$0xff] %v2880_v58 }
  0xcc   : > { %v519_v44 = vpop.permute.xlu1 %518  ;;  %v515_v45 = vpop.permute.xlu0 %514 }
  0xcd   : > { %v540_v59 = vsel %vm404_vm0, %v515_v45, %v519_v44 }
  0xd0   : > { %v525_v46 = vpop.permute.xlu1 %524  ;;  %v522_v47 = vpop.permute.xlu0 %521 }
  0xd1   : > { %v541_v60 = vsel %vm404_vm0, %v522_v47, %v525_v46 }
  0xd4   : > { %v531_v48 = vpop.permute.xlu1 %530  ;;  %v528_v49 = vpop.permute.xlu0 %527 }
  0xd5   : > { %v542_v61 = vsel %vm404_vm0, %v528_v49, %v531_v48 }
  0xd8   : > { %v2856_v50 = vpop.permute.xlu1 %537  ;;  %v534_v51 = vpop.permute.xlu0 %533 }
  0xd9   : > { %559 = vrot.lane.b32.xlu1 %v2856_v50, %s2552_s8  ;;  %v543_v52 = vsel %vm404_vm0, %v534_v51, %v2764_v7 }
  0xda   : > { %557 = vrot.lane.b32.xlu0 %v543_v52, %s2552_s8 }
  0xdc   : > { %v2922_v0 = vpop.permute.xlu0 %563  ;;  %v2924_v1 = vpop.permute.xlu1 %566 }
  0xdd   : > { %460 = vrot.lane.b32.xlu1 %v446_v53, %s2552_s8  ;;  %4251 = vst [vmem:[#allocation25_spill] sm:$0xff] %v2922_v0  ;;  %4252 = vst [vmem:[#allocation26_spill] sm:$0xff] %v2924_v1 }
  0xde   : > { %454 = vrot.lane.b32.xlu0 %v443_v54, %s2552_s8 }
  0xe0   : > { %v2926_v2 = vpop.permute.xlu0 %569  ;;  %v2928_v4 = vpop.permute.xlu1 %572 }
  0xe1   : > { %452 = vrot.lane.b32.xlu1 %v2870_v55, %s2552_s8  ;;  %4253 = vst [vmem:[#allocation27_spill] sm:$0xff] %v2926_v2  ;;  %4254 = vst [vmem:[#allocation28_spill] sm:$0xff] %v2928_v4 }
  0xe2   : > { %458 = vrot.lane.b32.xlu0 %v445_v56, %s2552_s8 }
  0xe4   : > { %v2930_v22 = vpop.permute.xlu0 %575  ;;  %v2932_v23 = vpop.permute.xlu1 %578 }
  0xe5   : > { %456 = vrot.lane.b32.xlu1 %v444_v57, %s2552_s8  ;;  %4255 = vst [vmem:[#allocation29_spill] sm:$0xff] %v2930_v22  ;;  %4256 = vst [vmem:[#allocation30_spill] sm:$0xff] %v2932_v23 }
  0xe6   : > { %549 = vrot.lane.b32.xlu0 %v2880_v58, %s2552_s8 }
  0xe8   : > { %v2934_v24 = vpop.permute.xlu0 %581  ;;  %v2936_v25 = vpop.permute.xlu1 %585 }
  0xe9   : > { %551 = vrot.lane.b32.xlu1 %v540_v59, %s2552_s8  ;;  %4257 = vst [vmem:[#allocation31_spill] sm:$0xff] %v2934_v24 }
  0xea   : > { %553 = vrot.lane.b32.xlu0 %v541_v60, %s2552_s8 }
  0xed   : > { %555 = vrot.lane.b32.xlu1 %v542_v61, %s2552_s8 }
  0xee   : > { %588 = vrot.lane.b32.xlu0 %v2757_v6, %s2549_s30 }
  0xf1   : > { %591 = vrot.lane.b32.xlu1 %v2764_v7, %s2545_s26 }
  0xf2   : > { %594 = vrot.lane.b32.xlu0 %v2757_v6, %s2550_s6 }
  0xf5   : > { %597 = vrot.lane.b32.xlu1 %v2764_v7, %s2547_s28 }
  0xf6   : > { %607 = vrot.lane.b32.xlu0 %v2764_v7, %s2548_s29 }
  0xf9   : > { %611 = vrot.lane.b32.xlu1 %v2897_v62, %s2553_s9 }
  0xfa   : > { %615 = vrot.lane.b32.xlu0 %v2904_v63, %s2555_s11 }
  0xfd   : > { %618 = vrot.lane.b32.xlu1 %v2897_v62, %s2554_s10 }
  0xfe   : > { %621 = vrot.lane.b32.xlu0 %v2904_v63, %s2557_s13 }
 0x101   : > { %624 = vrot.lane.b32.xlu1 %v2897_v62, %s2556_s12 }
 0x102   : > { %627 = vrot.lane.b32.xlu0 %v2904_v63, %s2559_s15 }
 0x105   : > { %630 = vrot.lane.b32.xlu1 %v2897_v62, %s2558_s14 }
 0x106   : > { %634 = vrot.lane.b32.xlu0 %v2897_v62, %s2548_s29 }
 0x123   : > { %v2938_v26 = vpop.permute.xlu0 %462 }
 0x14b   : > { %v2940_v27 = vpop.permute.xlu1 %559 }
 0x14c   : > { %v2942_v28 = vpop.permute.xlu0 %557 }
 0x14f   : > { %v2944_v29 = vpop.permute.xlu1 %460 }
 0x150   : > { %v2946_v42 = vpop.permute.xlu0 %454 }
 0x153   : > { %v2948_v44 = vpop.permute.xlu1 %452 }
 0x154   : > { %v2950_v45 = vpop.permute.xlu0 %458 }
 0x157   : > { %v2952_v46 = vpop.permute.xlu1 %456 }
 0x158   : > { %v2954_v47 = vpop.permute.xlu0 %549 }
 0x15b   : > { %v2956_v48 = vpop.permute.xlu1 %551 }
 0x15c   : > { %v2958_v49 = vpop.permute.xlu0 %553 }
 0x15f   : > { %v2960_v51 = vpop.permute.xlu1 %555 }
 0x160   : > { %v2962_v52 = vpop.permute.xlu0 %588 }
 0x163   : > { %v2964_v53 = vpop.permute.xlu1 %591 }
 0x164   : > { %v2966_v54 = vpop.permute.xlu0 %594 }
 0x167   : > { %v2968_v56 = vpop.permute.xlu1 %597 }
 0x168   : > { %v608_v57 = vpop.permute.xlu0 %607 }
 0x169   : > { %v2972_v59 = vsel %vm404_vm0, %v2757_v6, %v608_v57 }
 0x16a   : > { %4258 = vst [vmem:[#allocation32_spill] sm:$0xff] %v2972_v59  ;;  %646 = vrot.lane.b32.xlu1 %v2972_v59, %s2552_s8 }
 0x16b   : > { %v612_v60 = vpop.permute.xlu1 %611 }
 0x16c   : > { %v616_v61 = vpop.permute.xlu0 %615 }
 0x16d   : > { %v637_v11 = vsel %vm404_vm0, %v612_v60, %v616_v61 }
 0x16e   : > { %648 = vrot.lane.b32.xlu0 %v637_v11, %s2552_s8 }
 0x16f   : > { %v619_v58 = vpop.permute.xlu1 %618 }
 0x170   : > { %v622_v55 = vpop.permute.xlu0 %621 }
 0x171   : > { %v638_v9 = vsel %vm404_vm0, %v619_v58, %v622_v55 }
 0x172   : > { %650 = vrot.lane.b32.xlu1 %v638_v9, %s2552_s8  ;;  %v3012_v9 = vld [vmem:[%s2683_s25 + $0x14] sm:$0xf] }
 0x173   : > { %v625_v12 = vpop.permute.xlu1 %624 }
 0x174   : > { %v628_v0 = vpop.permute.xlu0 %627 }
 0x175   : > { %v639_v57 = vsel %vm404_vm0, %v625_v12, %v628_v0 }
 0x176   : > { %652 = vrot.lane.b32.xlu0 %v639_v57, %s2552_s8 }
 0x177   : > { %v631_v1 = vpop.permute.xlu1 %630 }
 0x178   : > { %v640_v59 = vsel %vm404_vm0, %v631_v1, %v2904_v63  ;;  %v2985_v11 = vpop.permute.xlu0 %634 }
 0x179   : > { %654 = vrot.lane.b32.xlu1 %v640_v59, %s2552_s8  ;;  %4259 = vst [vmem:[#allocation33_spill] sm:$0xff] %v2985_v11 }
 0x17a   : > { %656 = vrot.lane.b32.xlu0 %v2985_v11, %s2552_s8 }
 0x17d   : > { %660 = vrot.lane.b32.xlu1 %v2757_v6, %s2546_s27 }
 0x17e   : > { %663 = vrot.lane.b32.xlu0 %v2764_v7, %s2549_s30 }
 0x181   : > { %666 = vrot.lane.b32.xlu1 %v2757_v6, %s2545_s26 }
 0x182   : > { %669 = vrot.lane.b32.xlu0 %v2764_v7, %s2550_s6 }
 0x185   : > { %672 = vrot.lane.b32.xlu1 %v2757_v6, %s2547_s28 }
 0x186   : > { %675 = vrot.lane.b32.xlu0 %v2764_v7, %s2552_s8 }
 0x189   : > { %678 = vrot.lane.b32.xlu1 %v2757_v6, %s2551_s7  ;;  %v3019_v6 = vrot.slane %v3012_v9, 4 }
 0x18a   : > { %682 = vrot.lane.b32.xlu0 %v2904_v63, %s2546_s27 }
 0x18b   : > { %4260 = vst [vmem:[#allocation34_spill] sm:$0xff] %v3019_v6 }
 0x18d   : > { %685 = vrot.lane.b32.xlu1 %v2897_v62, %s2549_s30 }
 0x18e   : > { %688 = vrot.lane.b32.xlu0 %v2904_v63, %s2545_s26 }
 0x191   : > { %691 = vrot.lane.b32.xlu1 %v2897_v62, %s2550_s6 }
 0x192   : > { %694 = vrot.lane.b32.xlu0 %v2904_v63, %s2547_s28 }
 0x195   : > { %704 = vrot.lane.b32.xlu1 %v2904_v63, %s2548_s29 }
 0x196   : > { %708 = vrot.lane.b32.xlu0 %v3012_v9, %s2553_s9 }
 0x199   : > { %712 = vrot.lane.b32.xlu1 %v3019_v6, %s2555_s11 }
 0x19a   : > { %715 = vrot.lane.b32.xlu0 %v3012_v9, %s2554_s10 }
 0x19d   : > { %718 = vrot.lane.b32.xlu1 %v3019_v6, %s2557_s13 }
 0x19e   : > { %721 = vrot.lane.b32.xlu0 %v3012_v9, %s2556_s12 }
 0x1a1   : > { %724 = vrot.lane.b32.xlu1 %v3019_v6, %s2559_s15 }
 0x1a2   : > { %727 = vrot.lane.b32.xlu0 %v3012_v9, %s2558_s14 }
 0x1a5   : > { %731 = vrot.lane.b32.xlu1 %v3012_v9, %s2548_s29 }
 0x1dc   : > { %v3037_v12 = vpop.permute.xlu1 %646 }
 0x1e0   : > { %v3039_v55 = vpop.permute.xlu0 %648 }
 0x1e4   : > { %v3041_v58 = vpop.permute.xlu1 %650 }
 0x1e8   : > { %v3043_v0 = vpop.permute.xlu0 %652 }
 0x1eb   : > { %v3045_v1 = vpop.permute.xlu1 %654 }
 0x1ec   : > { %v3047_v59 = vpop.permute.xlu0 %656 }
 0x1ef   : > { %v3049_v60 = vpop.permute.xlu1 %660 }
 0x1f0   : > { %4261 = vst [vmem:[#allocation35_spill] sm:$0xff] %v3049_v60  ;;  %v3051_v61 = vpop.permute.xlu0 %663 }
 0x1f1   : > { %4262 = vst [vmem:[#allocation36_spill] sm:$0xff] %v3051_v61 }
 0x1f3   : > { %v3053_v57 = vpop.permute.xlu1 %666 }
 0x1f4   : > { %4263 = vst [vmem:[#allocation37_spill] sm:$0xff] %v3053_v57  ;;  %v3055_v30 = vpop.permute.xlu0 %669 }
 0x1f5   : > { %4264 = vst [vmem:[#allocation38_spill] sm:$0xff] %v3055_v30 }
 0x1f7   : > { %v3057_v33 = vpop.permute.xlu1 %672 }
 0x1f8   : > { %4265 = vst [vmem:[#allocation39_spill] sm:$0xff] %v3057_v33  ;;  %v3059_v8 = vpop.permute.xlu0 %675 }
 0x1f9   : > { %4266 = vst [vmem:[#allocation40_spill] sm:$0xff] %v3059_v8 }
 0x1fb   : > { %v3061_v13 = vpop.permute.xlu1 %678 }
 0x1fc   : > { %4267 = vst [vmem:[#allocation41_spill] sm:$0xff] %v3061_v13  ;;  %v3063_v2 = vpop.permute.xlu0 %682 }
 0x1ff   : > { %v3065_v4 = vpop.permute.xlu1 %685 }
 0x200   : > { %v3067_v32 = vpop.permute.xlu0 %688 }
 0x203   : > { %v3069_v35 = vpop.permute.xlu1 %691 }
 0x204   : > { %v3071_v60 = vpop.permute.xlu0 %694 }
 0x207   : > { %v705_v61 = vpop.permute.xlu1 %704 }
 0x208   : > { %v3075_v57 = vsel %vm404_vm0, %v2897_v62, %v705_v61  ;;  %v709_v30 = vpop.permute.xlu0 %708 }
 0x209   : > { %4268 = vst [vmem:[#allocation42_spill] sm:$0xff] %v3075_v57  ;;  %743 = vrot.lane.b32.xlu0 %v3075_v57, %s2552_s8 }
 0x20b   : > { %v713_v10 = vpop.permute.xlu1 %712 }
 0x20c   : > { %v734_v15 = vsel %vm404_vm0, %v709_v30, %v713_v10  ;;  %v716_v33 = vpop.permute.xlu0 %715 }
 0x20d   : > { %745 = vrot.lane.b32.xlu1 %v734_v15, %s2552_s8 }
 0x20f   : > { %v719_v8 = vpop.permute.xlu1 %718 }
 0x210   : > { %v735_v22 = vsel %vm404_vm0, %v716_v33, %v719_v8  ;;  %v722_v23 = vpop.permute.xlu0 %721  ;;  %v3115_v8 = vld [vmem:[%s2683_s25 + $0x18] sm:$0xf] }
 0x211   : > { %747 = vrot.lane.b32.xlu0 %v735_v22, %s2552_s8  ;;  %v3122_v15 = vrot.slane %v3115_v8, 4 }
 0x213   : > { %v725_v34 = vpop.permute.xlu1 %724 }
 0x214   : > { %v736_v61 = vsel %vm404_vm0, %v722_v23, %v725_v34  ;;  %v728_v37 = vpop.permute.xlu0 %727 }
 0x215   : > { %749 = vrot.lane.b32.xlu1 %v736_v61, %s2552_s8  ;;  %v737_v57 = vsel %vm404_vm0, %v728_v37, %v3019_v6 }
 0x216   : > { %751 = vrot.lane.b32.xlu0 %v737_v57, %s2552_s8 }
 0x217   : > { %v3088_v10 = vpop.permute.xlu1 %731 }
 0x218   : > { %4269 = vst [vmem:[#allocation43_spill] sm:$0xff] %v3088_v10 }
 0x219   : > { %753 = vrot.lane.b32.xlu1 %v3088_v10, %s2552_s8 }
 0x21a   : > { %757 = vrot.lane.b32.xlu0 %v2897_v62, %s2546_s27 }
 0x21d   : > { %760 = vrot.lane.b32.xlu1 %v2904_v63, %s2549_s30 }
 0x21e   : > { %763 = vrot.lane.b32.xlu0 %v2897_v62, %s2545_s26 }
 0x221   : > { %766 = vrot.lane.b32.xlu1 %v2904_v63, %s2550_s6 }
 0x222   : > { %769 = vrot.lane.b32.xlu0 %v2897_v62, %s2547_s28 }
 0x225   : > { %772 = vrot.lane.b32.xlu1 %v2904_v63, %s2552_s8 }
 0x226   : > { %775 = vrot.lane.b32.xlu0 %v2897_v62, %s2551_s7 }
 0x229   : > { %779 = vrot.lane.b32.xlu1 %v3019_v6, %s2546_s27 }
 0x22a   : > { %782 = vrot.lane.b32.xlu0 %v3012_v9, %s2549_s30 }
 0x22d   : > { %785 = vrot.lane.b32.xlu1 %v3019_v6, %s2545_s26 }
 0x22e   : > { %788 = vrot.lane.b32.xlu0 %v3012_v9, %s2550_s6 }
 0x231   : > { %791 = vrot.lane.b32.xlu1 %v3019_v6, %s2547_s28 }
 0x232   : > { %801 = vrot.lane.b32.xlu0 %v3019_v6, %s2548_s29 }
 0x235   : > { %805 = vrot.lane.b32.xlu1 %v3115_v8, %s2553_s9 }
 0x236   : > { %809 = vrot.lane.b32.xlu0 %v3122_v15, %s2555_s11 }
 0x239   : > { %812 = vrot.lane.b32.xlu1 %v3115_v8, %s2554_s10 }
 0x23a   : > { %815 = vrot.lane.b32.xlu0 %v3122_v15, %s2557_s13 }
 0x23d   : > { %818 = vrot.lane.b32.xlu1 %v3115_v8, %s2556_s12 }
 0x23e   : > { %821 = vrot.lane.b32.xlu0 %v3122_v15, %s2559_s15 }
 0x241   : > { %824 = vrot.lane.b32.xlu1 %v3115_v8, %s2558_s14 }
 0x242   : > { %828 = vrot.lane.b32.xlu0 %v3115_v8, %s2548_s29 }
 0x27b   : > { %v3140_v30 = vpop.permute.xlu0 %743 }
 0x27f   : > { %v3142_v33 = vpop.permute.xlu1 %745 }
 0x283   : > { %v3144_v34 = vpop.permute.xlu0 %747 }
 0x287   : > { %v3146_v37 = vpop.permute.xlu1 %749 }
 0x288   : > { %v3148_v62 = vpop.permute.xlu0 %751 }
 0x28b   : > { %v3150_v22 = vpop.permute.xlu1 %753 }
 0x28c   : > { %v3152_v23 = vpop.permute.xlu0 %757 }
 0x28d   : > { %4270 = vst [vmem:[#allocation44_spill] sm:$0xff] %v3152_v23 }
 0x28f   : > { %v3154_v57 = vpop.permute.xlu1 %760 }
 0x290   : > { %4271 = vst [vmem:[#allocation45_spill] sm:$0xff] %v3154_v57  ;;  %v3156_v61 = vpop.permute.xlu0 %763 }
 0x291   : > { %4272 = vst [vmem:[#allocation46_spill] sm:$0xff] %v3156_v61 }
 0x293   : > { %v3158_v10 = vpop.permute.xlu1 %766 }
 0x294   : > { %4273 = vst [vmem:[#allocation47_spill] sm:$0xff] %v3158_v10  ;;  %v3160_v14 = vpop.permute.xlu0 %769 }
 0x295   : > { %4274 = vst [vmem:[#allocation48_spill] sm:$0xff] %v3160_v14 }
 0x297   : > { %v3162_v3 = vpop.permute.xlu1 %772 }
 0x298   : > { %4275 = vst [vmem:[#allocation49_spill] sm:$0xff] %v3162_v3  ;;  %v3164_v13 = vpop.permute.xlu0 %775 }
 0x299   : > { %4276 = vst [vmem:[#allocation50_spill] sm:$0xff] %v3164_v13 }
 0x29b   : > { %v3166_v63 = vpop.permute.xlu1 %779 }
 0x29c   : > { %4277 = vst [vmem:[#allocation51_spill] sm:$0xff] %v3166_v63  ;;  %v3168_v24 = vpop.permute.xlu0 %782 }
 0x29d   : > { %4278 = vst [vmem:[#allocation52_spill] sm:$0xff] %v3168_v24 }
 0x29f   : > { %v3170_v7 = vpop.permute.xlu1 %785 }
 0x2a0   : > { %4279 = vst [vmem:[#allocation53_spill] sm:$0xff] %v3170_v7  ;;  %v3172_v36 = vpop.permute.xlu0 %788 }
 0x2a1   : > { %4280 = vst [vmem:[#allocation54_spill] sm:$0xff] %v3172_v36 }
 0x2a3   : > { %v3174_v23 = vpop.permute.xlu1 %791 }
 0x2a4   : > { %4281 = vst [vmem:[#allocation55_spill] sm:$0xff] %v3174_v23  ;;  %v802_v57 = vpop.permute.xlu0 %801 }
 0x2a5   : > { %v3178_v61 = vsel %vm404_vm0, %v3012_v9, %v802_v57 }
 0x2a6   : > { %4282 = vst [vmem:[#allocation56_spill] sm:$0xff] %v3178_v61  ;;  %840 = vrot.lane.b32.xlu1 %v3178_v61, %s2552_s8 }
 0x2a7   : > { %v806_v10 = vpop.permute.xlu1 %805 }
 0x2a8   : > { %v810_v14 = vpop.permute.xlu0 %809 }
 0x2a9   : > { %v831_v3 = vsel %vm404_vm0, %v806_v10, %v810_v14 }
 0x2aa   : > { %842 = vrot.lane.b32.xlu0 %v831_v3, %s2552_s8 }
 0x2ab   : > { %v813_v13 = vpop.permute.xlu1 %812 }
 0x2ac   : > { %v816_v63 = vpop.permute.xlu0 %815 }
 0x2ad   : > { %v832_v24 = vsel %vm404_vm0, %v813_v13, %v816_v63  ;;  %v3219_v13 = vld [vmem:[%s326_s24] sm:$0xf] }
 0x2ae   : > { %844 = vrot.lane.b32.xlu1 %v832_v24, %s2552_s8  ;;  %v3235_v63 = vrot.slane %v3219_v13, 4  ;;  %v2350_v24 = vld [vmem:[%s326_s24 + $0x4] sm:$0xf]  ;;  %s2571_s24 = smov 119  }
 0x2af   : > { %v819_v7 = vpop.permute.xlu1 %818 }
 0x2b0   : > { %v822_v57 = vpop.permute.xlu0 %821 }
 0x2b1   : > { %v833_v36 = vsel %vm404_vm0, %v819_v7, %v822_v57  ;;  %v3210_v7 = vld [vmem:[%s2683_s25 + $0x1c] sm:$0xf] }
 0x2b2   : > { %846 = vrot.lane.b32.xlu0 %v833_v36, %s2552_s8  ;;  %v3228_v36 = vrot.slane %v3210_v7, 4 }
 0x2b3   : > { %v825_v61 = vpop.permute.xlu1 %824 }
 0x2b4   : > { %v834_v14 = vsel %vm404_vm0, %v825_v61, %v3122_v15  ;;  %v3191_v3 = vpop.permute.xlu0 %828 }
 0x2b5   : > { %848 = vrot.lane.b32.xlu1 %v834_v14, %s2552_s8  ;;  %4283 = vst [vmem:[#allocation57_spill] sm:$0xff] %v3191_v3 }
 0x2b6   : > { %850 = vrot.lane.b32.xlu0 %v3191_v3, %s2552_s8 }
 0x2b9   : > { %854 = vrot.lane.b32.xlu1 %v3012_v9, %s2546_s27 }
 0x2ba   : > { %857 = vrot.lane.b32.xlu0 %v3019_v6, %s2549_s30 }
 0x2bd   : > { %860 = vrot.lane.b32.xlu1 %v3012_v9, %s2545_s26 }
 0x2be   : > { %863 = vrot.lane.b32.xlu0 %v3019_v6, %s2550_s6 }
 0x2c1   : > { %866 = vrot.lane.b32.xlu1 %v3012_v9, %s2547_s28 }
 0x2c2   : > { %869 = vrot.lane.b32.xlu0 %v3019_v6, %s2552_s8 }
 0x2c5   : > { %872 = vrot.lane.b32.xlu1 %v3012_v9, %s2551_s7  ;;  %v1098_v9 = vrot.slane %v2350_v24, 4 }
 0x2c6   : > { %925 = vrot.lane.b32.xlu0 %v3210_v7, %s2548_s29 }
 0x2c9   : > { %921 = vrot.lane.b32.xlu1 %v3210_v7, %s2558_s14 }
 0x2ca   : > { %1021 = vrot.lane.b32.xlu0 %v3219_v13, %s2548_s29 }
 0x2cd   : > { %1017 = vrot.lane.b32.xlu1 %v3219_v13, %s2558_s14 }
 0x2ce   : > { %915 = vrot.lane.b32.xlu0 %v3210_v7, %s2556_s12 }
 0x2d1   : > { %918 = vrot.lane.b32.xlu1 %v3228_v36, %s2559_s15 }
 0x2d2   : > { %1011 = vrot.lane.b32.xlu0 %v3219_v13, %s2556_s12 }
 0x2d5   : > { %1014 = vrot.lane.b32.xlu1 %v3235_v63, %s2559_s15 }
 0x2d6   : > { %1118 = vrot.lane.b32.xlu0 %v2350_v24, %s2548_s29 }
 0x2d9   : > { %909 = vrot.lane.b32.xlu1 %v3210_v7, %s2554_s10 }
 0x2da   : > { %912 = vrot.lane.b32.xlu0 %v3228_v36, %s2557_s13 }
 0x2dd   : > { %1114 = vrot.lane.b32.xlu1 %v2350_v24, %s2558_s14 }
 0x2de   : > { %1005 = vrot.lane.b32.xlu0 %v3219_v13, %s2554_s10 }
 0x2e1   : > { %1008 = vrot.lane.b32.xlu1 %v3235_v63, %s2557_s13 }
 0x2e2   : > { %902 = vrot.lane.b32.xlu0 %v3210_v7, %s2553_s9 }
 0x2e5   : > { %906 = vrot.lane.b32.xlu1 %v3228_v36, %s2555_s11 }
 0x2e6   : > { %1108 = vrot.lane.b32.xlu0 %v2350_v24, %s2556_s12  ;;  %s2581_s12 = smov 41  }
 0x2e9   : > { %1111 = vrot.lane.b32.xlu1 %v1098_v9, %s2559_s15 }
 0x2ea   : > { %998 = vrot.lane.b32.xlu0 %v3219_v13, %s2553_s9 }
 0x2ed   : > { %1002 = vrot.lane.b32.xlu1 %v3235_v63, %s2555_s11 }
 0x2ee   : > { %898 = vrot.lane.b32.xlu0 %v3122_v15, %s2548_s29 }
 0x2f1   : > { %1102 = vrot.lane.b32.xlu1 %v2350_v24, %s2554_s10 }
 0x2f2   : > { %1105 = vrot.lane.b32.xlu0 %v1098_v9, %s2557_s13 }
 0x2f5   : > { %994 = vrot.lane.b32.xlu1 %v3228_v36, %s2548_s29 }
 0x2f6   : > { %1095 = vrot.lane.b32.xlu0 %v2350_v24, %s2553_s9 }
 0x2f9   : > { %1099 = vrot.lane.b32.xlu1 %v1098_v9, %s2555_s11  ;;  %s2565_s11 = smov 86  }
 0x2fa   : > { %1091 = vrot.lane.b32.xlu0 %v3235_v63, %s2548_s29 }
 0x2fd   : > { %876 = vrot.lane.b32.xlu1 %v3122_v15, %s2546_s27 }
 0x2fe   : > { %879 = vrot.lane.b32.xlu0 %v3115_v8, %s2549_s30 }
 0x318   : > { %v3275_v10 = vpop.permute.xlu1 %840 }
 0x319   : > { %4284 = vst [vmem:[#allocation58_spill] sm:$0xff] %v3275_v10 }
 0x31c   : > { %v3277_v61 = vpop.permute.xlu0 %842 }
 0x31d   : > { %4285 = vst [vmem:[#allocation59_spill] sm:$0xff] %v3277_v61 }
 0x320   : > { %v3279_v57 = vpop.permute.xlu1 %844 }
 0x321   : > { %4286 = vst [vmem:[#allocation60_spill] sm:$0xff] %v3279_v57 }
 0x324   : > { %v3281_v14 = vpop.permute.xlu0 %846 }
 0x325   : > { %4287 = vst [vmem:[#allocation61_spill] sm:$0xff] %v3281_v14 }
 0x327   : > { %v3283_v24 = vpop.permute.xlu1 %848 }
 0x328   : > { %4288 = vst [vmem:[#allocation62_spill] sm:$0xff] %v3283_v24  ;;  %v3285_v6 = vpop.permute.xlu0 %850 }
 0x329   : > { %4289 = vst [vmem:[#allocation63_spill] sm:$0xff] %v3285_v6 }
 0x32b   : > { %v3287_v3 = vpop.permute.xlu1 %854 }
 0x32c   : > { %4290 = vst [vmem:[#allocation64_spill] sm:$0xff] %v3287_v3  ;;  %v3289_v23 = vpop.permute.xlu0 %857 }
 0x32d   : > { %4291 = vst [vmem:[#allocation65_spill] sm:$0xff] %v3289_v23 }
 0x32f   : > { %v3291_v5 = vpop.permute.xlu1 %860 }
 0x330   : > { %4292 = vst [vmem:[#allocation66_spill] sm:$0xff] %v3291_v5  ;;  %v3293_v17 = vpop.permute.xlu0 %863 }
 0x331   : > { %4293 = vst [vmem:[#allocation67_spill] sm:$0xff] %v3293_v17 }
 0x333   : > { %v3295_v16 = vpop.permute.xlu1 %866 }
 0x334   : > { %4294 = vst [vmem:[#allocation68_spill] sm:$0xff] %v3295_v16  ;;  %v3297_v10 = vpop.permute.xlu0 %869 }
 0x335   : > { %4295 = vst [vmem:[#allocation69_spill] sm:$0xff] %v3297_v10 }
 0x337   : > { %v3299_v61 = vpop.permute.xlu1 %872 }
 0x338   : > { %4296 = vst [vmem:[#allocation70_spill] sm:$0xff] %v3299_v61  ;;  %v3301_v57 = vpop.permute.xlu0 %925 }
 0x339   : > { %4297 = vst [vmem:[#allocation71_spill] sm:$0xff] %v3301_v57  ;;  %947 = vrot.lane.b32.xlu1 %v3301_v57, %s2552_s8 }
 0x33b   : > { %v922_v14 = vpop.permute.xlu1 %921 }
 0x33c   : > { %v931_v3 = vsel %vm404_vm0, %v922_v14, %v3228_v36  ;;  %v3307_v23 = vpop.permute.xlu0 %1021 }
 0x33d   : > { %4298 = vst [vmem:[#allocation72_spill] sm:$0xff] %v3307_v23  ;;  %1043 = vrot.lane.b32.xlu0 %v3307_v23, %s2552_s8  ;;  %945 = vrot.lane.b32.xlu1 %v931_v3, %s2552_s8 }
 0x33f   : > { %v1018_v5 = vpop.permute.xlu1 %1017 }
 0x340   : > { %v1027_v17 = vsel %vm404_vm0, %v1018_v5, %v3235_v63  ;;  %v916_v16 = vpop.permute.xlu0 %915 }
 0x341   : > { %1041 = vrot.lane.b32.xlu0 %v1027_v17, %s2552_s8 }
 0x343   : > { %v919_v10 = vpop.permute.xlu1 %918 }
 0x344   : > { %v930_v61 = vsel %vm404_vm0, %v916_v16, %v919_v10  ;;  %v1012_v57 = vpop.permute.xlu0 %1011 }
 0x345   : > { %943 = vrot.lane.b32.xlu1 %v930_v61, %s2552_s8 }
 0x347   : > { %v1015_v14 = vpop.permute.xlu1 %1014 }
 0x348   : > { %v1026_v24 = vsel %vm404_vm0, %v1012_v57, %v1015_v14  ;;  %v1119_v6 = vpop.permute.xlu0 %1118 }
 0x349   : > { %1039 = vrot.lane.b32.xlu1 %v1026_v24, %s2552_s8  ;;  %1140 = vrot.lane.b32.xlu0 %v1119_v6, %s2552_s8 }
 0x34b   : > { %v910_v3 = vpop.permute.xlu1 %909 }
 0x34c   : > { %v913_v23 = vpop.permute.xlu0 %912 }
 0x34d   : > { %v929_v5 = vsel %vm404_vm0, %v910_v3, %v913_v23 }
 0x34e   : > { %941 = vrot.lane.b32.xlu0 %v929_v5, %s2552_s8 }
 0x34f   : > { %v1115_v17 = vpop.permute.xlu1 %1114 }
 0x350   : > { %v1124_v16 = vsel %vm404_vm0, %v1115_v17, %v1098_v9  ;;  %v1006_v10 = vpop.permute.xlu0 %1005 }
 0x351   : > { %1138 = vrot.lane.b32.xlu1 %v1124_v16, %s2552_s8 }
 0x353   : > { %v1009_v61 = vpop.permute.xlu1 %1008 }
 0x354   : > { %v1025_v57 = vsel %vm404_vm0, %v1006_v10, %v1009_v61  ;;  %v903_v14 = vpop.permute.xlu0 %902 }
 0x355   : > { %1037 = vrot.lane.b32.xlu0 %v1025_v57, %s2552_s8 }
 0x357   : > { %v907_v24 = vpop.permute.xlu1 %906 }
 0x358   : > { %v928_v6 = vsel %vm404_vm0, %v903_v14, %v907_v24  ;;  %v1109_v11 = vpop.permute.xlu0 %1108 }
 0x359   : > { %939 = vrot.lane.b32.xlu1 %v928_v6, %s2552_s8 }
 0x35b   : > { %v1112_v23 = vpop.permute.xlu1 %1111 }
 0x35c   : > { %v1123_v3 = vsel %vm404_vm0, %v1109_v11, %v1112_v23  ;;  %v999_v5 = vpop.permute.xlu0 %998 }
 0x35d   : > { %1136 = vrot.lane.b32.xlu0 %v1123_v3, %s2552_s8 }
 0x35f   : > { %v1003_v9 = vpop.permute.xlu1 %1002 }
 0x360   : > { %v1024_v17 = vsel %vm404_vm0, %v999_v5, %v1003_v9  ;;  %v899_v16 = vpop.permute.xlu0 %898 }
 0x361   : > { %1035 = vrot.lane.b32.xlu1 %v1024_v17, %s2552_s8  ;;  %v3334_v10 = vsel %vm404_vm0, %v3115_v8, %v899_v16  ;;  %v4306_v16 = vld [vmem:[#allocation24_spill] sm:$0xff] }
 0x362   : > { %937 = vrot.lane.b32.xlu0 %v3334_v10, %s2552_s8 }
 0x363   : > { %v1103_v61 = vpop.permute.xlu1 %1102 }
 0x364   : > { %v1106_v57 = vpop.permute.xlu0 %1105 }
 0x365   : > { %v1122_v11 = vsel %vm404_vm0, %v1103_v61, %v1106_v57  ;;  %v4307_v61 = vld [vmem:[#allocation41_spill] sm:$0xff] }
 0x366   : > { %885 = vrot.lane.b32.xlu0 %v3115_v8, %s2550_s6  ;;  %1134 = vrot.lane.b32.xlu1 %v1122_v11, %s2552_s8  ;;  %v700_v57 = vsel %vm404_vm0, %v4307_v61, %v4306_v16  ;;  %v4322_v61 = vld [vmem:[#allocation38_spill] sm:$0xff] }
 0x367   : > { %v995_v14 = vpop.permute.xlu1 %994 }
 0x368   : > { %v3344_v24 = vsel %vm404_vm0, %v3210_v7, %v995_v14  ;;  %v1096_v6 = vpop.permute.xlu0 %1095 }
 0x36a   : > { %1033 = vrot.lane.b32.xlu0 %v3344_v24, %s2552_s8  ;;  %888 = vrot.lane.b32.xlu1 %v3122_v15, %s2547_s28 }
 0x36b   : > { %v1100_v23 = vpop.permute.xlu1 %1099 }
 0x36c   : > { %v1121_v3 = vsel %vm404_vm0, %v1096_v6, %v1100_v23  ;;  %v1092_v5 = vpop.permute.xlu0 %1091  ;;  %v4308_v6 = vld [vmem:[#allocation2_spill] sm:$0xff]  ;;  %v4309_v23 = vld [vmem:[#allocation11_spill] sm:$0xff] }
 0x36d   : > { %v1120_v9 = vsel %vm404_vm0, %v3219_v13, %v1092_v5  ;;  %v4310_v5 = vld [vmem:[#allocation21_spill] sm:$0xff] }
 0x36e   : > { %984 = vrot.lane.b32.xlu0 %v3228_v36, %s2547_s28  ;;  %981 = vrot.lane.b32.xlu1 %v3210_v7, %s2550_s6 }
 0x372   : > { %882 = vrot.lane.b32.xlu0 %v3122_v15, %s2545_s26  ;;  %1132 = vrot.lane.b32.xlu1 %v1121_v3, %s2552_s8  ;;  %v409_v3 = vsel %vm404_vm0, %v4309_v23, %v4308_v6 }
 0x376   : > { %978 = vrot.lane.b32.xlu0 %v3228_v36, %s2545_s26  ;;  %975 = vrot.lane.b32.xlu1 %v3210_v7, %s2549_s30 }
 0x37a   : > { %1078 = vrot.lane.b32.xlu0 %v3219_v13, %s2550_s6  ;;  %1130 = vrot.lane.b32.xlu1 %v1120_v9, %s2552_s8  ;;  %v4311_v9 = vld [vmem:[#allocation18_spill] sm:$0xff] }
 0x37e   : > { %972 = vrot.lane.b32.xlu0 %v3228_v36, %s2546_s27  ;;  %1081 = vrot.lane.b32.xlu1 %v3235_v63, %s2547_s28 }
 0x382   : > { %1075 = vrot.lane.b32.xlu0 %v3235_v63, %s2545_s26  ;;  %1072 = vrot.lane.b32.xlu1 %v3219_v13, %s2549_s30  ;;  %v4305_v13 = vld [vmem:[#allocation31_spill] sm:$0xff] }
 0x386   : > { %1069 = vrot.lane.b32.xlu0 %v3235_v63, %s2546_s27  ;;  %968 = vrot.lane.b32.xlu1 %v3115_v8, %s2551_s7 }
 0x38a   : > { %965 = vrot.lane.b32.xlu0 %v3122_v15, %s2552_s8  ;;  %962 = vrot.lane.b32.xlu1 %v3115_v8, %s2547_s28 }
 0x38e   : > { %956 = vrot.lane.b32.xlu0 %v3115_v8, %s2545_s26  ;;  %1065 = vrot.lane.b32.xlu1 %v3210_v7, %s2551_s7  ;;  %s2562_s7 = smov 22  }
 0x392   : > { %1059 = vrot.lane.b32.xlu0 %v3210_v7, %s2547_s28  ;;  %959 = vrot.lane.b32.xlu1 %v3122_v15, %s2550_s6  ;;  %s2561_s28 = smov 102  }
 0x396   : > { %950 = vrot.lane.b32.xlu0 %v3115_v8, %s2546_s27  ;;  %1062 = vrot.lane.b32.xlu1 %v3228_v36, %s2552_s8  ;;  %v3421_v8 = vpop.permute.xlu1 %876 }
 0x39a   : > { %1053 = vrot.lane.b32.xlu0 %v3210_v7, %s2545_s26  ;;  %953 = vrot.lane.b32.xlu1 %v3122_v15, %s2549_s30 }
 0x39e   : > { %1047 = vrot.lane.b32.xlu0 %v3210_v7, %s2546_s27  ;;  %1056 = vrot.lane.b32.xlu1 %v3228_v36, %s2550_s6  ;;  %v4304_v7 = vld [vmem:[#allocation4_spill] sm:$0xff]  ;;  %s2563_s27 = smov 54   ;;  %s2564_s6 = smov 6  }
 0x39f   : > { %v603_v17 = vsel %vm404_vm0, %v4305_v13, %v4304_v7  ;;  %v4320_v13 = vld [vmem:[#allocation28_spill] sm:$0xff] }
 0x3a2   : > { %1225 = vrot.lane.b32.xlu0 %v2940_v27, %s2560_s22  ;;  %1050 = vrot.lane.b32.xlu1 %v3228_v36, %s2549_s30  ;;  %v3419_v27 = vpop.permute.xlu0 %879 }
 0x3a6   : > { %1323 = vrot.lane.b32.xlu0 %v3150_v22, %s2561_s28  ;;  %1274 = vrot.lane.b32.xlu1 %v3047_v59, %s2562_s7  ;;  %v4303_v22 = vld [vmem:[#allocation20_spill] sm:$0xff] }
 0x3aa   : > { %1223 = vrot.lane.b32.xlu0 %v2942_v28, %s2560_s22  ;;  %1176 = vrot.lane.b32.xlu1 %v2938_v26, %s2549_s30 }
 0x3ab   : > { %v3427_v28 = vpop.permute.xlu1 %947 }
 0x3ae   : > { %1321 = vrot.lane.b32.xlu0 %v3148_v62, %s2561_s28  ;;  %1272 = vrot.lane.b32.xlu1 %v3045_v1, %s2562_s7  ;;  %v4302_v62 = vld [vmem:[#allocation3_spill] sm:$0xff] }
 0x3af   : > { %v3429_v59 = vpop.permute.xlu0 %1043  ;;  %v3439_v26 = vpop.permute.xlu1 %945 }
 0x3b2   : > { %1221 = vrot.lane.b32.xlu0 %v2960_v51, %s2560_s22  ;;  %1174 = vrot.lane.b32.xlu1 %v2944_v29, %s2549_s30 }
 0x3b3   : > { %v3441_v51 = vpop.permute.xlu0 %1041 }
 0x3b6   : > { %1319 = vrot.lane.b32.xlu0 %v3146_v37, %s2561_s28  ;;  %1270 = vrot.lane.b32.xlu1 %v3043_v0, %s2562_s7 }
 0x3b7   : > { %v3447_v29 = vpop.permute.xlu1 %943 }
 0x3ba   : > { %1219 = vrot.lane.b32.xlu0 %v2958_v49, %s2560_s22  ;;  %1172 = vrot.lane.b32.xlu1 %v2950_v45, %s2549_s30 }
 0x3bb   : > { %v3449_v1 = vpop.permute.xlu0 %1140  ;;  %v3455_v45 = vpop.permute.xlu1 %1039 }
 0x3be   : > { %1317 = vrot.lane.b32.xlu0 %v3144_v34, %s2561_s28  ;;  %1268 = vrot.lane.b32.xlu1 %v3041_v58, %s2562_s7  ;;  %v4301_v34 = vld [vmem:[#allocation14_spill] sm:$0xff] }
 0x3c0   : > { %v3457_v49 = vpop.permute.xlu0 %941 }
 0x3c2   : > { %1217 = vrot.lane.b32.xlu0 %v2956_v48, %s2560_s22  ;;  %1170 = vrot.lane.b32.xlu1 %v2952_v46, %s2549_s30 }
 0x3c3   : > { %v3463_v58 = vpop.permute.xlu1 %1138 }
 0x3c6   : > { %1315 = vrot.lane.b32.xlu0 %v3142_v33, %s2561_s28  ;;  %1266 = vrot.lane.b32.xlu1 %v3039_v55, %s2562_s7  ;;  %v509_v55 = vsel %vm404_vm0, %v2850_v40, %v2854_v43  ;;  %v4299_v33 = vld [vmem:[#allocation33_spill] sm:$0xff] }
 0x3c7   : > { %v3465_v0 = vpop.permute.xlu0 %1037 }
 0x3ca   : > { %1215 = vrot.lane.b32.xlu0 %v2954_v47, %s2560_s22  ;;  %1168 = vrot.lane.b32.xlu1 %v2946_v42, %s2549_s30 }
 0x3cb   : > { %v3471_v46 = vpop.permute.xlu1 %939 }
 0x3ce   : > { %1313 = vrot.lane.b32.xlu0 %v3140_v30, %s2561_s28  ;;  %1264 = vrot.lane.b32.xlu1 %v3037_v12, %s2562_s7  ;;  %v606_v30 = vsel %vm404_vm0, %v2966_v54, %v2968_v56  ;;  %v703_v12 = vsel %vm404_vm0, %v3069_v35, %v3071_v60  ;;  %v508_v54 = vsel %vm404_vm0, %v2846_v38, %v2852_v41 }
 0x3cf   : > { %v3477_v48 = vpop.permute.xlu0 %1136  ;;  %v605_v60 = vsel %vm404_vm0, %v2962_v52, %v2964_v53  ;;  %v411_v41 = vsel %vm404_vm0, %v2822_v19, %v2820_v18  ;;  %v507_v52 = vsel %vm404_vm0, %v2830_v31, %v2848_v39  ;;  %v604_v53 = vsel %vm404_vm0, %v2856_v50, %v2936_v25  ;;  %v4300_v39 = vld [vmem:[#allocation13_spill] sm:$0xff] }
 0x3d0   : > { %v701_v18 = vsel %vm404_vm0, %v4299_v33, %v3063_v2  ;;  %v410_v37 = vsel %vm404_vm0, %v4301_v34, %v4300_v39  ;;  %v506_v50 = vsel %vm404_vm0, %v4303_v22, %v4302_v62  ;;  %v4317_v39 = vld [vmem:[#allocation7_spill] sm:$0xff]  ;;  %v4319_v62 = vld [vmem:[#allocation16_spill] sm:$0xff] }
 0x3d2   : > { %1213 = vrot.lane.b32.xlu0 %v509_v55, %s2560_s22  ;;  %1166 = vrot.lane.b32.xlu1 %v2948_v44, %s2549_s30  ;;  %v412_v44 = vsel %vm404_vm0, %v2826_v21, %v2824_v20  ;;  %v702_v20 = vsel %vm404_vm0, %v3065_v4, %v3067_v32  ;;  %v505_v55 = vsel %vm404_vm0, %v4311_v9, %v4310_v5  ;;  %v4324_v5 = vld [vmem:[#allocation10_spill] sm:$0xff]  ;;  %v4325_v9 = vld [vmem:[#allocation5_spill] sm:$0xff] }
 0x3d3   : > { %v3485_v42 = vpop.permute.xlu1 %1035 }
 0x3d4   : > { %v3487_v47 = vpop.permute.xlu0 %937 }
 0x3d6   : > { %1311 = vrot.lane.b32.xlu0 %v703_v12, %s2561_s28  ;;  %1262 = vrot.lane.b32.xlu1 %v606_v30, %s2562_s7 }
 0x3d8   : > { %v3497_v40 = vpop.permute.xlu1 %1134  ;;  %v3499_v43 = vpop.permute.xlu0 %885 }
 0x3da   : > { %1211 = vrot.lane.b32.xlu0 %v508_v54, %s2560_s22  ;;  %1164 = vrot.lane.b32.xlu1 %v412_v44, %s2549_s30  ;;  %v4312_v44 = vld [vmem:[#allocation30_spill] sm:$0xff]  ;;  %v4313_v54 = vld [vmem:[#allocation29_spill] sm:$0xff] }
 0x3dc   : > { %v3509_v35 = vpop.permute.xlu1 %888  ;;  %v3511_v56 = vpop.permute.xlu0 %1033 }
 0x3de   : > { %1309 = vrot.lane.b32.xlu0 %v702_v20, %s2561_s28  ;;  %1260 = vrot.lane.b32.xlu1 %v605_v60, %s2562_s7  ;;  %v602_v60 = vsel %vm404_vm0, %v4313_v54, %v4312_v44  ;;  %v4314_v20 = vld [vmem:[#allocation40_spill] sm:$0xff]  ;;  %v4326_v44 = vld [vmem:[#allocation17_spill] sm:$0xff]  ;;  %v4327_v54 = vld [vmem:[#allocation15_spill] sm:$0xff] }
 0x3e0   : > { %v3521_v21 = vpop.permute.xlu1 %981  ;;  %v3523_v38 = vpop.permute.xlu0 %984 }
 0x3e2   : > { %1209 = vrot.lane.b32.xlu0 %v507_v52, %s2560_s22  ;;  %1162 = vrot.lane.b32.xlu1 %v411_v41, %s2549_s30  ;;  %v4315_v41 = vld [vmem:[#allocation39_spill] sm:$0xff] }
 0x3e3   : > { %v699_v52 = vsel %vm404_vm0, %v4315_v41, %v4314_v20 }
 0x3e4   : > { %v3533_v32 = vpop.permute.xlu1 %1132  ;;  %v3535_v4 = vpop.permute.xlu0 %882 }
 0x3e6   : > { %1307 = vrot.lane.b32.xlu0 %v701_v18, %s2561_s28  ;;  %1258 = vrot.lane.b32.xlu1 %v604_v53, %s2562_s7  ;;  %v4316_v18 = vld [vmem:[#allocation12_spill] sm:$0xff] }
 0x3e7   : > { %v408_v34 = vsel %vm404_vm0, %v4317_v39, %v4316_v18  ;;  %v4329_v18 = vld [vmem:[#allocation25_spill] sm:$0xff] }
 0x3e8   : > { %v3545_v19 = vpop.permute.xlu1 %975  ;;  %v3547_v31 = vpop.permute.xlu0 %978 }
 0x3ea   : > { %1207 = vrot.lane.b32.xlu0 %v506_v50, %s2560_s22  ;;  %1160 = vrot.lane.b32.xlu1 %v410_v37, %s2549_s30  ;;  %v4318_v37 = vld [vmem:[#allocation19_spill] sm:$0xff] }
 0x3eb   : > { %v504_v22 = vsel %vm404_vm0, %v4319_v62, %v4318_v37  ;;  %v4331_v37 = vld [vmem:[#allocation35_spill] sm:$0xff] }
 0x3ec   : > { %v3557_v2 = vpop.permute.xlu1 %1130  ;;  %v3559_v25 = vpop.permute.xlu0 %1078 }
 0x3ee   : > { %1305 = vrot.lane.b32.xlu0 %v700_v57, %s2561_s28  ;;  %1256 = vrot.lane.b32.xlu1 %v603_v17, %s2562_s7  ;;  %v4321_v17 = vld [vmem:[#allocation27_spill] sm:$0xff]  ;;  %v4323_v57 = vld [vmem:[#allocation37_spill] sm:$0xff] }
 0x3ef   : > { %v601_v16 = vsel %vm404_vm0, %v4321_v17, %v4320_v13  ;;  %v698_v6 = vsel %vm404_vm0, %v4323_v57, %v4322_v61  ;;  %v4332_v17 = vld [vmem:[#allocation9_spill] sm:$0xff]  ;;  %v4334_v57 = vld [vmem:[#allocation22_spill] sm:$0xff] }
 0x3f0   : > { %v3569_v11 = vpop.permute.xlu1 %1081  ;;  %v3571_v14 = vpop.permute.xlu0 %972 }
 0x3f2   : > { %1205 = vrot.lane.b32.xlu0 %v505_v55, %s2560_s22  ;;  %1158 = vrot.lane.b32.xlu1 %v409_v3, %s2549_s30  ;;  %v407_v55 = vsel %vm404_vm0, %v4325_v9, %v4324_v5  ;;  %v4335_v9 = vld [vmem:[#allocation23_spill] sm:$0xff] }
 0x3f4   : > { %v3581_v30 = vpop.permute.xlu1 %1072  ;;  %v3583_v12 = vpop.permute.xlu0 %1075 }
 0x3f6   : > { %1303 = vrot.lane.b32.xlu0 %v699_v52, %s2561_s28  ;;  %1254 = vrot.lane.b32.xlu1 %v602_v60, %s2562_s7  ;;  %v503_v60 = vsel %vm404_vm0, %v4327_v54, %v4326_v44  ;;  %v4328_v52 = vld [vmem:[#allocation26_spill] sm:$0xff] }
 0x3f7   : > { %v600_v39 = vsel %vm404_vm0, %v4329_v18, %v4328_v52 }
 0x3f8   : > { %v3593_v53 = vpop.permute.xlu1 %968  ;;  %v3595_v33 = vpop.permute.xlu0 %1069 }
 0x3fa   : > { %1203 = vrot.lane.b32.xlu0 %v504_v22, %s2560_s22  ;;  %1156 = vrot.lane.b32.xlu1 %v408_v34, %s2549_s30  ;;  %v4330_v34 = vld [vmem:[#allocation36_spill] sm:$0xff] }
 0x3fb   : > { %v697_v62 = vsel %vm404_vm0, %v4331_v37, %v4330_v34  ;;  %v4338_v34 = vld [vmem:[#allocation8_spill] sm:$0xff] }
 0x3fc   : > { %v3605_v50 = vpop.permute.xlu1 %962  ;;  %v3607_v7 = vpop.permute.xlu0 %965 }
 0x3fe   : > { %1301 = vrot.lane.b32.xlu0 %v698_v6, %s2561_s28  ;;  %1252 = vrot.lane.b32.xlu1 %v601_v16, %s2562_s7  ;;  %v4333_v16 = vld [vmem:[#allocation6_spill] sm:$0xff] }
 0x3ff   : > { %v406_v61 = vsel %vm404_vm0, %v4333_v16, %v4332_v17 }
 0x400   : > { %v3617_v23 = vpop.permute.xlu1 %1065  ;;  %v3619_v3 = vpop.permute.xlu0 %956 }
 0x402   : > { %1201 = vrot.lane.b32.xlu0 %v503_v60, %s2560_s22  ;;  %1154 = vrot.lane.b32.xlu1 %v407_v55, %s2549_s30  ;;  %v4336_v55 = vld [vmem:[#allocation63_spill] sm:$0xff]  ;;  %v4337_v60 = vld [vmem:[#allocation32_spill] sm:$0xff] }
 0x404   : > { %v3629_v20 = vpop.permute.xlu1 %959  ;;  %v3631_v41 = vpop.permute.xlu0 %1059 }
 0x406   : > { %1250 = vrot.lane.b32.xlu1 %v600_v39, %s2562_s7  ;;  %1299 = vrot.lane.b32.xlu0 %v697_v62, %s2561_s28  ;;  %v2520_v39 = vld [vmem:[%s2683_s25] sm:$0xf]  ;;  %v2566_v62 = vmov 0.0   ;;  %s2567_s25 = smov 38  }
 0x407   : > { %v405_v37 = vsel %vm404_vm0, %v2520_v39, %v4338_v34  ;;  %1728 = vmatprep.mubr.f32.mxu0 %v2566_v62  ;;  %1799 = vmatprep.mubr.f32.mxu1 %v2566_v62 }
 0x408   : > { %v3641_v22 = vpop.permute.xlu1 %1062  ;;  %v3643_v13 = vpop.permute.xlu0 %950 }
 0x40a   : > { %1152 = vrot.lane.b32.xlu1 %v406_v61, %s2549_s30  ;;  %1199 = vrot.lane.b32.xlu0 %v4334_v57, %s2560_s22  ;;  %v4339_v61 = vld [vmem:[#allocation62_spill] sm:$0xff]  ;;  %s2572_s22 = smov 125  }
 0x40c   : > { %v3651_v6 = vpop.permute.xlu1 %953  ;;  %v3653_v5 = vpop.permute.xlu0 %1053 }
 0x40e   : > { %1248 = vrot.lane.b32.xlu1 %v4335_v9, %s2562_s7  ;;  %1372 = vrot.lane.b32.xlu0 %v4336_v55, %s2563_s27  ;;  %s2574_s7 = smov 121  }
 0x410   : > { %v3659_v44 = vpop.permute.xlu1 %1056  ;;  %v3661_v54 = vpop.permute.xlu0 %1047 }
 0x412   : > { %1421 = vrot.lane.b32.xlu1 %v3427_v28, %s2564_s6  ;;  %1297 = vrot.lane.b32.xlu0 %v4337_v60, %s2561_s28  ;;  %v4340_v60 = vld [vmem:[#allocation61_spill] sm:$0xff]  ;;  %s2573_s28 = smov 115  }
 0x414   : > { %v3667_v52 = vpop.permute.xlu1 %1050  ;;  %v1226_v18 = vpop.permute.xlu0 %1225 }
 0x416   : > { %1470 = vrot.lane.b32.xlu1 %v3429_v59, %s2565_s11  ;;  %1150 = vrot.lane.b32.xlu0 %v405_v37, %s2549_s30  ;;  %s2580_s30 = smov 15  }
 0x418   : > { %v1275_v28 = vpop.permute.xlu1 %1274  ;;  %v3677_v17 = vpop.permute.xlu0 %1323 }
 0x419   : > { %v1564_v16 = vsel %vm1550_vm1, %v1226_v18, %v1275_v28 }
 0x41a   : > { %1370 = vrot.lane.b32.xlu1 %v4339_v61, %s2563_s27  ;;  %1419 = vrot.lane.b32.xlu0 %v3439_v26, %s2564_s6  ;;  %v1579_v59 = vsel %vm1565_vm2, %v1564_v16, %v3677_v17  ;;  %v4341_v16 = vld [vmem:[#allocation60_spill] sm:$0xff] }
 0x41b   : > { %2351 = vmatprep.subr.msk.mxu0 %vm404_vm0, %v1579_v59 }
 0x41c   : > { %v1177_v57 = vpop.permute.xlu1 %1176  ;;  %v1224_v9 = vpop.permute.xlu0 %1223 }
 0x41d   : > { %v1549_v55 = vsel %vm1535_vm3, %v1177_v57, %v1226_v18 }
 0x41e   : > { %1468 = vrot.lane.b32.xlu1 %v3441_v51, %s2565_s11  ;;  %1368 = vrot.lane.b32.xlu0 %v4340_v60, %s2563_s27 }
 0x41f   : > { %2352 = vmatpush1.msk.msra.mxu0 %vm404_vm0, %v1549_v55  ;;  %v4342_v55 = vld [vmem:[#allocation59_spill] sm:$0xff] }
 0x420   : > { %v1273_v39 = vpop.permute.xlu1 %1272  ;;  %v3693_v26 = vpop.permute.xlu0 %1321 }
 0x421   : > { %v1563_v34 = vsel %vm1550_vm1, %v1224_v9, %v1273_v39 }
 0x422   : > { %1417 = vrot.lane.b32.xlu1 %v3447_v29, %s2564_s6  ;;  %1519 = vrot.lane.b32.xlu0 %v3449_v1, %s2567_s25  ;;  %v1578_v51 = vsel %vm1565_vm2, %v1563_v34, %v3693_v26 }
 0x423   : > { %1670 = vmatprep.subr.mxu0 %v1578_v51 }
 0x424   : > { %v1175_v18 = vpop.permute.xlu1 %1174  ;;  %v1222_v37 = vpop.permute.xlu0 %1221 }
 0x425   : > { %v1548_v28 = vsel %vm1535_vm3, %v1175_v18, %v1224_v9  ;;  %v4343_v18 = vld [vmem:[#allocation58_spill] sm:$0xff] }
 0x426   : > { %1466 = vrot.lane.b32.xlu1 %v3455_v45, %s2565_s11  ;;  %1366 = vrot.lane.b32.xlu0 %v4341_v16, %s2563_s27 }
 0x427   : > { %1671 = vmatpush1.msra.mxu0 %v1548_v28 }
 0x428   : > { %v1271_v29 = vpop.permute.xlu1 %1270  ;;  %v3707_v61 = vpop.permute.xlu0 %1319 }
 0x429   : > { %v1562_v1 = vsel %vm1550_vm1, %v1222_v37, %v1271_v29  ;;  %v4344_v29 = vld [vmem:[#allocation55_spill] sm:$0xff] }
 0x42a   : > { %1415 = vrot.lane.b32.xlu1 %v3457_v49, %s2564_s6  ;;  %1517 = vrot.lane.b32.xlu0 %v3463_v58, %s2567_s25  ;;  %v1577_v59 = vsel %vm1565_vm2, %v1562_v1, %v3707_v61  ;;  %v4345_v1 = vld [vmem:[#allocation54_spill] sm:$0xff] }
 0x42b   : > { %1672 = vmatprep.subr.mxu0 %v1577_v59  ;;  %v800_v59 = vsel %vm404_vm0, %v4345_v1, %v4344_v29  ;;  %v4350_v29 = vld [vmem:[#allocation57_spill] sm:$0xff] }
 0x42c   : > { %v1173_v45 = vpop.permute.xlu1 %1172  ;;  %v1220_v57 = vpop.permute.xlu0 %1219  ;;  %v895_v1 = vsel %vm404_vm0, %v4350_v29, %v3421_v8  ;;  %v4360_v29 = vld [vmem:[#allocation47_spill] sm:$0xff] }
 0x42d   : > { %v1547_v9 = vsel %vm1535_vm3, %v1173_v45, %v1222_v37 }
 0x42e   : > { %1464 = vrot.lane.b32.xlu1 %v3465_v0, %s2565_s11  ;;  %1364 = vrot.lane.b32.xlu0 %v4342_v55, %s2563_s27 }
 0x42f   : > { %1673 = vmatpush1.msra.mxu0 %v1547_v9 }
 0x430   : > { %v1269_v60 = vpop.permute.xlu1 %1268  ;;  %v3721_v49 = vpop.permute.xlu0 %1317 }
 0x431   : > { %v1561_v58 = vsel %vm1550_vm1, %v1220_v57, %v1269_v60 }
 0x432   : > { %1413 = vrot.lane.b32.xlu1 %v3471_v46, %s2564_s6  ;;  %1515 = vrot.lane.b32.xlu0 %v3477_v48, %s2567_s25  ;;  %v1576_v39 = vsel %vm1565_vm2, %v1561_v58, %v3721_v49  ;;  %v4346_v58 = vld [vmem:[#allocation53_spill] sm:$0xff] }
 0x433   : > { %1674 = vmatprep.subr.mxu0 %v1576_v39  ;;  %v4347_v39 = vld [vmem:[#allocation52_spill] sm:$0xff] }
 0x434   : > { %v1171_v0 = vpop.permute.xlu1 %1170  ;;  %v1218_v34 = vpop.permute.xlu0 %1217 }
 0x435   : > { %v1546_v51 = vsel %vm1535_vm3, %v1171_v0, %v1220_v57  ;;  %v897_v57 = vsel %vm404_vm0, %v3499_v43, %v3509_v35  ;;  %v799_v0 = vsel %vm404_vm0, %v4347_v39, %v4346_v58  ;;  %v993_v43 = vsel %vm404_vm0, %v3521_v21, %v3523_v38  ;;  %v4354_v58 = vld [vmem:[#allocation70_spill] sm:$0xff] }
 0x436   : > { %1462 = vrot.lane.b32.xlu1 %v3485_v42, %s2565_s11  ;;  %1362 = vrot.lane.b32.xlu0 %v4343_v18, %s2563_s27  ;;  %v894_v39 = vsel %vm404_vm0, %v4354_v58, %v3122_v15 }
 0x437   : > { %1675 = vmatpush1.msra.mxu0 %v1546_v51  ;;  %v896_v51 = vsel %vm404_vm0, %v3419_v27, %v3535_v4  ;;  %v992_v27 = vsel %vm404_vm0, %v3545_v19, %v3547_v31 }
 0x438   : > { %v1267_v37 = vpop.permute.xlu1 %1266  ;;  %v3735_v46 = vpop.permute.xlu0 %1315 }
 0x439   : > { %v1560_v48 = vsel %vm1550_vm1, %v1218_v34, %v1267_v37 }
 0x43a   : > { %1411 = vrot.lane.b32.xlu1 %v3487_v47, %s2564_s6  ;;  %1513 = vrot.lane.b32.xlu0 %v3497_v40, %s2567_s25  ;;  %v1575_v28 = vsel %vm1565_vm2, %v1560_v48, %v3735_v46  ;;  %v4348_v48 = vld [vmem:[#allocation51_spill] sm:$0xff] }
 0x43b   : > { %1676 = vmatprep.subr.mxu0 %v1575_v28  ;;  %v4349_v28 = vld [vmem:[#allocation43_spill] sm:$0xff] }
 0x43c   : > { %v1169_v42 = vpop.permute.xlu1 %1168  ;;  %v1216_v16 = vpop.permute.xlu0 %1215 }
 0x43d   : > { %v1545_v45 = vsel %vm1535_vm3, %v1169_v42, %v1218_v34  ;;  %v798_v42 = vsel %vm404_vm0, %v4349_v28, %v4348_v48  ;;  %v4358_v48 = vld [vmem:[#allocation68_spill] sm:$0xff] }
 0x43e   : > { %1460 = vrot.lane.b32.xlu1 %v3511_v56, %s2565_s11  ;;  %1360 = vrot.lane.b32.xlu0 %v800_v59, %s2563_s27  ;;  %v1090_v59 = vsel %vm404_vm0, %v3559_v25, %v3569_v11 }
 0x43f   : > { %1677 = vmatpush1.msra.mxu0 %v1545_v45 }
 0x440   : > { %v1265_v47 = vpop.permute.xlu1 %1264  ;;  %v3751_v40 = vpop.permute.xlu0 %1313 }
 0x441   : > { %v1559_v9 = vsel %vm1550_vm1, %v1216_v16, %v1265_v47 }
 0x442   : > { %1409 = vrot.lane.b32.xlu1 %v897_v57, %s2564_s6  ;;  %1511 = vrot.lane.b32.xlu0 %v3533_v32, %s2567_s25  ;;  %v1574_v56 = vsel %vm1565_vm2, %v1559_v9, %v3751_v40  ;;  %v4351_v57 = vld [vmem:[#allocation34_spill] sm:$0xff] }
 0x443   : > { %1678 = vmatprep.subr.mxu0 %v1574_v56  ;;  %v4352_v9 = vld [vmem:[#allocation50_spill] sm:$0xff]  ;;  %v4353_v56 = vld [vmem:[#allocation71_spill] sm:$0xff] }
 0x444   : > { %v1167_v55 = vpop.permute.xlu1 %1166  ;;  %v1214_v60 = vpop.permute.xlu0 %1213  ;;  %v797_v8 = vsel %vm404_vm0, %v4352_v9, %v4351_v57  ;;  %v991_v25 = vsel %vm404_vm0, %v4353_v56, %v3571_v14  ;;  %v4363_v57 = vld [vmem:[#allocation66_spill] sm:$0xff] }
 0x445   : > { %v1544_v35 = vsel %vm1535_vm3, %v1167_v55, %v1216_v16 }
 0x446   : > { %1458 = vrot.lane.b32.xlu1 %v993_v43, %s2565_s11  ;;  %1358 = vrot.lane.b32.xlu0 %v799_v0, %s2563_s27  ;;  %v1089_v0 = vsel %vm404_vm0, %v3581_v30, %v3583_v12  ;;  %v990_v30 = vsel %vm404_vm0, %v3593_v53, %v3228_v36 }
 0x447   : > { %1679 = vmatpush1.msra.mxu0 %v1544_v35 }
 0x448   : > { %v1263_v32 = vpop.permute.xlu1 %1262  ;;  %v3771_v34 = vpop.permute.xlu0 %1311 }
 0x449   : > { %v1558_v18 = vsel %vm1550_vm1, %v1214_v60, %v1263_v32 }
 0x44a   : > { %1407 = vrot.lane.b32.xlu1 %v896_v51, %s2564_s6  ;;  %1509 = vrot.lane.b32.xlu0 %v3557_v2, %s2567_s25  ;;  %v1573_v21 = vsel %vm1565_vm2, %v1558_v18, %v3771_v34  ;;  %v4355_v51 = vld [vmem:[#allocation49_spill] sm:$0xff]  ;;  %v4356_v18 = vld [vmem:[#allocation48_spill] sm:$0xff] }
 0x44b   : > { %1680 = vmatprep.subr.mxu0 %v1573_v21  ;;  %v796_v15 = vsel %vm404_vm0, %v4356_v18, %v4355_v51 }
 0x44c   : > { %v1165_v38 = vpop.permute.xlu1 %1164  ;;  %v1212_v37 = vpop.permute.xlu0 %1211 }
 0x44d   : > { %v1543_v4 = vsel %vm1535_vm3, %v1165_v38, %v1214_v60 }
 0x44e   : > { %1456 = vrot.lane.b32.xlu1 %v992_v27, %s2565_s11  ;;  %1356 = vrot.lane.b32.xlu0 %v798_v42, %s2563_s27  ;;  %v4359_v42 = vld [vmem:[#allocation72_spill] sm:$0xff] }
 0x44f   : > { %1681 = vmatpush1.msra.mxu0 %v1543_v4  ;;  %v1088_v27 = vsel %vm404_vm0, %v4359_v42, %v3595_v33  ;;  %v989_v33 = vsel %vm404_vm0, %v3605_v50, %v3607_v7 }
 0x450   : > { %v1261_v2 = vpop.permute.xlu1 %1260  ;;  %v3791_v16 = vpop.permute.xlu0 %1309 }
 0x451   : > { %v1557_v19 = vsel %vm1550_vm1, %v1212_v37, %v1261_v2 }
 0x452   : > { %1405 = vrot.lane.b32.xlu1 %v895_v1, %s2564_s6  ;;  %1507 = vrot.lane.b32.xlu0 %v1090_v59, %s2567_s25  ;;  %v1572_v31 = vsel %vm1565_vm2, %v1557_v19, %v3791_v16  ;;  %v4361_v1 = vld [vmem:[#allocation46_spill] sm:$0xff] }
 0x453   : > { %1682 = vmatprep.subr.mxu0 %v1572_v31  ;;  %v795_v59 = vsel %vm404_vm0, %v4361_v1, %v4360_v29 }
 0x454   : > { %v1163_v45 = vpop.permute.xlu1 %1162  ;;  %v1210_v47 = vpop.permute.xlu0 %1209 }
 0x455   : > { %v1542_v11 = vsel %vm1535_vm3, %v1163_v45, %v1212_v37  ;;  %v4357_v37 = vld [vmem:[#allocation69_spill] sm:$0xff] }
 0x456   : > { %1454 = vrot.lane.b32.xlu1 %v991_v25, %s2565_s11  ;;  %1354 = vrot.lane.b32.xlu0 %v797_v8, %s2563_s27  ;;  %v893_v28 = vsel %vm404_vm0, %v4358_v48, %v4357_v37  ;;  %v1087_v8 = vsel %vm404_vm0, %v3617_v23, %v3235_v63  ;;  %v988_v63 = vsel %vm404_vm0, %v3619_v3, %v3629_v20 }
 0x457   : > { %1683 = vmatpush1.msra.mxu0 %v1542_v11  ;;  %v4364_v11 = vld [vmem:[#allocation45_spill] sm:$0xff]  ;;  %v1085_v37 = vsel %vm404_vm0, %v3653_v5, %v3659_v44  ;;  %v351_v5 = vld [vmem:[%s4211_s4] sm:$0xf] }
 0x458   : > { %v1259_v55 = vpop.permute.xlu1 %1258  ;;  %v3813_v60 = vpop.permute.xlu0 %1307 }
 0x459   : > { %v1556_v14 = vsel %vm1550_vm1, %v1210_v47, %v1259_v55  ;;  %v4365_v55 = vld [vmem:[#allocation44_spill] sm:$0xff] }
 0x45a   : > { %1403 = vrot.lane.b32.xlu1 %v894_v39, %s2564_s6  ;;  %1505 = vrot.lane.b32.xlu0 %v1089_v0, %s2567_s25  ;;  %v1571_v43 = vsel %vm1565_vm2, %v1556_v14, %v3813_v60  ;;  %v794_v58 = vsel %vm404_vm0, %v4365_v55, %v4364_v11  ;;  %v4366_v14 = vld [vmem:[#allocation65_spill] sm:$0xff] }
 0x45b   : > { %1684 = vmatprep.subr.mxu0 %v1571_v43  ;;  %v4367_v43 = vld [vmem:[#allocation64_spill] sm:$0xff] }
 0x45c   : > { %v1161_v35 = vpop.permute.xlu1 %1160  ;;  %v1208_v32 = vpop.permute.xlu0 %1207 }
 0x45d   : > { %v1541_v12 = vsel %vm1535_vm3, %v1161_v35, %v1210_v47  ;;  %v4362_v47 = vld [vmem:[#allocation67_spill] sm:$0xff]  ;;  %v891_v35 = vsel %vm404_vm0, %v4367_v43, %v4366_v14 }
 0x45e   : > { %1452 = vrot.lane.b32.xlu1 %v990_v30, %s2565_s11  ;;  %1352 = vrot.lane.b32.xlu0 %v796_v15, %s2563_s27  ;;  %v892_v9 = vsel %vm404_vm0, %v4363_v57, %v4362_v47  ;;  %v987_v15 = vsel %vm404_vm0, %v3643_v13, %v3651_v6  ;;  %v4369_v13 = vld [vmem:[#allocation56_spill] sm:$0xff] }
 0x45f   : > { %1685 = vmatpush1.msra.mxu0 %v1541_v12 }
 0x460   : > { %v1257_v21 = vpop.permute.xlu1 %1256  ;;  %v3835_v38 = vpop.permute.xlu0 %1305 }
 0x461   : > { %v1555_v36 = vsel %vm1550_vm1, %v1208_v32, %v1257_v21  ;;  %v2568_v21 = vmov 0  }
 0x462   : > { %1401 = vrot.lane.b32.xlu1 %v893_v28, %s2564_s6  ;;  %1503 = vrot.lane.b32.xlu0 %v1088_v27, %s2567_s25  ;;  %v1570_v53 = vsel %vm1565_vm2, %v1555_v36, %v3835_v38  ;;  %v1084_v27 = vsel %vm404_vm0, %v3661_v54, %v3667_v52 }
 0x463   : > { %1686 = vmatprep.subr.mxu0 %v1570_v53  ;;  %2519 = vset.pattern.permute.xlu0 %v2568_v21 }
 0x464   : > { %v1159_v4 = vpop.permute.xlu1 %1158  ;;  %v1206_v2 = vpop.permute.xlu0 %1205 }
 0x465   : > { %v1540_v19 = vsel %vm1535_vm3, %v1159_v4, %v1208_v32  ;;  %v1086_v32 = vsel %vm404_vm0, %v3631_v41, %v3641_v22  ;;  %v4368_v41 = vld [vmem:[#allocation42_spill] sm:$0xff] }
 0x466   : > { %1450 = vrot.lane.b32.xlu1 %v989_v33, %s2565_s11  ;;  %1350 = vrot.lane.b32.xlu0 %v795_v59, %s2563_s27  ;;  %v3933_v33 = vld [vmem:[%s4210_s3] sm:$0xf] }
 0x467   : > { %1687 = vmatpush1.msra.mxu0 %v1540_v19 }
 0x468   : > { %v1255_v31 = vpop.permute.xlu1 %1254  ;;  %v3857_v45 = vpop.permute.xlu0 %1303 }
 0x469   : > { %v1554_v50 = vsel %vm1550_vm1, %v1206_v2, %v1255_v31 }
 0x46a   : > { %1399 = vrot.lane.b32.xlu1 %v892_v9, %s2564_s6  ;;  %1501 = vrot.lane.b32.xlu0 %v1087_v8, %s2567_s25  ;;  %v1569_v7 = vsel %vm1565_vm2, %v1554_v50, %v3857_v45 }
 0x46b   : > { %1688 = vmatprep.subr.mxu0 %v1569_v7 }
 0x46c   : > { %v1157_v56 = vpop.permute.xlu1 %1156  ;;  %v1204_v25 = vpop.permute.xlu0 %1203 }
 0x46d   : > { %v1539_v23 = vsel %vm1535_vm3, %v1157_v56, %v1206_v2 }
 0x46e   : > { %1448 = vrot.lane.b32.xlu1 %v988_v63, %s2565_s11  ;;  %1348 = vrot.lane.b32.xlu0 %v794_v58, %s2563_s27 }
 0x46f   : > { %1689 = vmatpush1.msra.mxu0 %v1539_v23 }
 0x470   : > { %v1253_v39 = vpop.permute.xlu1 %1252  ;;  %v3879_v0 = vpop.permute.xlu0 %1301 }
 0x471   : > { %v1553_v3 = vsel %vm1550_vm1, %v1204_v25, %v1253_v39 }
 0x472   : > { %1397 = vrot.lane.b32.xlu1 %v891_v35, %s2564_s6  ;;  %1499 = vrot.lane.b32.xlu0 %v1086_v32, %s2567_s25  ;;  %v1568_v20 = vsel %vm1565_vm2, %v1553_v3, %v3879_v0 }
 0x473   : > { %1690 = vmatprep.subr.mxu0 %v1568_v20 }
 0x474   : > { %v1155_v51 = vpop.permute.xlu1 %1154  ;;  %v1202_v18 = vpop.permute.xlu0 %1201 }
 0x475   : > { %v1538_v30 = vsel %vm1535_vm3, %v1155_v51, %v1204_v25 }
 0x476   : > { %1446 = vrot.lane.b32.xlu1 %v987_v15, %s2565_s11  ;;  %1346 = vrot.lane.b32.xlu0 %v4368_v41, %s2563_s27  ;;  %s2575_s27 = smov 47  }
 0x477   : > { %1691 = vmatpush1.msra.mxu0 %v1538_v30 }
 0x478   : > { %v1251_v22 = vpop.permute.xlu1 %1250  ;;  %v3899_v12 = vpop.permute.xlu0 %1299 }
 0x479   : > { %v1552_v48 = vsel %vm1550_vm1, %v1202_v18, %v1251_v22 }
 0x47a   : > { %1395 = vrot.lane.b32.xlu1 %v4369_v13, %s2564_s6  ;;  %1497 = vrot.lane.b32.xlu0 %v1085_v37, %s2567_s25  ;;  %v1567_v6 = vsel %vm1565_vm2, %v1552_v48, %v3899_v12  ;;  %s2576_s6 = smov 43  }
 0x47b   : > { %1692 = vmatprep.subr.mxu0 %v1567_v6 }
 0x47c   : > { %v1153_v28 = vpop.permute.xlu1 %1152  ;;  %v1200_v42 = vpop.permute.xlu0 %1199 }
 0x47d   : > { %v1537_v36 = vsel %vm1535_vm3, %v1153_v28, %v1202_v18 }
 0x47e   : > { %1444 = vrot.lane.b32.xlu1 %v3334_v10, %s2565_s11  ;;  %1495 = vrot.lane.b32.xlu0 %v1084_v27, %s2567_s25  ;;  %s2577_s11 = smov 113  }
 0x47f   : > { %1693 = vmatpush1.msra.mxu0 %v1537_v36 }
 0x480   : > { %v1249_v44 = vpop.permute.xlu1 %1248  ;;  %v1373_v53 = vpop.permute.xlu0 %1372 }
 0x481   : > { %v1551_v54 = vsel %vm1550_vm1, %v1200_v42, %v1249_v44  ;;  %v1594_v19 = vsel %vm1580_vm6, %v3677_v17, %v1373_v53 }
 0x482   : > { %1493 = vrot.lane.b32.xlu1 %v3344_v24, %s2567_s25  ;;  %1642 = vperm.xlu0 %2519, %v351_v5   ;;  %s2579_s25 = smov 45  }
 0x484   : > { %v1422_v52 = vpop.permute.xlu1 %1421  ;;  %v3923_v4 = vpop.permute.xlu0 %1297 }
 0x485   : > { %v1566_v10 = vsel %vm1565_vm2, %v1551_v54, %v3923_v4  ;;  %v1609_v2 = vsel %vm1595_vm4, %v1373_v53, %v1422_v52  ;;  %vm2052_vm2 = vcmask 416768  }
 0x486   : > { %1694 = vmatprep.subr.mxu0 %v1566_v10 }
 0x488   : > { %v1471_v29 = vpop.permute.xlu1 %1470  ;;  %v1151_v1 = vpop.permute.xlu0 %1150 }
 0x489   : > { %v1536_v59 = vsel %vm1535_vm3, %v1151_v1, %v1200_v42  ;;  %v1624_v24 = vsel %vm1610_vm5, %v1609_v2, %v1471_v29 }
 0x48a   : > { %1695 = vmatpush1.msra.mxu0 %v1536_v59  ;;  %2354 = vmatprep.subr.msk.mxu1 %vm404_vm0, %v1624_v24 }
 0x48b   : > { %2355 = vmatpush1.msk.msra.mxu1 %vm404_vm0, %v1594_v19  ;;  %2382 = vmatprep.subr.mxu0 %v2566_v62 }
 0x48c   : > { %v1371_v31 = vpop.permute.xlu1 %1370  ;;  %v1420_v47 = vpop.permute.xlu0 %1419  ;;  %2353 = vmatmul.mubr.msk.f32.vlgmr.msra.gmra.mxu0 %vm1645_vm7, %v3933_v33 }
 0x48d   : > { %2410 = vmatprep.mubr.msk.f32.mxu0 %vm2569_vm8, %v2566_v62  ;;  %v1608_v57 = vsel %vm1595_vm4, %v1371_v31, %v1420_v47  ;;  %v1593_v17 = vsel %vm1580_vm6, %v3693_v26, %v1371_v31 }
 0x490   : > { %v1469_v9 = vpop.permute.xlu1 %1468  ;;  %v1369_v8 = vpop.permute.xlu0 %1368 }
 0x491   : > { %v1623_v50 = vsel %vm1610_vm5, %v1608_v57, %v1469_v9  ;;  %v1592_v26 = vsel %vm1580_vm6, %v3707_v61, %v1369_v8 }
 0x492   : > { %1741 = vmatprep.subr.mxu1 %v1623_v50 }
 0x493   : > { %1742 = vmatpush1.msra.mxu1 %v1593_v17 }
 0x494   : > { %v1418_v7 = vpop.permute.xlu1 %1417  ;;  %v1520_v56 = vpop.permute.xlu0 %1519 }
 0x495   : > { %v1639_v25 = vsel %vm1625_vm9, %v1471_v29, %v1520_v56  ;;  %v1607_v11 = vsel %vm1595_vm4, %v1369_v8, %v1418_v7 }
 0x496   : > { %2383 = vmatpush3.msk.msra.mxu0 %vm404_vm0, %v1639_v25  ;;  %vm2117_vm0 = vcmask 203776  }
 0x497   : > { %2384 = vmatprep.subr.mxu0 %v2566_v62 }
 0x498   : > { %v1467_v55 = vpop.permute.xlu1 %1466  ;;  %v1367_v58 = vpop.permute.xlu0 %1366 }
 0x499   : > { %v1622_v63 = vsel %vm1610_vm5, %v1607_v11, %v1467_v55  ;;  %v1591_v20 = vsel %vm1580_vm6, %v3721_v49, %v1367_v58 }
 0x49a   : > { %1743 = vmatprep.subr.mxu1 %v1622_v63 }
 0x49b   : > { %1744 = vmatpush1.msra.mxu1 %v1592_v26 }
 0x49c   : > { %v1416_v23 = vpop.permute.xlu1 %1415  ;;  %v1518_v39 = vpop.permute.xlu0 %1517 }
 0x49d   : > { %v1638_v14 = vsel %vm1625_vm9, %v1469_v9, %v1518_v39  ;;  %v1606_v43 = vsel %vm1595_vm4, %v1367_v58, %v1416_v23 }
 0x49e   : > { %2385 = vmatpush3.msra.mxu0 %v1638_v14 }
 0x49f   : > { %2386 = vmatprep.subr.mxu0 %v2566_v62 }
 0x4a0   : > { %v1465_v35 = vpop.permute.xlu1 %1464  ;;  %v1365_v32 = vpop.permute.xlu0 %1364 }
 0x4a1   : > { %v1621_v3 = vsel %vm1610_vm5, %v1606_v43, %v1465_v35  ;;  %v1590_v21 = vsel %vm1580_vm6, %v3735_v46, %v1365_v32 }
 0x4a2   : > { %1745 = vmatprep.subr.mxu1 %v1621_v3 }
 0x4a3   : > { %1746 = vmatpush1.msra.mxu1 %v1591_v20 }
 0x4a4   : > { %v1414_v61 = vpop.permute.xlu1 %1413  ;;  %v1516_v51 = vpop.permute.xlu0 %1515 }
 0x4a5   : > { %v1637_v18 = vsel %vm1625_vm9, %v1467_v55, %v1516_v51  ;;  %v1605_v15 = vsel %vm1595_vm4, %v1365_v32, %v1414_v61 }
 0x4a6   : > { %2387 = vmatpush3.msra.mxu0 %v1637_v18 }
 0x4a7   : > { %2388 = vmatprep.subr.mxu0 %v2566_v62 }
 0x4a8   : > { %v1463_v30 = vpop.permute.xlu1 %1462  ;;  %v1363_v41 = vpop.permute.xlu0 %1362 }
 0x4a9   : > { %v1620_v22 = vsel %vm1610_vm5, %v1605_v15, %v1463_v30  ;;  %v1589_v27 = vsel %vm1580_vm6, %v3751_v40, %v1363_v41 }
 0x4aa   : > { %1747 = vmatprep.subr.mxu1 %v1620_v22 }
 0x4ab   : > { %1748 = vmatpush1.msra.mxu1 %v1590_v21 }
 0x4ac   : > { %v1412_v49 = vpop.permute.xlu1 %1411  ;;  %v1514_v37 = vpop.permute.xlu0 %1513 }
 0x4ad   : > { %v1636_v48 = vsel %vm1625_vm9, %v1465_v35, %v1514_v37  ;;  %v1604_v13 = vsel %vm1595_vm4, %v1363_v41, %v1412_v49 }
 0x4ae   : > { %2389 = vmatpush3.msra.mxu0 %v1636_v48 }
 0x4af   : > { %2390 = vmatprep.subr.mxu0 %v2566_v62 }
 0x4b0   : > { %v1461_v6 = vpop.permute.xlu1 %1460  ;;  %v1361_v28 = vpop.permute.xlu0 %1360 }
 0x4b1   : > { %v1619_v42 = vsel %vm1610_vm5, %v1604_v13, %v1461_v6  ;;  %v1588_v10 = vsel %vm1580_vm6, %v3771_v34, %v1361_v28 }
 0x4b2   : > { %1749 = vmatprep.subr.mxu1 %v1619_v42 }
 0x4b3   : > { %1750 = vmatpush1.msra.mxu1 %v1589_v27 }
 0x4b4   : > { %v1410_v46 = vpop.permute.xlu1 %1409  ;;  %v1512_v36 = vpop.permute.xlu0 %1511 }
 0x4b5   : > { %v1635_v5 = vsel %vm1625_vm9, %v1463_v30, %v1512_v36  ;;  %v1603_v44 = vsel %vm1595_vm4, %v1361_v28, %v1410_v46 }
 0x4b6   : > { %2391 = vmatpush3.msra.mxu0 %v1635_v5 }
 0x4b7   : > { %2392 = vmatprep.subr.mxu0 %v2566_v62 }
 0x4b8   : > { %v1459_v53 = vpop.permute.xlu1 %1458  ;;  %v1359_v54 = vpop.permute.xlu0 %1358 }
 0x4b9   : > { %v1618_v52 = vsel %vm1610_vm5, %v1603_v44, %v1459_v53  ;;  %v1587_v31 = vsel %vm1580_vm6, %v3791_v16, %v1359_v54 }
 0x4ba   : > { %1751 = vmatprep.subr.mxu1 %v1618_v52 }
 0x4bb   : > { %1752 = vmatpush1.msra.mxu1 %v1588_v10 }
 0x4bc   : > { %v1408_v40 = vpop.permute.xlu1 %1407  ;;  %v1510_v2 = vpop.permute.xlu0 %1509 }
 0x4bd   : > { %v1634_v29 = vsel %vm1625_vm9, %v1461_v6, %v1510_v2  ;;  %v1602_v1 = vsel %vm1595_vm4, %v1359_v54, %v1408_v40 }
 0x4be   : > { %2393 = vmatpush3.msra.mxu0 %v1634_v29 }
 0x4bf   : > { %2394 = vmatprep.subr.mxu0 %v2566_v62 }
 0x4c0   : > { %v1457_v59 = vpop.permute.xlu1 %1456  ;;  %v1357_v24 = vpop.permute.xlu0 %1356 }
 0x4c1   : > { %v1617_v19 = vsel %vm1610_vm5, %v1602_v1, %v1457_v59  ;;  %v1586_v7 = vsel %vm1580_vm6, %v3813_v60, %v1357_v24 }
 0x4c2   : > { %1753 = vmatprep.subr.mxu1 %v1617_v19 }
 0x4c3   : > { %1754 = vmatpush1.msra.mxu1 %v1587_v31 }
 0x4c4   : > { %v1406_v34 = vpop.permute.xlu1 %1405  ;;  %v1508_v47 = vpop.permute.xlu0 %1507 }
 0x4c5   : > { %v1633_v57 = vsel %vm1625_vm9, %v1459_v53, %v1508_v47  ;;  %v1601_v9 = vsel %vm1595_vm4, %v1357_v24, %v1406_v34 }
 0x4c6   : > { %2395 = vmatpush3.msra.mxu0 %v1633_v57 }
 0x4c7   : > { %2396 = vmatprep.subr.mxu0 %v2566_v62 }
 0x4c8   : > { %v1455_v8 = vpop.permute.xlu1 %1454  ;;  %v1355_v50 = vpop.permute.xlu0 %1354 }
 0x4c9   : > { %v1616_v17 = vsel %vm1610_vm5, %v1601_v9, %v1455_v8  ;;  %v1585_v26 = vsel %vm1580_vm6, %v3835_v38, %v1355_v50 }
 0x4ca   : > { %1755 = vmatprep.subr.mxu1 %v1616_v17 }
 0x4cb   : > { %1756 = vmatpush1.msra.mxu1 %v1586_v7 }
 0x4cc   : > { %v1404_v16 = vpop.permute.xlu1 %1403  ;;  %v1506_v56 = vpop.permute.xlu0 %1505 }
 0x4cd   : > { %v1632_v25 = vsel %vm1625_vm9, %v1457_v59, %v1506_v56  ;;  %v1600_v11 = vsel %vm1595_vm4, %v1355_v50, %v1404_v16 }
 0x4ce   : > { %2397 = vmatpush3.msra.mxu0 %v1632_v25 }
 0x4cf   : > { %2398 = vmatprep.subr.mxu0 %v2566_v62 }
 0x4d0   : > { %v1453_v55 = vpop.permute.xlu1 %1452  ;;  %v1353_v58 = vpop.permute.xlu0 %1352 }
 0x4d1   : > { %v1615_v63 = vsel %vm1610_vm5, %v1600_v11, %v1453_v55  ;;  %v1584_v3 = vsel %vm1580_vm6, %v3857_v45, %v1353_v58 }
 0x4d2   : > { %1757 = vmatprep.subr.mxu1 %v1615_v63 }
 0x4d3   : > { %1758 = vmatpush1.msra.mxu1 %v1585_v26 }
 0x4d4   : > { %v1402_v60 = vpop.permute.xlu1 %1401  ;;  %v1504_v23 = vpop.permute.xlu0 %1503 }
 0x4d5   : > { %v1631_v39 = vsel %vm1625_vm9, %v1455_v8, %v1504_v23  ;;  %v1599_v14 = vsel %vm1595_vm4, %v1353_v58, %v1402_v60 }
 0x4d6   : > { %2399 = vmatpush3.msra.mxu0 %v1631_v39 }
 0x4d7   : > { %2400 = vmatprep.subr.mxu0 %v2566_v62 }
 0x4d8   : > { %v1451_v43 = vpop.permute.xlu1 %1450  ;;  %v1351_v35 = vpop.permute.xlu0 %1350 }
 0x4d9   : > { %v1614_v32 = vsel %vm1610_vm5, %v1599_v14, %v1451_v43  ;;  %v1583_v41 = vsel %vm1580_vm6, %v3879_v0, %v1351_v35 }
 0x4da   : > { %1759 = vmatprep.subr.mxu1 %v1614_v32 }
 0x4db   : > { %1760 = vmatpush1.msra.mxu1 %v1584_v3 }
 0x4dc   : > { %v1400_v38 = vpop.permute.xlu1 %1399  ;;  %v1502_v20 = vpop.permute.xlu0 %1501 }
 0x4dd   : > { %v1630_v61 = vsel %vm1625_vm9, %v1453_v55, %v1502_v20  ;;  %v1598_v51 = vsel %vm1595_vm4, %v1351_v35, %v1400_v38 }
 0x4de   : > { %2401 = vmatpush3.msra.mxu0 %v1630_v61 }
 0x4df   : > { %2402 = vmatprep.subr.mxu0 %v2566_v62 }
 0x4e0   : > { %v1449_v18 = vpop.permute.xlu1 %1448  ;;  %v1349_v15 = vpop.permute.xlu0 %1348 }
 0x4e1   : > { %v1613_v30 = vsel %vm1610_vm5, %v1598_v51, %v1449_v18  ;;  %v1582_v6 = vsel %vm1580_vm6, %v3899_v12, %v1349_v15 }
 0x4e2   : > { %1761 = vmatprep.subr.mxu1 %v1613_v30 }
 0x4e3   : > { %1762 = vmatpush1.msra.mxu1 %v1583_v41 }
 0x4e4   : > { %v1398_v45 = vpop.permute.xlu1 %1397  ;;  %v1500_v22 = vpop.permute.xlu0 %1499 }
 0x4e5   : > { %v1629_v21 = vsel %vm1625_vm9, %v1451_v43, %v1500_v22  ;;  %v1597_v49 = vsel %vm1595_vm4, %v1349_v15, %v1398_v45 }
 0x4e6   : > { %2403 = vmatpush3.msra.mxu0 %v1629_v21 }
 0x4e7   : > { %2404 = vmatprep.subr.mxu0 %v2566_v62 }
 0x4e8   : > { %v1447_v37 = vpop.permute.xlu1 %1446  ;;  %v1347_v48 = vpop.permute.xlu0 %1346 }
 0x4e9   : > { %v1612_v13 = vsel %vm1610_vm5, %v1597_v49, %v1447_v37  ;;  %v1581_v12 = vsel %vm1580_vm6, %v3923_v4, %v1347_v48 }
 0x4ea   : > { %1763 = vmatprep.subr.mxu1 %v1612_v13 }
 0x4eb   : > { %1764 = vmatpush1.msra.mxu1 %v1582_v6 }
 0x4ec   : > { %v1396_v0 = vpop.permute.xlu1 %1395  ;;  %v1498_v28 = vpop.permute.xlu0 %1497 }
 0x4ed   : > { %v1628_v42 = vsel %vm1625_vm9, %v1449_v18, %v1498_v28  ;;  %v1596_v27 = vsel %vm1595_vm4, %v1347_v48, %v1396_v0 }
 0x4ee   : > { %2405 = vmatpush3.msra.mxu0 %v1628_v42 }
 0x4ef   : > { %2406 = vmatprep.subr.mxu0 %v2566_v62 }
 0x4f0   : > { %v1445_v46 = vpop.permute.xlu1 %1444  ;;  %v1496_v36 = vpop.permute.xlu0 %1495 }
 0x4f1   : > { %v1627_v5 = vsel %vm1625_vm9, %v1447_v37, %v1496_v36  ;;  %v1611_v44 = vsel %vm1610_vm5, %v1596_v27, %v1445_v46 }
 0x4f2   : > { %1765 = vmatprep.subr.mxu1 %v1611_v44  ;;  %2407 = vmatpush3.msra.mxu0 %v1627_v5 }
 0x4f3   : > { %1766 = vmatpush1.msra.mxu1 %v1581_v12  ;;  %2408 = vmatprep.subr.mxu0 %v2566_v62 }
 0x4f4   : > { %v1494_v53 = vpop.permute.xlu1 %1493  ;;  %2356 = vmatmul.mubr.msk.f32.vlgmr.msra.gmra.mxu1 %vm1645_vm7, %v3933_v33 }
 0x4f5   : > { %v1626_v54 = vsel %vm1625_vm9, %v1445_v46, %v1494_v53 }
 0x4f6   : > { %2409 = vmatpush3.msra.mxu0 %v1626_v54 }
 0x4f7   : > { %2411 = vmatmul.mubr.msk.f32.vlgmr.msra.gmra.mxu0 %vm1645_vm7, %v3933_v33 }
 0x4fd   : > { %v1643_v52 = vpop.permute.xlu0 %1642 }
 0x54c   : > { %v1730_v10 = vpop.f32.mrf.mxu0 }
 0x54d   : > { %v1731_v40 = vadd.f32 %v1730_v10, %v1643_v52 }
 0x54e   : > { %v1732_v62 = vpop.f32.mrf.mxu0 }
 0x54f   : > { %1883 = vrot.lane.b32.xlu0 %v1731_v40, %s2570_s23  ;;  %1877 = vrot.lane.b32.xlu1 %v1731_v40, %s2548_s29  ;;  %v4029_v4 = vadd.f32 %v1732_v62, %v1643_v52  ;;  %s2578_s29 = smov 13   ;;  %s2585_s23 = smov 79  }
 0x553   : > { %1889 = vrot.lane.b32.xlu0 %v1731_v40, %s2571_s24  ;;  %1880 = vrot.lane.b32.xlu1 %v1731_v40, %s2572_s22  ;;  %s2586_s24 = smov 39   ;;  %s2587_s22 = smov 75  }
 0x557   : > { %1895 = vrot.lane.b32.xlu0 %v1731_v40, %s2573_s28  ;;  %1886 = vrot.lane.b32.xlu1 %v1731_v40, %s2574_s7  ;;  %s2589_s28 = smov 105   ;;  %s2605_s7 = smov 95  }
 0x55b   : > { %1914 = vrot.lane.b32.xlu0 %v1731_v40, %s2575_s27  ;;  %1892 = vrot.lane.b32.xlu1 %v1731_v40, %s2545_s26  ;;  %s2582_s26 = smov 109  }
 0x55f   : > { %1920 = vrot.lane.b32.xlu0 %v1731_v40, %s2576_s6  ;;  %1898 = vrot.lane.b32.xlu1 %v1731_v40, %s2577_s11  ;;  %s2590_s6 = smov 103   ;;  %s2591_s11 = smov 7  }
 0x563   : > { %1992 = vrot.lane.b32.xlu0 %v4029_v4, %s2578_s29  ;;  %1917 = vrot.lane.b32.xlu1 %v1731_v40, %s2579_s25  ;;  %s2593_s25 = smov 71  }
 0x567   : > { %1988 = vrot.lane.b32.xlu0 %v4029_v4, %s2580_s30  ;;  %1923 = vrot.lane.b32.xlu1 %v1731_v40, %s2581_s12  ;;  %s2594_s30 = smov 101   ;;  %s2595_s12 = smov 5  }
 0x5b4   : > { %v1801_v33 = vpop.f32.mrf.mxu1 }
 0x5b5   : > { %v4033_v2 = vadd.f32 %v1801_v33, %v1643_v52 }
 0x5b6   : > { %v1803_v29 = vpop.f32.mrf.mxu1 }
 0x5b7   : > { %v4035_v1 = vadd.f32 %v1803_v29, %v1643_v52  ;;  %v1872_v59 = vpop.f32.mrf.mxu0  ;;  %1994 = vrot.lane.b32.xlu1 %v4033_v2, %s2578_s29  ;;  %s2592_s29 = smov 37  }
 0x5b8   : > { %v4039_v19 = vadd.f32 %v1872_v59, %v1643_v52 }
 0x5b9   : > { %2070 = vrot.lane.b32.xlu0 %v4035_v1, %s2582_s26  ;;  %v2412_v24 = vpop.f32.mrf.mxu0  ;;  %s2596_s26 = smov 35  }
 0x5bb   : > { %2067 = vrot.lane.b32.xlu1 %v4035_v1, %s2583_s16  ;;  %s2597_s16 = smov 69  }
 0x5bd   : > { %2144 = vrot.lane.b32.xlu0 %v4039_v19, %s2584_s17  ;;  %s2598_s17 = smov 99  }
 0x5bf   : > { %2141 = vrot.lane.b32.xlu1 %v4039_v19, %s2585_s23  ;;  %s2599_s23 = smov 3  }
 0x5c1   : > { %2073 = vrot.lane.b32.xlu0 %v4035_v1, %s2552_s8  ;;  %v1878_v31 = vpop.permute.xlu1 %1877  ;;  %v1884_v34 = vpop.permute.xlu0 %1883  ;;  %s2364_s8 = sshll.u32 %s4375_s18, 4 }
 0x5c2   : > { %s4065_s27 = scalar_lea.vmem %s4209_s2, %s2364_s8 }
 0x5c3   : > { %1999 = vrot.lane.b32.xlu1 %v4033_v2, %s2557_s13  ;;  %s2588_s13 = smov 73   ;;  %v1912_v58 = vld [vmem:[%s4065_s27] sm:$0xf]  ;;  %v4089_v60 = vld [vmem:[%s4065_s27 + $0x8] sm:$0xf] }
 0x5c4   : > { %v4093_v23 = vld [vmem:[%s4065_s27 + $0x4] sm:$0xf]  ;;  %v4100_v39 = vld [vmem:[%s4065_s27 + $0xc] sm:$0xf]  ;;  %s2610_s27 = smov 91  }
 0x5c5   : > { %1927 = vrot.lane.b32.xlu0 %v1731_v40, %s2586_s24  ;;  %v1881_v47 = vpop.permute.xlu1 %1880  ;;  %v1890_v8 = vpop.permute.xlu0 %1889 }
 0x5c6   : > { %v1902_v57 = vsel %vm1901_vm10, %v1878_v31, %v1881_v47 }
 0x5c7   : > { %2147 = vrot.lane.b32.xlu1 %v4039_v19, %s2587_s22  ;;  %v1903_v9 = vsel %vm1595_vm4, %v1902_v57, %v1884_v34  ;;  %s2601_s22 = smov 67  }
 0x5c9   : > { %2002 = vrot.lane.b32.xlu0 %v4033_v2, %s2559_s15  ;;  %v1887_v50 = vpop.permute.xlu1 %1886  ;;  %v1896_v56 = vpop.permute.xlu0 %1895  ;;  %s2604_s15 = smov 65  }
 0x5ca   : > { %v1905_v17 = vsel %vm1904_vm11, %v1903_v9, %v1887_v50 }
 0x5cb   : > { %1929 = vrot.lane.b32.xlu1 %v4029_v4, %s2586_s24  ;;  %v1906_v7 = vsel %vm1550_vm1, %v1905_v17, %v1890_v8  ;;  %s2600_s24 = smov 33  }
 0x5cd   : > { %2150 = vrot.lane.b32.xlu0 %v4039_v19, %s2588_s13  ;;  %v1893_v16 = vpop.permute.xlu1 %1892  ;;  %s2602_s13 = smov 97   ;;  %v1915_v14 = vpop.permute.xlu0 %1914 }
 0x5ce   : > { %v1908_v25 = vsel %vm1907_vm12, %v1906_v7, %v1893_v16 }
 0x5cf   : > { %2076 = vrot.lane.b32.xlu1 %v4035_v1, %s2589_s28  ;;  %v1909_v11 = vsel %vm1625_vm9, %v1908_v25, %v1896_v56  ;;  %s2603_s28 = smov 64  }
 0x5d1   : > { %2079 = vrot.lane.b32.xlu0 %v4035_v1, %s2590_s6  ;;  %v1899_v55 = vpop.permute.xlu1 %1898  ;;  %s2607_s6 = smov 93   ;;  %v1921_v43 = vpop.permute.xlu0 %1920 }
 0x5d2   : > { %v1911_v63 = vsel %vm1910_vm13, %v1909_v11, %v1899_v55 }
 0x5d3   : > { %2005 = vrot.lane.b32.xlu1 %v4033_v2, %s2591_s11  ;;  %v4072_v26 = vadd.f32 %v1912_v58, %v1911_v63  ;;  %s2608_s11 = smov 31  }
 0x5d5   : > { %1934 = vrot.lane.b32.xlu0 %v4029_v4, %s2592_s29  ;;  %s2609_s29 = smov 61   ;;  %v1918_v35 = vpop.permute.xlu1 %1917  ;;  %v1993_v32 = vpop.permute.xlu0 %1992 }
 0x5d6   : > { %v1943_v44 = vsel %vm1901_vm10, %v1915_v14, %v1918_v35 }
 0x5d7   : > { %2153 = vrot.lane.b32.xlu1 %v4039_v19, %s2593_s25  ;;  %s2611_s25 = smov 29   ;;  %v1944_v54 = vsel %vm1595_vm4, %v1943_v44, %v1921_v43 }
 0x5d9   : > { %2082 = vrot.lane.b32.xlu0 %v4035_v1, %s2594_s30  ;;  %s2612_s30 = smov 27   ;;  %v1924_v3 = vpop.permute.xlu1 %1923  ;;  %v1989_v38 = vpop.permute.xlu0 %1988 }
 0x5da   : > { %v1945_v40 = vsel %vm1904_vm11, %v1944_v54, %v1924_v3 }
 0x5db   : > { %2008 = vrot.lane.b32.xlu1 %v4033_v2, %s2595_s12  ;;  %s2613_s12 = smov 59  }
 0x5dd   : > { %1937 = vrot.lane.b32.xlu0 %v4029_v4, %s2596_s26  ;;  %s2614_s26 = smov 25  }
 0x5df   : > { %2156 = vrot.lane.b32.xlu1 %v4039_v19, %s2597_s16  ;;  %s2615_s16 = smov 57  }
 0x5e1   : > { %2085 = vrot.lane.b32.xlu0 %v4035_v1, %s2598_s17  ;;  %s2616_s17 = smov 89  }
 0x5e3   : > { %2011 = vrot.lane.b32.xlu1 %v4033_v2, %s2599_s23  ;;  %s2617_s23 = smov 55  }
 0x5e5   : > { %1940 = vrot.lane.b32.xlu0 %v4029_v4, %s2600_s24  ;;  %s2618_s24 = smov 87  }
 0x5e7   : > { %2159 = vrot.lane.b32.xlu1 %v4039_v19, %s2601_s22  ;;  %s2619_s22 = smov 85  }
 0x5e9   : > { %2088 = vrot.lane.b32.xlu0 %v4035_v1, %s2602_s13  ;;  %s2620_s13 = smov 23  }
 0x5eb   : > { %2014 = vrot.lane.b32.xlu1 %v4033_v2, %s2558_s14  ;;  %s2606_s14 = smov 63  }
 0x5ed   : > { %1951 = vrot.lane.b32.xlu0 %v1912_v58, %s2603_s28 }
 0x5ef   : > { %2162 = vrot.lane.b32.xlu1 %v4039_v19, %s2604_s15  ;;  %s2621_s15 = smov 51  }
 0x5f1   : > { %2099 = vrot.lane.b32.xlu0 %v4089_v60, %s2603_s28 }
 0x5f3   : > { %2025 = vrot.lane.b32.xlu1 %v4093_v23, %s2603_s28 }
 0x5f5   : > { %1955 = vrot.lane.b32.xlu0 %v4029_v4, %s2605_s7  ;;  %s2622_s7 = smov 53  }
 0x5f7   : > { %2173 = vrot.lane.b32.xlu1 %v4100_v39, %s2603_s28 }
 0x5f9   : > { %2029 = vrot.lane.b32.xlu0 %v4033_v2, %s2606_s14  ;;  %s2623_s14 = smov 83  }
 0x5fb   : > { %1958 = vrot.lane.b32.xlu1 %v4029_v4, %s2607_s6  ;;  %s2624_s6 = smov 49  }
 0x5fd   : > { %2103 = vrot.lane.b32.xlu0 %v4035_v1, %s2608_s11  ;;  %s2625_s11 = smov 81  }
 0x5ff   : > { %2032 = vrot.lane.b32.xlu1 %v4033_v2, %s2609_s29  ;;  %s348_s29 = scalar_lea.vmem %s4212_s5, %s2364_s8 }
 0x601   : > { %1961 = vrot.lane.b32.xlu0 %v4029_v4, %s2610_s27 }
 0x603   : > { %2106 = vrot.lane.b32.xlu1 %v4035_v1, %s2611_s25 }
 0x605   : > { %2109 = vrot.lane.b32.xlu0 %v4035_v1, %s2612_s30 }
 0x607   : > { %2035 = vrot.lane.b32.xlu1 %v4033_v2, %s2613_s12 }
 0x609   : > { %2115 = vrot.lane.b32.xlu0 %v4039_v19, %s2614_s26 }
 0x60b   : > { %2113 = vrot.lane.b32.xlu1 %v4035_v1, %s2614_s26 }
 0x60d   : > { %2038 = vrot.lane.b32.xlu0 %v4033_v2, %s2615_s16 }
 0x60f   : > { %1964 = vrot.lane.b32.xlu1 %v4029_v4, %s2616_s17 }
 0x611   : > { %2041 = vrot.lane.b32.xlu0 %v4033_v2, %s2617_s23 }
 0x613   : > { %1967 = vrot.lane.b32.xlu1 %v4029_v4, %s2618_s24 }
 0x615   : > { %1970 = vrot.lane.b32.xlu0 %v4029_v4, %s2619_s22 }
 0x617   : > { %2120 = vrot.lane.b32.xlu1 %v4039_v19, %s2620_s13 }
 0x619   : > { %2048 = vrot.lane.b32.xlu0 %v4033_v2, %s2621_s15 }
 0x61b   : > { %2044 = vrot.lane.b32.xlu1 %v4033_v2, %s2622_s7 }
 0x61d   : > { %2123 = vrot.lane.b32.xlu0 %v4039_v19, %s2553_s9  ;;  %s2626_s9 = smov 17  }
 0x61f   : > { %2050 = vrot.lane.b32.xlu1 %v4035_v1, %s2621_s15 }
 0x621   : > { %2126 = vrot.lane.b32.xlu0 %v4039_v19, %s2554_s10 }
 0x623   : > { %1973 = vrot.lane.b32.xlu1 %v4029_v4, %s2623_s14 }
 0x625   : > { %2055 = vrot.lane.b32.xlu0 %v4035_v1, %s2624_s6 }
 0x627   : > { %1976 = vrot.lane.b32.xlu1 %v4029_v4, %s2625_s11 }
 0x629   : > { %v1995_v20 = vpop.permute.xlu1 %1994 }
 0x62a   : > { %v1997_v33 = vsel %vm1996_vm15, %v1993_v32, %v1995_v20 }
 0x62b   : > { %v2071_v61 = vpop.permute.xlu0 %2070  ;;  %2129 = vrot.lane.b32.xlu1 %v4039_v19, %s2626_s9  ;;  %v2017_v31 = vsel %vm1901_vm10, %v1989_v38, %v1997_v33 }
 0x62d   : > { %v2068_v51 = vpop.permute.xlu1 %2067 }
 0x62e   : > { %v2091_v62 = vsel %vm1901_vm10, %v2068_v51, %v2071_v61 }
 0x62f   : > { %v2145_v18 = vpop.permute.xlu0 %2144 }
 0x631   : > { %v2142_v15 = vpop.permute.xlu1 %2141 }
 0x632   : > { %v2165_v25 = vsel %vm1901_vm10, %v2142_v15, %v2145_v18 }
 0x633   : > { %v2074_v30 = vpop.permute.xlu0 %2073 }
 0x634   : > { %v2092_v2 = vsel %vm1595_vm4, %v2091_v62, %v2074_v30 }
 0x635   : > { %v2000_v41 = vpop.permute.xlu1 %1999 }
 0x636   : > { %v2018_v57 = vsel %vm1595_vm4, %v2017_v31, %v2000_v41 }
 0x637   : > { %v1928_v45 = vpop.permute.xlu0 %1927 }
 0x639   : > { %v2148_v22 = vpop.permute.xlu1 %2147 }
 0x63a   : > { %v2166_v63 = vsel %vm1595_vm4, %v2165_v25, %v2148_v22 }
 0x63b   : > { %v2003_v21 = vpop.permute.xlu0 %2002 }
 0x63c   : > { %v2019_v50 = vsel %vm1904_vm11, %v2018_v57, %v2003_v21 }
 0x63d   : > { %v1930_v49 = vpop.permute.xlu1 %1929 }
 0x63e   : > { %v1932_v52 = vsel %vm1931_vm14, %v1928_v45, %v1930_v49 }
 0x63f   : > { %v2151_v37 = vpop.permute.xlu0 %2150  ;;  %v1946_v29 = vsel %vm1550_vm1, %v1945_v40, %v1932_v52 }
 0x640   : > { %v2167_v35 = vsel %vm1904_vm11, %v2166_v63, %v2151_v37 }
 0x641   : > { %v2077_v48 = vpop.permute.xlu1 %2076 }
 0x642   : > { %v2093_v1 = vsel %vm1904_vm11, %v2092_v2, %v2077_v48 }
 0x643   : > { %v2080_v13 = vpop.permute.xlu0 %2079 }
 0x644   : > { %v2094_v9 = vsel %vm1550_vm1, %v2093_v1, %v2080_v13 }
 0x645   : > { %v2006_v6 = vpop.permute.xlu1 %2005 }
 0x646   : > { %v2020_v16 = vsel %vm1550_vm1, %v2019_v50, %v2006_v6 }
 0x647   : > { %v1935_v0 = vpop.permute.xlu0 %1934 }
 0x648   : > { %v1947_v59 = vsel %vm1907_vm12, %v1946_v29, %v1935_v0 }
 0x649   : > { %v2154_v28 = vpop.permute.xlu1 %2153 }
 0x64a   : > { %v2168_v38 = vsel %vm1550_vm1, %v2167_v35, %v2154_v28 }
 0x64b   : > { %v2083_v42 = vpop.permute.xlu0 %2082 }
 0x64c   : > { %v2095_v17 = vsel %vm1907_vm12, %v2094_v9, %v2083_v42 }
 0x64d   : > { %v2009_v27 = vpop.permute.xlu1 %2008 }
 0x64e   : > { %v2021_v11 = vsel %vm1907_vm12, %v2020_v16, %v2009_v27 }
 0x64f   : > { %v1938_v46 = vpop.permute.xlu0 %1937 }
 0x650   : > { %v1948_v19 = vsel %vm1625_vm9, %v1947_v59, %v1938_v46 }
 0x651   : > { %v2157_v36 = vpop.permute.xlu1 %2156 }
 0x652   : > { %v2169_v61 = vsel %vm1907_vm12, %v2168_v38, %v2157_v36 }
 0x653   : > { %v2086_v5 = vpop.permute.xlu0 %2085 }
 0x654   : > { %v2096_v56 = vsel %vm1625_vm9, %v2095_v17, %v2086_v5 }
 0x655   : > { %v2012_v12 = vpop.permute.xlu1 %2011 }
 0x656   : > { %v2022_v14 = vsel %vm1625_vm9, %v2021_v11, %v2012_v12 }
 0x657   : > { %v1941_v53 = vpop.permute.xlu0 %1940 }
 0x658   : > { %v1949_v47 = vsel %vm1910_vm13, %v1948_v19, %v1941_v53 }
 0x659   : > { %v2160_v10 = vpop.permute.xlu1 %2159 }
 0x65a   : > { %v2170_v51 = vsel %vm1625_vm9, %v2169_v61, %v2160_v10 }
 0x65b   : > { %v2089_v4 = vpop.permute.xlu0 %2088 }
 0x65c   : > { %v2097_v58 = vsel %vm1910_vm13, %v2096_v56, %v2089_v4 }
 0x65d   : > { %v2015_v24 = vpop.permute.xlu1 %2014 }
 0x65e   : > { %v2023_v32 = vsel %vm1910_vm13, %v2022_v14, %v2015_v24 }
 0x65f   : > { %v1952_v34 = vpop.permute.xlu0 %1951 }
 0x660   : > { %v1954_v8 = vadd.f32 %v1952_v34, %v1949_v47 }
 0x661   : > { %v2163_v7 = vpop.permute.xlu1 %2162 }
 0x662   : > { %2178 = vrot.lane.b32.xlu0 %v1954_v8, %s2603_s28  ;;  %v2171_v18 = vsel %vm1910_vm13, %v2170_v51, %v2163_v7 }
 0x663   : > { %v2100_v55 = vpop.permute.xlu0 %2099 }
 0x664   : > { %v2102_v43 = vadd.f32 %v2100_v55, %v2097_v58 }
 0x665   : > { %v2026_v3 = vpop.permute.xlu1 %2025 }
 0x666   : > { %v2028_v20 = vadd.f32 %v2026_v3, %v2023_v32  ;;  %2186 = vrot.lane.b32.xlu0 %v2102_v43, %s2603_s28 }
 0x667   : > { %v1956_v41 = vpop.permute.xlu0 %1955 }
 0x668   : > { %2182 = vrot.lane.b32.xlu1 %v2028_v20, %s2603_s28 }
 0x669   : > { %v2174_v15 = vpop.permute.xlu1 %2173 }
 0x66a   : > { %v2176_v30 = vadd.f32 %v2174_v15, %v2171_v18 }
 0x66b   : > { %v2030_v22 = vpop.permute.xlu0 %2029 }
 0x66c   : > { %2190 = vrot.lane.b32.xlu1 %v2176_v30, %s2603_s28 }
 0x66d   : > { %v1959_v45 = vpop.permute.xlu1 %1958 }
 0x66e   : > { %v1979_v62 = vsel %vm1901_vm10, %v1956_v41, %v1959_v45 }
 0x66f   : > { %v2104_v49 = vpop.permute.xlu0 %2103 }
 0x671   : > { %v2033_v21 = vpop.permute.xlu1 %2032 }
 0x672   : > { %v2058_v19 = vsel %vm1901_vm10, %v2030_v22, %v2033_v21 }
 0x673   : > { %v1962_v48 = vpop.permute.xlu0 %1961 }
 0x674   : > { %v1980_v4 = vsel %vm1595_vm4, %v1979_v62, %v1962_v48 }
 0x675   : > { %v2107_v37 = vpop.permute.xlu1 %2106 }
 0x676   : > { %v2132_v1 = vsel %vm1901_vm10, %v2104_v49, %v2107_v37 }
 0x677   : > { %v2110_v6 = vpop.permute.xlu0 %2109 }
 0x678   : > { %v2133_v34 = vsel %vm1595_vm4, %v2132_v1, %v2110_v6 }
 0x679   : > { %v2036_v13 = vpop.permute.xlu1 %2035 }
 0x67a   : > { %v2059_v47 = vsel %vm1595_vm4, %v2058_v19, %v2036_v13 }
 0x67b   : > { %v2116_v28 = vpop.permute.xlu0 %2115 }
 0x67d   : > { %v2114_v0 = vpop.permute.xlu1 %2113 }
 0x67e   : > { %v2118_v24 = vsel %vm2117_vm0, %v2114_v0, %v2116_v28 }
 0x67f   : > { %v2039_v27 = vpop.permute.xlu0 %2038  ;;  %v2134_v8 = vsel %vm1904_vm11, %v2133_v34, %v2118_v24 }
 0x680   : > { %v2060_v9 = vsel %vm1904_vm11, %v2059_v47, %v2039_v27 }
 0x681   : > { %v1965_v42 = vpop.permute.xlu1 %1964 }
 0x682   : > { %v1981_v33 = vsel %vm1904_vm11, %v1980_v4, %v1965_v42 }
 0x683   : > { %v2042_v36 = vpop.permute.xlu0 %2041 }
 0x684   : > { %v2061_v56 = vsel %vm1550_vm1, %v2060_v9, %v2042_v36 }
 0x685   : > { %v1968_v46 = vpop.permute.xlu1 %1967 }
 0x686   : > { %v1982_v29 = vsel %vm1550_vm1, %v1981_v33, %v1968_v46 }
 0x687   : > { %v1971_v44 = vpop.permute.xlu0 %1970 }
 0x688   : > { %v1983_v31 = vsel %vm1907_vm12, %v1982_v29, %v1971_v44 }
 0x689   : > { %v2121_v5 = vpop.permute.xlu1 %2120 }
 0x68a   : > { %v2135_v25 = vsel %vm1550_vm1, %v2134_v8, %v2121_v5 }
 0x68b   : > { %v2049_v53 = vpop.permute.xlu0 %2048 }
 0x68d   : > { %v2045_v12 = vpop.permute.xlu1 %2044 }
 0x68e   : > { %v2062_v11 = vsel %vm1907_vm12, %v2061_v56, %v2045_v12 }
 0x68f   : > { %v2124_v52 = vpop.permute.xlu0 %2123 }
 0x690   : > { %v2136_v55 = vsel %vm1907_vm12, %v2135_v25, %v2124_v52 }
 0x691   : > { %v2051_v54 = vpop.permute.xlu1 %2050 }
 0x692   : > { %v2053_v50 = vsel %vm2052_vm2, %v2049_v53, %v2051_v54 }
 0x693   : > { %v2127_v40 = vpop.permute.xlu0 %2126  ;;  %v2063_v63 = vsel %vm1625_vm9, %v2062_v11, %v2053_v50 }
 0x694   : > { %v2137_v58 = vsel %vm1625_vm9, %v2136_v55, %v2127_v40 }
 0x695   : > { %v1974_v10 = vpop.permute.xlu1 %1973 }
 0x696   : > { %v1984_v57 = vsel %vm1625_vm9, %v1983_v31, %v1974_v10 }
 0x697   : > { %v2056_v59 = vpop.permute.xlu0 %2055 }
 0x698   : > { %v2064_v43 = vsel %vm1910_vm13, %v2063_v63, %v2056_v59 }
 0x699   : > { %v1977_v2 = vpop.permute.xlu1 %1976  ;;  %v2066_v51 = vadd.f32 %v4089_v60, %v2064_v43 }
 0x69a   : > { %v1985_v17 = vsel %vm1910_vm13, %v1984_v57, %v1977_v2 }
 0x69b   : > { %v1987_v14 = vadd.f32 %v4093_v23, %v1985_v17 }
 0x69d   : > { %v2130_v7 = vpop.permute.xlu1 %2129 }
 0x69e   : > { %v2138_v35 = vsel %vm1910_vm13, %v2137_v58, %v2130_v7 }
 0x69f   : > { %v2140_v23 = vadd.f32 %v4100_v39, %v2138_v35 }
 0x6d4   : > { %v2179_v16 = vpop.permute.xlu0 %2178 }
 0x6d5   : > { %v2193_v3 = vsel %vm1580_vm6, %v4072_v26, %v2179_v16 }
 0x6d8   : > { %v2187_v20 = vpop.permute.xlu0 %2186 }
 0x6d9   : > { %v2195_v15 = vsel %vm1580_vm6, %v2066_v51, %v2187_v20 }
 0x6da   : > { %v2183_v32 = vpop.permute.xlu1 %2182 }
 0x6db   : > { %v2194_v38 = vsel %vm1580_vm6, %v1987_v14, %v2183_v32 }
 0x6dc   : > { %v2201_v61 = vcombine.low %v2193_v3, %v2194_v38 }
 0x6de   : > { %2205 = vst [vmem:[%s348_s29] sm:$0xff] %v2201_v61  ;;  %v2191_v18 = vpop.permute.xlu1 %2190 }
 0x6df   : > { %v2196_v30 = vsel %vm1580_vm6, %v2140_v23, %v2191_v18 }
 0x6e0   : > { %v2202_v26 = vcombine.low %v2195_v15, %v2196_v30 }
 0x6e2   : > { %2206 = vst [vmem:[%s348_s29 + $0x8] sm:$0xff] %v2202_v26 }
 0x6e3 PF: > { %s15_s20 = sadd.s32 1, %s2543_s20   ;;  %s4370_s18 = smov %s2539_s19 }
 0x6e4   : > { %p12_p5 = scmp.ge.s32.totalorder %s15_s20, 4   ;;  %s4371_s19 = smov %s4373_s21 }
 0x6e6   :  { %14 = sbr.rel (!%p12_p5) target bundleno = 2 (0x2), region = 84 }

</bundles_post_ra>
